<compile_context>
chip_gen: v6e
topology: v6e:2x2x1
jax: 0.10.0
libtpu: 0.0.40
codegen_flags: <defaults>
</compile_context>

<pallas_src>
import functools

import jax
import jax.numpy as jnp
from jax import lax
from jax.experimental import pallas as pl
from jax.experimental.pallas import tpu as pltpu


# ----------------------------- Pallas kernels -----------------------------

def _fused_conv3x3_kernel(xp_ref, w_ref, b_ref, o_ref, *, H, W, apply_gelu):
    """3x3 / stride-1 / pad-1 conv with im2col fused in-kernel.

    xp_ref : (1, H+2, W+2, Cin) bf16  pre-padded input (one batch element)
    w_ref  : (9, Cin, Cout)     bf16  taps ordered kh*3+kw
    b_ref  : (1, Cout)          f32
    o_ref  : (1, H*W, Cout)     bf16
    """
    cout = o_ref.shape[-1]
    acc = jnp.zeros((H * W, cout), jnp.float32)
    # 9 shifted bf16 matmuls accumulating in f32 (native MXU path).
    for kh in range(3):
        for kw in range(3):
            patch = xp_ref[0, kh:kh + H, kw:kw + W, :]        # (H, W, Cin) bf16
            patch = patch.reshape(H * W, patch.shape[-1])     # (HW, Cin)
            acc = acc + jnp.dot(patch, w_ref[kh * 3 + kw],
                                preferred_element_type=jnp.float32)
    acc = acc + b_ref[...]
    if apply_gelu:
        # TODO(synk): nn.GELU default is the exact erf-based GELU; tanh
        # approximation used here since erf has no guaranteed Mosaic lowering
        # (max |diff| ~3e-3, covered by the test tolerance).
        acc = jax.nn.gelu(acc, approximate=True)
    o_ref[0] = acc.astype(o_ref.dtype)


def _psa_attention_kernel(y_ref, conn_ref, wr_ref, wup_ref, wl_ref, o_ref, *, Ci):
    """Fused PSA attention: spatial_pool -> channel_pool -> residual add.

    y_ref    : (1, HW, C)   bf16  conv2 output
    conn_ref : (1, HW, C)   f32   residual connection (original input)
    wr_ref   : (C, Ci+1)    bf16  [conv_v_right | conv_q_right]
    wup_ref  : (Ci, C)      bf16  conv_up
    wl_ref   : (C, 2*Ci)    bf16  [conv_q_left | conv_v_left]
    o_ref    : (1, HW, C)   f32
    """
    y = y_ref[0]                                               # (HW, C) bf16

    # ---------------- spatial_pool (channel attention) ----------------
    # fused [v_right | q_right] 1x1 convs -> one lane-denser matmul
    vr_qr = jnp.dot(y, wr_ref[...], preferred_element_type=jnp.float32)  # (HW, Ci+1)
    input_x = vr_qr[:, :Ci]                                    # (HW, Ci)
    cm = vr_qr[:, Ci:Ci + 1]                                   # (HW, 1)
    cm = jnp.exp(cm - jnp.max(cm, axis=0, keepdims=True))      # softmax over HW
    cm = cm * pl.reciprocal(jnp.sum(cm, axis=0, keepdims=True), approx=True)
    context = jnp.sum(input_x * cm, axis=0, keepdims=True)     # (1, Ci)
    mask_ch = jax.nn.sigmoid(
        jnp.dot(context.astype(jnp.bfloat16), wup_ref[...],
                preferred_element_type=jnp.float32))           # (1, C)
    t = y.astype(jnp.float32) * mask_ch                        # (HW, C)

    # ---------------- channel_pool (spatial attention) ----------------
    # fused [q_left | v_left] 1x1 convs
    gl = jnp.dot(t.astype(jnp.bfloat16), wl_ref[...],
                 preferred_element_type=jnp.float32)           # (HW, 2*Ci)
    g, theta = gl[:, :Ci], gl[:, Ci:]
    avg = jnp.mean(g, axis=0, keepdims=True)                   # (1, Ci)
    ctx = jnp.sum(theta * avg, axis=1, keepdims=True)          # (HW, 1)
    ctx = jnp.exp(ctx - jnp.max(ctx, axis=0, keepdims=True))   # softmax over HW
    ctx = ctx * pl.reciprocal(jnp.sum(ctx, axis=0, keepdims=True), approx=True)
    mask_sp = jax.nn.sigmoid(ctx)                              # (HW, 1)

    o_ref[0] = (t * mask_sp + conn_ref[0]).astype(o_ref.dtype)


# ------------------------------ glue helpers ------------------------------

def _conv3x3_pallas(x_nhwc, w_oihw, bias, *, apply_gelu):
    """3x3/stride-1/pad-1 conv (+ optional fused GELU) -> (B, HW, Cout) bf16."""
    B, H, W, Cin = x_nhwc.shape
    Cout = w_oihw.shape[0]
    HW = H * W
    xp = jnp.pad(x_nhwc.astype(jnp.bfloat16), ((0, 0), (1, 1), (1, 1), (0, 0)))
    w_taps = (jnp.transpose(w_oihw, (2, 3, 1, 0))
              .reshape(9, Cin, Cout).astype(jnp.bfloat16))
    b_row = bias.reshape(1, Cout).astype(jnp.float32)
    kernel = functools.partial(_fused_conv3x3_kernel, H=H, W=W,
                               apply_gelu=apply_gelu)
    flops = 2 * B * HW * 9 * Cin * Cout
    bytes_accessed = (xp.size * 2 + w_taps.size * 2 + b_row.size * 4
                      + B * HW * Cout * 2)
    # TODO(synk): for large H*W add a spatial grid axis ("parallel", halo rows
    # via manual make_async_copy double-buffering) so blocks fit v7x 64MiB /
    # v5e 16MiB scoped VMEM and both v7x TensorCores share the spatial dim.
    return pl.pallas_call(
        kernel,
        out_shape=jax.ShapeDtypeStruct((B, HW, Cout), jnp.bfloat16),
        grid_spec=pltpu.PrefetchScalarGridSpec(
            num_scalar_prefetch=0,
            grid=(B,),
            in_specs=[
                pl.BlockSpec((1, H + 2, W + 2, Cin), lambda b: (b, 0, 0, 0)),
                pl.BlockSpec((9, Cin, Cout), lambda b: (0, 0, 0)),
                pl.BlockSpec((1, Cout), lambda b: (0, 0)),
            ],
            out_specs=pl.BlockSpec((1, HW, Cout), lambda b: (b, 0, 0)),
        ),
        compiler_params=pltpu.CompilerParams(dimension_semantics=("parallel",)),
        cost_estimate=pl.CostEstimate(
            flops=flops,
            transcendentals=(B * HW * Cout) if apply_gelu else 0,
            bytes_accessed=bytes_accessed),
    )(xp, w_taps, b_row)


def _psa_attention_pallas(y_flat, conn_flat, wqr, wvr, wup, wql, wvl):
    B, HW, C = y_flat.shape
    Ci = wvr.shape[1]
    wr = jnp.concatenate([wvr, wqr], axis=1).astype(jnp.bfloat16)   # (C, Ci+1)
    wl = jnp.concatenate([wql, wvl], axis=1).astype(jnp.bfloat16)   # (C, 2*Ci)
    wup_b = wup.astype(jnp.bfloat16)
    kernel = functools.partial(_psa_attention_kernel, Ci=Ci)
    flops = 2 * B * HW * C * (3 * Ci + 1) + 2 * B * Ci * C
    bytes_accessed = (y_flat.size * 2 + conn_flat.size * 4
                      + (wr.size + wl.size + wup_b.size) * 2 + B * HW * C * 4)
    # TODO(synk): for large H*W restructure as a two-pass (flash-style) loop
    # over HW tiles with running softmax/mean scratch instead of holding the
    # full (HW, C) activations in VMEM.
    return pl.pallas_call(
        kernel,
        out_shape=jax.ShapeDtypeStruct((B, HW, C), jnp.float32),
        grid_spec=pltpu.PrefetchScalarGridSpec(
            num_scalar_prefetch=0,
            grid=(B,),
            in_specs=[
                pl.BlockSpec((1, HW, C), lambda b: (b, 0, 0)),
                pl.BlockSpec((1, HW, C), lambda b: (b, 0, 0)),
                pl.BlockSpec((C, Ci + 1), lambda b: (0, 0)),
                pl.BlockSpec((Ci, C), lambda b: (0, 0)),
                pl.BlockSpec((C, 2 * Ci), lambda b: (0, 0)),
            ],
            out_specs=pl.BlockSpec((1, HW, C), lambda b: (b, 0, 0)),
        ),
        compiler_params=pltpu.CompilerParams(dimension_semantics=("parallel",)),
        cost_estimate=pl.CostEstimate(
            flops=flops, transcendentals=3 * B * HW,
            bytes_accessed=bytes_accessed),
    )(y_flat, conn_flat, wr, wup_b, wl)


# ------------------------------ full forward ------------------------------

def init_params(key, inplanes, planes):
    inter = planes // 2
    ks = jax.random.split(key, 9)
    s = 0.1
    return {
        "w1": s * jax.random.normal(ks[0], (planes, inplanes, 3, 3), jnp.float32),
        "b1": s * jax.random.normal(ks[1], (planes,), jnp.float32),
        "w2": s * jax.random.normal(ks[2], (planes, inplanes, 3, 3), jnp.float32),
        "b2": s * jax.random.normal(ks[3], (planes,), jnp.float32),
        "wq_r": s * jax.random.normal(ks[4], (1, inplanes, 1, 1), jnp.float32),
        "wv_r": s * jax.random.normal(ks[5], (inter, inplanes, 1, 1), jnp.float32),
        "w_up": s * jax.random.normal(ks[6], (planes, inter, 1, 1), jnp.float32),
        "wq_l": s * jax.random.normal(ks[7], (inter, inplanes, 1, 1), jnp.float32),
        "wv_l": s * jax.random.normal(ks[8], (inter, inplanes, 1, 1), jnp.float32),
    }


def _as_mat(w_1x1):
    # PyTorch 1x1 conv weight (Cout, Cin, 1, 1) -> (Cin, Cout) matmul matrix.
    return jnp.transpose(w_1x1[:, :, 0, 0], (1, 0))


@jax.jit
def psa_p_forward(x_nchw, params):
    B, C, H, W = x_nchw.shape
    x_nhwc = jnp.transpose(x_nchw, (0, 2, 3, 1))          # NCHW -> NHWC
    conn = x_nhwc.reshape(B, H * W, C)
    planes = params["w1"].shape[0]

    # conv1 + GELU fused in one kernel (bf16 intermediate), then conv2.
    h = _conv3x3_pallas(x_nhwc, params["w1"], params["b1"], apply_gelu=True)
    h = _conv3x3_pallas(h.reshape(B, H, W, planes), params["w2"], params["b2"],
                        apply_gelu=False)

    # fused PSA attention (spatial_pool -> channel_pool -> residual add)
    out_flat = _psa_attention_pallas(
        h, conn,
        _as_mat(params["wq_r"]), _as_mat(params["wv_r"]), _as_mat(params["w_up"]),
        _as_mat(params["wq_l"]), _as_mat(params["wv_l"]))

    out = out_flat.reshape(B, H, W, planes)
    return jnp.transpose(out, (0, 3, 1, 2))               # back to NCHW


# ------------------------- pure-JAX reference check ------------------------

def psa_p_reference(x_nchw, params):
    hp = lax.Precision.HIGHEST
    B, C, H, W = x_nchw.shape
    x_nhwc = jnp.transpose(x_nchw, (0, 2, 3, 1))
    conn = x_nhwc.reshape(B, H * W, C)

    def conv3x3(inp, w, b):
        out = lax.conv_general_dilated(
            inp, jnp.transpose(w, (2, 3, 1, 0)), (1, 1), ((1, 1), (1, 1)),
            dimension_numbers=("NHWC", "HWIO", "NHWC"), precision=hp)
        return out + b[None, None, None, :]

    h = conv3x3(x_nhwc, params["w1"], params["b1"])
    h = jax.nn.gelu(h, approximate=False)
    h = conv3x3(h, params["w2"], params["b2"])
    planes = params["w1"].shape[0]
    h = h.reshape(B, H * W, planes)

    wqr, wvr = _as_mat(params["wq_r"]), _as_mat(params["wv_r"])
    wup, wql, wvl = _as_mat(params["w_up"]), _as_mat(params["wq_l"]), _as_mat(params["wv_l"])

    # spatial_pool
    input_x = jnp.einsum("bnc,ci->bni", h, wvr, precision=hp)
    cm = jax.nn.softmax(jnp.einsum("bnc,co->bno", h, wqr, precision=hp), axis=1)
    context = jnp.einsum("bni,bno->boi", input_x, cm, precision=hp)       # (B,1,Ci)
    mask_ch = jax.nn.sigmoid(jnp.einsum("boi,ic->boc", context, wup, precision=hp))
    t = h * mask_ch
    # channel_pool
    g = jnp.einsum("bnc,ci->bni", t, wql, precision=hp)
    avg = jnp.mean(g, axis=1, keepdims=True)                              # (B,1,Ci)
    theta = jnp.einsum("bnc,ci->bni", t, wvl, precision=hp)
    ctx = jax.nn.softmax(jnp.einsum("boi,bni->bno", avg, theta, precision=hp), axis=1)
    mask_sp = jax.nn.sigmoid(ctx)
    out = (t * mask_sp + conn).reshape(B, H, W, planes)
    return jnp.transpose(out, (0, 3, 1, 2))


# ----------------------------------- main -----------------------------------

if __name__ == "__main__":
    key = jax.random.PRNGKey(0)
    kx, kp = jax.random.split(key)

    inplanes = planes = 4          # residual add + conv2 require inplanes == planes
    B, H, W = 2, 16, 16
    x = jax.random.normal(kx, (B, inplanes, H, W), jnp.float32)   # NCHW
    params = init_params(kp, inplanes, planes)

    out = jax.block_until_ready(psa_p_forward(x, params))
    ref = psa_p_reference(x, params)

    assert out.shape == (B, planes, H, W)
    max_err = float(jnp.max(jnp.abs(out - ref)))
    # bf16 MXU matmuls + tanh-GELU vs the f32 HIGHEST-precision reference.
    assert jnp.allclose(out, ref, rtol=2e-2, atol=2e-2), max_err

    print("KERNEL_OK")
</pallas_src>

<mosaic_0001>
module attributes {stable_mosaic.version = 11 : i64} {
  func.func @_psa_attention_kernel(%arg0: i32, %arg1: memref<1x256x4xbf16, #tpu.memory_space<vmem>>, %arg2: memref<1x256x4xf32, #tpu.memory_space<vmem>>, %arg3: memref<4x3xbf16, #tpu.memory_space<vmem>>, %arg4: memref<2x4xbf16, #tpu.memory_space<vmem>>, %arg5: memref<4x4xbf16, #tpu.memory_space<vmem>>, %arg6: memref<1x256x4xf32, #tpu.memory_space<vmem>>) attributes {dimension_semantics = [#tpu.dimension_semantics<parallel>], iteration_bounds = array<i64: 2>, scalar_prefetch = 0 : i64, scratch_operands = 0 : i64, tpu.core_type = #tpu.core_type<tc>, window_params = [{transform_indices = @transform_0, window_bounds = array<i64: 1, 256, 4>}, {transform_indices = @transform_1, window_bounds = array<i64: 1, 256, 4>}, {pipeline_mode = #tpu.pipeline_mode<synchronous>, transform_indices = @transform_2, window_bounds = array<i64: 4, 3>}, {pipeline_mode = #tpu.pipeline_mode<synchronous>, transform_indices = @transform_3, window_bounds = array<i64: 2, 4>}, {pipeline_mode = #tpu.pipeline_mode<synchronous>, transform_indices = @transform_4, window_bounds = array<i64: 4, 4>}, {transform_indices = @transform_5, window_bounds = array<i64: 1, 256, 4>}]} {
    %c0 = arith.constant 0 : index
    %c0_0 = arith.constant 0 : index
    %c0_1 = arith.constant 0 : index
    %0 = vector.load %arg1[%c0, %c0_0, %c0_1] : memref<1x256x4xbf16, #tpu.memory_space<vmem>>, vector<1x256x4xbf16>
    %1 = vector.shape_cast %0 : vector<1x256x4xbf16> to vector<256x4xbf16>
    %c0_2 = arith.constant 0 : index
    %c0_3 = arith.constant 0 : index
    %2 = vector.load %arg3[%c0_2, %c0_3] : memref<4x3xbf16, #tpu.memory_space<vmem>>, vector<4x3xbf16>
    %cst = arith.constant dense<0.000000e+00> : vector<256x3xf32>
    %3 = tpu.matmul %1, %2, %cst {dimension_numbers = #tpu.dot_dimension_numbers<[1], [0], [0], [1], [0, 0, 1, 1], [], []>} : vector<256x4xbf16>, vector<4x3xbf16>, vector<256x3xf32> -> vector<256x3xf32>
    %4 = vector.extract_strided_slice %3 {offsets = [0, 0], sizes = [256, 2], strides = [1, 1]} : vector<256x3xf32> to vector<256x2xf32>
    %5 = vector.extract_strided_slice %3 {offsets = [0, 2], sizes = [256, 1], strides = [1, 1]} : vector<256x3xf32> to vector<256x1xf32>
    %cst_4 = arith.constant dense<0xFF800000> : vector<1xf32>
    %6 = vector.multi_reduction <maximumf>, %5, %cst_4 [0] : vector<256x1xf32> to vector<1xf32>
    %7 = vector.shape_cast %6 : vector<1xf32> to vector<1x1xf32>
    %8 = vector.broadcast %7 : vector<1x1xf32> to vector<256x1xf32>
    %9 = arith.subf %5, %8 : vector<256x1xf32>
    %10 = math.exp %9 : vector<256x1xf32>
    %cst_5 = arith.constant dense<0.000000e+00> : vector<1xf32>
    %11 = vector.multi_reduction <add>, %10, %cst_5 [0] : vector<256x1xf32> to vector<1xf32>
    %12 = vector.shape_cast %11 : vector<1xf32> to vector<1x1xf32>
    %13 = tpu.reciprocal %12 {approx = true} : vector<1x1xf32> -> vector<1x1xf32>
    %14 = vector.broadcast %13 : vector<1x1xf32> to vector<256x1xf32>
    %15 = arith.mulf %10, %14 : vector<256x1xf32>
    %16 = vector.broadcast %15 : vector<256x1xf32> to vector<256x2xf32>
    %17 = arith.mulf %4, %16 : vector<256x2xf32>
    %cst_6 = arith.constant dense<0.000000e+00> : vector<2xf32>
    %18 = vector.multi_reduction <add>, %17, %cst_6 [0] : vector<256x2xf32> to vector<2xf32>
    %19 = vector.shape_cast %18 : vector<2xf32> to vector<1x2xf32>
    %20 = arith.truncf %19 : vector<1x2xf32> to vector<1x2xbf16>
    %c0_7 = arith.constant 0 : index
    %c0_8 = arith.constant 0 : index
    %21 = vector.load %arg4[%c0_7, %c0_8] : memref<2x4xbf16, #tpu.memory_space<vmem>>, vector<2x4xbf16>
    %cst_9 = arith.constant dense<0.000000e+00> : vector<1x4xf32>
    %22 = tpu.matmul %20, %21, %cst_9 {dimension_numbers = #tpu.dot_dimension_numbers<[1], [0], [0], [1], [0, 0, 1, 1], [], []>} : vector<1x2xbf16>, vector<2x4xbf16>, vector<1x4xf32> -> vector<1x4xf32>
    %23 = arith.negf %22 : vector<1x4xf32>
    %24 = math.exp %23 : vector<1x4xf32>
    %cst_10 = arith.constant 1.000000e+00 : f32
    %25 = vector.broadcast %cst_10 : f32 to vector<1x4xf32>
    %26 = arith.addf %25, %24 : vector<1x4xf32>
    %27 = arith.divf %25, %26 : vector<1x4xf32>
    %28 = arith.extf %1 : vector<256x4xbf16> to vector<256x4xf32>
    %29 = vector.broadcast %27 : vector<1x4xf32> to vector<256x4xf32>
    %30 = arith.mulf %28, %29 : vector<256x4xf32>
    %31 = arith.truncf %30 : vector<256x4xf32> to vector<256x4xbf16>
    %c0_11 = arith.constant 0 : index
    %c0_12 = arith.constant 0 : index
    %32 = vector.load %arg5[%c0_11, %c0_12] : memref<4x4xbf16, #tpu.memory_space<vmem>>, vector<4x4xbf16>
    %cst_13 = arith.constant dense<0.000000e+00> : vector<256x4xf32>
    %33 = tpu.matmul %31, %32, %cst_13 {dimension_numbers = #tpu.dot_dimension_numbers<[1], [0], [0], [1], [0, 0, 1, 1], [], []>} : vector<256x4xbf16>, vector<4x4xbf16>, vector<256x4xf32> -> vector<256x4xf32>
    %34 = vector.extract_strided_slice %33 {offsets = [0, 0], sizes = [256, 2], strides = [1, 1]} : vector<256x4xf32> to vector<256x2xf32>
    %35 = vector.extract_strided_slice %33 {offsets = [0, 2], sizes = [256, 2], strides = [1, 1]} : vector<256x4xf32> to vector<256x2xf32>
    %cst_14 = arith.constant dense<0.000000e+00> : vector<2xf32>
    %36 = vector.multi_reduction <add>, %34, %cst_14 [0] : vector<256x2xf32> to vector<2xf32>
    %37 = vector.shape_cast %36 : vector<2xf32> to vector<1x2xf32>
    %cst_15 = arith.constant 2.560000e+02 : f32
    %38 = vector.broadcast %cst_15 : f32 to vector<1x2xf32>
    %39 = arith.divf %37, %38 : vector<1x2xf32>
    %40 = vector.broadcast %39 : vector<1x2xf32> to vector<256x2xf32>
    %41 = arith.mulf %35, %40 : vector<256x2xf32>
    %cst_16 = arith.constant dense<0.000000e+00> : vector<256xf32>
    %42 = vector.multi_reduction <add>, %41, %cst_16 [1] : vector<256x2xf32> to vector<256xf32>
    %43 = vector.shape_cast %42 : vector<256xf32> to vector<256x1xf32>
    %cst_17 = arith.constant dense<0xFF800000> : vector<1xf32>
    %44 = vector.multi_reduction <maximumf>, %43, %cst_17 [0] : vector<256x1xf32> to vector<1xf32>
    %45 = vector.shape_cast %44 : vector<1xf32> to vector<1x1xf32>
    %46 = vector.broadcast %45 : vector<1x1xf32> to vector<256x1xf32>
    %47 = arith.subf %43, %46 : vector<256x1xf32>
    %48 = math.exp %47 : vector<256x1xf32>
    %cst_18 = arith.constant dense<0.000000e+00> : vector<1xf32>
    %49 = vector.multi_reduction <add>, %48, %cst_18 [0] : vector<256x1xf32> to vector<1xf32>
    %50 = vector.shape_cast %49 : vector<1xf32> to vector<1x1xf32>
    %51 = tpu.reciprocal %50 {approx = true} : vector<1x1xf32> -> vector<1x1xf32>
    %52 = vector.broadcast %51 : vector<1x1xf32> to vector<256x1xf32>
    %53 = arith.mulf %48, %52 : vector<256x1xf32>
    %54 = arith.negf %53 : vector<256x1xf32>
    %55 = math.exp %54 : vector<256x1xf32>
    %cst_19 = arith.constant 1.000000e+00 : f32
    %56 = vector.broadcast %cst_19 : f32 to vector<256x1xf32>
    %57 = arith.addf %56, %55 : vector<256x1xf32>
    %58 = arith.divf %56, %57 : vector<256x1xf32>
    %59 = vector.broadcast %58 : vector<256x1xf32> to vector<256x4xf32>
    %60 = arith.mulf %30, %59 : vector<256x4xf32>
    %c0_20 = arith.constant 0 : index
    %c0_21 = arith.constant 0 : index
    %c0_22 = arith.constant 0 : index
    %61 = vector.load %arg2[%c0_20, %c0_21, %c0_22] : memref<1x256x4xf32, #tpu.memory_space<vmem>>, vector<1x256x4xf32>
    %62 = vector.shape_cast %61 : vector<1x256x4xf32> to vector<256x4xf32>
    %63 = arith.addf %60, %62 : vector<256x4xf32>
    %c0_23 = arith.constant 0 : index
    %c0_24 = arith.constant 0 : index
    %c0_25 = arith.constant 0 : index
    %64 = vector.load %arg6[%c0_23, %c0_24, %c0_25] : memref<1x256x4xf32, #tpu.memory_space<vmem>>, vector<1x256x4xf32>
    %65 = vector.shape_cast %64 : vector<1x256x4xf32> to vector<256x4xf32>
    %66 = vector.shape_cast %63 : vector<256x4xf32> to vector<1x256x4xf32>
    tpu.vector_store %arg6[%c0_23, %c0_24, %c0_25], %66 {strides = array<i32>} : memref<1x256x4xf32, #tpu.memory_space<vmem>>, vector<1x256x4xf32>,
    return
  }
  func.func @transform_0(%arg0: i32) -> (i32, i32, i32) {
    %c0_i32 = arith.constant 0 : i32
    %c0_i32_0 = arith.constant 0 : i32
    %c0_i32_1 = arith.constant 0 : i32
    return %arg0, %c0_i32, %c0_i32_0 : i32, i32, i32
  }
  func.func @transform_1(%arg0: i32) -> (i32, i32, i32) {
    %c0_i32 = arith.constant 0 : i32
    %c0_i32_0 = arith.constant 0 : i32
    %c0_i32_1 = arith.constant 0 : i32
    return %arg0, %c0_i32, %c0_i32_0 : i32, i32, i32
  }
  func.func @transform_2(%arg0: i32) -> (i32, i32) {
    %c0_i32 = arith.constant 0 : i32
    %c0_i32_0 = arith.constant 0 : i32
    %c0_i32_1 = arith.constant 0 : i32
    return %c0_i32, %c0_i32_0 : i32, i32
  }
  func.func @transform_3(%arg0: i32) -> (i32, i32) {
    %c0_i32 = arith.constant 0 : i32
    %c0_i32_0 = arith.constant 0 : i32
    %c0_i32_1 = arith.constant 0 : i32
    return %c0_i32, %c0_i32_0 : i32, i32
  }
  func.func @transform_4(%arg0: i32) -> (i32, i32) {
    %c0_i32 = arith.constant 0 : i32
    %c0_i32_0 = arith.constant 0 : i32
    %c0_i32_1 = arith.constant 0 : i32
    return %c0_i32, %c0_i32_0 : i32, i32
  }
  func.func @transform_5(%arg0: i32) -> (i32, i32, i32) {
    %c0_i32 = arith.constant 0 : i32
    %c0_i32_0 = arith.constant 0 : i32
    %c0_i32_1 = arith.constant 0 : i32
    return %arg0, %c0_i32, %c0_i32_0 : i32, i32, i32
  }
}

module attributes {stable_mosaic.version = 11 : i64} {
  func.func @_fused_conv3x3_kernel(%arg0: i32, %arg1: memref<1x18x18x4xbf16, #tpu.memory_space<vmem>>, %arg2: memref<9x4x4xbf16, #tpu.memory_space<vmem>>, %arg3: memref<1x4xf32, #tpu.memory_space<vmem>>, %arg4: memref<1x256x4xbf16, #tpu.memory_space<vmem>>) attributes {dimension_semantics = [#tpu.dimension_semantics<parallel>], iteration_bounds = array<i64: 2>, scalar_prefetch = 0 : i64, scratch_operands = 0 : i64, tpu.core_type = #tpu.core_type<tc>, window_params = [{transform_indices = @transform_0, window_bounds = array<i64: 1, 18, 18, 4>}, {pipeline_mode = #tpu.pipeline_mode<synchronous>, transform_indices = @transform_1, window_bounds = array<i64: 9, 4, 4>}, {pipeline_mode = #tpu.pipeline_mode<synchronous>, transform_indices = @transform_2, window_bounds = array<i64: 1, 4>}, {transform_indices = @transform_3, window_bounds = array<i64: 1, 256, 4>}]} {
    %cst = arith.constant 0.000000e+00 : f32
    %0 = vector.broadcast %cst : f32 to vector<256x4xf32>
    %c0 = arith.constant 0 : index
    %c0_0 = arith.constant 0 : index
    %c0_1 = arith.constant 0 : index
    %c0_2 = arith.constant 0 : index
    %1 = vector.load %arg1[%c0, %c0_0, %c0_1, %c0_2] : memref<1x18x18x4xbf16, #tpu.memory_space<vmem>>, vector<1x16x16x4xbf16>
    %2 = vector.shape_cast %1 : vector<1x16x16x4xbf16> to vector<16x16x4xbf16>
    %3 = vector.shape_cast %2 : vector<16x16x4xbf16> to vector<256x4xbf16>
    %c0_3 = arith.constant 0 : index
    %c0_4 = arith.constant 0 : index
    %c0_5 = arith.constant 0 : index
    %4 = vector.load %arg2[%c0_3, %c0_4, %c0_5] : memref<9x4x4xbf16, #tpu.memory_space<vmem>>, vector<1x4x4xbf16>
    %5 = vector.shape_cast %4 : vector<1x4x4xbf16> to vector<4x4xbf16>
    %cst_6 = arith.constant dense<0.000000e+00> : vector<256x4xf32>
    %6 = tpu.matmul %3, %5, %cst_6 {dimension_numbers = #tpu.dot_dimension_numbers<[1], [0], [0], [1], [0, 0, 1, 1], [], []>} : vector<256x4xbf16>, vector<4x4xbf16>, vector<256x4xf32> -> vector<256x4xf32>
    %7 = arith.addf %0, %6 : vector<256x4xf32>
    %c0_7 = arith.constant 0 : index
    %c0_8 = arith.constant 0 : index
    %c1 = arith.constant 1 : index
    %c0_9 = arith.constant 0 : index
    %8 = vector.load %arg1[%c0_7, %c0_8, %c1, %c0_9] : memref<1x18x18x4xbf16, #tpu.memory_space<vmem>>, vector<1x16x16x4xbf16>
    %9 = vector.shape_cast %8 : vector<1x16x16x4xbf16> to vector<16x16x4xbf16>
    %10 = vector.shape_cast %9 : vector<16x16x4xbf16> to vector<256x4xbf16>
    %c1_10 = arith.constant 1 : index
    %c0_11 = arith.constant 0 : index
    %c0_12 = arith.constant 0 : index
    %11 = vector.load %arg2[%c1_10, %c0_11, %c0_12] : memref<9x4x4xbf16, #tpu.memory_space<vmem>>, vector<1x4x4xbf16>
    %12 = vector.shape_cast %11 : vector<1x4x4xbf16> to vector<4x4xbf16>
    %cst_13 = arith.constant dense<0.000000e+00> : vector<256x4xf32>
    %13 = tpu.matmul %10, %12, %cst_13 {dimension_numbers = #tpu.dot_dimension_numbers<[1], [0], [0], [1], [0, 0, 1, 1], [], []>} : vector<256x4xbf16>, vector<4x4xbf16>, vector<256x4xf32> -> vector<256x4xf32>
    %14 = arith.addf %7, %13 : vector<256x4xf32>
    %c0_14 = arith.constant 0 : index
    %c0_15 = arith.constant 0 : index
    %c2 = arith.constant 2 : index
    %c0_16 = arith.constant 0 : index
    %15 = vector.load %arg1[%c0_14, %c0_15, %c2, %c0_16] : memref<1x18x18x4xbf16, #tpu.memory_space<vmem>>, vector<1x16x16x4xbf16>
    %16 = vector.shape_cast %15 : vector<1x16x16x4xbf16> to vector<16x16x4xbf16>
    %17 = vector.shape_cast %16 : vector<16x16x4xbf16> to vector<256x4xbf16>
    %c2_17 = arith.constant 2 : index
    %c0_18 = arith.constant 0 : index
    %c0_19 = arith.constant 0 : index
    %18 = vector.load %arg2[%c2_17, %c0_18, %c0_19] : memref<9x4x4xbf16, #tpu.memory_space<vmem>>, vector<1x4x4xbf16>
    %19 = vector.shape_cast %18 : vector<1x4x4xbf16> to vector<4x4xbf16>
    %cst_20 = arith.constant dense<0.000000e+00> : vector<256x4xf32>
    %20 = tpu.matmul %17, %19, %cst_20 {dimension_numbers = #tpu.dot_dimension_numbers<[1], [0], [0], [1], [0, 0, 1, 1], [], []>} : vector<256x4xbf16>, vector<4x4xbf16>, vector<256x4xf32> -> vector<256x4xf32>
    %21 = arith.addf %14, %20 : vector<256x4xf32>
    %c0_21 = arith.constant 0 : index
    %c1_22 = arith.constant 1 : index
    %c0_23 = arith.constant 0 : index
    %c0_24 = arith.constant 0 : index
    %22 = vector.load %arg1[%c0_21, %c1_22, %c0_23, %c0_24] : memref<1x18x18x4xbf16, #tpu.memory_space<vmem>>, vector<1x16x16x4xbf16>
    %23 = vector.shape_cast %22 : vector<1x16x16x4xbf16> to vector<16x16x4xbf16>
    %24 = vector.shape_cast %23 : vector<16x16x4xbf16> to vector<256x4xbf16>
    %c3 = arith.constant 3 : index
    %c0_25 = arith.constant 0 : index
    %c0_26 = arith.constant 0 : index
    %25 = vector.load %arg2[%c3, %c0_25, %c0_26] : memref<9x4x4xbf16, #tpu.memory_space<vmem>>, vector<1x4x4xbf16>
    %26 = vector.shape_cast %25 : vector<1x4x4xbf16> to vector<4x4xbf16>
    %cst_27 = arith.constant dense<0.000000e+00> : vector<256x4xf32>
    %27 = tpu.matmul %24, %26, %cst_27 {dimension_numbers = #tpu.dot_dimension_numbers<[1], [0], [0], [1], [0, 0, 1, 1], [], []>} : vector<256x4xbf16>, vector<4x4xbf16>, vector<256x4xf32> -> vector<256x4xf32>
    %28 = arith.addf %21, %27 : vector<256x4xf32>
    %c0_28 = arith.constant 0 : index
    %c1_29 = arith.constant 1 : index
    %c1_30 = arith.constant 1 : index
    %c0_31 = arith.constant 0 : index
    %29 = vector.load %arg1[%c0_28, %c1_29, %c1_30, %c0_31] : memref<1x18x18x4xbf16, #tpu.memory_space<vmem>>, vector<1x16x16x4xbf16>
    %30 = vector.shape_cast %29 : vector<1x16x16x4xbf16> to vector<16x16x4xbf16>
    %31 = vector.shape_cast %30 : vector<16x16x4xbf16> to vector<256x4xbf16>
    %c4 = arith.constant 4 : index
    %c0_32 = arith.constant 0 : index
    %c0_33 = arith.constant 0 : index
    %32 = vector.load %arg2[%c4, %c0_32, %c0_33] : memref<9x4x4xbf16, #tpu.memory_space<vmem>>, vector<1x4x4xbf16>
    %33 = vector.shape_cast %32 : vector<1x4x4xbf16> to vector<4x4xbf16>
    %cst_34 = arith.constant dense<0.000000e+00> : vector<256x4xf32>
    %34 = tpu.matmul %31, %33, %cst_34 {dimension_numbers = #tpu.dot_dimension_numbers<[1], [0], [0], [1], [0, 0, 1, 1], [], []>} : vector<256x4xbf16>, vector<4x4xbf16>, vector<256x4xf32> -> vector<256x4xf32>
    %35 = arith.addf %28, %34 : vector<256x4xf32>
    %c0_35 = arith.constant 0 : index
    %c1_36 = arith.constant 1 : index
    %c2_37 = arith.constant 2 : index
    %c0_38 = arith.constant 0 : index
    %36 = vector.load %arg1[%c0_35, %c1_36, %c2_37, %c0_38] : memref<1x18x18x4xbf16, #tpu.memory_space<vmem>>, vector<1x16x16x4xbf16>
    %37 = vector.shape_cast %36 : vector<1x16x16x4xbf16> to vector<16x16x4xbf16>
    %38 = vector.shape_cast %37 : vector<16x16x4xbf16> to vector<256x4xbf16>
    %c5 = arith.constant 5 : index
    %c0_39 = arith.constant 0 : index
    %c0_40 = arith.constant 0 : index
    %39 = vector.load %arg2[%c5, %c0_39, %c0_40] : memref<9x4x4xbf16, #tpu.memory_space<vmem>>, vector<1x4x4xbf16>
    %40 = vector.shape_cast %39 : vector<1x4x4xbf16> to vector<4x4xbf16>
    %cst_41 = arith.constant dense<0.000000e+00> : vector<256x4xf32>
    %41 = tpu.matmul %38, %40, %cst_41 {dimension_numbers = #tpu.dot_dimension_numbers<[1], [0], [0], [1], [0, 0, 1, 1], [], []>} : vector<256x4xbf16>, vector<4x4xbf16>, vector<256x4xf32> -> vector<256x4xf32>
    %42 = arith.addf %35, %41 : vector<256x4xf32>
    %c0_42 = arith.constant 0 : index
    %c2_43 = arith.constant 2 : index
    %c0_44 = arith.constant 0 : index
    %c0_45 = arith.constant 0 : index
    %43 = vector.load %arg1[%c0_42, %c2_43, %c0_44, %c0_45] : memref<1x18x18x4xbf16, #tpu.memory_space<vmem>>, vector<1x16x16x4xbf16>
    %44 = vector.shape_cast %43 : vector<1x16x16x4xbf16> to vector<16x16x4xbf16>
    %45 = vector.shape_cast %44 : vector<16x16x4xbf16> to vector<256x4xbf16>
    %c6 = arith.constant 6 : index
    %c0_46 = arith.constant 0 : index
    %c0_47 = arith.constant 0 : index
    %46 = vector.load %arg2[%c6, %c0_46, %c0_47] : memref<9x4x4xbf16, #tpu.memory_space<vmem>>, vector<1x4x4xbf16>
    %47 = vector.shape_cast %46 : vector<1x4x4xbf16> to vector<4x4xbf16>
    %cst_48 = arith.constant dense<0.000000e+00> : vector<256x4xf32>
    %48 = tpu.matmul %45, %47, %cst_48 {dimension_numbers = #tpu.dot_dimension_numbers<[1], [0], [0], [1], [0, 0, 1, 1], [], []>} : vector<256x4xbf16>, vector<4x4xbf16>, vector<256x4xf32> -> vector<256x4xf32>
    %49 = arith.addf %42, %48 : vector<256x4xf32>
    %c0_49 = arith.constant 0 : index
    %c2_50 = arith.constant 2 : index
    %c1_51 = arith.constant 1 : index
    %c0_52 = arith.constant 0 : index
    %50 = vector.load %arg1[%c0_49, %c2_50, %c1_51, %c0_52] : memref<1x18x18x4xbf16, #tpu.memory_space<vmem>>, vector<1x16x16x4xbf16>
    %51 = vector.shape_cast %50 : vector<1x16x16x4xbf16> to vector<16x16x4xbf16>
    %52 = vector.shape_cast %51 : vector<16x16x4xbf16> to vector<256x4xbf16>
    %c7 = arith.constant 7 : index
    %c0_53 = arith.constant 0 : index
    %c0_54 = arith.constant 0 : index
    %53 = vector.load %arg2[%c7, %c0_53, %c0_54] : memref<9x4x4xbf16, #tpu.memory_space<vmem>>, vector<1x4x4xbf16>
    %54 = vector.shape_cast %53 : vector<1x4x4xbf16> to vector<4x4xbf16>
    %cst_55 = arith.constant dense<0.000000e+00> : vector<256x4xf32>
    %55 = tpu.matmul %52, %54, %cst_55 {dimension_numbers = #tpu.dot_dimension_numbers<[1], [0], [0], [1], [0, 0, 1, 1], [], []>} : vector<256x4xbf16>, vector<4x4xbf16>, vector<256x4xf32> -> vector<256x4xf32>
    %56 = arith.addf %49, %55 : vector<256x4xf32>
    %c0_56 = arith.constant 0 : index
    %c2_57 = arith.constant 2 : index
    %c2_58 = arith.constant 2 : index
    %c0_59 = arith.constant 0 : index
    %57 = vector.load %arg1[%c0_56, %c2_57, %c2_58, %c0_59] : memref<1x18x18x4xbf16, #tpu.memory_space<vmem>>, vector<1x16x16x4xbf16>
    %58 = vector.shape_cast %57 : vector<1x16x16x4xbf16> to vector<16x16x4xbf16>
    %59 = vector.shape_cast %58 : vector<16x16x4xbf16> to vector<256x4xbf16>
    %c8 = arith.constant 8 : index
    %c0_60 = arith.constant 0 : index
    %c0_61 = arith.constant 0 : index
    %60 = vector.load %arg2[%c8, %c0_60, %c0_61] : memref<9x4x4xbf16, #tpu.memory_space<vmem>>, vector<1x4x4xbf16>
    %61 = vector.shape_cast %60 : vector<1x4x4xbf16> to vector<4x4xbf16>
    %cst_62 = arith.constant dense<0.000000e+00> : vector<256x4xf32>
    %62 = tpu.matmul %59, %61, %cst_62 {dimension_numbers = #tpu.dot_dimension_numbers<[1], [0], [0], [1], [0, 0, 1, 1], [], []>} : vector<256x4xbf16>, vector<4x4xbf16>, vector<256x4xf32> -> vector<256x4xf32>
    %63 = arith.addf %56, %62 : vector<256x4xf32>
    %c0_63 = arith.constant 0 : index
    %c0_64 = arith.constant 0 : index
    %64 = vector.load %arg3[%c0_63, %c0_64] : memref<1x4xf32, #tpu.memory_space<vmem>>, vector<1x4xf32>
    %65 = vector.broadcast %64 : vector<1x4xf32> to vector<256x4xf32>
    %66 = arith.addf %63, %65 : vector<256x4xf32>
    %67 = arith.mulf %66, %66 : vector<256x4xf32>
    %68 = arith.mulf %66, %67 : vector<256x4xf32>
    %cst_65 = arith.constant 4.471500e-02 : f32
    %69 = vector.broadcast %cst_65 : f32 to vector<256x4xf32>
    %70 = arith.mulf %69, %68 : vector<256x4xf32>
    %71 = arith.addf %66, %70 : vector<256x4xf32>
    %cst_66 = arith.constant 0.797884583 : f32
    %72 = vector.broadcast %cst_66 : f32 to vector<256x4xf32>
    %73 = arith.mulf %72, %71 : vector<256x4xf32>
    %74 = math.tanh %73 : vector<256x4xf32>
    %cst_67 = arith.constant 1.000000e+00 : f32
    %75 = vector.broadcast %cst_67 : f32 to vector<256x4xf32>
    %76 = arith.addf %75, %74 : vector<256x4xf32>
    %cst_68 = arith.constant 5.000000e-01 : f32
    %77 = vector.broadcast %cst_68 : f32 to vector<256x4xf32>
    %78 = arith.mulf %77, %76 : vector<256x4xf32>
    %79 = arith.mulf %66, %78 : vector<256x4xf32>
    %80 = arith.truncf %79 : vector<256x4xf32> to vector<256x4xbf16>
    %c0_69 = arith.constant 0 : index
    %c0_70 = arith.constant 0 : index
    %c0_71 = arith.constant 0 : index
    %81 = vector.load %arg4[%c0_69, %c0_70, %c0_71] : memref<1x256x4xbf16, #tpu.memory_space<vmem>>, vector<1x256x4xbf16>
    %82 = vector.shape_cast %81 : vector<1x256x4xbf16> to vector<256x4xbf16>
    %83 = vector.shape_cast %80 : vector<256x4xbf16> to vector<1x256x4xbf16>
    tpu.vector_store %arg4[%c0_69, %c0_70, %c0_71], %83 {strides = array<i32>} : memref<1x256x4xbf16, #tpu.memory_space<vmem>>, vector<1x256x4xbf16>,
    return
  }
  func.func @transform_0(%arg0: i32) -> (i32, i32, i32, i32) {
    %c0_i32 = arith.constant 0 : i32
    %c0_i32_0 = arith.constant 0 : i32
    %c0_i32_1 = arith.constant 0 : i32
    %c0_i32_2 = arith.constant 0 : i32
    return %arg0, %c0_i32, %c0_i32_0, %c0_i32_1 : i32, i32, i32, i32
  }
  func.func @transform_1(%arg0: i32) -> (i32, i32, i32) {
    %c0_i32 = arith.constant 0 : i32
    %c0_i32_0 = arith.constant 0 : i32
    %c0_i32_1 = arith.constant 0 : i32
    %c0_i32_2 = arith.constant 0 : i32
    return %c0_i32, %c0_i32_0, %c0_i32_1 : i32, i32, i32
  }
  func.func @transform_2(%arg0: i32) -> (i32, i32) {
    %c0_i32 = arith.constant 0 : i32
    %c0_i32_0 = arith.constant 0 : i32
    %c0_i32_1 = arith.constant 0 : i32
    return %c0_i32, %c0_i32_0 : i32, i32
  }
  func.func @transform_3(%arg0: i32) -> (i32, i32, i32) {
    %c0_i32 = arith.constant 0 : i32
    %c0_i32_0 = arith.constant 0 : i32
    %c0_i32_1 = arith.constant 0 : i32
    return %arg0, %c0_i32, %c0_i32_0 : i32, i32, i32
  }
}

module attributes {stable_mosaic.version = 11 : i64} {
  func.func @_fused_conv3x3_kernel(%arg0: i32, %arg1: memref<1x18x18x4xbf16, #tpu.memory_space<vmem>>, %arg2: memref<9x4x4xbf16, #tpu.memory_space<vmem>>, %arg3: memref<1x4xf32, #tpu.memory_space<vmem>>, %arg4: memref<1x256x4xbf16, #tpu.memory_space<vmem>>) attributes {dimension_semantics = [#tpu.dimension_semantics<parallel>], iteration_bounds = array<i64: 2>, scalar_prefetch = 0 : i64, scratch_operands = 0 : i64, tpu.core_type = #tpu.core_type<tc>, window_params = [{transform_indices = @transform_0, window_bounds = array<i64: 1, 18, 18, 4>}, {pipeline_mode = #tpu.pipeline_mode<synchronous>, transform_indices = @transform_1, window_bounds = array<i64: 9, 4, 4>}, {pipeline_mode = #tpu.pipeline_mode<synchronous>, transform_indices = @transform_2, window_bounds = array<i64: 1, 4>}, {transform_indices = @transform_3, window_bounds = array<i64: 1, 256, 4>}]} {
    %cst = arith.constant 0.000000e+00 : f32
    %0 = vector.broadcast %cst : f32 to vector<256x4xf32>
    %c0 = arith.constant 0 : index
    %c0_0 = arith.constant 0 : index
    %c0_1 = arith.constant 0 : index
    %c0_2 = arith.constant 0 : index
    %1 = vector.load %arg1[%c0, %c0_0, %c0_1, %c0_2] : memref<1x18x18x4xbf16, #tpu.memory_space<vmem>>, vector<1x16x16x4xbf16>
    %2 = vector.shape_cast %1 : vector<1x16x16x4xbf16> to vector<16x16x4xbf16>
    %3 = vector.shape_cast %2 : vector<16x16x4xbf16> to vector<256x4xbf16>
    %c0_3 = arith.constant 0 : index
    %c0_4 = arith.constant 0 : index
    %c0_5 = arith.constant 0 : index
    %4 = vector.load %arg2[%c0_3, %c0_4, %c0_5] : memref<9x4x4xbf16, #tpu.memory_space<vmem>>, vector<1x4x4xbf16>
    %5 = vector.shape_cast %4 : vector<1x4x4xbf16> to vector<4x4xbf16>
    %cst_6 = arith.constant dense<0.000000e+00> : vector<256x4xf32>
    %6 = tpu.matmul %3, %5, %cst_6 {dimension_numbers = #tpu.dot_dimension_numbers<[1], [0], [0], [1], [0, 0, 1, 1], [], []>} : vector<256x4xbf16>, vector<4x4xbf16>, vector<256x4xf32> -> vector<256x4xf32>
    %7 = arith.addf %0, %6 : vector<256x4xf32>
    %c0_7 = arith.constant 0 : index
    %c0_8 = arith.constant 0 : index
    %c1 = arith.constant 1 : index
    %c0_9 = arith.constant 0 : index
    %8 = vector.load %arg1[%c0_7, %c0_8, %c1, %c0_9] : memref<1x18x18x4xbf16, #tpu.memory_space<vmem>>, vector<1x16x16x4xbf16>
    %9 = vector.shape_cast %8 : vector<1x16x16x4xbf16> to vector<16x16x4xbf16>
    %10 = vector.shape_cast %9 : vector<16x16x4xbf16> to vector<256x4xbf16>
    %c1_10 = arith.constant 1 : index
    %c0_11 = arith.constant 0 : index
    %c0_12 = arith.constant 0 : index
    %11 = vector.load %arg2[%c1_10, %c0_11, %c0_12] : memref<9x4x4xbf16, #tpu.memory_space<vmem>>, vector<1x4x4xbf16>
    %12 = vector.shape_cast %11 : vector<1x4x4xbf16> to vector<4x4xbf16>
    %cst_13 = arith.constant dense<0.000000e+00> : vector<256x4xf32>
    %13 = tpu.matmul %10, %12, %cst_13 {dimension_numbers = #tpu.dot_dimension_numbers<[1], [0], [0], [1], [0, 0, 1, 1], [], []>} : vector<256x4xbf16>, vector<4x4xbf16>, vector<256x4xf32> -> vector<256x4xf32>
    %14 = arith.addf %7, %13 : vector<256x4xf32>
    %c0_14 = arith.constant 0 : index
    %c0_15 = arith.constant 0 : index
    %c2 = arith.constant 2 : index
    %c0_16 = arith.constant 0 : index
    %15 = vector.load %arg1[%c0_14, %c0_15, %c2, %c0_16] : memref<1x18x18x4xbf16, #tpu.memory_space<vmem>>, vector<1x16x16x4xbf16>
    %16 = vector.shape_cast %15 : vector<1x16x16x4xbf16> to vector<16x16x4xbf16>
    %17 = vector.shape_cast %16 : vector<16x16x4xbf16> to vector<256x4xbf16>
    %c2_17 = arith.constant 2 : index
    %c0_18 = arith.constant 0 : index
    %c0_19 = arith.constant 0 : index
    %18 = vector.load %arg2[%c2_17, %c0_18, %c0_19] : memref<9x4x4xbf16, #tpu.memory_space<vmem>>, vector<1x4x4xbf16>
    %19 = vector.shape_cast %18 : vector<1x4x4xbf16> to vector<4x4xbf16>
    %cst_20 = arith.constant dense<0.000000e+00> : vector<256x4xf32>
    %20 = tpu.matmul %17, %19, %cst_20 {dimension_numbers = #tpu.dot_dimension_numbers<[1], [0], [0], [1], [0, 0, 1, 1], [], []>} : vector<256x4xbf16>, vector<4x4xbf16>, vector<256x4xf32> -> vector<256x4xf32>
    %21 = arith.addf %14, %20 : vector<256x4xf32>
    %c0_21 = arith.constant 0 : index
    %c1_22 = arith.constant 1 : index
    %c0_23 = arith.constant 0 : index
    %c0_24 = arith.constant 0 : index
    %22 = vector.load %arg1[%c0_21, %c1_22, %c0_23, %c0_24] : memref<1x18x18x4xbf16, #tpu.memory_space<vmem>>, vector<1x16x16x4xbf16>
    %23 = vector.shape_cast %22 : vector<1x16x16x4xbf16> to vector<16x16x4xbf16>
    %24 = vector.shape_cast %23 : vector<16x16x4xbf16> to vector<256x4xbf16>
    %c3 = arith.constant 3 : index
    %c0_25 = arith.constant 0 : index
    %c0_26 = arith.constant 0 : index
    %25 = vector.load %arg2[%c3, %c0_25, %c0_26] : memref<9x4x4xbf16, #tpu.memory_space<vmem>>, vector<1x4x4xbf16>
    %26 = vector.shape_cast %25 : vector<1x4x4xbf16> to vector<4x4xbf16>
    %cst_27 = arith.constant dense<0.000000e+00> : vector<256x4xf32>
    %27 = tpu.matmul %24, %26, %cst_27 {dimension_numbers = #tpu.dot_dimension_numbers<[1], [0], [0], [1], [0, 0, 1, 1], [], []>} : vector<256x4xbf16>, vector<4x4xbf16>, vector<256x4xf32> -> vector<256x4xf32>
    %28 = arith.addf %21, %27 : vector<256x4xf32>
    %c0_28 = arith.constant 0 : index
    %c1_29 = arith.constant 1 : index
    %c1_30 = arith.constant 1 : index
    %c0_31 = arith.constant 0 : index
    %29 = vector.load %arg1[%c0_28, %c1_29, %c1_30, %c0_31] : memref<1x18x18x4xbf16, #tpu.memory_space<vmem>>, vector<1x16x16x4xbf16>
    %30 = vector.shape_cast %29 : vector<1x16x16x4xbf16> to vector<16x16x4xbf16>
    %31 = vector.shape_cast %30 : vector<16x16x4xbf16> to vector<256x4xbf16>
    %c4 = arith.constant 4 : index
    %c0_32 = arith.constant 0 : index
    %c0_33 = arith.constant 0 : index
    %32 = vector.load %arg2[%c4, %c0_32, %c0_33] : memref<9x4x4xbf16, #tpu.memory_space<vmem>>, vector<1x4x4xbf16>
    %33 = vector.shape_cast %32 : vector<1x4x4xbf16> to vector<4x4xbf16>
    %cst_34 = arith.constant dense<0.000000e+00> : vector<256x4xf32>
    %34 = tpu.matmul %31, %33, %cst_34 {dimension_numbers = #tpu.dot_dimension_numbers<[1], [0], [0], [1], [0, 0, 1, 1], [], []>} : vector<256x4xbf16>, vector<4x4xbf16>, vector<256x4xf32> -> vector<256x4xf32>
    %35 = arith.addf %28, %34 : vector<256x4xf32>
    %c0_35 = arith.constant 0 : index
    %c1_36 = arith.constant 1 : index
    %c2_37 = arith.constant 2 : index
    %c0_38 = arith.constant 0 : index
    %36 = vector.load %arg1[%c0_35, %c1_36, %c2_37, %c0_38] : memref<1x18x18x4xbf16, #tpu.memory_space<vmem>>, vector<1x16x16x4xbf16>
    %37 = vector.shape_cast %36 : vector<1x16x16x4xbf16> to vector<16x16x4xbf16>
    %38 = vector.shape_cast %37 : vector<16x16x4xbf16> to vector<256x4xbf16>
    %c5 = arith.constant 5 : index
    %c0_39 = arith.constant 0 : index
    %c0_40 = arith.constant 0 : index
    %39 = vector.load %arg2[%c5, %c0_39, %c0_40] : memref<9x4x4xbf16, #tpu.memory_space<vmem>>, vector<1x4x4xbf16>
    %40 = vector.shape_cast %39 : vector<1x4x4xbf16> to vector<4x4xbf16>
    %cst_41 = arith.constant dense<0.000000e+00> : vector<256x4xf32>
    %41 = tpu.matmul %38, %40, %cst_41 {dimension_numbers = #tpu.dot_dimension_numbers<[1], [0], [0], [1], [0, 0, 1, 1], [], []>} : vector<256x4xbf16>, vector<4x4xbf16>, vector<256x4xf32> -> vector<256x4xf32>
    %42 = arith.addf %35, %41 : vector<256x4xf32>
    %c0_42 = arith.constant 0 : index
    %c2_43 = arith.constant 2 : index
    %c0_44 = arith.constant 0 : index
    %c0_45 = arith.constant 0 : index
    %43 = vector.load %arg1[%c0_42, %c2_43, %c0_44, %c0_45] : memref<1x18x18x4xbf16, #tpu.memory_space<vmem>>, vector<1x16x16x4xbf16>
    %44 = vector.shape_cast %43 : vector<1x16x16x4xbf16> to vector<16x16x4xbf16>
    %45 = vector.shape_cast %44 : vector<16x16x4xbf16> to vector<256x4xbf16>
    %c6 = arith.constant 6 : index
    %c0_46 = arith.constant 0 : index
    %c0_47 = arith.constant 0 : index
    %46 = vector.load %arg2[%c6, %c0_46, %c0_47] : memref<9x4x4xbf16, #tpu.memory_space<vmem>>, vector<1x4x4xbf16>
    %47 = vector.shape_cast %46 : vector<1x4x4xbf16> to vector<4x4xbf16>
    %cst_48 = arith.constant dense<0.000000e+00> : vector<256x4xf32>
    %48 = tpu.matmul %45, %47, %cst_48 {dimension_numbers = #tpu.dot_dimension_numbers<[1], [0], [0], [1], [0, 0, 1, 1], [], []>} : vector<256x4xbf16>, vector<4x4xbf16>, vector<256x4xf32> -> vector<256x4xf32>
    %49 = arith.addf %42, %48 : vector<256x4xf32>
    %c0_49 = arith.constant 0 : index
    %c2_50 = arith.constant 2 : index
    %c1_51 = arith.constant 1 : index
    %c0_52 = arith.constant 0 : index
    %50 = vector.load %arg1[%c0_49, %c2_50, %c1_51, %c0_52] : memref<1x18x18x4xbf16, #tpu.memory_space<vmem>>, vector<1x16x16x4xbf16>
    %51 = vector.shape_cast %50 : vector<1x16x16x4xbf16> to vector<16x16x4xbf16>
    %52 = vector.shape_cast %51 : vector<16x16x4xbf16> to vector<256x4xbf16>
    %c7 = arith.constant 7 : index
    %c0_53 = arith.constant 0 : index
    %c0_54 = arith.constant 0 : index
    %53 = vector.load %arg2[%c7, %c0_53, %c0_54] : memref<9x4x4xbf16, #tpu.memory_space<vmem>>, vector<1x4x4xbf16>
    %54 = vector.shape_cast %53 : vector<1x4x4xbf16> to vector<4x4xbf16>
    %cst_55 = arith.constant dense<0.000000e+00> : vector<256x4xf32>
    %55 = tpu.matmul %52, %54, %cst_55 {dimension_numbers = #tpu.dot_dimension_numbers<[1], [0], [0], [1], [0, 0, 1, 1], [], []>} : vector<256x4xbf16>, vector<4x4xbf16>, vector<256x4xf32> -> vector<256x4xf32>
    %56 = arith.addf %49, %55 : vector<256x4xf32>
    %c0_56 = arith.constant 0 : index
    %c2_57 = arith.constant 2 : index
    %c2_58 = arith.constant 2 : index
    %c0_59 = arith.constant 0 : index
    %57 = vector.load %arg1[%c0_56, %c2_57, %c2_58, %c0_59] : memref<1x18x18x4xbf16, #tpu.memory_space<vmem>>, vector<1x16x16x4xbf16>
    %58 = vector.shape_cast %57 : vector<1x16x16x4xbf16> to vector<16x16x4xbf16>
    %59 = vector.shape_cast %58 : vector<16x16x4xbf16> to vector<256x4xbf16>
    %c8 = arith.constant 8 : index
    %c0_60 = arith.constant 0 : index
    %c0_61 = arith.constant 0 : index
    %60 = vector.load %arg2[%c8, %c0_60, %c0_61] : memref<9x4x4xbf16, #tpu.memory_space<vmem>>, vector<1x4x4xbf16>
    %61 = vector.shape_cast %60 : vector<1x4x4xbf16> to vector<4x4xbf16>
    %cst_62 = arith.constant dense<0.000000e+00> : vector<256x4xf32>
    %62 = tpu.matmul %59, %61, %cst_62 {dimension_numbers = #tpu.dot_dimension_numbers<[1], [0], [0], [1], [0, 0, 1, 1], [], []>} : vector<256x4xbf16>, vector<4x4xbf16>, vector<256x4xf32> -> vector<256x4xf32>
    %63 = arith.addf %56, %62 : vector<256x4xf32>
    %c0_63 = arith.constant 0 : index
    %c0_64 = arith.constant 0 : index
    %64 = vector.load %arg3[%c0_63, %c0_64] : memref<1x4xf32, #tpu.memory_space<vmem>>, vector<1x4xf32>
    %65 = vector.broadcast %64 : vector<1x4xf32> to vector<256x4xf32>
    %66 = arith.addf %63, %65 : vector<256x4xf32>
    %67 = arith.truncf %66 : vector<256x4xf32> to vector<256x4xbf16>
    %c0_65 = arith.constant 0 : index
    %c0_66 = arith.constant 0 : index
    %c0_67 = arith.constant 0 : index
    %68 = vector.load %arg4[%c0_65, %c0_66, %c0_67] : memref<1x256x4xbf16, #tpu.memory_space<vmem>>, vector<1x256x4xbf16>
    %69 = vector.shape_cast %68 : vector<1x256x4xbf16> to vector<256x4xbf16>
    %70 = vector.shape_cast %67 : vector<256x4xbf16> to vector<1x256x4xbf16>
    tpu.vector_store %arg4[%c0_65, %c0_66, %c0_67], %70 {strides = array<i32>} : memref<1x256x4xbf16, #tpu.memory_space<vmem>>, vector<1x256x4xbf16>,
    return
  }
  func.func @transform_0(%arg0: i32) -> (i32, i32, i32, i32) {
    %c0_i32 = arith.constant 0 : i32
    %c0_i32_0 = arith.constant 0 : i32
    %c0_i32_1 = arith.constant 0 : i32
    %c0_i32_2 = arith.constant 0 : i32
    return %arg0, %c0_i32, %c0_i32_0, %c0_i32_1 : i32, i32, i32, i32
  }
  func.func @transform_1(%arg0: i32) -> (i32, i32, i32) {
    %c0_i32 = arith.constant 0 : i32
    %c0_i32_0 = arith.constant 0 : i32
    %c0_i32_1 = arith.constant 0 : i32
    %c0_i32_2 = arith.constant 0 : i32
    return %c0_i32, %c0_i32_0, %c0_i32_1 : i32, i32, i32
  }
  func.func @transform_2(%arg0: i32) -> (i32, i32) {
    %c0_i32 = arith.constant 0 : i32
    %c0_i32_0 = arith.constant 0 : i32
    %c0_i32_1 = arith.constant 0 : i32
    return %c0_i32, %c0_i32_0 : i32, i32
  }
  func.func @transform_3(%arg0: i32) -> (i32, i32, i32) {
    %c0_i32 = arith.constant 0 : i32
    %c0_i32_0 = arith.constant 0 : i32
    %c0_i32_1 = arith.constant 0 : i32
    return %arg0, %c0_i32, %c0_i32_0 : i32, i32, i32
  }
}

</mosaic_0001>

<bundles_post_ra>
// kernel: psa_p_forward.5
= control target key start
LH: loop header
LB: loop body
LE: loop exit
PB: predicated region body
PF: predicated region fallthrough
CT: control target
= control target key end

     0   :  { %s2956_s18 = smov 0   ;;  %s4296_s0 = inlined_call_operand.vmem [shape: bf16[2,256,4], index: 0, kind: input, shape index: {}]   ;;  %s4297_s1 = inlined_call_operand.vmem [shape: f32[2,256,4], index: 1, kind: input, shape index: {}]   ;;  %s4298_s2 = inlined_call_operand.vmem [shape: bf16[4,3], index: 2, kind: input, shape index: {}]   ;;  %s4299_s3 = inlined_call_operand.vmem [shape: bf16[2,4], index: 3, kind: input, shape index: {}]   ;;  %s4300_s4 = inlined_call_operand.vmem [shape: bf16[4,4], index: 4, kind: input, shape index: {}]   ;;  %s4301_s5 = inlined_call_operand.vmem [shape: f32[2,256,4], index: 5, kind: output, shape index: {}]  }
   0x1 LB: > { %s2376_s19 = sadd.s32 4294967295, %s2919_s18   ;;  %p2380_p0 = scmp.ge.s32.totalorder %s2919_s18, 1  ;;  %s2919_s18 = sphi %s2956_s18, %s15_s18  }
   0x2   : > { %p197_p1 = scmp.lt.s32.totalorder %s2919_s18, 3 }
   0x4   : > { %p198_p2 = pnand %p2380_p0, %p197_p1 }
   0x6   : > { %201 = sbr.rel (%p198_p2) target bundleno = 1763 (0x6e3), region = 40 }
   0xb   : > { %v278_v0 = vld [vmem:[%s4298_s2] sm:$0x3]  ;;  %vm408_vm0 = vcmask 1041408   ;;  %p230_p3 = scmp.lt.s32.totalorder %s2376_s19, 1  ;;  %vm359_vm1 = vcmask 31744   ;;  %vm573_vm2 = vcmask 23568  }
   0xc   : > { %2584 = vmatprep.subr.msk.bf16.mxu0 %vm408_vm0, %v278_v0  ;;  %v410_v1 = vsel %vm408_vm0, %v278_v0, 0  ;;  %vm1108_vm3 = vcmask 1040384   ;;  %vm2923_vm4 = vmmov 0   ;;  %vm1033_vm5 = vcmask 15360   ;;  %s2924_s30 = smov 2   ;;  %s2925_s6 = smov 126  }
   0xd   : > { %2511 = vmatpush3.bf16.msra.mxu0 %v410_v1  ;;  %s4399_s19 = smov (!%p230_p3, %s2376_s19), 1 }
   0xe   : > { %s2471_s22 = sshll.u32 %s4399_s19, 7  ;;  %s2472_s7 = sshll.u32 %s4399_s19, 8 }
   0xf   : > { %s2975_s25 = scalar_lea.vmem %s4296_s0, %s2471_s22  ;;  %s4143_s10 = scalar_lea.vmem %s4297_s1, %s2472_s7 }
  0x10   : > { %v246_v2 = vld [vmem:[%s2975_s25] sm:$0xff]   ;;  %v248_v3 = vld [vmem:[%s2975_s25 + $0x8] sm:$0xff]   ;;  %v250_v4 = vld [vmem:[%s2975_s25 + $0x10] sm:$0xff]   ;;  %s4157_s13 = scalar_lea.vmem %s4301_s5, %s2472_s7 }
  0x11   : > { %2512 = vmatprep.mubr.msk.bf16.mxu0 %vm359_vm1, %v246_v2  ;;  %v252_v5 = vld [vmem:[%s2975_s25 + $0x18] sm:$0xff]   ;;  %v254_v6 = vld [vmem:[%s2975_s25 + $0x20] sm:$0xff]   ;;  %v256_v7 = vld [vmem:[%s2975_s25 + $0x28] sm:$0xff]  }
  0x12   : > { %2513 = vmatmul.mubr.msk.bf16.vlgmr.msra.gmra.mxu0 %vm359_vm1, %v248_v3  ;;  %v258_v8 = vld [vmem:[%s2975_s25 + $0x30] sm:$0xff]   ;;  %v260_v9 = vld [vmem:[%s2975_s25 + $0x38] sm:$0xff]   ;;  %v262_v10 = vld [vmem:[%s2975_s25 + $0x40] sm:$0xff]  }
  0x13   : > { %2516 = vmatprep.mubr.msk.bf16.mxu0 %vm359_vm1, %v250_v4  ;;  %v264_v11 = vld [vmem:[%s2975_s25 + $0x48] sm:$0xff]   ;;  %v266_v12 = vld [vmem:[%s2975_s25 + $0x50] sm:$0xff]   ;;  %v268_v13 = vld [vmem:[%s2975_s25 + $0x58] sm:$0xff]  }
  0x14   : > { %v270_v14 = vld [vmem:[%s2975_s25 + $0x60] sm:$0xff]   ;;  %v272_v15 = vld [vmem:[%s2975_s25 + $0x68] sm:$0xff]   ;;  %v274_v16 = vld [vmem:[%s2975_s25 + $0x70] sm:$0xff]  }
  0x15   : > { %v276_v17 = vld [vmem:[%s2975_s25 + $0x78] sm:$0xff]  }
  0x1a   : > { %2517 = vmatmul.mubr.msk.bf16.gmra.mxu0 %vm359_vm1, %v252_v5 }
  0x1b   : > { %2520 = vmatprep.mubr.msk.bf16.mxu0 %vm359_vm1, %v254_v6 }
  0x22   : > { %2521 = vmatmul.mubr.msk.bf16.gmra.mxu0 %vm359_vm1, %v256_v7 }
  0x23   : > { %2524 = vmatprep.mubr.msk.bf16.mxu0 %vm359_vm1, %v258_v8 }
  0x2a   : > { %2525 = vmatmul.mubr.msk.bf16.gmra.mxu0 %vm359_vm1, %v260_v9 }
  0x2b   : > { %2528 = vmatprep.mubr.msk.bf16.mxu0 %vm359_vm1, %v262_v10 }
  0x32   : > { %2529 = vmatmul.mubr.msk.bf16.gmra.mxu0 %vm359_vm1, %v264_v11 }
  0x33   : > { %2532 = vmatprep.mubr.msk.bf16.mxu0 %vm359_vm1, %v266_v12  ;;  %v2921_v12 = vmov 2  }
  0x34   : > { %2600 = vset.pattern.permute.xlu1 %v2921_v12  ;;  %2599 = vset.pattern.permute.xlu0 %v2921_v12 }
  0x3a   : > { %2533 = vmatmul.mubr.msk.bf16.gmra.mxu0 %vm359_vm1, %v268_v13 }
  0x3b   : > { %2536 = vmatprep.mubr.msk.bf16.mxu0 %vm359_vm1, %v270_v14 }
  0x42   : > { %2537 = vmatmul.mubr.msk.bf16.gmra.mxu0 %vm359_vm1, %v272_v15 }
  0x43   : > { %2540 = vmatprep.mubr.msk.bf16.mxu0 %vm359_vm1, %v274_v16 }
  0x4a   : > { %2541 = vmatmul.mubr.msk.bf16.gmra.mxu0 %vm359_vm1, %v276_v17 }
  0xd2   : > { %v3009_v18 = vpop.f32.mrf.mxu0 }
  0xd3   : > { %v576_v44 = vsel %vm573_vm2, %v3009_v18, -inf }
  0xd4   : > { %v3011_v19 = vpop.f32.mrf.mxu0 }
  0xd5   : > { %v574_v51 = vsel %vm573_vm2, %v3011_v19, -inf }
  0xd6   : > { %v3013_v20 = vpop.f32.mrf.mxu0 }
  0xd7   : > { %v577_v45 = vsel %vm573_vm2, %v3013_v20, -inf }
  0xd8   : > { %v3015_v21 = vpop.f32.mrf.mxu0 }
  0xd9   : > { %v575_v55 = vsel %vm573_vm2, %v3015_v21, -inf }
  0xda   : > { %v3017_v22 = vpop.f32.mrf.mxu0 }
  0xdb   : > { %v582_v42 = vsel %vm573_vm2, %v3017_v22, -inf }
  0xdc   : > { %v3019_v23 = vpop.f32.mrf.mxu0  ;;  %v583_v52 = vmax.f32 %v576_v44, %v582_v42 }
  0xdd   : > { %v578_v47 = vsel %vm573_vm2, %v3019_v23, -inf }
  0xde   : > { %v3021_v24 = vpop.f32.mrf.mxu0  ;;  %v579_v59 = vmax.f32 %v574_v51, %v578_v47 }
  0xdf   : > { %v584_v43 = vsel %vm573_vm2, %v3021_v24, -inf }
  0xe0   : > { %v3023_v25 = vpop.f32.mrf.mxu0  ;;  %v585_v53 = vmax.f32 %v577_v45, %v584_v43 }
  0xe1   : > { %v580_v48 = vsel %vm573_vm2, %v3023_v25, -inf }
  0xe2   : > { %v3025_v26 = vpop.f32.mrf.mxu0  ;;  %v581_v60 = vmax.f32 %v575_v55, %v580_v48 }
  0xe3   : > { %v590_v49 = vsel %vm573_vm2, %v3025_v26, -inf }
  0xe4   : > { %v3027_v27 = vpop.f32.mrf.mxu0  ;;  %v591_v61 = vmax.f32 %v583_v52, %v590_v49 }
  0xe5   : > { %v586_v56 = vsel %vm573_vm2, %v3027_v27, -inf }
  0xe6   : > { %v3029_v28 = vpop.f32.mrf.mxu0  ;;  %v587_v4 = vmax.f32 %v579_v59, %v586_v56 }
  0xe7   : > { %v592_v50 = vsel %vm573_vm2, %v3029_v28, -inf }
  0xe8   : > { %v3031_v29 = vpop.f32.mrf.mxu0  ;;  %v593_v62 = vmax.f32 %v585_v53, %v592_v50 }
  0xe9   : > { %v588_v57 = vsel %vm573_vm2, %v3031_v29, -inf }
  0xea   : > { %v3033_v30 = vpop.f32.mrf.mxu0  ;;  %v589_v5 = vmax.f32 %v581_v60, %v588_v57 }
  0xeb   : > { %v598_v0 = vsel %vm573_vm2, %v3033_v30, -inf }
  0xec   : > { %v3035_v31 = vpop.f32.mrf.mxu0  ;;  %v599_v13 = vmax.f32 %v591_v61, %v598_v0 }
  0xed   : > { %v594_v1 = vsel %vm573_vm2, %v3035_v31, -inf }
  0xee   : > { %v3037_v32 = vpop.f32.mrf.mxu0  ;;  %v595_v14 = vmax.f32 %v587_v4, %v594_v1 }
  0xef   : > { %v600_v58 = vsel %vm573_vm2, %v3037_v32, -inf }
  0xf0   : > { %v3039_v33 = vpop.f32.mrf.mxu0  ;;  %v601_v6 = vmax.f32 %v593_v62, %v600_v58 }
  0xf1   : > { %v596_v2 = vsel %vm573_vm2, %v3039_v33, -inf }
  0xf2   : > { %v3041_v34 = vpop.f32.mrf.mxu0  ;;  %v597_v15 = vmax.f32 %v589_v5, %v596_v2 }
  0xf3   : > { %4334 = vst [vmem:[#allocation2_spill] sm:$0xff] %v3041_v34  ;;  %v606_v8 = vsel %vm573_vm2, %v3041_v34, -inf }
  0xf4   : > { %v3043_v35 = vpop.f32.mrf.mxu0  ;;  %v607_v47 = vmax.f32 %v599_v13, %v606_v8 }
  0xf5   : > { %v602_v9 = vsel %vm573_vm2, %v3043_v35, -inf }
  0xf6   : > { %v3045_v36 = vpop.f32.mrf.mxu0  ;;  %v603_v48 = vmax.f32 %v595_v14, %v602_v9 }
  0xf7   : > { %4335 = vst [vmem:[#allocation3_spill] sm:$0xff] %v3045_v36  ;;  %v608_v3 = vsel %vm573_vm2, %v3045_v36, -inf }
  0xf8   : > { %v3047_v37 = vpop.f32.mrf.mxu0  ;;  %v609_v16 = vmax.f32 %v601_v6, %v608_v3 }
  0xf9   : > { %4336 = vst [vmem:[#allocation4_spill] sm:$0xff] %v3047_v37  ;;  %v604_v10 = vsel %vm573_vm2, %v3047_v37, -inf }
  0xfa   : > { %v3049_v38 = vpop.f32.mrf.mxu0  ;;  %v605_v49 = vmax.f32 %v597_v15, %v604_v10 }
  0xfb   : > { %4337 = vst [vmem:[#allocation5_spill] sm:$0xff] %v3049_v38  ;;  %v614_v42 = vsel %vm573_vm2, %v3049_v38, -inf }
  0xfc   : > { %v3051_v39 = vpop.f32.mrf.mxu0  ;;  %v615_v56 = vmax.f32 %v607_v47, %v614_v42 }
  0xfd   : > { %4338 = vst [vmem:[#allocation6_spill] sm:$0xff] %v3051_v39  ;;  %v610_v43 = vsel %vm573_vm2, %v3051_v39, -inf }
  0xfe   : > { %v3053_v40 = vpop.f32.mrf.mxu0  ;;  %v611_v57 = vmax.f32 %v603_v48, %v610_v43 }
  0xff   : > { %4339 = vst [vmem:[#allocation7_spill] sm:$0xff] %v3053_v40  ;;  %v616_v11 = vsel %vm573_vm2, %v3053_v40, -inf }
 0x100   : > { %v3055_v41 = vpop.f32.mrf.mxu0  ;;  %v617_v50 = vmax.f32 %v609_v16, %v616_v11 }
 0x101   : > { %4340 = vst [vmem:[#allocation8_spill] sm:$0xff] %v3055_v41  ;;  %v612_v44 = vsel %vm573_vm2, %v3055_v41, -inf }
 0x102   : > { %v3065_v46 = vpop.f32.mrf.mxu0  ;;  %v613_v58 = vmax.f32 %v605_v49, %v612_v44 }
 0x103   : > { %4341 = vst [vmem:[#allocation9_spill] sm:$0xff] %v3065_v46  ;;  %v622_v52 = vsel %vm573_vm2, %v3065_v46, -inf }
 0x104   : > { %v3077_v54 = vpop.f32.mrf.mxu0  ;;  %v623_v1 = vmax.f32 %v615_v56, %v622_v52 }
 0x105   : > { %4342 = vst [vmem:[#allocation10_spill] sm:$0xff] %v3077_v54  ;;  %v618_v53 = vsel %vm573_vm2, %v3077_v54, -inf }
 0x106   : > { %v3087_v63 = vpop.f32.mrf.mxu0  ;;  %v619_v2 = vmax.f32 %v611_v57, %v618_v53 }
 0x107   : > { %4343 = vst [vmem:[#allocation11_spill] sm:$0xff] %v3087_v63  ;;  %v624_v45 = vsel %vm573_vm2, %v3087_v63, -inf }
 0x108   : > { %v3097_v7 = vpop.f32.mrf.mxu0  ;;  %v625_v59 = vmax.f32 %v617_v50, %v624_v45 }
 0x109   : > { %4344 = vst [vmem:[#allocation12_spill] sm:$0xff] %v3097_v7  ;;  %v620_v55 = vsel %vm573_vm2, %v3097_v7, -inf }
 0x10a   : > { %v3107_v17 = vpop.f32.mrf.mxu0  ;;  %v621_v3 = vmax.f32 %v613_v58, %v620_v55 }
 0x10b   : > { %4345 = vst [vmem:[#allocation13_spill] sm:$0xff] %v3107_v17  ;;  %v630_v61 = vsel %vm573_vm2, %v3107_v17, -inf }
 0x10c   : > { %v3117_v51 = vpop.f32.mrf.mxu0  ;;  %v631_v8 = vmax.f32 %v623_v1, %v630_v61 }
 0x10d   : > { %4346 = vst [vmem:[#allocation14_spill] sm:$0xff] %v3117_v51  ;;  %v626_v62 = vsel %vm573_vm2, %v3117_v51, -inf }
 0x10e   : > { %v3125_v60 = vpop.f32.mrf.mxu0  ;;  %v627_v9 = vmax.f32 %v619_v2, %v626_v62 }
 0x10f   : > { %4347 = vst [vmem:[#allocation15_spill] sm:$0xff] %v3125_v60  ;;  %v632_v0 = vsel %vm573_vm2, %v3125_v60, -inf }
 0x110   : > { %v633_v4 = vmax.f32 %v625_v59, %v632_v0  ;;  %v3133_v5 = vpop.f32.mrf.mxu0 }
 0x111   : > { %4348 = vst [vmem:[#allocation16_spill] sm:$0xff] %v3133_v5  ;;  %v628_v6 = vsel %vm573_vm2, %v3133_v5, -inf }
 0x112   : > { %v629_v10 = vmax.f32 %v621_v3, %v628_v6  ;;  %v635_v11 = vmax.f32 %v631_v8, %v633_v4 }
 0x114   : > { %v634_v12 = vmax.f32 %v627_v9, %v629_v10 }
 0x116   : > { %v636_v13 = vmax.f32 %v634_v12, %v635_v11 }
 0x118   : > { %v637_v14 = vrot.slane %v636_v13, 4 }
 0x11a   : > { %v638_v15 = vmax.f32 %v636_v13, %v637_v14 }
 0x11c   : > { %v639_v16 = vrot.slane %v638_v15, 2 }
 0x11e   : > { %v640_v42 = vmax.f32 %v638_v15, %v639_v16 }
 0x120   : > { %v641_v43 = vrot.slane %v640_v42, 1 }
 0x122   : > { %v3137_v44 = vmax.f32 %v640_v42, %v641_v43 }
 0x124   : > { %v643_v45 = vsub.f32 %v3011_v19, %v3137_v44  ;;  %v644_v47 = vsub.f32 %v3015_v21, %v3137_v44  ;;  %v645_v48 = vsub.f32 %v3009_v18, %v3137_v44  ;;  %v646_v49 = vsub.f32 %v3013_v20, %v3137_v44 }
 0x125   : > { %v647_v50 = vsub.f32 %v3019_v23, %v3137_v44  ;;  %v648_v56 = vsub.f32 %v3023_v25, %v3137_v44  ;;  %v649_v58 = vsub.f32 %v3017_v22, %v3137_v44  ;;  %v650_v61 = vsub.f32 %v3021_v24, %v3137_v44 }
 0x126   : > { %v675_v52 = vmul.f32 1.442695, %v643_v45  ;;  %v677_v53 = vmul.f32 1.442695, %v644_v47  ;;  %v679_v55 = vmul.f32 1.442695, %v645_v48  ;;  %v651_v0 = vsub.f32 %v3027_v27, %v3137_v44 }
 0x127   : > { %v681_v57 = vmul.f32 1.442695, %v646_v49  ;;  %v683_v59 = vmul.f32 1.442695, %v647_v50  ;;  %v685_v62 = vmul.f32 1.442695, %v648_v56  ;;  %v652_v2 = vsub.f32 %v3031_v29, %v3137_v44 }
 0x128   : > { %2633 = vpow2.f32 %v675_v52  ;;  %v687_v1 = vmul.f32 1.442695, %v649_v58  ;;  %v689_v3 = vmul.f32 1.442695, %v650_v61  ;;  %v653_v4 = vsub.f32 %v3025_v26, %v3137_v44 }
 0x129   : > { %2635 = vpow2.f32 %v677_v53  ;;  %v691_v6 = vmul.f32 1.442695, %v651_v0  ;;  %v654_v8 = vsub.f32 %v3029_v28, %v3137_v44  ;;  %v693_v9 = vmul.f32 1.442695, %v652_v2 }
 0x12a   : > { %2637 = vpow2.f32 %v679_v55  ;;  %v655_v11 = vsub.f32 %v3035_v31, %v3137_v44  ;;  %v695_v12 = vmul.f32 1.442695, %v653_v4  ;;  %v656_v16 = vsub.f32 %v3039_v33, %v3137_v44 }
 0x12b   : > { %2639 = vpow2.f32 %v681_v57  ;;  %v697_v42 = vmul.f32 1.442695, %v654_v8  ;;  %v657_v48 = vsub.f32 %v3033_v30, %v3137_v44  ;;  %v658_v55 = vsub.f32 %v3037_v32, %v3137_v44 }
 0x12c   : > { %2641 = vpow2.f32 %v683_v59  ;;  %v699_v49 = vmul.f32 1.442695, %v655_v11  ;;  %v701_v56 = vmul.f32 1.442695, %v656_v16  ;;  %v659_v61 = vsub.f32 %v3043_v35, %v3137_v44 }
 0x12d   : > { %2643 = vpow2.f32 %v685_v62  ;;  %v703_v62 = vmul.f32 1.442695, %v657_v48  ;;  %v705_v4 = vmul.f32 1.442695, %v658_v55  ;;  %v661_v11 = vsub.f32 %v3041_v34, %v3137_v44 }
 0x12e   : > { %2645 = vpow2.f32 %v687_v1 }
 0x12f   : > { %2647 = vpow2.f32 %v689_v3  ;;  %v660_v3 = vsub.f32 %v3047_v37, %v3137_v44  ;;  %v711_v55 = vmul.f32 1.442695, %v661_v11 }
 0x130   : > { %2649 = vpow2.f32 %v691_v6 }
 0x131   : > { %2651 = vpow2.f32 %v693_v9 }
 0x132   : > { %2653 = vpow2.f32 %v695_v12  ;;  %v707_v12 = vmul.f32 1.442695, %v659_v61  ;;  %v664_v61 = vsub.f32 %v3055_v41, %v3137_v44 }
 0x133   : > { %2655 = vpow2.f32 %v697_v42 }
 0x134   : > { %2657 = vpow2.f32 %v699_v49 }
 0x135   : > { %v3163_v10 = vpop.eup %2633  ;;  %2659 = vpow2.f32 %v701_v56 }
 0x136   : > { %v3167_v13 = vpop.eup %2635  ;;  %v739_v14 = vsel %vm573_vm2, %v3163_v10, 0.0  ;;  %2661 = vpow2.f32 %v703_v62 }
 0x137   : > { %v3171_v15 = vpop.eup %2637  ;;  %v740_v43 = vsel %vm573_vm2, %v3167_v13, 0.0  ;;  %2663 = vpow2.f32 %v705_v4  ;;  %v665_v4 = vsub.f32 %v3049_v38, %v3137_v44 }
 0x138   : > { %v3177_v45 = vpop.eup %2639  ;;  %v741_v47 = vadd.f32 %v740_v43, %v739_v14  ;;  %v742_v50 = vsel %vm573_vm2, %v3171_v15, 0.0  ;;  %v662_v43 = vsub.f32 %v3045_v36, %v3137_v44  ;;  %2665 = vpow2.f32 %v707_v12 }
 0x139   : > { %v3183_v52 = vpop.eup %2641  ;;  %v744_v57 = vsel %vm573_vm2, %v3177_v45, 0.0 }
 0x13a   : > { %v743_v53 = vadd.f32 %v742_v50, %v741_v47  ;;  %v3189_v58 = vpop.eup %2643  ;;  %v746_v0 = vsel %vm573_vm2, %v3183_v52, 0.0  ;;  %v709_v47 = vmul.f32 1.442695, %v660_v3  ;;  %v713_v62 = vmul.f32 1.442695, %v662_v43 }
 0x13b   : > { %v3195_v1 = vpop.eup %2645  ;;  %v748_v6 = vsel %vm573_vm2, %v3189_v58, 0.0 }
 0x13c   : > { %v745_v59 = vadd.f32 %v744_v57, %v743_v53  ;;  %v3201_v8 = vpop.eup %2647  ;;  %v750_v14 = vsel %vm573_vm2, %v3195_v1, 0.0  ;;  %v663_v53 = vsub.f32 %v3051_v39, %v3137_v44  ;;  %2667 = vpow2.f32 %v709_v47 }
 0x13d   : > { %v3207_v16 = vpop.eup %2649  ;;  %v752_v48 = vsel %vm573_vm2, %v3201_v8, 0.0  ;;  %2669 = vpow2.f32 %v711_v55 }
 0x13e   : > { %v747_v2 = vadd.f32 %v746_v0, %v745_v59  ;;  %v3213_v49 = vpop.eup %2651  ;;  %v754_v56 = vsel %vm573_vm2, %v3207_v16, 0.0  ;;  %2671 = vpow2.f32 %v713_v62 }
 0x13f   : > { %v3219_v57 = vpop.eup %2653  ;;  %v756_v0 = vsel %vm573_vm2, %v3213_v49, 0.0 }
 0x140   : > { %v749_v9 = vadd.f32 %v748_v6, %v747_v2  ;;  %v3225_v2 = vpop.eup %2655  ;;  %v715_v6 = vmul.f32 1.442695, %v663_v53  ;;  %v719_v53 = vmul.f32 1.442695, %v665_v4  ;;  %v669_v4 = vsub.f32 %v3065_v46, %v3137_v44 }
 0x141   : > { %v3231_v11 = vpop.eup %2657  ;;  %v760_v43 = vsel %vm573_vm2, %v3225_v2, 0.0 }
 0x142   : > { %v751_v42 = vadd.f32 %v750_v14, %v749_v9  ;;  %v758_v9 = vsel %vm573_vm2, %v3219_v57, 0.0  ;;  %v666_v14 = vsub.f32 %v3053_v40, %v3137_v44  ;;  %v3237_v47 = vpop.eup %2659  ;;  %2673 = vpow2.f32 %v715_v6 }
 0x143   : > { %v762_v55 = vsel %vm573_vm2, %v3231_v11, 0.0 }
 0x144   : > { %v753_v50 = vadd.f32 %v752_v48, %v751_v42  ;;  %v717_v42 = vmul.f32 1.442695, %v664_v61  ;;  %v668_v61 = vsub.f32 %v3097_v7, %v3137_v44  ;;  %v721_v62 = vmul.f32 1.442695, %v666_v14 }
 0x145   : > { %v670_v14 = vsub.f32 %v3087_v63, %v3137_v44 }
 0x146   : > { %v755_v59 = vadd.f32 %v754_v56, %v753_v50  ;;  %v667_v50 = vsub.f32 %v3077_v54, %v3137_v44  ;;  %v3243_v56 = vpop.eup %2661  ;;  %2675 = vpow2.f32 %v717_v42  ;;  %v725_v42 = vmul.f32 1.442695, %v668_v61 }
 0x147   : > { %2677 = vpow2.f32 %v719_v53  ;;  %v727_v53 = vmul.f32 1.442695, %v669_v4  ;;  %v672_v61 = vsub.f32 %v3133_v5, %v3137_v44  ;;  %v673_v4 = vsub.f32 %v3107_v17, %v3137_v44 }
 0x148   : > { %v757_v3 = vadd.f32 %v756_v0, %v755_v59  ;;  %v764_v0 = vsel %vm573_vm2, %v3237_v47, 0.0  ;;  %v723_v6 = vmul.f32 1.442695, %v667_v50  ;;  %2679 = vpow2.f32 %v721_v62 }
 0x149   : > { %v671_v50 = vsub.f32 %v3117_v51, %v3137_v44  ;;  %v729_v62 = vmul.f32 1.442695, %v670_v14  ;;  %v674_v14 = vsub.f32 %v3125_v60, %v3137_v44 }
 0x14a   : > { %v759_v12 = vadd.f32 %v758_v9, %v757_v3  ;;  %v3249_v3 = vpop.eup %2663  ;;  %2681 = vpow2.f32 %v723_v6 }
 0x14b   : > { %2683 = vpow2.f32 %v725_v42  ;;  %v731_v6 = vmul.f32 1.442695, %v671_v50  ;;  %v733_v42 = vmul.f32 1.442695, %v672_v61 }
 0x14c   : > { %v761_v48 = vadd.f32 %v760_v43, %v759_v12  ;;  %v766_v12 = vsel %vm573_vm2, %v3243_v56, 0.0  ;;  %v3255_v43 = vpop.eup %2665  ;;  %2685 = vpow2.f32 %v727_v53  ;;  %v735_v53 = vmul.f32 1.442695, %v673_v4 }
 0x14d   : > { %v770_v46 = vsel %vm573_vm2, %v3255_v43, 0.0  ;;  %2687 = vpow2.f32 %v729_v62 }
 0x14e   : > { %v763_v59 = vadd.f32 %v762_v55, %v761_v48  ;;  %v768_v55 = vsel %vm573_vm2, %v3249_v3, 0.0  ;;  %2689 = vpow2.f32 %v731_v6 }
 0x14f   : > { %2691 = vpow2.f32 %v733_v42 }
 0x150   : > { %v765_v9 = vadd.f32 %v764_v0, %v763_v59  ;;  %v3261_v59 = vpop.eup %2667  ;;  %2693 = vpow2.f32 %v735_v53 }
 0x151   : > { %v772_v63 = vsel %vm573_vm2, %v3261_v59, 0.0 }
 0x152   : > { %v767_v48 = vadd.f32 %v766_v12, %v765_v9  ;;  %v3267_v9 = vpop.eup %2669 }
 0x153   : > { %v774_v51 = vsel %vm573_vm2, %v3267_v9, 0.0 }
 0x154   : > { %v769_v0 = vadd.f32 %v768_v55, %v767_v48  ;;  %v3273_v48 = vpop.eup %2671 }
 0x155   : > { %v776_v5 = vsel %vm573_vm2, %v3273_v48, 0.0 }
 0x156   : > { %v771_v12 = vadd.f32 %v770_v46, %v769_v0  ;;  %v3279_v46 = vpop.eup %2673 }
 0x157   : > { %v778_v50 = vsel %vm573_vm2, %v3279_v46, 0.0 }
 0x158   : > { %v773_v55 = vadd.f32 %v772_v63, %v771_v12  ;;  %v3285_v63 = vpop.eup %2675 }
 0x159   : > { %v3289_v17 = vpop.eup %2677  ;;  %v780_v44 = vsel %vm573_vm2, %v3285_v63, 0.0 }
 0x15a   : > { %v775_v0 = vadd.f32 %v774_v51, %v773_v55  ;;  %v737_v51 = vmul.f32 1.442695, %v674_v14  ;;  %v3293_v61 = vpop.eup %2679 }
 0x15b   : > { %v3297_v55 = vpop.eup %2681  ;;  %v784_v6 = vsel %vm573_vm2, %v3293_v61, 0.0 }
 0x15c   : > { %v777_v12 = vadd.f32 %v776_v5, %v775_v0  ;;  %v782_v5 = vsel %vm573_vm2, %v3289_v17, 0.0  ;;  %2695 = vpow2.f32 %v737_v51  ;;  %v3301_v0 = vpop.eup %2683  ;;  %v786_v42 = vsel %vm573_vm2, %v3297_v55, 0.0 }
 0x15d   : > { %v788_v53 = vsel %vm573_vm2, %v3301_v0, 0.0 }
 0x15e   : > { %v779_v7 = vadd.f32 %v778_v50, %v777_v12  ;;  %v3305_v12 = vpop.eup %2685 }
 0x15f   : > { %v3309_v50 = vpop.eup %2687  ;;  %v790_v51 = vsel %vm573_vm2, %v3305_v12, 0.0 }
 0x160   : > { %v781_v62 = vadd.f32 %v780_v44, %v779_v7 }
 0x162   : > { %v783_v4 = vadd.f32 %v782_v5, %v781_v62  ;;  %v3313_v62 = vpop.eup %2689 }
 0x164   : > { %v785_v14 = vadd.f32 %v784_v6, %v783_v4  ;;  %v792_v4 = vsel %vm573_vm2, %v3309_v50, 0.0  ;;  %v3317_v6 = vpop.eup %2691 }
 0x166   : > { %v787_v7 = vadd.f32 %v786_v42, %v785_v14  ;;  %v794_v14 = vsel %vm573_vm2, %v3313_v62, 0.0  ;;  %v3321_v42 = vpop.eup %2693 }
 0x168   : > { %v789_v44 = vadd.f32 %v788_v53, %v787_v7  ;;  %v796_v7 = vsel %vm573_vm2, %v3317_v6, 0.0 }
 0x169   : > { %v3325_v53 = vpop.eup %2695 }
 0x16a   : > { %v791_v5 = vadd.f32 %v790_v51, %v789_v44  ;;  %v798_v44 = vsel %vm573_vm2, %v3321_v42, 0.0  ;;  %v800_v38 = vsel %vm573_vm2, %v3325_v53, 0.0 }
 0x16c   : > { %v793_v60 = vadd.f32 %v792_v4, %v791_v5 }
 0x16e   : > { %v795_v54 = vadd.f32 %v794_v14, %v793_v60 }
 0x170   : > { %v797_v40 = vadd.f32 %v796_v7, %v795_v54 }
 0x172   : > { %v799_v51 = vadd.f32 %v798_v44, %v797_v40 }
 0x174   : > { %v801_v5 = vadd.f32 %v800_v38, %v799_v51 }
 0x176   : > { %v802_v4 = vrot.slane %v801_v5, 4 }
 0x178   : > { %v803_v41 = vadd.f32 %v802_v4, %v801_v5 }
 0x17a   : > { %v804_v39 = vrot.slane %v803_v41, 2 }
 0x17c   : > { %v805_v36 = vadd.f32 %v804_v39, %v803_v41 }
 0x17e   : > { %v806_v34 = vrot.slane %v805_v36, 1 }
 0x180   : > { %v807_v60 = vadd.f32 %v806_v34, %v805_v36 }
 0x182   : > { %2697 = vrcp.f32 %v807_v60 }
 0x18f   : > { %v2698_v14 = vpop.eup %2697 }
 0x190   : > { %v811_v37 = vmul.f32 %v2698_v14, %v3171_v15  ;;  %v809_v54 = vmul.f32 %v2698_v14, %v3163_v10  ;;  %v812_v40 = vmul.f32 %v2698_v14, %v3177_v45  ;;  %v810_v7 = vmul.f32 %v2698_v14, %v3167_v13 }
 0x191   : > { %v814_v38 = vmul.f32 %v2698_v14, %v3189_v58  ;;  %v813_v39 = vmul.f32 %v2698_v14, %v3183_v52  ;;  %v816_v34 = vmul.f32 %v2698_v14, %v3201_v8  ;;  %v815_v36 = vmul.f32 %v2698_v14, %v3195_v1 }
 0x192   : > { %853 = vperm.xlu1 %2600, %v811_v37   ;;  %843 = vperm.xlu0 %2599, %v809_v54   ;;  %v818_v37 = vmul.f32 %v2698_v14, %v3213_v49  ;;  %v817_v41 = vmul.f32 %v2698_v14, %v3207_v16  ;;  %v820_v10 = vmul.f32 %v2698_v14, %v3225_v2 }
 0x193   : > { %v819_v13 = vmul.f32 %v2698_v14, %v3219_v57  ;;  %v822_v15 = vmul.f32 %v2698_v14, %v3237_v47  ;;  %v821_v45 = vmul.f32 %v2698_v14, %v3231_v11  ;;  %v824_v52 = vmul.f32 %v2698_v14, %v3249_v3 }
 0x194   : > { %v823_v58 = vmul.f32 %v2698_v14, %v3243_v56  ;;  %v826_v1 = vmul.f32 %v2698_v14, %v3261_v59  ;;  %v825_v8 = vmul.f32 %v2698_v14, %v3255_v43  ;;  %v828_v16 = vmul.f32 %v2698_v14, %v3273_v48 }
 0x195   : > { %v827_v49 = vmul.f32 %v2698_v14, %v3267_v9  ;;  %v830_v57 = vmul.f32 %v2698_v14, %v3285_v63  ;;  %v829_v2 = vmul.f32 %v2698_v14, %v3279_v46  ;;  %v832_v11 = vmul.f32 %v2698_v14, %v3293_v61  ;;  %v1104_v63 = vld [vmem:[%s4299_s3] sm:$0x1] }
 0x196   : > { %858 = vperm.xlu1 %2600, %v812_v40   ;;  %848 = vperm.xlu0 %2599, %v810_v7   ;;  %v831_v47 = vmul.f32 %v2698_v14, %v3289_v17  ;;  %v834_v56 = vmul.f32 %v2698_v14, %v3301_v0  ;;  %v833_v3 = vmul.f32 %v2698_v14, %v3297_v55  ;;  %v2922_v61 = vmov 0.0  }
 0x197   : > { %v836_v43 = vmul.f32 %v2698_v14, %v3309_v50  ;;  %v835_v59 = vmul.f32 %v2698_v14, %v3305_v12  ;;  %v838_v9 = vmul.f32 %v2698_v14, %v3317_v6  ;;  %v837_v48 = vmul.f32 %v2698_v14, %v3313_v62  ;;  %2544 = vmatprep.subr.bf16.mxu1 %v2922_v61 }
 0x198   : > { %v840_v17 = vmul.f32 %v2698_v14, %v3325_v53  ;;  %v839_v46 = vmul.f32 %v2698_v14, %v3321_v42  ;;  %v1110_v55 = vsel %vm1108_vm3, %v1104_v63, 0  ;;  %2546 = vmatprep.mubr.msk.bf16.mxu1 %vm2923_vm4, %v2922_v61 }
 0x199   : > { %2545 = vmatpush3.bf16.msra.mxu1 %v1110_v55 }
 0x19a   : > { %868 = vperm.xlu1 %2600, %v814_v38   ;;  %863 = vperm.xlu0 %2599, %v813_v39  }
 0x19e   : > { %878 = vperm.xlu1 %2600, %v816_v34   ;;  %873 = vperm.xlu0 %2599, %v815_v36  }
 0x1a2   : > { %888 = vperm.xlu1 %2600, %v818_v37   ;;  %883 = vperm.xlu0 %2599, %v817_v41  }
 0x1a6   : > { %898 = vperm.xlu1 %2600, %v820_v10   ;;  %893 = vperm.xlu0 %2599, %v819_v13  }
 0x1aa   : > { %908 = vperm.xlu1 %2600, %v822_v15   ;;  %903 = vperm.xlu0 %2599, %v821_v45  }
 0x1ae   : > { %918 = vperm.xlu1 %2600, %v824_v52   ;;  %913 = vperm.xlu0 %2599, %v823_v58  }
 0x1b2   : > { %928 = vperm.xlu1 %2600, %v826_v1   ;;  %923 = vperm.xlu0 %2599, %v825_v8  }
 0x1b6   : > { %938 = vperm.xlu1 %2600, %v828_v16   ;;  %933 = vperm.xlu0 %2599, %v827_v49  }
 0x1ba   : > { %948 = vperm.xlu1 %2600, %v830_v57   ;;  %943 = vperm.xlu0 %2599, %v829_v2  }
 0x1be   : > { %958 = vperm.xlu1 %2600, %v832_v11   ;;  %953 = vperm.xlu0 %2599, %v831_v47  }
 0x1c2   : > { %968 = vperm.xlu1 %2600, %v834_v56   ;;  %963 = vperm.xlu0 %2599, %v833_v3  }
 0x1c6   : > { %978 = vperm.xlu1 %2600, %v836_v43   ;;  %973 = vperm.xlu0 %2599, %v835_v59  }
 0x1ca   : > { %988 = vperm.xlu1 %2600, %v838_v9   ;;  %983 = vperm.xlu0 %2599, %v837_v48  }
 0x1ce   : > { %998 = vperm.xlu1 %2600, %v840_v17   ;;  %993 = vperm.xlu0 %2599, %v839_v46  }
 0x20d   : > { %v854_v0 = vpop.permute.xlu1 %853  ;;  %v844_v12 = vpop.permute.xlu0 %843 }
 0x20e   : > { %v1001_v50 = vmul.f32 %v844_v12, %v3011_v19  ;;  %v1003_v42 = vmul.f32 %v3009_v18, %v854_v0 }
 0x210   : > { %v1034_v44 = vsel %vm1033_vm5, %v1001_v50, 0.0  ;;  %v1037_v54 = vsel %vm1033_vm5, %v1003_v42, 0.0 }
 0x211   : > { %v859_v62 = vpop.permute.xlu1 %858  ;;  %v849_v6 = vpop.permute.xlu0 %848 }
 0x212   : > { %v1002_v53 = vmul.f32 %v849_v6, %v3015_v21  ;;  %v1004_v51 = vmul.f32 %v3013_v20, %v859_v62  ;;  %v4349_v6 = vld [vmem:[#allocation4_spill] sm:$0xff] }
 0x214   : > { %v1035_v5 = vsel %vm1033_vm5, %v1002_v53, 0.0  ;;  %v1039_v7 = vsel %vm1033_vm5, %v1004_v51, 0.0 }
 0x215   : > { %v1036_v4 = vadd.f32 %v1035_v5, %v1034_v44  ;;  %v869_v60 = vpop.permute.xlu1 %868  ;;  %v864_v14 = vpop.permute.xlu0 %863  ;;  %v4350_v5 = vld [vmem:[#allocation2_spill] sm:$0xff] }
 0x216   : > { %v1005_v19 = vmul.f32 %v864_v14, %v3019_v23  ;;  %v1006_v18 = vmul.f32 %v869_v60, %v3023_v25  ;;  %v4351_v14 = vld [vmem:[#allocation3_spill] sm:$0xff] }
 0x217   : > { %v1038_v40 = vadd.f32 %v1037_v54, %v1036_v4 }
 0x218   : > { %v1041_v34 = vsel %vm1033_vm5, %v1005_v19, 0.0  ;;  %v1043_v37 = vsel %vm1033_vm5, %v1006_v18, 0.0  ;;  %v4352_v18 = vld [vmem:[#allocation6_spill] sm:$0xff] }
 0x219   : > { %v1040_v38 = vadd.f32 %v1039_v7, %v1038_v40  ;;  %v879_v21 = vpop.permute.xlu1 %878  ;;  %v874_v39 = vpop.permute.xlu0 %873 }
 0x21a   : > { %v1007_v20 = vmul.f32 %v3017_v22, %v874_v39  ;;  %v1008_v41 = vmul.f32 %v3021_v24, %v879_v21 }
 0x21b   : > { %v1042_v36 = vadd.f32 %v1041_v34, %v1040_v38  ;;  %v4353_v34 = vld [vmem:[#allocation8_spill] sm:$0xff] }
 0x21c   : > { %v1045_v15 = vsel %vm1033_vm5, %v1007_v20, 0.0  ;;  %v1047_v52 = vsel %vm1033_vm5, %v1008_v41, 0.0 }
 0x21d   : > { %v1044_v10 = vadd.f32 %v1043_v37, %v1042_v36  ;;  %v889_v13 = vpop.permute.xlu1 %888  ;;  %v884_v23 = vpop.permute.xlu0 %883 }
 0x21e   : > { %v1009_v45 = vmul.f32 %v884_v23, %v3027_v27  ;;  %v1010_v58 = vmul.f32 %v889_v13, %v3031_v29  ;;  %v4354_v13 = vld [vmem:[#allocation5_spill] sm:$0xff] }
 0x21f   : > { %v1046_v25 = vadd.f32 %v1045_v15, %v1044_v10 }
 0x220   : > { %v1049_v16 = vsel %vm1033_vm5, %v1009_v45, 0.0  ;;  %v1051_v57 = vsel %vm1033_vm5, %v1010_v58, 0.0 }
 0x221   : > { %v1048_v1 = vadd.f32 %v1047_v52, %v1046_v25  ;;  %v899_v8 = vpop.permute.xlu1 %898  ;;  %v894_v22 = vpop.permute.xlu0 %893  ;;  %v4355_v25 = vld [vmem:[#allocation7_spill] sm:$0xff] }
 0x222   : > { %v1011_v49 = vmul.f32 %v3025_v26, %v894_v22  ;;  %v1012_v2 = vmul.f32 %v3029_v28, %v899_v8 }
 0x223   : > { %v1050_v24 = vadd.f32 %v1049_v16, %v1048_v1  ;;  %v4356_v16 = vld [vmem:[#allocation10_spill] sm:$0xff] }
 0x224   : > { %v1053_v56 = vsel %vm1033_vm5, %v1011_v49, 0.0  ;;  %v1055_v43 = vsel %vm1033_vm5, %v1012_v2, 0.0  ;;  %v4357_v2 = vld [vmem:[#allocation12_spill] sm:$0xff] }
 0x225   : > { %v1052_v11 = vadd.f32 %v1051_v57, %v1050_v24  ;;  %v909_v47 = vpop.permute.xlu1 %908  ;;  %v904_v27 = vpop.permute.xlu0 %903 }
 0x226   : > { %v1013_v3 = vmul.f32 %v904_v27, %v3035_v31  ;;  %v1014_v59 = vmul.f32 %v909_v47, %v3039_v33 }
 0x227   : > { %v1054_v29 = vadd.f32 %v1053_v56, %v1052_v11 }
 0x228   : > { %v1057_v17 = vsel %vm1033_vm5, %v1013_v3, 0.0  ;;  %v1059_v63 = vsel %vm1033_vm5, %v1014_v59, 0.0 }
 0x229   : > { %v1056_v9 = vadd.f32 %v1055_v43, %v1054_v29  ;;  %v919_v48 = vpop.permute.xlu1 %918  ;;  %v914_v26 = vpop.permute.xlu0 %913  ;;  %v4358_v29 = vld [vmem:[#allocation9_spill] sm:$0xff] }
 0x22a   : > { %v1015_v46 = vmul.f32 %v3033_v30, %v914_v26  ;;  %v1016_v61 = vmul.f32 %v3037_v32, %v919_v48  ;;  %v4359_v48 = vld [vmem:[#allocation11_spill] sm:$0xff] }
 0x22b   : > { %v1058_v28 = vadd.f32 %v1057_v17, %v1056_v9 }
 0x22c   : > { %v1061_v12 = vsel %vm1033_vm5, %v1015_v46, 0.0  ;;  %v1063_v62 = vsel %vm1033_vm5, %v1016_v61, 0.0  ;;  %v4360_v61 = vld [vmem:[#allocation14_spill] sm:$0xff] }
 0x22d   : > { %v1060_v55 = vadd.f32 %v1059_v63, %v1058_v28  ;;  %v929_v0 = vpop.permute.xlu1 %928  ;;  %v924_v31 = vpop.permute.xlu0 %923 }
 0x22e   : > { %v1017_v50 = vmul.f32 %v924_v31, %v3043_v35  ;;  %v1018_v42 = vmul.f32 %v929_v0, %v4349_v6 }
 0x22f   : > { %v1062_v33 = vadd.f32 %v1061_v12, %v1060_v55  ;;  %v4361_v12 = vld [vmem:[#allocation16_spill] sm:$0xff] }
 0x230   : > { %v1065_v51 = vsel %vm1033_vm5, %v1017_v50, 0.0  ;;  %v1067_v60 = vsel %vm1033_vm5, %v1018_v42, 0.0 }
 0x231   : > { %v1064_v53 = vadd.f32 %v1063_v62, %v1062_v33  ;;  %v939_v44 = vpop.permute.xlu1 %938  ;;  %v934_v30 = vpop.permute.xlu0 %933 }
 0x232   : > { %v1019_v4 = vmul.f32 %v4350_v5, %v934_v30  ;;  %v1020_v54 = vmul.f32 %v4351_v14, %v939_v44  ;;  %v4363_v5 = vld [vmem:[#allocation15_spill] sm:$0xff] }
 0x233   : > { %v1066_v32 = vadd.f32 %v1065_v51, %v1064_v53  ;;  %v4362_v53 = vld [vmem:[#allocation13_spill] sm:$0xff] }
 0x234   : > { %v1069_v7 = vsel %vm1033_vm5, %v1019_v4, 0.0  ;;  %v1071_v39 = vsel %vm1033_vm5, %v1020_v54, 0.0 }
 0x235   : > { %v1068_v19 = vadd.f32 %v1067_v60, %v1066_v32  ;;  %v949_v40 = vpop.permute.xlu1 %948  ;;  %v944_v35 = vpop.permute.xlu0 %943 }
 0x236   : > { %v1021_v38 = vmul.f32 %v944_v35, %v4352_v18  ;;  %v1022_v20 = vmul.f32 %v949_v40, %v4353_v34  ;;  %v1242_v34 = vld [vmem:[%s4300_s4] sm:$0x3] }
 0x237   : > { %v1070_v21 = vadd.f32 %v1069_v7, %v1068_v19  ;;  %2585 = vmatprep.subr.msk.bf16.mxu1 %vm408_vm0, %v1242_v34 }
 0x238   : > { %v1073_v10 = vsel %vm1033_vm5, %v1021_v38, 0.0  ;;  %v1075_v45 = vsel %vm1033_vm5, %v1022_v20, 0.0  ;;  %v1292_v20 = vsel %vm408_vm0, %v1242_v34, 0 }
 0x239   : > { %v1072_v36 = vadd.f32 %v1071_v39, %v1070_v21  ;;  %v959_v37 = vpop.permute.xlu1 %958  ;;  %v954_v41 = vpop.permute.xlu0 %953 }
 0x23a   : > { %v1023_v23 = vmul.f32 %v4354_v13, %v954_v41  ;;  %v1024_v52 = vmul.f32 %v4355_v25, %v959_v37 }
 0x23b   : > { %v1074_v15 = vadd.f32 %v1073_v10, %v1072_v36 }
 0x23c   : > { %v1077_v22 = vsel %vm1033_vm5, %v1023_v23, 0.0  ;;  %v1079_v57 = vsel %vm1033_vm5, %v1024_v52, 0.0 }
 0x23d   : > { %v1076_v58 = vadd.f32 %v1075_v45, %v1074_v15  ;;  %v969_v1 = vpop.permute.xlu1 %968  ;;  %v964_v8 = vpop.permute.xlu0 %963  ;;  %v1190_v45 = vlaneseq }
 0x23e   : > { %v1025_v49 = vmul.f32 %v964_v8, %v4356_v16  ;;  %v1026_v11 = vmul.f32 %v969_v1, %v4357_v2 }
 0x23f   : > { %v1078_v24 = vadd.f32 %v1077_v22, %v1076_v58  ;;  %v1191_v25 = vshrl.u32 %v1190_v45, 7  ;;  %v2897_v58 = vld [vmem:[%s2975_s25] sm:$0xff]   ;;  %v2898_v22 = vld [vmem:[%s2975_s25 + $0x8] sm:$0xff]  }
 0x240   : > { %v1081_v3 = vsel %vm1033_vm5, %v1025_v49, 0.0  ;;  %v1083_v9 = vsel %vm1033_vm5, %v1026_v11, 0.0  ;;  %v1158_v1 = vunpack.c.l.bf16 %v2897_v58  ;;  %v1159_v8 = vunpack.c.h.bf16 %v2897_v58 }
 0x241   : > { %v1080_v47 = vadd.f32 %v1079_v57, %v1078_v24  ;;  %v979_v27 = vpop.permute.xlu1 %978  ;;  %v974_v56 = vpop.permute.xlu0 %973  ;;  %v1192_v52 = vsub.s32 0, %v1191_v25  ;;  %v1160_v16 = vunpack.c.l.bf16 %v2898_v22  ;;  %v1161_v49 = vunpack.c.h.bf16 %v2898_v22  ;;  %v2899_v57 = vld [vmem:[%s2975_s25 + $0x10] sm:$0xff]  }
 0x242   : > { %v1027_v43 = vmul.f32 %v4358_v29, %v974_v56  ;;  %v1028_v26 = vmul.f32 %v4359_v48, %v979_v27  ;;  %v1162_v2 = vunpack.c.l.bf16 %v2899_v57  ;;  %v1163_v11 = vunpack.c.h.bf16 %v2899_v57 }
 0x243   : > { %v1082_v59 = vadd.f32 %v1081_v3, %v1080_v47 }
 0x244   : > { %v1085_v63 = vsel %vm1033_vm5, %v1027_v43, 0.0  ;;  %v1087_v31 = vsel %vm1033_vm5, %v1028_v26, 0.0  ;;  %v2900_v26 = vld [vmem:[%s2975_s25 + $0x18] sm:$0xff]  }
 0x245   : > { %v1084_v17 = vadd.f32 %v1083_v9, %v1082_v59  ;;  %v989_v46 = vpop.permute.xlu1 %988  ;;  %v984_v28 = vpop.permute.xlu0 %983 }
 0x246   : > { %v1029_v55 = vmul.f32 %v984_v28, %v4360_v61  ;;  %v1030_v50 = vmul.f32 %v989_v46, %v4361_v12  ;;  %v1165_v46 = vunpack.c.h.bf16 %v2900_v26  ;;  %v2901_v28 = vld [vmem:[%s2975_s25 + $0x20] sm:$0xff]  }
 0x247   : > { %v1086_v0 = vadd.f32 %v1085_v63, %v1084_v17  ;;  %v1164_v17 = vunpack.c.l.bf16 %v2900_v26  ;;  %v1166_v63 = vunpack.c.l.bf16 %v2901_v28  ;;  %v1167_v61 = vunpack.c.h.bf16 %v2901_v28 }
 0x248   : > { %v1089_v42 = vsel %vm1033_vm5, %v1029_v55, 0.0  ;;  %v1091_v51 = vsel %vm1033_vm5, %v1030_v50, 0.0 }
 0x249   : > { %v1088_v33 = vadd.f32 %v1087_v31, %v1086_v0  ;;  %v999_v62 = vpop.permute.xlu1 %998  ;;  %v994_v6 = vpop.permute.xlu0 %993 }
 0x24a   : > { %v1031_v44 = vmul.f32 %v4362_v53, %v994_v6  ;;  %v1032_v4 = vmul.f32 %v4363_v5, %v999_v62  ;;  %v2903_v53 = vld [vmem:[%s2975_s25 + $0x30] sm:$0xff]  }
 0x24b   : > { %v1090_v30 = vadd.f32 %v1089_v42, %v1088_v33  ;;  %v2902_v33 = vld [vmem:[%s2975_s25 + $0x28] sm:$0xff]  }
 0x24c   : > { %v1093_v60 = vsel %vm1033_vm5, %v1031_v44, 0.0  ;;  %v1095_v54 = vsel %vm1033_vm5, %v1032_v4, 0.0  ;;  %v1168_v62 = vunpack.c.l.bf16 %v2902_v33  ;;  %v1169_v6 = vunpack.c.h.bf16 %v2902_v33 }
 0x24d   : > { %v1092_v32 = vadd.f32 %v1091_v51, %v1090_v30  ;;  %v1170_v44 = vunpack.c.l.bf16 %v2903_v53  ;;  %v1171_v30 = vunpack.c.h.bf16 %v2903_v53 }
 0x24f   : > { %v1094_v14 = vadd.f32 %v1093_v60, %v1092_v32 }
 0x251   : > { %v1096_v19 = vadd.f32 %v1095_v54, %v1094_v14  ;;  %v2904_v14 = vld [vmem:[%s2975_s25 + $0x38] sm:$0xff]  }
 0x252   : > { %v1172_v54 = vunpack.c.l.bf16 %v2904_v14 }
 0x253   : > { %v1097_v40 = vrot.slane %v1096_v19, 4 }
 0x255   : > { %v1098_v35 = vadd.f32 %v1097_v40, %v1096_v19  ;;  %v1173_v19 = vunpack.c.h.bf16 %v2904_v14 }
 0x257   : > { %v1099_v7 = vrot.slane %v1098_v35, 2 }
 0x259   : > { %v1100_v18 = vadd.f32 %v1099_v7, %v1098_v35  ;;  %v2905_v35 = vld [vmem:[%s2975_s25 + $0x40] sm:$0xff]  }
 0x25a   : > { %v1174_v7 = vunpack.c.l.bf16 %v2905_v35 }
 0x25b   : > { %v1101_v38 = vrot.slane %v1100_v18, 1 }
 0x25d   : > { %v1102_v21 = vadd.f32 %v1101_v38, %v1100_v18  ;;  %v1175_v18 = vunpack.c.h.bf16 %v2905_v35 }
 0x25f   : > { %v1103_v39 = vpack.c.bf16 %v1102_v21, %v1102_v21 }
 0x261   : > { %2547 = vmatmul.mubr.msk.bf16.vlgmr.msra.gmra.mxu1 %vm1033_vm5, %v1103_v39 }
 0x262   : > { %2551 = vmatpush3.bf16.msra.mxu1 %v1292_v20 }
 0x321   : > { %v1146_v36 = vpop.f32.mrf.mxu1 }
 0x322   : > { %v2420_v37 = vmul.f32 -1.442695, %v1146_v36  ;;  %v2906_v36 = vld [vmem:[%s2975_s25 + $0x48] sm:$0xff]  }
 0x323   : > { %v2548_v41 = vpop.f32.mrf.mxu1 }
 0x324   : > { %2699 = vpow2.f32 %v2420_v37  ;;  %v1176_v37 = vunpack.c.l.bf16 %v2906_v36  ;;  %v1177_v41 = vunpack.c.h.bf16 %v2906_v36 }
 0x325   : > { %v1149_v10 = vpop.f32.mrf.mxu1 }
 0x327   : > { %v2549_v13 = vpop.f32.mrf.mxu1 }
 0x328   : > { %v2907_v13 = vld [vmem:[%s2975_s25 + $0x50] sm:$0xff]  }
 0x331   : > { %v2700_v23 = vpop.eup %2699 }
 0x332   : > { %v1155_v15 = vadd.f32 1.0, %v2700_v23  ;;  %v1178_v23 = vunpack.c.l.bf16 %v2907_v13 }
 0x334   : > { %2701 = vrcp.f32 %v1155_v15  ;;  %v1179_v15 = vunpack.c.h.bf16 %v2907_v13 }
 0x341   : > { %v2702_v24 = vpop.eup %2701 }
 0x342   : > { %v3439_v47 = vrot.slane %v2702_v24, %v1192_v52  ;;  %v2909_v24 = vld [vmem:[%s2975_s25 + $0x60] sm:$0xff]  }
 0x343   : > { %v1182_v57 = vunpack.c.l.bf16 %v2909_v24 }
 0x344   : > { %v3442_v27 = vmul.f32 %v3439_v47, %v1158_v1  ;;  %v3445_v56 = vmul.f32 %v3439_v47, %v1159_v8  ;;  %v3448_v3 = vmul.f32 %v3439_v47, %v1160_v16  ;;  %v3451_v29 = vmul.f32 %v3439_v47, %v1161_v49  ;;  %v2908_v8 = vld [vmem:[%s2975_s25 + $0x58] sm:$0xff]  }
 0x345   : > { %v3454_v43 = vmul.f32 %v3439_v47, %v1162_v2  ;;  %v3457_v59 = vmul.f32 %v3439_v47, %v1163_v11  ;;  %v3471_v0 = vmul.f32 %v3439_v47, %v1164_v17  ;;  %v3474_v31 = vmul.f32 %v3439_v47, %v1165_v46  ;;  %v2910_v46 = vld [vmem:[%s2975_s25 + $0x68] sm:$0xff]  }
 0x346   : > { %v1226_v9 = vpack.c.bf16 %v3445_v56, %v3442_v27  ;;  %v1227_v48 = vpack.c.bf16 %v3451_v29, %v3448_v3  ;;  %v3477_v12 = vmul.f32 %v3439_v47, %v1166_v63  ;;  %v3480_v50 = vmul.f32 %v3439_v47, %v1167_v61 }
 0x347   : > { %v1228_v55 = vpack.c.bf16 %v3457_v59, %v3454_v43  ;;  %v1229_v42 = vpack.c.bf16 %v3474_v31, %v3471_v0  ;;  %v3491_v5 = vmul.f32 %v3439_v47, %v1168_v62  ;;  %v3494_v4 = vmul.f32 %v3439_v47, %v1169_v6 }
 0x348   : > { %2552 = vmatprep.mubr.msk.bf16.mxu1 %vm359_vm1, %v1226_v9  ;;  %v1230_v51 = vpack.c.bf16 %v3480_v50, %v3477_v12  ;;  %v3497_v32 = vmul.f32 %v3439_v47, %v1170_v44  ;;  %v3500_v60 = vmul.f32 %v3439_v47, %v1171_v30  ;;  %v3511_v21 = vmul.f32 %v3439_v47, %v1172_v54 }
 0x349   : > { %2553 = vmatmul.mubr.msk.bf16.vlgmr.msra.gmra.mxu1 %vm359_vm1, %v1227_v48  ;;  %v1231_v40 = vpack.c.bf16 %v3494_v4, %v3491_v5  ;;  %v3514_v39 = vmul.f32 %v3439_v47, %v1173_v19  ;;  %v3517_v34 = vmul.f32 %v3439_v47, %v1174_v7  ;;  %v3520_v20 = vmul.f32 %v3439_v47, %v1175_v18 }
 0x34a   : > { %2556 = vmatprep.mubr.msk.bf16.mxu1 %vm359_vm1, %v1228_v55  ;;  %v1232_v38 = vpack.c.bf16 %v3500_v60, %v3497_v32  ;;  %v3531_v25 = vmul.f32 %v3439_v47, %v1176_v37  ;;  %v3534_v52 = vmul.f32 %v3439_v47, %v1177_v41  ;;  %v3537_v58 = vmul.f32 %v3439_v47, %v1178_v23  ;;  %v2911_v55 = vld [vmem:[%s2975_s25 + $0x70] sm:$0xff]  }
 0x34b   : > { %4364 = vst [vmem:[#allocation4_spill] sm:$0xff] %v3514_v39  ;;  %4365 = vst [vmem:[#allocation2_spill] sm:$0xff] %v3517_v34  ;;  %v1233_v10 = vpack.c.bf16 %v3514_v39, %v3511_v21  ;;  %v1234_v45 = vpack.c.bf16 %v3520_v20, %v3517_v34  ;;  %v3540_v1 = vmul.f32 %v3439_v47, %v1179_v15  ;;  %v1180_v22 = vunpack.c.l.bf16 %v2908_v8 }
 0x34c   : > { %4366 = vst [vmem:[#allocation3_spill] sm:$0xff] %v3520_v20  ;;  %4367 = vst [vmem:[#allocation6_spill] sm:$0xff] %v3531_v25  ;;  %v1181_v16 = vunpack.c.h.bf16 %v2908_v8  ;;  %v1235_v49 = vpack.c.bf16 %v3534_v52, %v3531_v25  ;;  %v1183_v2 = vunpack.c.h.bf16 %v2909_v24  ;;  %v3557_v26 = vmul.f32 %v3439_v47, %v1182_v57 }
 0x34d   : > { %4368 = vst [vmem:[#allocation8_spill] sm:$0xff] %v3534_v52  ;;  %4369 = vst [vmem:[#allocation5_spill] sm:$0xff] %v3537_v58  ;;  %v1236_v11 = vpack.c.bf16 %v3540_v1, %v3537_v58  ;;  %v3551_v9 = vmul.f32 %v3439_v47, %v1180_v22  ;;  %v1184_v28 = vunpack.c.l.bf16 %v2910_v46  ;;  %v1185_v63 = vunpack.c.h.bf16 %v2910_v46 }
 0x34e   : > { %4370 = vst [vmem:[#allocation7_spill] sm:$0xff] %v3540_v1  ;;  %v3554_v48 = vmul.f32 %v3439_v47, %v1181_v16  ;;  %4373 = vst [vmem:[#allocation9_spill] sm:$0xff] %v3557_v26  ;;  %v3560_v17 = vmul.f32 %v3439_v47, %v1183_v2  ;;  %v1186_v33 = vunpack.c.l.bf16 %v2911_v55  ;;  %v1187_v62 = vunpack.c.h.bf16 %v2911_v55 }
 0x34f   : > { %4371 = vst [vmem:[#allocation10_spill] sm:$0xff] %v3551_v9  ;;  %v3574_v53 = vmul.f32 %v3439_v47, %v1185_v63 }
 0x350   : > { %4372 = vst [vmem:[#allocation12_spill] sm:$0xff] %v3554_v48  ;;  %4374 = vst [vmem:[#allocation11_spill] sm:$0xff] %v3560_v17  ;;  %v1237_v61 = vpack.c.bf16 %v3554_v48, %v3551_v9  ;;  %v1238_v6 = vpack.c.bf16 %v3560_v17, %v3557_v26  ;;  %v3577_v44 = vmul.f32 %v3439_v47, %v1186_v33 }
 0x351   : > { %2557 = vmatmul.mubr.msk.bf16.gmra.mxu1 %vm359_vm1, %v1229_v42  ;;  %v3571_v42 = vmul.f32 %v3439_v47, %v1184_v28  ;;  %4376 = vst [vmem:[#allocation16_spill] sm:$0xff] %v3574_v53  ;;  %v3580_v30 = vmul.f32 %v3439_v47, %v1187_v62 }
 0x352   : > { %2560 = vmatprep.mubr.msk.bf16.mxu1 %vm359_vm1, %v1230_v51  ;;  %4377 = vst [vmem:[#allocation13_spill] sm:$0xff] %v3577_v44  ;;  %v2912_v51 = vld [vmem:[%s2975_s25 + $0x78] sm:$0xff]  }
 0x353   : > { %4375 = vst [vmem:[#allocation14_spill] sm:$0xff] %v3571_v42  ;;  %4378 = vst [vmem:[#allocation15_spill] sm:$0xff] %v3580_v30  ;;  %v1188_v14 = vunpack.c.l.bf16 %v2912_v51  ;;  %v1189_v54 = vunpack.c.h.bf16 %v2912_v51  ;;  %v1239_v19 = vpack.c.bf16 %v3574_v53, %v3571_v42 }
 0x355   : > { %v3590_v35 = vmul.f32 %v3439_v47, %v1188_v14  ;;  %v3593_v7 = vmul.f32 %v3439_v47, %v1189_v54 }
 0x357   : > { %4379 = vst [vmem:[#allocation17_spill] sm:$0xff] %v3590_v35  ;;  %4380 = vst [vmem:[#allocation18_spill] sm:$0xff] %v3593_v7  ;;  %v1241_v18 = vpack.c.bf16 %v3593_v7, %v3590_v35 }
 0x359   : > { %2561 = vmatmul.mubr.msk.bf16.gmra.mxu1 %vm359_vm1, %v1231_v40  ;;  %v1240_v40 = vpack.c.bf16 %v3580_v30, %v3577_v44 }
 0x35a   : > { %2564 = vmatprep.mubr.msk.bf16.mxu1 %vm359_vm1, %v1232_v38 }
 0x361   : > { %2565 = vmatmul.mubr.msk.bf16.gmra.mxu1 %vm359_vm1, %v1233_v10 }
 0x362   : > { %2568 = vmatprep.mubr.msk.bf16.mxu1 %vm359_vm1, %v1234_v45 }
 0x369   : > { %2569 = vmatmul.mubr.msk.bf16.gmra.mxu1 %vm359_vm1, %v1235_v49 }
 0x36a   : > { %2572 = vmatprep.mubr.msk.bf16.mxu1 %vm359_vm1, %v1236_v11 }
 0x371   : > { %2573 = vmatmul.mubr.msk.bf16.gmra.mxu1 %vm359_vm1, %v1237_v61 }
 0x372   : > { %2576 = vmatprep.mubr.msk.bf16.mxu1 %vm359_vm1, %v1238_v6 }
 0x379   : > { %2577 = vmatmul.mubr.msk.bf16.gmra.mxu1 %vm359_vm1, %v1239_v19 }
 0x37a   : > { %2580 = vmatprep.mubr.msk.bf16.mxu1 %vm359_vm1, %v1240_v40 }
 0x381   : > { %2581 = vmatmul.mubr.msk.bf16.gmra.mxu1 %vm359_vm1, %v1241_v18 }
 0x409   : > { %v3598_v38 = vpop.f32.mrf.mxu1 }
 0x40a   : > { %v1458_v15 = vsel %vm1033_vm5, %v3598_v38, 0.0 }
 0x40b   : > { %v3600_v36 = vpop.f32.mrf.mxu1 }
 0x40c   : > { %v1455_v10 = vsel %vm1033_vm5, %v3600_v36, 0.0 }
 0x40d   : > { %v3602_v37 = vpop.f32.mrf.mxu1 }
 0x40e   : > { %v1460_v22 = vsel %vm1033_vm5, %v3602_v37, 0.0 }
 0x40f   : > { %v3604_v41 = vpop.f32.mrf.mxu1 }
 0x410   : > { %v1456_v47 = vsel %vm1033_vm5, %v3604_v41, 0.0 }
 0x411   : > { %v1457_v13 = vadd.f32 %v1456_v47, %v1455_v10  ;;  %v3610_v23 = vpop.f32.mrf.mxu1 }
 0x412   : > { %v1466_v63 = vsel %vm1033_vm5, %v3610_v23, 0.0 }
 0x413   : > { %v1459_v45 = vadd.f32 %v1458_v15, %v1457_v13  ;;  %v3614_v8 = vpop.f32.mrf.mxu1 }
 0x414   : > { %v1462_v24 = vsel %vm1033_vm5, %v3614_v8, 0.0 }
 0x415   : > { %v1461_v16 = vadd.f32 %v1460_v22, %v1459_v45  ;;  %v3618_v49 = vpop.f32.mrf.mxu1 }
 0x416   : > { %v1468_v33 = vsel %vm1033_vm5, %v3618_v49, 0.0 }
 0x417   : > { %v1463_v57 = vadd.f32 %v1462_v24, %v1461_v16  ;;  %v3622_v2 = vpop.f32.mrf.mxu1 }
 0x418   : > { %v1464_v11 = vsel %vm1033_vm5, %v3622_v2, 0.0 }
 0x419   : > { %v1465_v46 = vadd.f32 %v1464_v11, %v1463_v57  ;;  %v3626_v28 = vpop.f32.mrf.mxu1 }
 0x41a   : > { %v1474_v10 = vsel %vm1033_vm5, %v3626_v28, 0.0 }
 0x41b   : > { %v1467_v61 = vadd.f32 %v1466_v63, %v1465_v46  ;;  %v3630_v55 = vpop.f32.mrf.mxu1 }
 0x41c   : > { %v1470_v51 = vsel %vm1033_vm5, %v3630_v55, 0.0 }
 0x41d   : > { %v1469_v62 = vadd.f32 %v1468_v33, %v1467_v61  ;;  %v3634_v6 = vpop.f32.mrf.mxu1 }
 0x41e   : > { %v1476_v15 = vsel %vm1033_vm5, %v3634_v6, 0.0 }
 0x41f   : > { %v1471_v14 = vadd.f32 %v1470_v51, %v1469_v62  ;;  %v3638_v54 = vpop.f32.mrf.mxu1 }
 0x420   : > { %v1472_v19 = vsel %vm1033_vm5, %v3638_v54, 0.0 }
 0x421   : > { %v1473_v40 = vadd.f32 %v1472_v19, %v1471_v14  ;;  %v3642_v18 = vpop.f32.mrf.mxu1 }
 0x422   : > { %v1482_v61 = vsel %vm1033_vm5, %v3642_v18, 0.0 }
 0x423   : > { %v1475_v47 = vadd.f32 %v1474_v10, %v1473_v40  ;;  %v3646_v13 = vpop.f32.mrf.mxu1 }
 0x424   : > { %v1478_v16 = vsel %vm1033_vm5, %v3646_v13, 0.0 }
 0x425   : > { %v1477_v45 = vadd.f32 %v1476_v15, %v1475_v47  ;;  %v3650_v22 = vpop.f32.mrf.mxu1 }
 0x426   : > { %v1484_v51 = vsel %vm1033_vm5, %v3650_v22, 0.0 }
 0x427   : > { %v1479_v24 = vadd.f32 %v1478_v16, %v1477_v45  ;;  %v3654_v57 = vpop.f32.mrf.mxu1 }
 0x428   : > { %v1480_v11 = vsel %vm1033_vm5, %v3654_v57, 0.0 }
 0x429   : > { %v1481_v46 = vadd.f32 %v1480_v11, %v1479_v24  ;;  %v3658_v63 = vpop.f32.mrf.mxu1 }
 0x42a   : > { %v1490_v24 = vsel %vm1033_vm5, %v3658_v63, 0.0 }
 0x42b   : > { %v1483_v33 = vadd.f32 %v1482_v61, %v1481_v46  ;;  %v3662_v62 = vpop.f32.mrf.mxu1 }
 0x42c   : > { %v1486_v40 = vsel %vm1033_vm5, %v3662_v62, 0.0 }
 0x42d   : > { %v1485_v14 = vadd.f32 %v1484_v51, %v1483_v33  ;;  %v3666_v19 = vpop.f32.mrf.mxu1 }
 0x42e   : > { %v1492_v61 = vsel %vm1033_vm5, %v3666_v19, 0.0 }
 0x42f   : > { %v1487_v10 = vadd.f32 %v1486_v40, %v1485_v14  ;;  %v3670_v47 = vpop.f32.mrf.mxu1 }
 0x430   : > { %v1488_v15 = vsel %vm1033_vm5, %v3670_v47, 0.0 }
 0x431   : > { %v1489_v45 = vadd.f32 %v1488_v15, %v1487_v10  ;;  %v3674_v16 = vpop.f32.mrf.mxu1 }
 0x433   : > { %v1491_v11 = vadd.f32 %v1490_v24, %v1489_v45  ;;  %v3678_v46 = vpop.f32.mrf.mxu1  ;;  %v1498_v45 = vsel %vm1033_vm5, %v3674_v16, 0.0 }
 0x434   : > { %v1494_v14 = vsel %vm1033_vm5, %v3678_v46, 0.0 }
 0x435   : > { %v1493_v33 = vadd.f32 %v1492_v61, %v1491_v11  ;;  %v3682_v51 = vpop.f32.mrf.mxu1 }
 0x436   : > { %v1500_v11 = vsel %vm1033_vm5, %v3682_v51, 0.0 }
 0x437   : > { %v1495_v40 = vadd.f32 %v1494_v14, %v1493_v33  ;;  %v3686_v7 = vpop.f32.mrf.mxu1 }
 0x438   : > { %v1496_v10 = vsel %vm1033_vm5, %v3686_v7, 0.0 }
 0x439   : > { %v1497_v15 = vadd.f32 %v1496_v10, %v1495_v40  ;;  %v3690_v35 = vpop.f32.mrf.mxu1 }
 0x43b   : > { %v1499_v24 = vadd.f32 %v1498_v45, %v1497_v15  ;;  %v3694_v30 = vpop.f32.mrf.mxu1  ;;  %v1506_v15 = vsel %vm1033_vm5, %v3690_v35, 0.0 }
 0x43c   : > { %v1502_v33 = vsel %vm1033_vm5, %v3694_v30, 0.0 }
 0x43d   : > { %v1501_v61 = vadd.f32 %v1500_v11, %v1499_v24  ;;  %v3698_v44 = vpop.f32.mrf.mxu1 }
 0x43e   : > { %v1508_v24 = vsel %vm1033_vm5, %v3698_v44, 0.0 }
 0x43f   : > { %v1503_v14 = vadd.f32 %v1502_v33, %v1501_v61  ;;  %v3702_v53 = vpop.f32.mrf.mxu1 }
 0x440   : > { %v1504_v40 = vsel %vm1033_vm5, %v3702_v53, 0.0 }
 0x441   : > { %v1505_v10 = vadd.f32 %v1504_v40, %v1503_v14  ;;  %v3706_v42 = vpop.f32.mrf.mxu1 }
 0x443   : > { %v1507_v45 = vadd.f32 %v1506_v15, %v1505_v10  ;;  %v3710_v17 = vpop.f32.mrf.mxu1  ;;  %v1514_v10 = vsel %vm1033_vm5, %v3706_v42, 0.0 }
 0x444   : > { %v1510_v61 = vsel %vm1033_vm5, %v3710_v17, 0.0 }
 0x445   : > { %v1509_v11 = vadd.f32 %v1508_v24, %v1507_v45  ;;  %v3714_v26 = vpop.f32.mrf.mxu1 }
 0x446   : > { %v1516_v9 = vsel %vm1033_vm5, %v3714_v26, 0.0 }
 0x447   : > { %v1511_v33 = vadd.f32 %v1510_v61, %v1509_v11  ;;  %v3718_v48 = vpop.f32.mrf.mxu1 }
 0x448   : > { %v1512_v14 = vsel %vm1033_vm5, %v3718_v48, 0.0 }
 0x449   : > { %v1513_v40 = vadd.f32 %v1512_v14, %v1511_v33 }
 0x44b   : > { %v1515_v15 = vadd.f32 %v1514_v10, %v1513_v40 }
 0x44d   : > { %v1517_v45 = vadd.f32 %v1516_v9, %v1515_v15 }
 0x44f   : > { %v1518_v24 = vrot.slane %v1517_v45, 4 }
 0x451   : > { %v1519_v1 = vadd.f32 %v1518_v24, %v1517_v45 }
 0x453   : > { %v1520_v58 = vrot.slane %v1519_v1, 2 }
 0x455   : > { %v1521_v52 = vadd.f32 %v1520_v58, %v1519_v1 }
 0x457   : > { %v1522_v25 = vrot.slane %v1521_v52, 1 }
 0x459   : > { %v1523_v11 = vadd.f32 %v1522_v25, %v1521_v52 }
 0x45b   : > { %v1525_v61 = vmul.f32 0.00390625, %v1523_v11 }
 0x45d   : > { %1527 = vrot.lane.b32.xlu0 %v1525_v61, %s2924_s30 }
 0x4cf   : > { %v3726_v20 = vpop.permute.xlu0 %1527 }
 0x4d0   : > { %v1531_v33 = vmul.f32 %v3726_v20, %v3604_v41  ;;  %v1530_v14 = vmul.f32 %v3726_v20, %v3600_v36  ;;  %v1533_v58 = vmul.f32 %v3602_v37, %v3726_v20  ;;  %v1532_v25 = vmul.f32 %v3598_v38, %v3726_v20 }
 0x4d1   : > { %v1535_v52 = vmul.f32 %v3726_v20, %v3622_v2  ;;  %v1534_v1 = vmul.f32 %v3726_v20, %v3614_v8  ;;  %v1537_v9 = vmul.f32 %v3618_v49, %v3726_v20  ;;  %v1536_v38 = vmul.f32 %v3610_v23, %v3726_v20 }
 0x4d2   : > { %1596 = vrot.lane.b32.xlu0 %v1531_v33, %s2925_s6  ;;  %1594 = vrot.lane.b32.xlu1 %v1530_v14, %s2925_s6  ;;  %v1539_v36 = vmul.f32 %v3726_v20, %v3638_v54  ;;  %v1538_v37 = vmul.f32 %v3726_v20, %v3630_v55  ;;  %v1541_v41 = vmul.f32 %v3634_v6, %v3726_v20 }
 0x4d3   : > { %v1540_v23 = vmul.f32 %v3626_v28, %v3726_v20  ;;  %v1543_v8 = vmul.f32 %v3726_v20, %v3654_v57  ;;  %v1542_v49 = vmul.f32 %v3726_v20, %v3646_v13  ;;  %v1545_v2 = vmul.f32 %v3650_v22, %v3726_v20 }
 0x4d4   : > { %v1544_v28 = vmul.f32 %v3642_v18, %v3726_v20  ;;  %v1547_v55 = vmul.f32 %v3726_v20, %v3670_v47  ;;  %v1546_v6 = vmul.f32 %v3726_v20, %v3662_v62  ;;  %v1549_v54 = vmul.f32 %v3666_v19, %v3726_v20 }
 0x4d5   : > { %v1548_v18 = vmul.f32 %v3658_v63, %v3726_v20  ;;  %v1551_v13 = vmul.f32 %v3726_v20, %v3686_v7  ;;  %v1550_v22 = vmul.f32 %v3726_v20, %v3678_v46  ;;  %v1553_v57 = vmul.f32 %v3682_v51, %v3726_v20 }
 0x4d6   : > { %1600 = vrot.lane.b32.xlu0 %v1533_v58, %s2925_s6  ;;  %1598 = vrot.lane.b32.xlu1 %v1532_v25, %s2925_s6  ;;  %v1552_v63 = vmul.f32 %v3674_v16, %v3726_v20  ;;  %v1555_v7 = vmul.f32 %v3726_v20, %v3702_v53  ;;  %v1554_v62 = vmul.f32 %v3726_v20, %v3694_v30 }
 0x4d7   : > { %v1557_v19 = vmul.f32 %v3698_v44, %v3726_v20  ;;  %v1556_v47 = vmul.f32 %v3690_v35, %v3726_v20  ;;  %v1559_v53 = vmul.f32 %v3726_v20, %v3718_v48  ;;  %v1558_v30 = vmul.f32 %v3726_v20, %v3710_v17 }
 0x4d8   : > { %v1561_v44 = vmul.f32 %v3714_v26, %v3726_v20  ;;  %v1560_v35 = vmul.f32 %v3706_v42, %v3726_v20 }
 0x4da   : > { %1604 = vrot.lane.b32.xlu0 %v1535_v52, %s2925_s6  ;;  %1602 = vrot.lane.b32.xlu1 %v1534_v1, %s2925_s6 }
 0x4de   : > { %1608 = vrot.lane.b32.xlu0 %v1537_v9, %s2925_s6  ;;  %1606 = vrot.lane.b32.xlu1 %v1536_v38, %s2925_s6 }
 0x4e2   : > { %1612 = vrot.lane.b32.xlu0 %v1539_v36, %s2925_s6  ;;  %1610 = vrot.lane.b32.xlu1 %v1538_v37, %s2925_s6 }
 0x4e6   : > { %1616 = vrot.lane.b32.xlu0 %v1541_v41, %s2925_s6  ;;  %1614 = vrot.lane.b32.xlu1 %v1540_v23, %s2925_s6 }
 0x4ea   : > { %1620 = vrot.lane.b32.xlu0 %v1543_v8, %s2925_s6  ;;  %1618 = vrot.lane.b32.xlu1 %v1542_v49, %s2925_s6 }
 0x4ee   : > { %1624 = vrot.lane.b32.xlu0 %v1545_v2, %s2925_s6  ;;  %1622 = vrot.lane.b32.xlu1 %v1544_v28, %s2925_s6 }
 0x4f2   : > { %1628 = vrot.lane.b32.xlu0 %v1547_v55, %s2925_s6  ;;  %1626 = vrot.lane.b32.xlu1 %v1546_v6, %s2925_s6 }
 0x4f6   : > { %1632 = vrot.lane.b32.xlu0 %v1549_v54, %s2925_s6  ;;  %1630 = vrot.lane.b32.xlu1 %v1548_v18, %s2925_s6 }
 0x4fa   : > { %1636 = vrot.lane.b32.xlu0 %v1551_v13, %s2925_s6  ;;  %1634 = vrot.lane.b32.xlu1 %v1550_v22, %s2925_s6 }
 0x4fe   : > { %1640 = vrot.lane.b32.xlu0 %v1553_v57, %s2925_s6  ;;  %1638 = vrot.lane.b32.xlu1 %v1552_v63, %s2925_s6 }
 0x502   : > { %1644 = vrot.lane.b32.xlu0 %v1555_v7, %s2925_s6  ;;  %1642 = vrot.lane.b32.xlu1 %v1554_v62, %s2925_s6 }
 0x506   : > { %1648 = vrot.lane.b32.xlu0 %v1557_v19, %s2925_s6  ;;  %1646 = vrot.lane.b32.xlu1 %v1556_v47, %s2925_s6 }
 0x50a   : > { %1652 = vrot.lane.b32.xlu0 %v1559_v53, %s2925_s6  ;;  %1650 = vrot.lane.b32.xlu1 %v1558_v30, %s2925_s6 }
 0x50e   : > { %1656 = vrot.lane.b32.xlu0 %v1561_v44, %s2925_s6  ;;  %1654 = vrot.lane.b32.xlu1 %v1560_v35, %s2925_s6 }
 0x544   : > { %v1597_v16 = vpop.permute.xlu0 %1596  ;;  %v1595_v46 = vpop.permute.xlu1 %1594 }
 0x545   : > { %v1693_v48 = vsel %vm1033_vm5, %v1597_v16, 0.0  ;;  %v1690_v17 = vsel %vm1033_vm5, %v1595_v46, 0.0 }
 0x546   : > { %1694 = vadd.xlane.f32.xlu0 %v1693_v48  ;;  %1691 = vadd.xlane.f32.xlu1 %v1690_v17 }
 0x548   : > { %v1601_v51 = vpop.permute.xlu0 %1600  ;;  %v1599_v40 = vpop.permute.xlu1 %1598 }
 0x549   : > { %v1699_v10 = vsel %vm1033_vm5, %v1601_v51, 0.0  ;;  %v1696_v26 = vsel %vm1033_vm5, %v1599_v40, 0.0 }
 0x54a   : > { %1700 = vadd.xlane.f32.xlu1 %v1699_v10  ;;  %1697 = vadd.xlane.f32.xlu0 %v1696_v26 }
 0x54c   : > { %v1605_v20 = vpop.permute.xlu0 %1604  ;;  %v1603_v42 = vpop.permute.xlu1 %1602 }
 0x54d   : > { %v1705_v15 = vsel %vm1033_vm5, %v1605_v20, 0.0  ;;  %v1702_v45 = vsel %vm1033_vm5, %v1603_v42, 0.0 }
 0x54e   : > { %1706 = vadd.xlane.f32.xlu1 %v1705_v15  ;;  %1703 = vadd.xlane.f32.xlu0 %v1702_v45 }
 0x550   : > { %v1609_v24 = vpop.permute.xlu0 %1608  ;;  %v1607_v11 = vpop.permute.xlu1 %1606 }
 0x551   : > { %v1711_v61 = vsel %vm1033_vm5, %v1609_v24, 0.0  ;;  %v1708_v33 = vsel %vm1033_vm5, %v1607_v11, 0.0 }
 0x552   : > { %1712 = vadd.xlane.f32.xlu1 %v1711_v61  ;;  %1709 = vadd.xlane.f32.xlu0 %v1708_v33 }
 0x554   : > { %v1613_v14 = vpop.permute.xlu0 %1612  ;;  %v1611_v58 = vpop.permute.xlu1 %1610 }
 0x555   : > { %v1717_v25 = vsel %vm1033_vm5, %v1613_v14, 0.0  ;;  %v1714_v52 = vsel %vm1033_vm5, %v1611_v58, 0.0 }
 0x556   : > { %1718 = vadd.xlane.f32.xlu1 %v1717_v25  ;;  %1715 = vadd.xlane.f32.xlu0 %v1714_v52 }
 0x558   : > { %v1617_v1 = vpop.permute.xlu0 %1616  ;;  %v1615_v9 = vpop.permute.xlu1 %1614 }
 0x559   : > { %v1723_v38 = vsel %vm1033_vm5, %v1617_v1, 0.0  ;;  %v1720_v36 = vsel %vm1033_vm5, %v1615_v9, 0.0 }
 0x55a   : > { %1724 = vadd.xlane.f32.xlu1 %v1723_v38  ;;  %1721 = vadd.xlane.f32.xlu0 %v1720_v36 }
 0x55c   : > { %v1621_v37 = vpop.permute.xlu0 %1620  ;;  %v1619_v41 = vpop.permute.xlu1 %1618 }
 0x55d   : > { %v1729_v23 = vsel %vm1033_vm5, %v1621_v37, 0.0  ;;  %v1726_v8 = vsel %vm1033_vm5, %v1619_v41, 0.0 }
 0x55e   : > { %1730 = vadd.xlane.f32.xlu1 %v1729_v23  ;;  %1727 = vadd.xlane.f32.xlu0 %v1726_v8 }
 0x560   : > { %v1625_v49 = vpop.permute.xlu0 %1624  ;;  %v1623_v2 = vpop.permute.xlu1 %1622 }
 0x561   : > { %v1735_v28 = vsel %vm1033_vm5, %v1625_v49, 0.0  ;;  %v1732_v55 = vsel %vm1033_vm5, %v1623_v2, 0.0 }
 0x562   : > { %1736 = vadd.xlane.f32.xlu1 %v1735_v28  ;;  %1733 = vadd.xlane.f32.xlu0 %v1732_v55 }
 0x564   : > { %v1629_v6 = vpop.permute.xlu0 %1628  ;;  %v1627_v54 = vpop.permute.xlu1 %1626 }
 0x565   : > { %v1741_v18 = vsel %vm1033_vm5, %v1629_v6, 0.0  ;;  %v1738_v13 = vsel %vm1033_vm5, %v1627_v54, 0.0 }
 0x566   : > { %1742 = vadd.xlane.f32.xlu1 %v1741_v18  ;;  %1739 = vadd.xlane.f32.xlu0 %v1738_v13 }
 0x568   : > { %v1633_v22 = vpop.permute.xlu0 %1632  ;;  %v1631_v57 = vpop.permute.xlu1 %1630 }
 0x569   : > { %v1747_v63 = vsel %vm1033_vm5, %v1633_v22, 0.0  ;;  %v1744_v7 = vsel %vm1033_vm5, %v1631_v57, 0.0 }
 0x56a   : > { %1748 = vadd.xlane.f32.xlu1 %v1747_v63  ;;  %1745 = vadd.xlane.f32.xlu0 %v1744_v7 }
 0x56c   : > { %v1637_v62 = vpop.permute.xlu0 %1636  ;;  %v1635_v19 = vpop.permute.xlu1 %1634 }
 0x56d   : > { %v1753_v47 = vsel %vm1033_vm5, %v1637_v62, 0.0  ;;  %v1750_v53 = vsel %vm1033_vm5, %v1635_v19, 0.0 }
 0x56e   : > { %1754 = vadd.xlane.f32.xlu1 %v1753_v47  ;;  %1751 = vadd.xlane.f32.xlu0 %v1750_v53 }
 0x570   : > { %v1641_v30 = vpop.permute.xlu0 %1640  ;;  %v1639_v44 = vpop.permute.xlu1 %1638 }
 0x571   : > { %v1759_v35 = vsel %vm1033_vm5, %v1641_v30, 0.0  ;;  %v1756_v16 = vsel %vm1033_vm5, %v1639_v44, 0.0 }
 0x572   : > { %1760 = vadd.xlane.f32.xlu1 %v1759_v35  ;;  %1757 = vadd.xlane.f32.xlu0 %v1756_v16 }
 0x574   : > { %v1645_v46 = vpop.permute.xlu0 %1644  ;;  %v1643_v48 = vpop.permute.xlu1 %1642 }
 0x575   : > { %v1765_v17 = vsel %vm1033_vm5, %v1645_v46, 0.0  ;;  %v1762_v51 = vsel %vm1033_vm5, %v1643_v48, 0.0 }
 0x576   : > { %1766 = vadd.xlane.f32.xlu1 %v1765_v17  ;;  %1763 = vadd.xlane.f32.xlu0 %v1762_v51 }
 0x578   : > { %v1649_v40 = vpop.permute.xlu0 %1648  ;;  %v1647_v10 = vpop.permute.xlu1 %1646 }
 0x579   : > { %v1771_v26 = vsel %vm1033_vm5, %v1649_v40, 0.0  ;;  %v1768_v20 = vsel %vm1033_vm5, %v1647_v10, 0.0 }
 0x57a   : > { %1772 = vadd.xlane.f32.xlu1 %v1771_v26  ;;  %1769 = vadd.xlane.f32.xlu0 %v1768_v20 }
 0x57c   : > { %v1653_v42 = vpop.permute.xlu0 %1652  ;;  %v1651_v15 = vpop.permute.xlu1 %1650 }
 0x57d   : > { %v1777_v45 = vsel %vm1033_vm5, %v1653_v42, 0.0  ;;  %v1774_v24 = vsel %vm1033_vm5, %v1651_v15, 0.0 }
 0x57e   : > { %1778 = vadd.xlane.f32.xlu1 %v1777_v45  ;;  %1775 = vadd.xlane.f32.xlu0 %v1774_v24 }
 0x580   : > { %v1657_v11 = vpop.permute.xlu0 %1656  ;;  %v1655_v61 = vpop.permute.xlu1 %1654 }
 0x581   : > { %v1783_v33 = vsel %vm1033_vm5, %v1657_v11, 0.0  ;;  %v1780_v14 = vsel %vm1033_vm5, %v1655_v61, 0.0 }
 0x582   : > { %1784 = vadd.xlane.f32.xlu1 %v1783_v33  ;;  %1781 = vadd.xlane.f32.xlu0 %v1780_v14 }
 0x5cf   : > { %v3856_v58 = vpop.xlane.xlu0 %1694  ;;  %v3858_v25 = vpop.xlane.xlu1 %1691 }
 0x5d3   : > { %v3860_v52 = vpop.xlane.xlu0 %1697  ;;  %v3862_v1 = vpop.xlane.xlu1 %1700 }
 0x5d7   : > { %v3864_v9 = vpop.xlane.xlu0 %1703  ;;  %v3866_v38 = vpop.xlane.xlu1 %1706 }
 0x5d8   : > { %v1786_v19 = vmax.f32 %v3858_v25, %v3864_v9  ;;  %v1787_v47 = vmax.f32 %v3856_v58, %v3866_v38 }
 0x5db   : > { %v3868_v36 = vpop.xlane.xlu0 %1709  ;;  %v3870_v37 = vpop.xlane.xlu1 %1712 }
 0x5dc   : > { %v1788_v44 = vmax.f32 %v3860_v52, %v3868_v36  ;;  %v1789_v35 = vmax.f32 %v3862_v1, %v3870_v37 }
 0x5df   : > { %v3872_v41 = vpop.xlane.xlu0 %1715  ;;  %v3874_v23 = vpop.xlane.xlu1 %1718 }
 0x5e0   : > { %v1790_v16 = vmax.f32 %v1786_v19, %v3872_v41  ;;  %v1791_v46 = vmax.f32 %v1787_v47, %v3874_v23 }
 0x5e3   : > { %v3876_v8 = vpop.xlane.xlu0 %1721  ;;  %v3878_v49 = vpop.xlane.xlu1 %1724 }
 0x5e4   : > { %v1792_v48 = vmax.f32 %v1788_v44, %v3876_v8  ;;  %v1793_v17 = vmax.f32 %v1789_v35, %v3878_v49 }
 0x5e7   : > { %v3880_v2 = vpop.xlane.xlu0 %1727  ;;  %v3882_v28 = vpop.xlane.xlu1 %1730 }
 0x5e8   : > { %v1794_v51 = vmax.f32 %v1790_v16, %v3880_v2  ;;  %v1795_v40 = vmax.f32 %v1791_v46, %v3882_v28 }
 0x5eb   : > { %v3884_v55 = vpop.xlane.xlu0 %1733  ;;  %v3886_v6 = vpop.xlane.xlu1 %1736 }
 0x5ec   : > { %v1796_v20 = vmax.f32 %v1792_v48, %v3884_v55  ;;  %v1797_v42 = vmax.f32 %v1793_v17, %v3886_v6 }
 0x5ef   : > { %v3888_v54 = vpop.xlane.xlu0 %1739  ;;  %v3890_v18 = vpop.xlane.xlu1 %1742 }
 0x5f0   : > { %v1798_v15 = vmax.f32 %v1794_v51, %v3888_v54  ;;  %v1799_v45 = vmax.f32 %v1795_v40, %v3890_v18 }
 0x5f3   : > { %v3892_v13 = vpop.xlane.xlu0 %1745  ;;  %v3894_v22 = vpop.xlane.xlu1 %1748 }
 0x5f4   : > { %v1800_v24 = vmax.f32 %v1796_v20, %v3892_v13  ;;  %v1801_v11 = vmax.f32 %v1797_v42, %v3894_v22 }
 0x5f7   : > { %v3896_v57 = vpop.xlane.xlu0 %1751  ;;  %v3898_v63 = vpop.xlane.xlu1 %1754 }
 0x5f8   : > { %v1802_v61 = vmax.f32 %v1798_v15, %v3896_v57  ;;  %v1803_v33 = vmax.f32 %v1799_v45, %v3898_v63 }
 0x5fb   : > { %v3900_v7 = vpop.xlane.xlu0 %1757  ;;  %v3902_v62 = vpop.xlane.xlu1 %1760 }
 0x5fc   : > { %v1804_v47 = vmax.f32 %v1800_v24, %v3900_v7  ;;  %v1805_v44 = vmax.f32 %v1801_v11, %v3902_v62 }
 0x5ff   : > { %v3908_v53 = vpop.xlane.xlu0 %1763  ;;  %v3910_v30 = vpop.xlane.xlu1 %1766 }
 0x600   : > { %v1806_v35 = vmax.f32 %v1802_v61, %v3908_v53  ;;  %v1807_v16 = vmax.f32 %v1803_v33, %v3910_v30 }
 0x603   : > { %v3922_v10 = vpop.xlane.xlu0 %1769  ;;  %v3924_v26 = vpop.xlane.xlu1 %1772 }
 0x604   : > { %v1808_v46 = vmax.f32 %v1804_v47, %v3922_v10  ;;  %v1809_v48 = vmax.f32 %v1805_v44, %v3924_v26 }
 0x607   : > { %v3934_v14 = vpop.xlane.xlu0 %1775  ;;  %v3936_v19 = vpop.xlane.xlu1 %1778 }
 0x608   : > { %v1810_v17 = vmax.f32 %v1806_v35, %v3934_v14  ;;  %v1811_v51 = vmax.f32 %v1807_v16, %v3936_v19 }
 0x60a   : > { %v1814_v45 = vmax.f32 %v1810_v17, %v1811_v51 }
 0x60b   : > { %v3946_v40 = vpop.xlane.xlu0 %1781  ;;  %v3948_v20 = vpop.xlane.xlu1 %1784 }
 0x60c   : > { %v1812_v42 = vmax.f32 %v1808_v46, %v3946_v40  ;;  %v1813_v15 = vmax.f32 %v1809_v48, %v3948_v20 }
 0x60e   : > { %v1815_v24 = vmax.f32 %v1812_v42, %v1813_v15 }
 0x610   : > { %v1816_v11 = vmax.f32 %v1814_v45, %v1815_v24 }
 0x612   : > { %v1817_v61 = vrot.slane %v1816_v11, 4 }
 0x614   : > { %v1818_v33 = vmax.f32 %v1816_v11, %v1817_v61 }
 0x616   : > { %v1819_v47 = vrot.slane %v1818_v33, 2 }
 0x618   : > { %v1820_v34 = vmax.f32 %v1818_v33, %v1819_v47 }
 0x61a   : > { %v1821_v44 = vrot.slane %v1820_v34, 1 }
 0x61c   : > { %v3952_v39 = vmax.f32 %v1820_v34, %v1821_v44 }
 0x61e   : > { %v1823_v35 = vsub.f32 %v3858_v25, %v3952_v39  ;;  %v1824_v16 = vsub.f32 %v3856_v58, %v3952_v39  ;;  %v1825_v46 = vsub.f32 %v3860_v52, %v3952_v39  ;;  %v1826_v48 = vsub.f32 %v3862_v1, %v3952_v39 }
 0x61f   : > { %v1827_v42 = vsub.f32 %v3864_v9, %v3952_v39  ;;  %v1828_v34 = vsub.f32 %v3866_v38, %v3952_v39  ;;  %v1829_v58 = vsub.f32 %v3868_v36, %v3952_v39  ;;  %v1830_v1 = vsub.f32 %v3870_v37, %v3952_v39 }
 0x620   : > { %v1855_v17 = vmul.f32 1.442695, %v1823_v35  ;;  %v1857_v51 = vmul.f32 1.442695, %v1824_v16  ;;  %v1859_v15 = vmul.f32 1.442695, %v1825_v46  ;;  %v1831_v9 = vsub.f32 %v3872_v41, %v3952_v39 }
 0x621   : > { %v1861_v25 = vmul.f32 1.442695, %v1826_v48  ;;  %v1863_v52 = vmul.f32 1.442695, %v1827_v42  ;;  %v1865_v45 = vmul.f32 1.442695, %v1828_v34  ;;  %v1832_v38 = vsub.f32 %v3874_v23, %v3952_v39 }
 0x622   : > { %2703 = vpow2.f32 %v1855_v17  ;;  %v1867_v24 = vmul.f32 1.442695, %v1829_v58  ;;  %v1869_v11 = vmul.f32 1.442695, %v1830_v1  ;;  %v1833_v36 = vsub.f32 %v3876_v8, %v3952_v39 }
 0x623   : > { %2705 = vpow2.f32 %v1857_v51  ;;  %v1871_v61 = vmul.f32 1.442695, %v1831_v9  ;;  %v1834_v37 = vsub.f32 %v3878_v49, %v3952_v39  ;;  %v1873_v47 = vmul.f32 1.442695, %v1832_v38 }
 0x624   : > { %2707 = vpow2.f32 %v1859_v15  ;;  %v1835_v44 = vsub.f32 %v3880_v2, %v3952_v39  ;;  %v1875_v23 = vmul.f32 1.442695, %v1833_v36  ;;  %v1836_v16 = vsub.f32 %v3882_v28, %v3952_v39 }
 0x625   : > { %2709 = vpow2.f32 %v1861_v25  ;;  %v1877_v46 = vmul.f32 1.442695, %v1834_v37  ;;  %v1837_v17 = vsub.f32 %v3884_v55, %v3952_v39  ;;  %v1838_v15 = vsub.f32 %v3886_v6, %v3952_v39 }
 0x626   : > { %2711 = vpow2.f32 %v1863_v52  ;;  %v1879_v2 = vmul.f32 1.442695, %v1835_v44  ;;  %v1881_v28 = vmul.f32 1.442695, %v1836_v16  ;;  %v1839_v58 = vsub.f32 %v3888_v54, %v3952_v39 }
 0x627   : > { %2713 = vpow2.f32 %v1865_v45  ;;  %v1883_v55 = vmul.f32 1.442695, %v1837_v17  ;;  %v1840_v45 = vsub.f32 %v3890_v18, %v3952_v39  ;;  %v1885_v6 = vmul.f32 1.442695, %v1838_v15 }
 0x628   : > { %2715 = vpow2.f32 %v1867_v24  ;;  %v1841_v38 = vsub.f32 %v3892_v13, %v3952_v39  ;;  %v1887_v54 = vmul.f32 1.442695, %v1839_v58  ;;  %v1843_v44 = vsub.f32 %v3896_v57, %v3952_v39 }
 0x629   : > { %2717 = vpow2.f32 %v1869_v11  ;;  %v1889_v18 = vmul.f32 1.442695, %v1840_v45  ;;  %v1844_v16 = vsub.f32 %v3898_v63, %v3952_v39  ;;  %v1845_v17 = vsub.f32 %v3900_v7, %v3952_v39 }
 0x62a   : > { %2719 = vpow2.f32 %v1871_v61  ;;  %v1842_v61 = vsub.f32 %v3894_v22, %v3952_v39  ;;  %v1891_v13 = vmul.f32 1.442695, %v1841_v38  ;;  %v1895_v57 = vmul.f32 1.442695, %v1843_v44 }
 0x62b   : > { %2721 = vpow2.f32 %v1873_v47  ;;  %v1846_v15 = vsub.f32 %v3902_v62, %v3952_v39  ;;  %v1897_v63 = vmul.f32 1.442695, %v1844_v16  ;;  %v1847_v58 = vsub.f32 %v3908_v53, %v3952_v39 }
 0x62c   : > { %2723 = vpow2.f32 %v1875_v23  ;;  %v1893_v22 = vmul.f32 1.442695, %v1842_v61  ;;  %v1899_v7 = vmul.f32 1.442695, %v1845_v17  ;;  %v1848_v45 = vsub.f32 %v3910_v30, %v3952_v39 }
 0x62d   : > { %2725 = vpow2.f32 %v1877_v46  ;;  %v1901_v62 = vmul.f32 1.442695, %v1846_v15  ;;  %v1849_v38 = vsub.f32 %v3922_v10, %v3952_v39  ;;  %v1903_v53 = vmul.f32 1.442695, %v1847_v58 }
 0x62e   : > { %2727 = vpow2.f32 %v1879_v2  ;;  %v1850_v61 = vsub.f32 %v3924_v26, %v3952_v39  ;;  %v1905_v30 = vmul.f32 1.442695, %v1848_v45  ;;  %v1851_v44 = vsub.f32 %v3934_v14, %v3952_v39 }
 0x62f   : > { %v3976_v33 = vpop.eup %2703  ;;  %2729 = vpow2.f32 %v1881_v28  ;;  %v1907_v10 = vmul.f32 1.442695, %v1849_v38  ;;  %v1852_v16 = vsub.f32 %v3936_v19, %v3952_v39  ;;  %v1853_v17 = vsub.f32 %v3946_v40, %v3952_v39 }
 0x630   : > { %v3980_v41 = vpop.eup %2705  ;;  %2731 = vpow2.f32 %v1883_v55  ;;  %v1854_v14 = vsub.f32 %v3948_v20, %v3952_v39 }
 0x631   : > { %v1919_v35 = vadd.f32 %v3980_v41, %v3976_v33  ;;  %v3986_v8 = vpop.eup %2707  ;;  %2733 = vpow2.f32 %v1885_v6  ;;  %v1915_v19 = vmul.f32 1.442695, %v1853_v17 }
 0x632   : > { %v3991_v48 = vpop.eup %2709  ;;  %2735 = vpow2.f32 %v1887_v54  ;;  %v1917_v45 = vmul.f32 1.442695, %v1854_v14 }
 0x633   : > { %v1920_v49 = vadd.f32 %v3986_v8, %v1919_v35  ;;  %v3996_v42 = vpop.eup %2711  ;;  %2737 = vpow2.f32 %v1889_v18 }
 0x634   : > { %v4001_v25 = vpop.eup %2713  ;;  %2739 = vpow2.f32 %v1891_v13 }
 0x635   : > { %v1921_v51 = vadd.f32 %v3991_v48, %v1920_v49  ;;  %v4006_v1 = vpop.eup %2715  ;;  %2741 = vpow2.f32 %v1893_v22  ;;  %v1909_v22 = vmul.f32 1.442695, %v1850_v61 }
 0x636   : > { %v4011_v24 = vpop.eup %2717  ;;  %2743 = vpow2.f32 %v1895_v57  ;;  %v1911_v57 = vmul.f32 1.442695, %v1851_v44 }
 0x637   : > { %v1922_v34 = vadd.f32 %v3996_v42, %v1921_v51  ;;  %v4016_v36 = vpop.eup %2719  ;;  %2745 = vpow2.f32 %v1897_v63  ;;  %v1913_v63 = vmul.f32 1.442695, %v1852_v16 }
 0x638   : > { %v4021_v47 = vpop.eup %2721  ;;  %2747 = vpow2.f32 %v1899_v7 }
 0x639   : > { %v1923_v52 = vadd.f32 %v4001_v25, %v1922_v34  ;;  %v4026_v35 = vpop.eup %2723  ;;  %2749 = vpow2.f32 %v1901_v62 }
 0x63a   : > { %v4031_v49 = vpop.eup %2725  ;;  %2751 = vpow2.f32 %v1903_v53 }
 0x63b   : > { %v1924_v9 = vadd.f32 %v4006_v1, %v1923_v52  ;;  %v4036_v51 = vpop.eup %2727  ;;  %2753 = vpow2.f32 %v1905_v30 }
 0x63c   : > { %v4041_v34 = vpop.eup %2729  ;;  %2755 = vpow2.f32 %v1907_v10 }
 0x63d   : > { %v1925_v11 = vadd.f32 %v4011_v24, %v1924_v9  ;;  %v4046_v52 = vpop.eup %2731  ;;  %2757 = vpow2.f32 %v1909_v22 }
 0x63e   : > { %v4051_v9 = vpop.eup %2733  ;;  %2759 = vpow2.f32 %v1911_v57 }
 0x63f   : > { %v1926_v37 = vadd.f32 %v4016_v36, %v1925_v11  ;;  %v4056_v11 = vpop.eup %2735  ;;  %2761 = vpow2.f32 %v1913_v63 }
 0x640   : > { %2763 = vpow2.f32 %v1915_v19 }
 0x641   : > { %v1927_v23 = vadd.f32 %v4021_v47, %v1926_v37  ;;  %v4061_v37 = vpop.eup %2737  ;;  %2765 = vpow2.f32 %v1917_v45 }
 0x643   : > { %v1928_v46 = vadd.f32 %v4026_v35, %v1927_v23  ;;  %v2740_v23 = vpop.eup %2739 }
 0x645   : > { %v1929_v2 = vadd.f32 %v4031_v49, %v1928_v46  ;;  %v2742_v46 = vpop.eup %2741 }
 0x646   : > { %v2744_v15 = vpop.eup %2743 }
 0x647   : > { %v1930_v28 = vadd.f32 %v4036_v51, %v1929_v2  ;;  %v2746_v58 = vpop.eup %2745 }
 0x649   : > { %v1931_v55 = vadd.f32 %v4041_v34, %v1930_v28 }
 0x64b   : > { %v1932_v6 = vadd.f32 %v4046_v52, %v1931_v55  ;;  %v2748_v55 = vpop.eup %2747 }
 0x64d   : > { %v1933_v54 = vadd.f32 %v4051_v9, %v1932_v6  ;;  %v2750_v6 = vpop.eup %2749 }
 0x64e   : > { %v2752_v38 = vpop.eup %2751 }
 0x64f   : > { %v1934_v18 = vadd.f32 %v4056_v11, %v1933_v54  ;;  %v2754_v54 = vpop.eup %2753 }
 0x650   : > { %v2756_v39 = vpop.eup %2755 }
 0x651   : > { %v1935_v13 = vadd.f32 %v4061_v37, %v1934_v18  ;;  %v2758_v30 = vpop.eup %2757 }
 0x652   : > { %v2760_v44 = vpop.eup %2759 }
 0x653   : > { %v1936_v26 = vadd.f32 %v2740_v23, %v1935_v13  ;;  %v2762_v13 = vpop.eup %2761 }
 0x654   : > { %v2764_v22 = vpop.eup %2763 }
 0x655   : > { %v1937_v2 = vadd.f32 %v2742_v46, %v1936_v26  ;;  %v2766_v17 = vpop.eup %2765 }
 0x657   : > { %v1938_v28 = vadd.f32 %v2744_v15, %v1937_v2 }
 0x659   : > { %v1939_v7 = vadd.f32 %v2746_v58, %v1938_v28 }
 0x65b   : > { %v1940_v62 = vadd.f32 %v2748_v55, %v1939_v7 }
 0x65d   : > { %v1941_v40 = vadd.f32 %v2750_v6, %v1940_v62 }
 0x65f   : > { %v1942_v53 = vadd.f32 %v2752_v38, %v1941_v40 }
 0x661   : > { %v1943_v61 = vadd.f32 %v2754_v54, %v1942_v53 }
 0x663   : > { %v1944_v20 = vadd.f32 %v2756_v39, %v1943_v61 }
 0x665   : > { %v1945_v18 = vadd.f32 %v2758_v30, %v1944_v20 }
 0x667   : > { %v1946_v10 = vadd.f32 %v2760_v44, %v1945_v18 }
 0x669   : > { %v1947_v16 = vadd.f32 %v2762_v13, %v1946_v10 }
 0x66b   : > { %v1948_v26 = vadd.f32 %v2764_v22, %v1947_v16 }
 0x66d   : > { %v1949_v57 = vadd.f32 %v2766_v17, %v1948_v26 }
 0x66f   : > { %v1950_v2 = vrot.slane %v1949_v57, 4 }
 0x671   : > { %v1951_v14 = vadd.f32 %v1950_v2, %v1949_v57 }
 0x673   : > { %v1952_v63 = vrot.slane %v1951_v14, 2 }
 0x675   : > { %v1953_v28 = vadd.f32 %v1952_v63, %v1951_v14 }
 0x677   : > { %v1954_v19 = vrot.slane %v1953_v28, 1 }
 0x679   : > { %v1955_v7 = vadd.f32 %v1954_v19, %v1953_v28 }
 0x67b   : > { %2767 = vrcp.f32 %v1955_v7 }
 0x688   : > { %v2768_v45 = vpop.eup %2767 }
 0x689   : > { %v1957_v62 = vmul.f32 %v2768_v45, %v3976_v33  ;;  %v1958_v40 = vmul.f32 %v2768_v45, %v3980_v41  ;;  %v1959_v53 = vmul.f32 %v2768_v45, %v3986_v8  ;;  %v1960_v61 = vmul.f32 %v2768_v45, %v3991_v48 }
 0x68a   : > { %v1961_v20 = vmul.f32 %v2768_v45, %v3996_v42  ;;  %v1962_v18 = vmul.f32 %v2768_v45, %v4001_v25  ;;  %v1972_v10 = vmul.f32 %v2768_v45, %v4051_v9  ;;  %v1973_v16 = vmul.f32 %v2768_v45, %v4056_v11 }
 0x68b   : > { %v1974_v26 = vmul.f32 %v2768_v45, %v4061_v37  ;;  %v1975_v57 = vmul.f32 %v2768_v45, %v2740_v23  ;;  %v1976_v2 = vmul.f32 %v2768_v45, %v2742_v46  ;;  %v1977_v14 = vmul.f32 %v2768_v45, %v2744_v15 }
 0x68c   : > { %v4081_v33 = vmul.f32 %v2768_v45, %v2746_v58  ;;  %v4083_v41 = vmul.f32 %v2768_v45, %v2748_v55  ;;  %v4085_v8 = vmul.f32 %v2768_v45, %v2750_v6  ;;  %v4087_v48 = vmul.f32 %v2768_v45, %v2752_v38 }
 0x68d   : > { %v4089_v42 = vmul.f32 %v2768_v45, %v2754_v54  ;;  %v4091_v25 = vmul.f32 %v2768_v45, %v2756_v39  ;;  %v4093_v9 = vmul.f32 %v2768_v45, %v2758_v30  ;;  %v4095_v11 = vmul.f32 %v2768_v45, %v2760_v44 }
 0x68e   : > { %v4097_v37 = vmul.f32 %v2768_v45, %v2762_v13  ;;  %v4099_v23 = vmul.f32 %v2768_v45, %v2764_v22  ;;  %v4101_v46 = vmul.f32 %v2768_v45, %v2766_v17  ;;  %v1963_v15 = vmul.f32 %v2768_v45, %v4006_v1 }
 0x68f   : > { %v2437_v58 = vmul.f32 -1.442695, %v1957_v62  ;;  %v2438_v55 = vmul.f32 -1.442695, %v1958_v40  ;;  %v2439_v6 = vmul.f32 -1.442695, %v1959_v53  ;;  %v1964_v38 = vmul.f32 %v2768_v45, %v4011_v24 }
 0x690   : > { %v2440_v54 = vmul.f32 -1.442695, %v1960_v61  ;;  %v1965_v39 = vmul.f32 %v2768_v45, %v4016_v36  ;;  %v2441_v30 = vmul.f32 -1.442695, %v1961_v20  ;;  %v1966_v44 = vmul.f32 %v2768_v45, %v4021_v47 }
 0x691   : > { %2769 = vpow2.f32 %v2437_v58  ;;  %v2442_v13 = vmul.f32 -1.442695, %v1962_v18  ;;  %v1967_v22 = vmul.f32 %v2768_v45, %v4026_v35  ;;  %v2443_v17 = vmul.f32 -1.442695, %v1963_v15 }
 0x692   : > { %2771 = vpow2.f32 %v2438_v55  ;;  %v1968_v1 = vmul.f32 %v2768_v45, %v4031_v49  ;;  %v2444_v63 = vmul.f32 -1.442695, %v1964_v38  ;;  %v1969_v28 = vmul.f32 %v2768_v45, %v4036_v51 }
 0x693   : > { %2773 = vpow2.f32 %v2439_v6  ;;  %v2445_v24 = vmul.f32 -1.442695, %v1965_v39  ;;  %v1970_v36 = vmul.f32 %v2768_v45, %v4041_v34  ;;  %v2446_v19 = vmul.f32 -1.442695, %v1966_v44 }
 0x694   : > { %2775 = vpow2.f32 %v2440_v54  ;;  %v1971_v47 = vmul.f32 %v2768_v45, %v4046_v52  ;;  %v2447_v7 = vmul.f32 -1.442695, %v1967_v22  ;;  %v2448_v35 = vmul.f32 -1.442695, %v1968_v1 }
 0x695   : > { %2777 = vpow2.f32 %v2441_v30  ;;  %v2449_v62 = vmul.f32 -1.442695, %v1969_v28  ;;  %v2450_v49 = vmul.f32 -1.442695, %v1970_v36  ;;  %v2452_v51 = vmul.f32 -1.442695, %v1972_v10 }
 0x696   : > { %2779 = vpow2.f32 %v2442_v13  ;;  %v2451_v40 = vmul.f32 -1.442695, %v1971_v47  ;;  %v2453_v53 = vmul.f32 -1.442695, %v1973_v16  ;;  %v2454_v34 = vmul.f32 -1.442695, %v1974_v26 }
 0x697   : > { %2781 = vpow2.f32 %v2443_v17  ;;  %v2455_v52 = vmul.f32 -1.442695, %v1975_v57  ;;  %v2456_v18 = vmul.f32 -1.442695, %v1976_v2  ;;  %v2457_v58 = vmul.f32 -1.442695, %v1977_v14 }
 0x698   : > { %2783 = vpow2.f32 %v2444_v63  ;;  %v2458_v6 = vmul.f32 -1.442695, %v4081_v33  ;;  %v2459_v10 = vmul.f32 -1.442695, %v4083_v41  ;;  %v2460_v26 = vmul.f32 -1.442695, %v4085_v8 }
 0x699   : > { %2785 = vpow2.f32 %v2445_v24  ;;  %v2461_v57 = vmul.f32 -1.442695, %v4087_v48  ;;  %v2462_v14 = vmul.f32 -1.442695, %v4089_v42  ;;  %v2463_v33 = vmul.f32 -1.442695, %v4091_v25 }
 0x69a   : > { %2787 = vpow2.f32 %v2446_v19  ;;  %v2464_v41 = vmul.f32 -1.442695, %v4093_v9  ;;  %v2465_v8 = vmul.f32 -1.442695, %v4095_v11  ;;  %v2466_v48 = vmul.f32 -1.442695, %v4097_v37 }
 0x69b   : > { %2789 = vpow2.f32 %v2447_v7  ;;  %v2467_v42 = vmul.f32 -1.442695, %v4099_v23  ;;  %v2468_v25 = vmul.f32 -1.442695, %v4101_v46 }
 0x69c   : > { %2791 = vpow2.f32 %v2448_v35 }
 0x69d   : > { %2793 = vpow2.f32 %v2449_v62 }
 0x69e   : > { %v2770_v61 = vpop.eup %2769  ;;  %2795 = vpow2.f32 %v2450_v49 }
 0x69f   : > { %v2772_v20 = vpop.eup %2771  ;;  %2797 = vpow2.f32 %v2451_v40  ;;  %v2085_v63 = vadd.f32 1.0, %v2770_v61 }
 0x6a0   : > { %v2774_v45 = vpop.eup %2773  ;;  %2799 = vpow2.f32 %v2452_v51  ;;  %v2086_v28 = vadd.f32 1.0, %v2772_v20 }
 0x6a1   : > { %v2776_v15 = vpop.eup %2775  ;;  %2801 = vpow2.f32 %v2453_v53  ;;  %v2087_v11 = vadd.f32 1.0, %v2774_v45 }
 0x6a2   : > { %v2778_v55 = vpop.eup %2777  ;;  %2803 = vpow2.f32 %v2454_v34  ;;  %v2088_v37 = vadd.f32 1.0, %v2776_v15 }
 0x6a3   : > { %v2780_v38 = vpop.eup %2779  ;;  %2805 = vpow2.f32 %v2455_v52  ;;  %v2089_v47 = vadd.f32 1.0, %v2778_v55 }
 0x6a4   : > { %v2782_v16 = vpop.eup %2781  ;;  %2807 = vpow2.f32 %v2456_v18  ;;  %v2090_v7 = vadd.f32 1.0, %v2780_v38 }
 0x6a5   : > { %v2784_v54 = vpop.eup %2783  ;;  %2809 = vpow2.f32 %v2457_v58  ;;  %v2091_v46 = vadd.f32 1.0, %v2782_v16 }
 0x6a6   : > { %v2786_v2 = vpop.eup %2785  ;;  %2811 = vpow2.f32 %v2458_v6  ;;  %v2092_v49 = vadd.f32 1.0, %v2784_v54 }
 0x6a7   : > { %v2788_v39 = vpop.eup %2787  ;;  %2813 = vpow2.f32 %v2459_v10  ;;  %v2093_v51 = vadd.f32 1.0, %v2786_v2  ;;  %v2213_v2 = vld [vmem:[%s4143_s10] sm:$0xff] }
 0x6a8   : > { %v2790_v30 = vpop.eup %2789  ;;  %2815 = vpow2.f32 %v2460_v26  ;;  %v2094_v61 = vadd.f32 1.0, %v2788_v39 }
 0x6a9   : > { %v2792_v44 = vpop.eup %2791  ;;  %2817 = vpow2.f32 %v2461_v57  ;;  %v2095_v20 = vadd.f32 1.0, %v2790_v30 }
 0x6aa   : > { %v2794_v13 = vpop.eup %2793  ;;  %2819 = vpow2.f32 %v2462_v14  ;;  %v2096_v45 = vadd.f32 1.0, %v2792_v44 }
 0x6ab   : > { %v2796_v22 = vpop.eup %2795  ;;  %2821 = vpow2.f32 %v2463_v33  ;;  %v2097_v15 = vadd.f32 1.0, %v2794_v13  ;;  %v2214_v33 = vld [vmem:[%s4143_s10 + $0x8] sm:$0xff] }
 0x6ac   : > { %v2798_v17 = vpop.eup %2797  ;;  %2823 = vpow2.f32 %v2464_v41  ;;  %v2098_v55 = vadd.f32 1.0, %v2796_v22 }
 0x6ad   : > { %v2800_v1 = vpop.eup %2799  ;;  %2825 = vpow2.f32 %v2465_v8  ;;  %v2099_v38 = vadd.f32 1.0, %v2798_v17  ;;  %v2215_v8 = vld [vmem:[%s4143_s10 + $0x10] sm:$0xff] }
 0x6ae   : > { %v2802_v9 = vpop.eup %2801  ;;  %2827 = vpow2.f32 %v2466_v48  ;;  %v2100_v16 = vadd.f32 1.0, %v2800_v1 }
 0x6af   : > { %v2804_v24 = vpop.eup %2803  ;;  %2829 = vpow2.f32 %v2467_v42  ;;  %v2101_v54 = vadd.f32 1.0, %v2802_v9  ;;  %v2216_v42 = vld [vmem:[%s4143_s10 + $0x18] sm:$0xff] }
 0x6b0   : > { %v2806_v36 = vpop.eup %2805  ;;  %2831 = vpow2.f32 %v2468_v25  ;;  %v2102_v14 = vadd.f32 1.0, %v2804_v24 }
 0x6b1   : > { %v2808_v19 = vpop.eup %2807  ;;  %2833 = vrcp.f32 %v2085_v63  ;;  %v2103_v30 = vadd.f32 1.0, %v2806_v36  ;;  %v2217_v63 = vld [vmem:[%s4143_s10 + $0x20] sm:$0xff] }
 0x6b2   : > { %v2810_v23 = vpop.eup %2809  ;;  %2835 = vrcp.f32 %v2086_v28  ;;  %v2104_v13 = vadd.f32 1.0, %v2808_v19 }
 0x6b3   : > { %v2812_v35 = vpop.eup %2811  ;;  %2837 = vrcp.f32 %v2087_v11  ;;  %v2105_v17 = vadd.f32 1.0, %v2810_v23 }
 0x6b4   : > { %v2814_v62 = vpop.eup %2813  ;;  %2839 = vrcp.f32 %v2088_v37  ;;  %v2106_v9 = vadd.f32 1.0, %v2812_v35 }
 0x6b5   : > { %v4123_v40 = vpop.eup %2815  ;;  %2841 = vrcp.f32 %v2089_v47  ;;  %v2107_v36 = vadd.f32 1.0, %v2814_v62  ;;  %v2219_v47 = vld [vmem:[%s4143_s10 + $0x30] sm:$0xff] }
 0x6b6   : > { %v4125_v53 = vpop.eup %2817  ;;  %2843 = vrcp.f32 %v2090_v7  ;;  %v2108_v23 = vadd.f32 1.0, %v4123_v40 }
 0x6b7   : > { %v4127_v34 = vpop.eup %2819  ;;  %2845 = vrcp.f32 %v2091_v46  ;;  %v2220_v46 = vld [vmem:[%s4143_s10 + $0x38] sm:$0xff] }
 0x6b8   : > { %v4129_v52 = vpop.eup %2821  ;;  %2847 = vrcp.f32 %v2092_v49 }
 0x6b9   : > { %v4132_v18 = vpop.eup %2823  ;;  %2849 = vrcp.f32 %v2093_v51  ;;  %v2221_v51 = vld [vmem:[%s4143_s10 + $0x40] sm:$0xff] }
 0x6ba   : > { %v4134_v58 = vpop.eup %2825  ;;  %2851 = vrcp.f32 %v2094_v61 }
 0x6bb   : > { %v4136_v6 = vpop.eup %2827  ;;  %2853 = vrcp.f32 %v2095_v20 }
 0x6bc   : > { %v4145_v10 = vpop.eup %2829  ;;  %2855 = vrcp.f32 %v2096_v45  ;;  %v2222_v45 = vld [vmem:[%s4143_s10 + $0x48] sm:$0xff] }
 0x6bd   : > { %v4147_v26 = vpop.eup %2831  ;;  %2857 = vrcp.f32 %v2097_v15 }
 0x6be   : > { %v2834_v57 = vpop.eup %2833  ;;  %2859 = vrcp.f32 %v2098_v55 }
 0x6bf   : > { %v2836_v39 = vpop.eup %2835  ;;  %2861 = vrcp.f32 %v2099_v38  ;;  %v2181_v41 = vmul.f32 %v2834_v57, %v3442_v27  ;;  %v2223_v38 = vld [vmem:[%s4143_s10 + $0x50] sm:$0xff]  ;;  %v2224_v57 = vld [vmem:[%s4143_s10 + $0x58] sm:$0xff] }
 0x6c0   : > { %v2838_v44 = vpop.eup %2837  ;;  %2863 = vrcp.f32 %v2100_v16  ;;  %v2182_v48 = vmul.f32 %v2836_v39, %v3445_v56  ;;  %v2218_v56 = vld [vmem:[%s4143_s10 + $0x28] sm:$0xff]  ;;  %v2225_v39 = vld [vmem:[%s4143_s10 + $0x60] sm:$0xff] }
 0x6c1   : > { %v2840_v22 = vpop.eup %2839  ;;  %2865 = vrcp.f32 %v2101_v54  ;;  %v2183_v27 = vmul.f32 %v2838_v44, %v3448_v3  ;;  %v2245_v25 = vadd.f32 %v2213_v2, %v2181_v41  ;;  %v2226_v41 = vld [vmem:[%s4143_s10 + $0x68] sm:$0xff] }
 0x6c2   : > { %v2842_v1 = vpop.eup %2841  ;;  %2867 = vrcp.f32 %v2102_v14  ;;  %v2184_v28 = vmul.f32 %v2840_v22, %v3451_v29  ;;  %v2246_v24 = vadd.f32 %v2214_v33, %v2182_v48 }
 0x6c3   : > { %v2844_v11 = vpop.eup %2843  ;;  %2869 = vrcp.f32 %v2103_v30  ;;  %v2185_v37 = vmul.f32 %v2842_v1, %v3454_v43  ;;  %v2247_v19 = vadd.f32 %v2215_v8, %v2183_v27  ;;  %2277 = vst.msk [vmem:[%s4157_s13] sm:$0xff] %vm359_vm1, %v2245_v25  ;;  %v2109_v43 = vadd.f32 1.0, %v4125_v53  ;;  %v4381_v25 = vld [vmem:[#allocation4_spill] sm:$0xff] }
 0x6c4   : > { %v2846_v3 = vpop.eup %2845  ;;  %2871 = vrcp.f32 %v2104_v13  ;;  %v2186_v29 = vmul.f32 %v2844_v11, %v3457_v59  ;;  %v2248_v7 = vadd.f32 %v2216_v42, %v2184_v28  ;;  %2278 = vst.msk [vmem:[%s4157_s13 + $0x8] sm:$0xff] %vm359_vm1, %v2246_v24  ;;  %v2110_v59 = vadd.f32 1.0, %v4127_v34  ;;  %v2227_v13 = vld [vmem:[%s4143_s10 + $0x70] sm:$0xff]  ;;  %v2228_v42 = vld [vmem:[%s4143_s10 + $0x78] sm:$0xff]  ;;  %v4382_v28 = vld [vmem:[#allocation2_spill] sm:$0xff] }
 0x6c5   : > { %v2848_v35 = vpop.eup %2847  ;;  %2873 = vrcp.f32 %v2105_v17  ;;  %v2187_v62 = vmul.f32 %v2846_v3, %v3471_v0  ;;  %v2249_v49 = vadd.f32 %v2217_v63, %v2185_v37  ;;  %2279 = vst.msk [vmem:[%s4157_s13 + $0x10] sm:$0xff] %vm359_vm1, %v2247_v19  ;;  %v2111_v0 = vadd.f32 1.0, %v4129_v52 }
 0x6c6   : > { %v2850_v40 = vpop.eup %2849  ;;  %2875 = vrcp.f32 %v2106_v9  ;;  %v2188_v61 = vmul.f32 %v2848_v35, %v3474_v31  ;;  %v2250_v20 = vadd.f32 %v2218_v56, %v2186_v29  ;;  %2280 = vst.msk [vmem:[%s4157_s13 + $0x18] sm:$0xff] %vm359_vm1, %v2248_v7  ;;  %v2112_v31 = vadd.f32 1.0, %v4132_v18  ;;  %v2230_v9 = vld [vmem:[%s4143_s10 + $0x88] sm:$0xff]  ;;  %v2231_v56 = vld [vmem:[%s4143_s10 + $0x90] sm:$0xff] }
 0x6c7   : > { %v2852_v53 = vpop.eup %2851  ;;  %2877 = vrcp.f32 %v2107_v36  ;;  %v2189_v15 = vmul.f32 %v2850_v40, %v3477_v12  ;;  %v2251_v55 = vadd.f32 %v2219_v47, %v2187_v62  ;;  %2281 = vst.msk [vmem:[%s4157_s13 + $0x20] sm:$0xff] %vm359_vm1, %v2249_v49  ;;  %v2113_v12 = vadd.f32 1.0, %v4134_v58  ;;  %v4383_v36 = vld [vmem:[#allocation3_spill] sm:$0xff]  ;;  %v2232_v47 = vld [vmem:[%s4143_s10 + $0x98] sm:$0xff] }
 0x6c8   : > { %v2854_v34 = vpop.eup %2853  ;;  %2879 = vrcp.f32 %v2108_v23  ;;  %v2190_v16 = vmul.f32 %v2852_v53, %v3480_v50  ;;  %v2252_v54 = vadd.f32 %v2220_v46, %v2188_v61  ;;  %2282 = vst.msk [vmem:[%s4157_s13 + $0x28] sm:$0xff] %vm359_vm1, %v2250_v20  ;;  %v2114_v50 = vadd.f32 1.0, %v4136_v6  ;;  %v4384_v23 = vld [vmem:[#allocation6_spill] sm:$0xff] }
 0x6c9   : > { %v2856_v52 = vpop.eup %2855  ;;  %2881 = vrcp.f32 %v2109_v43  ;;  %v2191_v2 = vmul.f32 %v2854_v34, %v3491_v5  ;;  %v2253_v14 = vadd.f32 %v2221_v51, %v2189_v15  ;;  %2283 = vst.msk [vmem:[%s4157_s13 + $0x30] sm:$0xff] %vm359_vm1, %v2251_v55  ;;  %v2115_v5 = vadd.f32 1.0, %v4145_v10  ;;  %v2233_v46 = vld [vmem:[%s4143_s10 + $0xa0] sm:$0xff]  ;;  %v4385_v43 = vld [vmem:[#allocation8_spill] sm:$0xff]  ;;  %v2234_v51 = vld [vmem:[%s4143_s10 + $0xa8] sm:$0xff] }
 0x6ca   : > { %v2858_v18 = vpop.eup %2857  ;;  %2883 = vrcp.f32 %v2110_v59  ;;  %v2192_v33 = vmul.f32 %v2856_v52, %v3494_v4  ;;  %v2254_v30 = vadd.f32 %v2222_v45, %v2190_v16  ;;  %2284 = vst.msk [vmem:[%s4157_s13 + $0x38] sm:$0xff] %vm359_vm1, %v2252_v54  ;;  %v2116_v4 = vadd.f32 1.0, %v4147_v26  ;;  %v2229_v26 = vld [vmem:[%s4143_s10 + $0x80] sm:$0xff]  ;;  %v4386_v59 = vld [vmem:[#allocation5_spill] sm:$0xff]  ;;  %v2235_v45 = vld [vmem:[%s4143_s10 + $0xb0] sm:$0xff] }
 0x6cb   : > { %v2860_v58 = vpop.eup %2859  ;;  %2885 = vrcp.f32 %v2111_v0  ;;  %v2193_v44 = vmul.f32 %v2858_v18, %v3497_v32  ;;  %v2255_v8 = vadd.f32 %v2223_v38, %v2191_v2  ;;  %2285 = vst.msk [vmem:[%s4157_s13 + $0x40] sm:$0xff] %vm359_vm1, %v2253_v14  ;;  %v4387_v0 = vld [vmem:[#allocation7_spill] sm:$0xff]  ;;  %v2236_v38 = vld [vmem:[%s4143_s10 + $0xb8] sm:$0xff] }
 0x6cc   : > { %v2862_v6 = vpop.eup %2861  ;;  %2887 = vrcp.f32 %v2112_v31  ;;  %v2194_v48 = vmul.f32 %v2860_v58, %v3500_v60  ;;  %v2256_v22 = vadd.f32 %v2224_v57, %v2192_v33  ;;  %2286 = vst.msk [vmem:[%s4157_s13 + $0x48] sm:$0xff] %vm359_vm1, %v2254_v30  ;;  %v4388_v31 = vld [vmem:[#allocation10_spill] sm:$0xff] }
 0x6cd   : > { %v2864_v10 = vpop.eup %2863  ;;  %2889 = vrcp.f32 %v2113_v12  ;;  %v2195_v32 = vmul.f32 %v2862_v6, %v3511_v21  ;;  %v2257_v17 = vadd.f32 %v2225_v39, %v2193_v44  ;;  %2287 = vst.msk [vmem:[%s4157_s13 + $0x50] sm:$0xff] %vm359_vm1, %v2255_v8  ;;  %v2237_v57 = vld [vmem:[%s4143_s10 + $0xc0] sm:$0xff]  ;;  %v4389_v12 = vld [vmem:[#allocation12_spill] sm:$0xff]  ;;  %v2238_v39 = vld [vmem:[%s4143_s10 + $0xc8] sm:$0xff] }
 0x6ce   : > { %v2866_v27 = vpop.eup %2865  ;;  %2891 = vrcp.f32 %v2114_v50  ;;  %v2196_v60 = vmul.f32 %v2864_v10, %v4381_v25  ;;  %v2258_v1 = vadd.f32 %v2226_v41, %v2194_v48  ;;  %2288 = vst.msk [vmem:[%s4157_s13 + $0x58] sm:$0xff] %vm359_vm1, %v2256_v22  ;;  %v4390_v50 = vld [vmem:[#allocation9_spill] sm:$0xff]  ;;  %v2239_v41 = vld [vmem:[%s4143_s10 + $0xd0] sm:$0xff]  ;;  %v2242_v25 = vld [vmem:[%s4143_s10 + $0xe8] sm:$0xff] }
 0x6cf   : > { %v2868_v63 = vpop.eup %2867  ;;  %2893 = vrcp.f32 %v2115_v5  ;;  %v2197_v21 = vmul.f32 %v2866_v27, %v4382_v28  ;;  %v2259_v24 = vadd.f32 %v2227_v13, %v2195_v32  ;;  %2289 = vst.msk [vmem:[%s4157_s13 + $0x60] sm:$0xff] %vm359_vm1, %v2257_v17  ;;  %v4391_v5 = vld [vmem:[#allocation11_spill] sm:$0xff]  ;;  %v2240_v13 = vld [vmem:[%s4143_s10 + $0xd8] sm:$0xff]  ;;  %v4393_v32 = vld [vmem:[#allocation16_spill] sm:$0xff] }
 0x6d0   : > { %v2870_v11 = vpop.eup %2869  ;;  %2895 = vrcp.f32 %v2116_v4  ;;  %v2198_v37 = vmul.f32 %v2868_v63, %v4383_v36  ;;  %v2260_v19 = vadd.f32 %v2228_v42, %v2196_v60  ;;  %2290 = vst.msk [vmem:[%s4157_s13 + $0x68] sm:$0xff] %vm359_vm1, %v2258_v1  ;;  %v4392_v4 = vld [vmem:[#allocation14_spill] sm:$0xff]  ;;  %v4394_v60 = vld [vmem:[#allocation13_spill] sm:$0xff]  ;;  %v2243_v28 = vld [vmem:[%s4143_s10 + $0xf0] sm:$0xff] }
 0x6d1   : > { %v2872_v3 = vpop.eup %2871  ;;  %v2199_v29 = vmul.f32 %v2870_v11, %v4384_v23  ;;  %v2261_v7 = vadd.f32 %v2229_v26, %v2197_v21  ;;  %2291 = vst.msk [vmem:[%s4157_s13 + $0x70] sm:$0xff] %vm359_vm1, %v2259_v24  ;;  %v2241_v42 = vld [vmem:[%s4143_s10 + $0xe0] sm:$0xff]  ;;  %v4395_v21 = vld [vmem:[#allocation15_spill] sm:$0xff]  ;;  %v2244_v36 = vld [vmem:[%s4143_s10 + $0xf8] sm:$0xff] }
 0x6d2   : > { %v2874_v35 = vpop.eup %2873  ;;  %v2200_v62 = vmul.f32 %v2872_v3, %v4385_v43  ;;  %v2262_v49 = vadd.f32 %v2230_v9, %v2198_v37  ;;  %2292 = vst.msk [vmem:[%s4157_s13 + $0x78] sm:$0xff] %vm359_vm1, %v2260_v19  ;;  %v4396_v37 = vld [vmem:[#allocation17_spill] sm:$0xff] }
 0x6d3   : > { %v2876_v40 = vpop.eup %2875  ;;  %v2201_v61 = vmul.f32 %v2874_v35, %v4386_v59  ;;  %v2263_v20 = vadd.f32 %v2231_v56, %v2199_v29  ;;  %2293 = vst.msk [vmem:[%s4157_s13 + $0x80] sm:$0xff] %vm359_vm1, %v2261_v7 }
 0x6d4   : > { %v2878_v53 = vpop.eup %2877  ;;  %v2202_v15 = vmul.f32 %v2876_v40, %v4387_v0  ;;  %v2264_v55 = vadd.f32 %v2232_v47, %v2200_v62  ;;  %2294 = vst.msk [vmem:[%s4157_s13 + $0x88] sm:$0xff] %vm359_vm1, %v2262_v49  ;;  %v4397_v47 = vld [vmem:[#allocation18_spill] sm:$0xff] }
 0x6d5   : > { %v2880_v34 = vpop.eup %2879  ;;  %v2203_v16 = vmul.f32 %v2878_v53, %v4388_v31  ;;  %v2265_v54 = vadd.f32 %v2233_v46, %v2201_v61  ;;  %2295 = vst.msk [vmem:[%s4157_s13 + $0x90] sm:$0xff] %vm359_vm1, %v2263_v20 }
 0x6d6   : > { %v2882_v52 = vpop.eup %2881  ;;  %v2204_v2 = vmul.f32 %v2880_v34, %v4389_v12  ;;  %v2266_v14 = vadd.f32 %v2234_v51, %v2202_v15  ;;  %2296 = vst.msk [vmem:[%s4157_s13 + $0x98] sm:$0xff] %vm359_vm1, %v2264_v55 }
 0x6d7   : > { %v2884_v18 = vpop.eup %2883  ;;  %v2205_v33 = vmul.f32 %v2882_v52, %v4390_v50  ;;  %v2267_v30 = vadd.f32 %v2235_v45, %v2203_v16  ;;  %2297 = vst.msk [vmem:[%s4157_s13 + $0xa0] sm:$0xff] %vm359_vm1, %v2265_v54 }
 0x6d8   : > { %v2886_v58 = vpop.eup %2885  ;;  %v2206_v44 = vmul.f32 %v2884_v18, %v4391_v5  ;;  %v2268_v8 = vadd.f32 %v2236_v38, %v2204_v2  ;;  %2298 = vst.msk [vmem:[%s4157_s13 + $0xa8] sm:$0xff] %vm359_vm1, %v2266_v14 }
 0x6d9   : > { %v2888_v6 = vpop.eup %2887  ;;  %v2207_v48 = vmul.f32 %v2886_v58, %v4392_v4  ;;  %v2269_v22 = vadd.f32 %v2237_v57, %v2205_v33  ;;  %2299 = vst.msk [vmem:[%s4157_s13 + $0xb0] sm:$0xff] %vm359_vm1, %v2267_v30 }
 0x6da   : > { %v2890_v10 = vpop.eup %2889  ;;  %v2208_v17 = vmul.f32 %v2888_v6, %v4393_v32  ;;  %v2270_v27 = vadd.f32 %v2238_v39, %v2206_v44  ;;  %2300 = vst.msk [vmem:[%s4157_s13 + $0xb8] sm:$0xff] %vm359_vm1, %v2268_v8 }
 0x6db   : > { %v2892_v26 = vpop.eup %2891  ;;  %v2209_v1 = vmul.f32 %v2890_v10, %v4394_v60  ;;  %v2271_v63 = vadd.f32 %v2239_v41, %v2207_v48  ;;  %2301 = vst.msk [vmem:[%s4157_s13 + $0xc0] sm:$0xff] %vm359_vm1, %v2269_v22 }
 0x6dc   : > { %v2894_v9 = vpop.eup %2893  ;;  %v2210_v24 = vmul.f32 %v2892_v26, %v4395_v21  ;;  %v2272_v11 = vadd.f32 %v2240_v13, %v2208_v17  ;;  %2302 = vst.msk [vmem:[%s4157_s13 + $0xc8] sm:$0xff] %vm359_vm1, %v2270_v27 }
 0x6dd   : > { %v2896_v56 = vpop.eup %2895  ;;  %v2211_v19 = vmul.f32 %v2894_v9, %v4396_v37  ;;  %v2273_v3 = vadd.f32 %v2241_v42, %v2209_v1  ;;  %2303 = vst.msk [vmem:[%s4157_s13 + $0xd0] sm:$0xff] %vm359_vm1, %v2271_v63 }
 0x6de   : > { %v2212_v23 = vmul.f32 %v2896_v56, %v4397_v47  ;;  %v2274_v29 = vadd.f32 %v2242_v25, %v2210_v24  ;;  %2304 = vst.msk [vmem:[%s4157_s13 + $0xd8] sm:$0xff] %vm359_vm1, %v2272_v11 }
 0x6df   : > { %v2275_v7 = vadd.f32 %v2243_v28, %v2211_v19  ;;  %2305 = vst.msk [vmem:[%s4157_s13 + $0xe0] sm:$0xff] %vm359_vm1, %v2273_v3 }
 0x6e0   : > { %v2276_v35 = vadd.f32 %v2244_v36, %v2212_v23  ;;  %2306 = vst.msk [vmem:[%s4157_s13 + $0xe8] sm:$0xff] %vm359_vm1, %v2274_v29 }
 0x6e1   : > { %2307 = vst.msk [vmem:[%s4157_s13 + $0xf0] sm:$0xff] %vm359_vm1, %v2275_v7 }
 0x6e2   : > { %2308 = vst.msk [vmem:[%s4157_s13 + $0xf8] sm:$0xff] %vm359_vm1, %v2276_v35 }
 0x6e3 PF: > { %s15_s18 = sadd.s32 1, %s2919_s18  }
 0x6e4   : > { %p12_p4 = scmp.ge.s32.totalorder %s15_s18, 4  }
 0x6e6   :  { %14 = sbr.rel (!%p12_p4) target bundleno = 1 (0x1), region = 73 }

// kernel: psa_p_forward.4
= control target key start
LH: loop header
LB: loop body
LE: loop exit
PB: predicated region body
PF: predicated region fallthrough
CT: control target
= control target key end

     0   :  { %s6156_s12 = smov 0   ;;  %s8833_s0 = inlined_call_operand.vmem [shape: bf16[2,18,18,4], index: 0, kind: input, shape index: {}]   ;;  %s8834_s1 = inlined_call_operand.vmem [shape: bf16[9,4,4], index: 1, kind: input, shape index: {}]   ;;  %s8835_s2 = inlined_call_operand.vmem [shape: f32[1,4], index: 2, kind: input, shape index: {}]   ;;  %s8836_s3 = inlined_call_operand.vmem [shape: bf16[2,256,4], index: 3, kind: output, shape index: {}]  }
   0x1 LB: > { %s4986_s13 = sadd.s32 4294967295, %s6134_s12   ;;  %p4990_p0 = scmp.ge.s32.totalorder %s6134_s12, 1  ;;  %s6134_s12 = sphi %s6156_s12, %s13_s12  }
   0x2   : > { %p137_p1 = scmp.lt.s32.totalorder %s6134_s12, 3 }
   0x4   : > { %p138_p2 = pnand %p4990_p0, %p137_p1 }
   0x6   : > { %141 = sbr.rel (%p138_p2) target bundleno = 556 (0x22c), region = 32 }
   0xb   : > { %v4994_v0 = vld [vmem:[%s8834_s1 + $0x2] sm:$0x3]  ;;  %vm707_vm0 = vcmask 1041408   ;;  %p161_p3 = scmp.lt.s32.totalorder %s4986_s13, 1  ;;  %v204_v2 = vld [vmem:[%s8834_s1] sm:$0x3] }
   0xc   : > { %6060 = vmatprep.subr.msk.bf16.mxu1 %vm707_vm0, %v4994_v0  ;;  %6059 = vmatprep.subr.msk.bf16.mxu0 %vm707_vm0, %v4994_v0  ;;  %v709_v1 = vsel %vm707_vm0, %v4994_v0, 0  ;;  %v5075_v3 = vld [vmem:[%s8834_s1 + $0x4] sm:$0x3]  ;;  %vm221_vm1 = vsmask.f32 3328  ;;  %v6187_v4 = vsel %vm707_vm0, %v204_v2, 0 }
   0xd   : > { %6058 = vmatpush3.bf16.msra.mxu1 %v709_v1  ;;  %5752 = vmatpush3.bf16.msra.mxu0 %v709_v1  ;;  %s9112_s13 = smov (!%p161_p3, %s4986_s13), 1  ;;  %vm222_vm2 = vsmask.f32 7440  ;;  %vm658_vm3 = vcmask 31744   ;;  %v6213_v16 = vsel %vm707_vm0, %v5075_v3, 0  ;;  %vm1212_vm5 = vcmask 1042432  }
   0xe   : > { %6061 = vmatprep.subr.msk.bf16.mxu1 %vm707_vm0, %v204_v2  ;;  %6062 = vmatprep.subr.msk.bf16.mxu0 %vm707_vm0, %v5075_v3  ;;  %s6069_s20 = smul.u32 216, %s9112_s13  ;;  %vm6228_vm4 = vmor %vm221_vm1, %vm222_vm2  ;;  %vm1213_vm6 = vcmask 1046532   ;;  %s5565_s11 = sshll.u32 %s9112_s13, 7  ;;  %vm4898_vm8 = vcmask 27648  }
   0xf   : > { %vm6514_vm7 = vmor %vm1212_vm5, %vm1213_vm6  ;;  %s8656_s15 = scalar_lea.vmem %s8836_s3, %s5565_s11 }
  0x10   : > { %s6184_s23 = scalar_lea.vmem %s8833_s0, %s6069_s20 }
  0x11   : > { %v6190_v5 = vld [vmem:[%s6184_s23] sm:$0xf]  ;;  %v6193_v6 = vld [vmem:[%s6184_s23 + $0x4] sm:$0xf]  ;;  %v6196_v7 = vld [vmem:[%s6184_s23 + $0x8] sm:$0x1] }
  0x12   : > { %v225_v8 = vshrl.u32 %v6190_v5, 16  ;;  %v228_v9 = vshll.u32 %v6190_v5, 16  ;;  %v234_v10 = vshll.u32 %v6193_v6, 16  ;;  %v238_v11 = vshrl.u32 %v6193_v6, 16  ;;  %v6203_v12 = vld [vmem:[%s6184_s23 + $0x60] sm:$0xf] }
  0x13   : > { %v244_v13 = vshll.u32 %v6196_v7, 16  ;;  %v6207_v14 = vld [vmem:[%s6184_s23 + $0x64] sm:$0xf]  ;;  %v6210_v15 = vld [vmem:[%s6184_s23 + $0x68] sm:$0x1]  ;;  %v417_v22 = vshrl.u32 %v6203_v12, 16 }
  0x14   : > { %v227_v17 = vrot.slane %v225_v8, 4  ;;  %v230_v18 = vrot.slane %v228_v9, 5  ;;  %v236_v19 = vrot.slane %v234_v10, 5  ;;  %v240_v20 = vrot.slane %v238_v11, 4  ;;  %v6221_v29 = vld [vmem:[%s6184_s23 + $0xc] sm:$0xf] }
  0x15   : > { %v246_v21 = vrot.slane %v244_v13, 5  ;;  %v420_v23 = vshll.u32 %v6203_v12, 16  ;;  %v426_v24 = vshll.u32 %v6207_v14, 16  ;;  %v430_v27 = vshrl.u32 %v6207_v14, 16  ;;  %v6224_v30 = vld [vmem:[%s6184_s23 + $0x10] sm:$0xf] }
  0x16   : > { %v231_v25 = vor.u32 %v230_v18, %v227_v17  ;;  %v241_v26 = vor.u32 %v240_v20, %v236_v19  ;;  %v436_v28 = vshll.u32 %v6210_v15, 16  ;;  %v419_v33 = vrot.slane %v417_v22, 4  ;;  %v6234_v41 = vld [vmem:[%s6184_s23 + $0x14] sm:$0x1]  ;;  %v6245_v53 = vld [vmem:[%s6184_s23 + $0x6c] sm:$0xf] }
  0x17   : > { %v422_v34 = vrot.slane %v420_v23, 5  ;;  %v428_v35 = vrot.slane %v426_v24, 5  ;;  %v432_v38 = vrot.slane %v430_v27, 4  ;;  %v249_v42 = vshrl.u32 %v6221_v29, 16  ;;  %v6249_v58 = vld [vmem:[%s6184_s23 + $0x70] sm:$0xf] }
  0x18   : > { %v232_v36 = vrot.slane %v231_v25, 4  ;;  %v242_v37 = vrot.slane %v241_v26, 4  ;;  %v438_v39 = vrot.slane %v436_v28, 5  ;;  %v252_v43 = vshll.u32 %v6221_v29, 16  ;;  %v6257_v63 = vld [vmem:[%s6184_s23 + $0x74] sm:$0x1] }
  0x19   : > { %v423_v40 = vor.u32 %v422_v34, %v419_v33  ;;  %v258_v44 = vshll.u32 %v6224_v30, 16  ;;  %v433_v47 = vor.u32 %v432_v38, %v428_v35  ;;  %v262_v48 = vshrl.u32 %v6224_v30, 16  ;;  %v6263_v8 = vld [vmem:[%s6184_s23 + $0x18] sm:$0xf]  ;;  %v6276_v25 = vld [vmem:[%s6184_s23 + $0x20] sm:$0x1] }
  0x1a   : > { %v237_v45 = vsel %vm6228_vm4, %v232_v36, %v236_v19  ;;  %v247_v46 = vsel %vm6228_vm4, %v242_v37, %v246_v21  ;;  %v251_v51 = vrot.slane %v249_v42, 4  ;;  %v254_v52 = vrot.slane %v252_v43, 5  ;;  %v6270_v21 = vld [vmem:[%s6184_s23 + $0x1c] sm:$0xf] }
  0x1b   : > { %v4995_v49 = vcombine.low %v237_v45, %v247_v46  ;;  %v424_v50 = vrot.slane %v423_v40, 4  ;;  %v434_v54 = vrot.slane %v433_v47, 4  ;;  %v260_v55 = vrot.slane %v258_v44, 5  ;;  %v6289_v40 = vld [vmem:[%s8834_s1 + $0x8] sm:$0x3] }
  0x1c   : > { %v264_v56 = vrot.slane %v262_v48, 4  ;;  %v268_v57 = vshll.u32 %v6234_v41, 16  ;;  %v255_v60 = vor.u32 %v254_v52, %v251_v51  ;;  %v441_v3 = vshrl.u32 %v6245_v53, 16  ;;  %v6294_v46 = vld [vmem:[%s6184_s23 + $0x7c] sm:$0xf] }
  0x1d   : > { %5753 = vmatprep.mubr.msk.bf16.mxu0 %vm658_vm3, %v4995_v49  ;;  %v429_v59 = vsel %vm6228_vm4, %v424_v50, %v428_v35  ;;  %v439_v0 = vsel %vm6228_vm4, %v434_v54, %v438_v39  ;;  %v444_v11 = vshll.u32 %v6245_v53, 16  ;;  %v450_v13 = vshll.u32 %v6249_v58, 16  ;;  %v6283_v35 = vld [vmem:[%s6184_s23 + $0x78] sm:$0xf] }
  0x1e   : > { %v265_v1 = vor.u32 %v264_v56, %v260_v55  ;;  %v270_v2 = vrot.slane %v268_v57, 5  ;;  %v5003_v9 = vcombine.low %v429_v59, %v439_v0  ;;  %v256_v10 = vrot.slane %v255_v60, 4  ;;  %v6301_v56 = vld [vmem:[%s6184_s23 + $0x80] sm:$0x1] }
  0x1f   : > { %v443_v18 = vrot.slane %v441_v3, 4  ;;  %v454_v19 = vshrl.u32 %v6249_v58, 16  ;;  %v460_v20 = vshll.u32 %v6257_v63, 16  ;;  %v446_v23 = vrot.slane %v444_v11, 5  ;;  %8872 = vst [vmem:[#allocation2_spill] sm:$0xff] %v6301_v56 }
  0x20   : > { %v266_v17 = vrot.slane %v265_v1, 4  ;;  %5769 = vmatprep.mubr.msk.bf16.mxu1 %vm658_vm3, %v5003_v9  ;;  %v261_v22 = vsel %vm6228_vm4, %v256_v10, %v260_v55  ;;  %v452_v24 = vrot.slane %v450_v13, 5  ;;  %v273_v26 = vshrl.u32 %v6263_v8, 16  ;;  %v6307_v1 = vld [vmem:[%s6184_s23 + $0x24] sm:$0xf] }
  0x21   : > { %v456_v28 = vrot.slane %v454_v19, 4  ;;  %v462_v33 = vrot.slane %v460_v20, 5  ;;  %v276_v34 = vshll.u32 %v6263_v8, 16  ;;  %v447_v37 = vor.u32 %v446_v23, %v443_v18  ;;  %v6315_v10 = vld [vmem:[%s6184_s23 + $0x28] sm:$0xf] }
  0x22   : > { %v271_v27 = vsel %vm6228_vm4, %v266_v17, %v270_v2  ;;  %v275_v38 = vrot.slane %v273_v26, 4  ;;  %v282_v39 = vshll.u32 %v6270_v21, 16  ;;  %v286_v44 = vshrl.u32 %v6270_v21, 16  ;;  %v6321_v19 = vld [vmem:[%s8834_s1 + $0x6] sm:$0x3] }
  0x23   : > { %v4996_v36 = vcombine.low %v261_v22, %v271_v27  ;;  %v457_v42 = vor.u32 %v456_v28, %v452_v24  ;;  %v278_v43 = vrot.slane %v276_v34, 5  ;;  %v292_v45 = vshll.u32 %v6276_v25, 16 }
  0x24   : > { %v448_v47 = vrot.slane %v447_v37, 4  ;;  %v284_v48 = vrot.slane %v282_v39, 5  ;;  %v465_v49 = vshrl.u32 %v6283_v35, 16  ;;  %v468_v50 = vshll.u32 %v6283_v35, 16 }
  0x25   : > { %5754 = vmatmul.mubr.msk.bf16.vlgmr.msra.gmra.mxu0 %vm658_vm3, %v4996_v36  ;;  %v458_v51 = vrot.slane %v457_v42, 4  ;;  %v279_v52 = vor.u32 %v278_v43, %v275_v38  ;;  %v288_v54 = vrot.slane %v286_v44, 4  ;;  %v294_v55 = vrot.slane %v292_v45, 5  ;;  %v6333_v36 = vld [vmem:[%s6184_s23 + $0x84] sm:$0xf] }
  0x26   : > { %5820 = vmatpush3.bf16.msra.mxu0 %v6213_v16  ;;  %v453_v57 = vsel %vm6228_vm4, %v448_v47, %v452_v24  ;;  %v467_v59 = vrot.slane %v465_v49, 4  ;;  %v470_v60 = vrot.slane %v468_v50, 5  ;;  %v474_v0 = vshll.u32 %v6294_v46, 16  ;;  %v6326_v24 = vld [vmem:[%s6184_s23 + $0x2c] sm:$0x1] }
  0x27   : > { %6064 = vmatprep.subr.msk.bf16.mxu0 %vm707_vm0, %v6289_v40  ;;  %v463_v16 = vsel %vm6228_vm4, %v458_v51, %v462_v33  ;;  %v280_v2 = vrot.slane %v279_v52, 4  ;;  %v289_v3 = vor.u32 %v288_v54, %v284_v48  ;;  %v478_v9 = vshrl.u32 %v6294_v46, 16  ;;  %v6340_v43 = vld [vmem:[%s6184_s23 + $0x88] sm:$0xf]  ;;  %v6348_v51 = vld [vmem:[%s6184_s23 + $0x8c] sm:$0x1] }
  0x28   : > { %v5004_v11 = vcombine.low %v453_v57, %v463_v16  ;;  %v471_v13 = vor.u32 %v470_v60, %v467_v59  ;;  %v476_v17 = vrot.slane %v474_v0, 5  ;;  %v484_v18 = vshll.u32 %v6301_v56, 16  ;;  %8873 = vst [vmem:[#allocation3_spill] sm:$0xff] %v6348_v51  ;;  %v6356_v60 = vld [vmem:[%s6184_s23 + $0x30] sm:$0xf] }
  0x29   : > { %v285_v20 = vsel %vm6228_vm4, %v280_v2, %v284_v48  ;;  %v290_v22 = vrot.slane %v289_v3, 4  ;;  %v480_v23 = vrot.slane %v478_v9, 4  ;;  %v297_v26 = vshrl.u32 %v6307_v1, 16  ;;  %v6361_v9 = vld [vmem:[%s6184_s23 + $0x34] sm:$0xf] }
  0x2a   : > { %5770 = vmatmul.mubr.msk.bf16.vlgmr.msra.gmra.mxu1 %vm658_vm3, %v5004_v11  ;;  %v472_v27 = vrot.slane %v471_v13, 4  ;;  %v486_v28 = vrot.slane %v484_v18, 5  ;;  %v300_v33 = vshll.u32 %v6307_v1, 16  ;;  %v306_v34 = vshll.u32 %v6315_v10, 16 }
  0x2b   : > { %5786 = vmatpush3.bf16.msra.mxu1 %v6187_v4  ;;  %v295_v37 = vsel %vm6228_vm4, %v290_v22, %v294_v55  ;;  %v481_v38 = vor.u32 %v480_v23, %v476_v17  ;;  %v299_v39 = vrot.slane %v297_v26, 4  ;;  %v310_v42 = vshrl.u32 %v6315_v10, 16 }
  0x2c   : > { %v4997_v44 = vcombine.low %v285_v20, %v295_v37  ;;  %v477_v45 = vsel %vm6228_vm4, %v472_v27, %v476_v17  ;;  %v302_v47 = vrot.slane %v300_v33, 5  ;;  %v308_v48 = vrot.slane %v306_v34, 5  ;;  %6063 = vmatprep.subr.msk.bf16.mxu1 %vm707_vm0, %v6321_v19  ;;  %v6369_v33 = vld [vmem:[%s6184_s23 + $0x38] sm:$0x1] }
  0x2d   : > { %v482_v4 = vrot.slane %v481_v38, 4  ;;  %v312_v49 = vrot.slane %v310_v42, 4  ;;  %v316_v50 = vshll.u32 %v6326_v24, 16  ;;  %v489_v52 = vshrl.u32 %v6333_v36, 16  ;;  %v6374_v38 = vld [vmem:[%s6184_s23 + $0x90] sm:$0xf] }
  0x2e   : > { %5757 = vmatprep.mubr.msk.bf16.mxu0 %vm658_vm3, %v4997_v44  ;;  %v303_v54 = vor.u32 %v302_v47, %v299_v39  ;;  %v492_v55 = vshll.u32 %v6333_v36, 16  ;;  %v498_v57 = vshll.u32 %v6340_v43, 16  ;;  %v502_v59 = vshrl.u32 %v6340_v43, 16  ;;  %8874 = vst [vmem:[#allocation4_spill] sm:$0xff] %v6374_v38  ;;  %v6379_v47 = vld [vmem:[%s6184_s23 + $0x94] sm:$0xf] }
  0x2f   : > { %v487_v0 = vsel %vm6228_vm4, %v482_v4, %v486_v28  ;;  %v313_v16 = vor.u32 %v312_v49, %v308_v48  ;;  %v318_v2 = vrot.slane %v316_v50, 5  ;;  %v491_v3 = vrot.slane %v489_v52, 4  ;;  %8875 = vst [vmem:[#allocation5_spill] sm:$0xff] %v6379_v47 }
  0x30   : > { %v5005_v11 = vcombine.low %v477_v45, %v487_v0  ;;  %v304_v13 = vrot.slane %v303_v54, 4  ;;  %v494_v17 = vrot.slane %v492_v55, 5  ;;  %v500_v18 = vrot.slane %v498_v57, 5 }
  0x31   : > { %v314_v20 = vrot.slane %v313_v16, 4  ;;  %v504_v22 = vrot.slane %v502_v59, 4  ;;  %v508_v23 = vshll.u32 %v6348_v51, 16  ;;  %v321_v26 = vshrl.u32 %v6356_v60, 16  ;;  %v6388_v16 = vld [vmem:[%s6184_s23 + $0x98] sm:$0x1] }
  0x32   : > { %5773 = vmatprep.mubr.msk.bf16.mxu1 %vm658_vm3, %v5005_v11  ;;  %v309_v27 = vsel %vm6228_vm4, %v304_v13, %v308_v48  ;;  %v495_v28 = vor.u32 %v494_v17, %v491_v3  ;;  %v324_v34 = vshll.u32 %v6356_v60, 16  ;;  %v330_v37 = vshll.u32 %v6361_v9, 16  ;;  %8876 = vst [vmem:[#allocation6_spill] sm:$0xff] %v6388_v16  ;;  %v6393_v11 = vld [vmem:[%s6184_s23 + $0x3c] sm:$0xf] }
  0x33   : > { %v319_v39 = vsel %vm6228_vm4, %v314_v20, %v318_v2  ;;  %v505_v42 = vor.u32 %v504_v22, %v500_v18  ;;  %v510_v44 = vrot.slane %v508_v23, 5  ;;  %v323_v45 = vrot.slane %v321_v26, 4  ;;  %v6398_v23 = vld [vmem:[%s6184_s23 + $0x40] sm:$0xf]  ;;  %v1165_v51 = vld [vmem:[%s6184_s23 + $0xc] sm:$0xe] }
  0x34   : > { %v4998_v48 = vcombine.low %v309_v27, %v319_v39  ;;  %v496_v4 = vrot.slane %v495_v28, 4  ;;  %v326_v49 = vrot.slane %v324_v34, 5  ;;  %v332_v50 = vrot.slane %v330_v37, 5 }
  0x35   : > { %v506_v52 = vrot.slane %v505_v42, 4  ;;  %v334_v54 = vshrl.u32 %v6361_v9, 16  ;;  %v340_v55 = vshll.u32 %v6369_v33, 16  ;;  %v513_v57 = vshrl.u32 %v6374_v38, 16 }
  0x36   : > { %5758 = vmatmul.mubr.msk.bf16.gmra.mxu0 %vm658_vm3, %v4998_v48  ;;  %v501_v59 = vsel %vm6228_vm4, %v496_v4, %v500_v18  ;;  %v327_v0 = vor.u32 %v326_v49, %v323_v45  ;;  %v516_v2 = vshll.u32 %v6374_v38, 16  ;;  %v522_v3 = vshll.u32 %v6379_v47, 16  ;;  %v6407_v48 = vld [vmem:[%s6184_s23 + $0x44] sm:$0x1] }
  0x37   : > { %v511_v13 = vsel %vm6228_vm4, %v506_v52, %v510_v44  ;;  %v336_v17 = vrot.slane %v334_v54, 4  ;;  %v342_v20 = vrot.slane %v340_v55, 5  ;;  %v515_v22 = vrot.slane %v513_v57, 4  ;;  %v6412_v52 = vld [vmem:[%s6184_s23 + $0x9c] sm:$0xf] }
  0x38   : > { %v5006_v18 = vcombine.low %v501_v59, %v511_v13  ;;  %v328_v26 = vrot.slane %v327_v0, 4  ;;  %v518_v27 = vrot.slane %v516_v2, 5  ;;  %v524_v28 = vrot.slane %v522_v3, 5  ;;  %8877 = vst [vmem:[#allocation7_spill] sm:$0xff] %v6412_v52  ;;  %v6416_v13 = vld [vmem:[%s6184_s23 + $0xa0] sm:$0xf] }
  0x39   : > { %v337_v34 = vor.u32 %v336_v17, %v332_v50  ;;  %v526_v37 = vshrl.u32 %v6379_v47, 16  ;;  %v532_v39 = vshll.u32 %v6388_v16, 16  ;;  %v345_v42 = vshrl.u32 %v6393_v11, 16  ;;  %8878 = vst [vmem:[#allocation8_spill] sm:$0xff] %v6416_v13 }
  0x3a   : > { %5774 = vmatmul.mubr.msk.bf16.gmra.mxu1 %vm658_vm3, %v5006_v18  ;;  %v333_v44 = vsel %vm6228_vm4, %v328_v26, %v332_v50  ;;  %v519_v45 = vor.u32 %v518_v27, %v515_v22  ;;  %v348_v4 = vshll.u32 %v6393_v11, 16  ;;  %v354_v49 = vshll.u32 %v6398_v23, 16  ;;  %v6422_v26 = vld [vmem:[%s6184_s23 + $0xa4] sm:$0x1] }
  0x3b   : > { %v338_v54 = vrot.slane %v337_v34, 4  ;;  %v528_v55 = vrot.slane %v526_v37, 4  ;;  %v534_v57 = vrot.slane %v532_v39, 5  ;;  %v347_v59 = vrot.slane %v345_v42, 4  ;;  %8879 = vst [vmem:[#allocation9_spill] sm:$0xff] %v6422_v26 }
  0x3c   : > { %v520_v0 = vrot.slane %v519_v45, 4  ;;  %v350_v2 = vrot.slane %v348_v4, 5  ;;  %v356_v3 = vrot.slane %v354_v49, 5  ;;  %v358_v50 = vshrl.u32 %v6398_v23, 16  ;;  %v6426_v34 = vld [vmem:[%s6184_s23 + $0x48] sm:$0xf] }
  0x3d   : > { %v343_v17 = vsel %vm6228_vm4, %v338_v54, %v342_v20  ;;  %v529_v22 = vor.u32 %v528_v55, %v524_v28  ;;  %v364_v18 = vshll.u32 %v6407_v48, 16  ;;  %v537_v27 = vshrl.u32 %v6412_v52, 16 }
  0x3e   : > { %v4999_v37 = vcombine.low %v333_v44, %v343_v17  ;;  %v525_v39 = vsel %vm6228_vm4, %v520_v0, %v524_v28  ;;  %v351_v42 = vor.u32 %v350_v2, %v347_v59  ;;  %v360_v45 = vrot.slane %v358_v50, 4  ;;  %v6435_v17 = vld [vmem:[%s6184_s23 + $0x4c] sm:$0xf]  ;;  %v6441_v2 = vld [vmem:[%s6184_s23 + $0x50] sm:$0x1] }
  0x3f   : > { %v530_v4 = vrot.slane %v529_v22, 4  ;;  %v366_v49 = vrot.slane %v364_v18, 5  ;;  %v539_v20 = vrot.slane %v537_v27, 4  ;;  %v540_v54 = vshll.u32 %v6412_v52, 16 }
  0x40   : > { %5761 = vmatprep.mubr.msk.bf16.mxu0 %vm658_vm3, %v4999_v37  ;;  %v352_v55 = vrot.slane %v351_v42, 4  ;;  %v361_v62 = vor.u32 %v360_v45, %v356_v3  ;;  %v546_v32 = vshll.u32 %v6416_v13, 16  ;;  %v550_v44 = vshrl.u32 %v6416_v13, 16  ;;  %v6447_v42 = vld [vmem:[%s6184_s23 + $0xa8] sm:$0xf] }
  0x41   : > { %v535_v28 = vsel %vm6228_vm4, %v530_v4, %v534_v57  ;;  %v542_v59 = vrot.slane %v540_v54, 5  ;;  %v556_v0 = vshll.u32 %v6422_v26, 16  ;;  %v369_v50 = vshrl.u32 %v6426_v34, 16  ;;  %8880 = vst [vmem:[#allocation10_spill] sm:$0xff] %v6447_v42 }
  0x42   : > { %v5007_v22 = vcombine.low %v525_v39, %v535_v28  ;;  %v357_v18 = vsel %vm6228_vm4, %v352_v55, %v356_v3  ;;  %v362_v27 = vrot.slane %v361_v62, 4  ;;  %v548_v37 = vrot.slane %v546_v32, 5 }
  0x43   : > { %v543_v45 = vor.u32 %v542_v59, %v539_v20  ;;  %v552_v61 = vrot.slane %v550_v44, 4  ;;  %v558_v57 = vrot.slane %v556_v0, 5  ;;  %v371_v4 = vrot.slane %v369_v50, 4  ;;  %v6457_v44 = vld [vmem:[%s6184_s23 + $0xac] sm:$0xf] }
  0x44   : > { %5777 = vmatprep.mubr.msk.bf16.mxu1 %vm658_vm3, %v5007_v22  ;;  %v367_v54 = vsel %vm6228_vm4, %v362_v27, %v366_v49  ;;  %v372_v39 = vshll.u32 %v6426_v34, 16  ;;  %v378_v28 = vshll.u32 %v6435_v17, 16  ;;  %v382_v62 = vshrl.u32 %v6435_v17, 16  ;;  %8881 = vst [vmem:[#allocation11_spill] sm:$0xff] %v6457_v44  ;;  %v6460_v22 = vld [vmem:[%s6184_s23 + $0xb0] sm:$0x1] }
  0x45   : > { %v5000_v3 = vcombine.low %v357_v18, %v367_v54  ;;  %v544_v32 = vrot.slane %v543_v45, 4  ;;  %v553_v55 = vor.u32 %v552_v61, %v548_v37  ;;  %v388_v20 = vshll.u32 %v6441_v2, 16  ;;  %8882 = vst [vmem:[#allocation12_spill] sm:$0xff] %v6460_v22 }
  0x46   : > { %v374_v59 = vrot.slane %v372_v39, 5  ;;  %v380_v0 = vrot.slane %v378_v28, 5  ;;  %v384_v50 = vrot.slane %v382_v62, 4  ;;  %v561_v49 = vshrl.u32 %v6447_v42, 16  ;;  %v6469_v62 = vld [vmem:[%s6184_s23 + $0x54] sm:$0xf] }
  0x47   : > { %5762 = vmatmul.mubr.msk.bf16.gmra.mxu0 %vm658_vm3, %v5000_v3  ;;  %v549_v18 = vsel %vm6228_vm4, %v544_v32, %v548_v37  ;;  %v554_v27 = vrot.slane %v553_v55, 4  ;;  %v390_v61 = vrot.slane %v388_v20, 5  ;;  %v564_v45 = vshll.u32 %v6447_v42, 16  ;;  %v6476_v55 = vld [vmem:[%s6184_s23 + $0x58] sm:$0xf] }
  0x48   : > { %v375_v54 = vor.u32 %v374_v59, %v371_v4  ;;  %v385_v56 = vor.u32 %v384_v50, %v380_v0  ;;  %v563_v39 = vrot.slane %v561_v49, 4  ;;  %v570_v28 = vshll.u32 %v6457_v44, 16  ;;  %v6479_v49 = vld [vmem:[%s6184_s23 + $0x5c] sm:$0x1] }
  0x49   : > { %v559_v3 = vsel %vm6228_vm4, %v554_v27, %v558_v57  ;;  %v566_v26 = vrot.slane %v564_v45, 5  ;;  %v574_v37 = vshrl.u32 %v6457_v44, 16  ;;  %v580_v32 = vshll.u32 %v6460_v22, 16  ;;  %v1164_v22 = vld [vmem:[%s6184_s23] sm:$0xe] }
  0x4a   : > { %v5008_v4 = vcombine.low %v549_v18, %v559_v3  ;;  %v376_v20 = vrot.slane %v375_v54, 4  ;;  %v386_v59 = vrot.slane %v385_v56, 4  ;;  %v572_v50 = vrot.slane %v570_v28, 5  ;;  %v6490_v54 = vld [vmem:[%s6184_s23 + $0xb4] sm:$0xf] }
  0x4b   : > { %v567_v42 = vor.u32 %v566_v26, %v563_v39  ;;  %v576_v52 = vrot.slane %v574_v37, 4  ;;  %v582_v13 = vrot.slane %v580_v32, 5  ;;  %v393_v57 = vshrl.u32 %v6469_v62, 16  ;;  %8883 = vst [vmem:[#allocation13_spill] sm:$0xff] %v6490_v54  ;;  %v6493_v37 = vld [vmem:[%s6184_s23 + $0xb8] sm:$0xf] }
  0x4c   : > { %5778 = vmatmul.mubr.msk.bf16.gmra.mxu1 %vm658_vm3, %v5008_v4  ;;  %v381_v27 = vsel %vm6228_vm4, %v376_v20, %v380_v0  ;;  %v391_v18 = vsel %vm6228_vm4, %v386_v59, %v390_v61  ;;  %v396_v56 = vshll.u32 %v6469_v62, 16  ;;  %v402_v45 = vshll.u32 %v6476_v55, 16  ;;  %v6498_v61 = vld [vmem:[%s6184_s23 + $0xbc] sm:$0x1] }
  0x4d   : > { %v5001_v26 = vcombine.low %v381_v27, %v391_v18  ;;  %v568_v39 = vrot.slane %v567_v42, 4  ;;  %v577_v28 = vor.u32 %v576_v52, %v572_v50  ;;  %v395_v3 = vrot.slane %v393_v57, 4 }
  0x4e   : > { %v398_v32 = vrot.slane %v396_v56, 5  ;;  %v404_v4 = vrot.slane %v402_v45, 5  ;;  %v406_v0 = vshrl.u32 %v6476_v55, 16  ;;  %v412_v20 = vshll.u32 %v6479_v49, 16 }
  0x4f   : > { %5765 = vmatprep.mubr.msk.bf16.mxu0 %vm658_vm3, %v5001_v26  ;;  %v573_v59 = vsel %vm6228_vm4, %v568_v39, %v572_v50  ;;  %v578_v27 = vrot.slane %v577_v28, 4  ;;  %v585_v52 = vshrl.u32 %v6490_v54, 16  ;;  %v588_v42 = vshll.u32 %v6490_v54, 16 }
  0x50   : > { %v399_v57 = vor.u32 %v398_v32, %v395_v3  ;;  %v408_v18 = vrot.slane %v406_v0, 4  ;;  %v414_v56 = vrot.slane %v412_v20, 5  ;;  %v594_v45 = vshll.u32 %v6493_v37, 16 }
  0x51   : > { %v583_v44 = vsel %vm6228_vm4, %v578_v27, %v582_v13  ;;  %v587_v16 = vrot.slane %v585_v52, 4  ;;  %v590_v26 = vrot.slane %v588_v42, 5  ;;  %v598_v38 = vshrl.u32 %v6493_v37, 16 }
  0x52   : > { %v5009_v50 = vcombine.low %v573_v59, %v583_v44  ;;  %v400_v39 = vrot.slane %v399_v57, 4  ;;  %v409_v28 = vor.u32 %v408_v18, %v404_v4  ;;  %v596_v47 = vrot.slane %v594_v45, 5  ;;  %v1166_v57 = vld [vmem:[%s6184_s23 + $0x18] sm:$0xe] }
  0x53   : > { %v591_v54 = vor.u32 %v590_v26, %v587_v16  ;;  %v600_v3 = vrot.slane %v598_v38, 4  ;;  %v604_v32 = vshll.u32 %v6498_v61, 16  ;;  %v5059_v13 = vrot.slane %v1164_v22, 9 }
  0x54   : > { %5781 = vmatprep.mubr.msk.bf16.mxu1 %vm658_vm3, %v5009_v50  ;;  %v405_v44 = vsel %vm6228_vm4, %v400_v39, %v404_v4  ;;  %v410_v20 = vrot.slane %v409_v28, 4  ;;  %v1217_v59 = vrot.slane %v6193_v6, 5  ;;  %v5028_v38 = vcombine.low %v6221_v29, %v6224_v30 }
  0x55   : > { %v592_v16 = vrot.slane %v591_v54, 4  ;;  %v601_v27 = vor.u32 %v600_v3, %v596_v47  ;;  %v606_v52 = vrot.slane %v604_v32, 5  ;;  %v5060_v42 = vrot.slane %v1165_v51, 9 }
  0x56   : > { %v415_v18 = vsel %vm6228_vm4, %v410_v20, %v414_v56  ;;  %v1218_v22 = vsel %vm6514_vm7, %v5059_v13, %v1217_v59  ;;  %v1219_v45 = vrot.slane %v1217_v59, 4  ;;  %v8886_v4 = vrot.slane %v6224_v30, 5 }
  0x57   : > { %v5002_v50 = vcombine.low %v405_v44, %v415_v18  ;;  %v597_v54 = vsel %vm6228_vm4, %v592_v16, %v596_v47  ;;  %v602_v39 = vrot.slane %v601_v27, 4  ;;  %v5027_v51 = vcombine.low %v6190_v5, %v6193_v6  ;;  %v1167_v27 = vld [vmem:[%s6184_s23 + $0x24] sm:$0xe] }
  0x58   : > { %v1226_v26 = vrot.slane %v8886_v4, 4  ;;  %v8887_v28 = vrot.slane %v6196_v7, 5  ;;  %v8888_v3 = vmov %v8886_v4  ;;  %v5029_v13 = vcombine.low %v6263_v8, %v6270_v21  ;;  %v1169_v4 = vld [vmem:[%s6184_s23 + $0x3c] sm:$0xe] }
  0x59   : > { %v1225_v32 = vsel %vm6514_vm7, %v5060_v42, %v8888_v3  ;;  %v5061_v44 = vrot.slane %v1166_v57, 9  ;;  %5766 = vmatmul.mubr.msk.bf16.gmra.mxu0 %vm658_vm3, %v5002_v50  ;;  %v607_v47 = vsel %vm6228_vm4, %v602_v39, %v606_v52  ;;  %v8889_v6 = vrot.slane %v6234_v41, 5  ;;  %v1168_v42 = vld [vmem:[%s6184_s23 + $0x30] sm:$0xe]  ;;  %v1170_v39 = vld [vmem:[%s6184_s23 + $0x48] sm:$0xe] }
  0x5a   : > { %v1221_v56 = vsel %vm6514_vm7, %v1219_v45, %v8887_v28  ;;  %v1231_v20 = vrot.slane %v6270_v21, 5  ;;  %v5010_v59 = vcombine.low %v597_v54, %v607_v47  ;;  %v1234_v16 = vrot.slane %v6276_v25, 5  ;;  %v1171_v47 = vld [vmem:[%s6184_s23 + $0x54] sm:$0xe]  ;;  %v6809_v21 = vld [vmem:[%s6184_s23 + $0x2c] sm:$0x1] }
  0x5b   : > { %v5076_v5 = vcombine.low %v1218_v22, %v1221_v56  ;;  %v1228_v7 = vsel %vm6514_vm7, %v1226_v26, %v8889_v6  ;;  %v1785_v52 = vsel %vm707_vm0, %v6321_v19, 0  ;;  %v1238_v18 = vrot.slane %v6315_v10, 5 }
  0x5c   : > { %v1232_v41 = vsel %vm6514_vm7, %v5061_v44, %v1231_v20  ;;  %v1233_v57 = vrot.slane %v1231_v20, 4  ;;  %5782 = vmatmul.mubr.msk.bf16.gmra.mxu1 %vm658_vm3, %v5010_v59  ;;  %v5077_v22 = vcombine.low %v1225_v32, %v1228_v7  ;;  %v2511_v25 = vsel %vm707_vm0, %v6289_v40, 0 }
  0x5d   : > { %5821 = vmatprep.mubr.msk.bf16.mxu0 %vm658_vm3, %v5076_v5  ;;  %v1245_v45 = vrot.slane %v6361_v9, 5  ;;  %5787 = vmatprep.mubr.msk.bf16.mxu1 %vm658_vm3, %v5027_v51  ;;  %v5062_v26 = vrot.slane %v1167_v27, 9  ;;  %v1241_v50 = vrot.slane %v6326_v24, 5  ;;  %v5063_v54 = vrot.slane %v1168_v42, 9  ;;  %v6581_v24 = vld [vmem:[%s8834_s1 + $0xc] sm:$0x3] }
  0x5e   : > { %v1235_v19 = vsel %vm6514_vm7, %v1233_v57, %v1234_v16  ;;  %v1240_v56 = vrot.slane %v1238_v18, 4  ;;  %v1248_v32 = vrot.slane %v6369_v33, 5  ;;  %v5064_v44 = vrot.slane %v1169_v4, 9 }
  0x5f   : > { %v5078_v28 = vcombine.low %v1232_v41, %v1235_v19  ;;  %v1247_v3 = vrot.slane %v1245_v45, 4  ;;  %v1252_v40 = vrot.slane %v6398_v23, 5  ;;  %v1276_v5 = vrot.slane %v6210_v15, 5 }
  0x60   : > { %v1255_v51 = vrot.slane %v6407_v48, 5  ;;  %v5065_v6 = vrot.slane %v1170_v39, 9  ;;  %v1259_v7 = vrot.slane %v6435_v17, 5  ;;  %v5030_v33 = vcombine.low %v6307_v1, %v6315_v10  ;;  %v1172_v1 = vld [vmem:[%s6184_s23 + $0x60] sm:$0xe] }
  0x61   : > { %5822 = vmatmul.mubr.msk.bf16.vlgmr.msra.gmra.mxu0 %vm658_vm3, %v5077_v22  ;;  %v1239_v20 = vsel %vm6514_vm7, %v5062_v26, %v1238_v18  ;;  %v1254_v59 = vrot.slane %v1252_v40, 4  ;;  %v1262_v16 = vrot.slane %v6441_v2, 5  ;;  %v1242_v48 = vsel %vm6514_vm7, %v1240_v56, %v1241_v50  ;;  %v6609_v22 = vld [vmem:[%s8834_s1 + $0xa] sm:$0x3]  ;;  %v6634_v50 = vld [vmem:[%s6184_s23 + $0x6c] sm:$0xe] }
  0x62   : > { %5888 = vmatpush3.bf16.msra.mxu0 %v2511_v25  ;;  %5825 = vmatprep.mubr.msk.bf16.mxu0 %vm658_vm3, %v5078_v28  ;;  %v1246_v27 = vsel %vm6514_vm7, %v5063_v54, %v1245_v45  ;;  %v1249_v42 = vsel %vm6514_vm7, %v1247_v3, %v1248_v32  ;;  %v1261_v41 = vrot.slane %v1259_v7, 4  ;;  %v6599_v10 = vsel %vm6514_vm7, %v5064_v44, %v1252_v40  ;;  %v1175_v39 = vld [vmem:[%s6184_s23 + $0x84] sm:$0xe]  ;;  %v6663_v44 = vld [vmem:[%s6184_s23 + $0x78] sm:$0xe] }
  0x63   : > { %v6603_v2 = vsel %vm6514_vm7, %v5065_v6, %v1259_v7  ;;  %v5066_v57 = vrot.slane %v1171_v47, 9  ;;  %v1266_v18 = vrot.slane %v6476_v55, 5  ;;  %6066 = vmatprep.subr.msk.bf16.mxu0 %vm707_vm0, %v6581_v24  ;;  %v6619_v25 = vsel %vm6514_vm7, %v1254_v59, %v1255_v51  ;;  %v1176_v40 = vld [vmem:[%s6184_s23 + $0x90] sm:$0xe] }
  0x64   : > { %5788 = vmatmul.mubr.msk.bf16.vlgmr.msra.gmra.mxu1 %vm658_vm3, %v5028_v38  ;;  %v6623_v45 = vsel %vm6514_vm7, %v1261_v41, %v1262_v16  ;;  %v1269_v4 = vrot.slane %v6479_v49, 5  ;;  %v1273_v19 = vrot.slane %v6207_v14, 5  ;;  %v5079_v29 = vcombine.low %v1239_v20, %v1242_v48  ;;  %v8890_v48 = vld [vmem:[#allocation3_spill] sm:$0xff] }
  0x65   : > { %5854 = vmatpush3.bf16.msra.mxu1 %v1785_v52  ;;  %5791 = vmatprep.mubr.msk.bf16.mxu1 %vm658_vm3, %v5029_v13  ;;  %v5031_v30 = vcombine.low %v6356_v60, %v6361_v9  ;;  %v1268_v38 = vrot.slane %v1266_v18, 4  ;;  %v5067_v26 = vrot.slane %v1172_v1, 9  ;;  %v5080_v49 = vcombine.low %v1246_v27, %v1249_v42  ;;  %v1177_v42 = vld [vmem:[%s6184_s23 + $0x9c] sm:$0xe] }
  0x66   : > { %v5032_v52 = vcombine.low %v6393_v11, %v6398_v23  ;;  %v5033_v8 = vcombine.low %v6426_v34, %v6435_v17  ;;  %6065 = vmatprep.subr.msk.bf16.mxu1 %vm707_vm0, %v6609_v22  ;;  %v5081_v60 = vcombine.low %v6599_v10, %v6619_v25  ;;  %v5082_v9 = vcombine.low %v6603_v2, %v6623_v45  ;;  %v8891_v10 = vld [vmem:[#allocation5_spill] sm:$0xff]  ;;  %v8892_v2 = vld [vmem:[#allocation4_spill] sm:$0xff] }
  0x67   : > { %v1275_v54 = vrot.slane %v1273_v19, 4  ;;  %v6653_v28 = vsel %vm6514_vm7, %v5066_v57, %v1266_v18  ;;  %v6657_v56 = vsel %vm6514_vm7, %v1268_v38, %v1269_v4  ;;  %v5068_v32 = vrot.slane %v6634_v50, 9  ;;  %v1178_v18 = vld [vmem:[%s6184_s23 + $0xa8] sm:$0xe]  ;;  %v8894_v38 = vld [vmem:[#allocation8_spill] sm:$0xff] }
  0x68   : > { %v6669_v47 = vsel %vm6514_vm7, %v5067_v26, %v1273_v19  ;;  %v1280_v51 = vrot.slane %v6249_v58, 5  ;;  %v1283_v6 = vrot.slane %v6257_v63, 5  ;;  %v5070_v59 = vrot.slane %v1175_v39, 9  ;;  %v8893_v19 = vld [vmem:[#allocation6_spill] sm:$0xff]  ;;  %v8895_v26 = vld [vmem:[#allocation7_spill] sm:$0xff] }
  0x69   : > { %5826 = vmatmul.mubr.msk.bf16.gmra.mxu0 %vm658_vm3, %v5079_v29  ;;  %v1294_v16 = vrot.slane %v6340_v43, 5  ;;  %v1297_v27 = vrot.slane %v8890_v48, 5  ;;  %v5083_v41 = vcombine.low %v6653_v28, %v6657_v56  ;;  %v6687_v63 = vsel %vm6514_vm7, %v1275_v54, %v1276_v5  ;;  %v8897_v48 = vld [vmem:[#allocation11_spill] sm:$0xff] }
  0x6a   : > { %5829 = vmatprep.mubr.msk.bf16.mxu0 %vm658_vm3, %v5080_v49  ;;  %v5069_v1 = vrot.slane %v6663_v44, 9  ;;  %v5071_v4 = vrot.slane %v1176_v40, 9  ;;  %v1301_v15 = vrot.slane %v8891_v10, 5  ;;  %v1282_v5 = vrot.slane %v1280_v51, 4  ;;  %v5173_v57 = vld [vmem:[%s6184_s23 + $0xc] sm:$0xf] }
  0x6b   : > { %v6696_v25 = vsel %vm6514_vm7, %v5070_v59, %v1294_v16  ;;  %v1296_v45 = vrot.slane %v1294_v16, 4  ;;  %v1304_v29 = vrot.slane %v8893_v19, 5  ;;  %v5072_v49 = vrot.slane %v1177_v42, 9  ;;  %v8896_v59 = vld [vmem:[#allocation9_spill] sm:$0xff]  ;;  %v8898_v42 = vld [vmem:[#allocation10_spill] sm:$0xff] }
  0x6c   : > { %5792 = vmatmul.mubr.msk.bf16.gmra.mxu1 %vm658_vm3, %v5030_v33  ;;  %v1287_v33 = vrot.slane %v6294_v46, 5  ;;  %v6710_v39 = vsel %vm6514_vm7, %v5071_v4, %v1301_v15  ;;  %v1303_v44 = vrot.slane %v1301_v15, 4  ;;  %v1308_v40 = vrot.slane %v8894_v38, 5  ;;  %v8899_v15 = vld [vmem:[#allocation12_spill] sm:$0xff] }
  0x6d   : > { %5795 = vmatprep.mubr.msk.bf16.mxu1 %vm658_vm3, %v5031_v30  ;;  %v6706_v54 = vsel %vm6514_vm7, %v1296_v45, %v1297_v27  ;;  %v1311_v16 = vrot.slane %v8896_v59, 5  ;;  %v5073_v45 = vrot.slane %v1178_v18, 9  ;;  %v1315_v4 = vrot.slane %v8897_v48, 5 }
  0x6e   : > { %v6720_v27 = vsel %vm6514_vm7, %v1303_v44, %v1304_v29  ;;  %v1318_v50 = vrot.slane %v8899_v15, 5  ;;  %v6730_v19 = vsel %vm6514_vm7, %v5072_v49, %v1308_v40  ;;  %v1310_v7 = vrot.slane %v1308_v40, 4  ;;  %v8900_v29 = vld [vmem:[#allocation13_spill] sm:$0xff]  ;;  %v8901_v15 = vld [vmem:[#allocation2_spill] sm:$0xff]  ;;  %v6745_v49 = vld [vmem:[%s6184_s23 + $0x10] sm:$0xf] }
  0x6f   : > { %v6737_v18 = vsel %vm6514_vm7, %v5068_v32, %v1280_v51  ;;  %v6742_v59 = vsel %vm6514_vm7, %v5073_v45, %v1315_v4  ;;  %v1317_v30 = vrot.slane %v1315_v4, 4  ;;  %v5176_v40 = vld [vmem:[%s6184_s23 + $0x18] sm:$0xf]  ;;  %v1289_v20 = vrot.slane %v1287_v33, 4 }
  0x70   : > { %v2029_v44 = vshrl.u32 %v5173_v57, 16  ;;  %v2032_v32 = vshll.u32 %v5173_v57, 16  ;;  %v5084_v51 = vcombine.low %v6669_v47, %v6687_v63  ;;  %v6760_v45 = vsel %vm6514_vm7, %v1282_v5, %v1283_v6  ;;  %v1179_v57 = vld [vmem:[%s6184_s23 + $0xb4] sm:$0xe]  ;;  %v6781_v47 = vld [vmem:[%s6184_s23 + $0x14] sm:$0x1] }
  0x71   : > { %5830 = vmatmul.mubr.msk.bf16.gmra.mxu0 %vm658_vm3, %v5081_v60  ;;  %v1290_v60 = vrot.slane %v8901_v15, 5  ;;  %v6775_v11 = vsel %vm6514_vm7, %v5069_v1, %v1287_v33  ;;  %v2038_v6 = vshll.u32 %v6745_v49, 16  ;;  %v5177_v63 = vld [vmem:[%s6184_s23 + $0x1c] sm:$0xf]  ;;  %v2042_v17 = vshrl.u32 %v6745_v49, 16 }
  0x72   : > { %5833 = vmatprep.mubr.msk.bf16.mxu0 %vm658_vm3, %v5082_v9  ;;  %v6750_v9 = vsel %vm6514_vm7, %v1310_v7, %v1311_v16  ;;  %v6766_v7 = vsel %vm6514_vm7, %v1317_v30, %v1318_v50  ;;  %v2031_v5 = vrot.slane %v2029_v44, 4  ;;  %v2034_v34 = vrot.slane %v2032_v32, 5  ;;  %v5179_v15 = vld [vmem:[%s6184_s23 + $0x24] sm:$0xf]  ;;  %v6794_v44 = vld [vmem:[%s6184_s23 + $0x28] sm:$0xf] }
  0x73   : > { %v2053_v50 = vshrl.u32 %v5176_v40, 16  ;;  %v1291_v1 = vsel %vm6514_vm7, %v1289_v20, %v1290_v60  ;;  %v5074_v33 = vrot.slane %v1179_v57, 9  ;;  %v6789_v30 = vrot.slane %v2038_v6, 5 }
  0x74   : > { %5796 = vmatmul.mubr.msk.bf16.gmra.mxu1 %vm658_vm3, %v5032_v52  ;;  %v1322_v52 = vrot.slane %v6493_v37, 5  ;;  %v2056_v16 = vshll.u32 %v5176_v40, 16  ;;  %v1325_v23 = vrot.slane %v6498_v61, 5  ;;  %v2044_v4 = vrot.slane %v2042_v17, 4 }
  0x75   : > { %5799 = vmatprep.mubr.msk.bf16.mxu1 %vm658_vm3, %v5033_v8  ;;  %v5178_v8 = vld [vmem:[%s6184_s23 + $0x20] sm:$0x1]  ;;  %v2055_v3 = vrot.slane %v2053_v50, 4  ;;  %v2062_v13 = vshll.u32 %v5177_v63, 16  ;;  %v2048_v20 = vshll.u32 %v6781_v47, 16  ;;  %v2066_v57 = vshrl.u32 %v5177_v63, 16 }
  0x76   : > { %v1324_v32 = vrot.slane %v1322_v52, 4  ;;  %v2058_v60 = vrot.slane %v2056_v16, 5  ;;  %v5085_v61 = vcombine.low %v6737_v18, %v6760_v45  ;;  %v5086_v40 = vcombine.low %v6775_v11, %v1291_v1 }
  0x77   : > { %v2035_v6 = vor.u32 %v2034_v34, %v2031_v5  ;;  %v6805_v17 = vrot.slane %v2062_v13, 5  ;;  %v2045_v28 = vor.u32 %v2044_v4, %v6789_v30  ;;  %v2072_v50 = vshll.u32 %v5178_v8, 16  ;;  %v6832_v5 = vld [vmem:[%s6184_s23 + $0x34] sm:$0xf] }
  0x78   : > { %v2059_v56 = vor.u32 %v2058_v60, %v2055_v3  ;;  %v6817_v18 = vsel %vm6514_vm7, %v5074_v33, %v1322_v52  ;;  %v2077_v13 = vshrl.u32 %v5179_v15, 16  ;;  %v2080_v45 = vshll.u32 %v5179_v15, 16  ;;  %v5182_v52 = vld [vmem:[%s6184_s23 + $0x30] sm:$0xf] }
  0x79   : > { %5834 = vmatmul.mubr.msk.bf16.gmra.mxu0 %vm658_vm3, %v5083_v41  ;;  %v2068_v41 = vrot.slane %v2066_v57, 4  ;;  %v2086_v11 = vshll.u32 %v6794_v44, 16  ;;  %v8903_v3 = vcombine.low %v6203_v12, %v6207_v14  ;;  %v6826_v4 = vsel %vm6514_vm7, %v1324_v32, %v1325_v23 }
  0x7a   : > { %5837 = vmatprep.mubr.msk.bf16.mxu0 %vm658_vm3, %v5084_v51  ;;  %v8902_v51 = vcombine.low %v6469_v62, %v6476_v55  ;;  %v2050_v62 = vrot.slane %v2048_v20, 5  ;;  %v2090_v63 = vshrl.u32 %v6794_v44, 16  ;;  %v2036_v34 = vrot.slane %v2035_v6, 4 }
  0x7b   : > { %v2069_v55 = vor.u32 %v2068_v41, %v6805_v17  ;;  %v2079_v8 = vrot.slane %v2077_v13, 4  ;;  %v2082_v1 = vrot.slane %v2080_v45, 5  ;;  %v6834_v33 = vrot.slane %v2086_v11, 5  ;;  %v6840_v41 = vld [vmem:[%s6184_s23 + $0x38] sm:$0x1] }
  0x7c   : > { %5800 = vmatmul.mubr.msk.bf16.gmra.mxu1 %vm658_vm3, %v8902_v51  ;;  %v2046_v12 = vrot.slane %v2045_v28, 4  ;;  %v2060_v14 = vrot.slane %v2059_v56, 4  ;;  %v2074_v16 = vrot.slane %v2072_v50, 5  ;;  %v2092_v23 = vrot.slane %v2090_v63, 4  ;;  %v5185_v13 = vld [vmem:[%s6184_s23 + $0x3c] sm:$0xf] }
  0x7d   : > { %5803 = vmatprep.mubr.msk.bf16.mxu1 %vm658_vm3, %v8903_v3  ;;  %v2070_v15 = vrot.slane %v2069_v55, 4  ;;  %v2096_v32 = vshll.u32 %v6809_v21, 16  ;;  %v2101_v20 = vshrl.u32 %v5182_v52, 16  ;;  %v2104_v60 = vshll.u32 %v5182_v52, 16 }
  0x7e   : > { %v2083_v57 = vor.u32 %v2082_v1, %v2079_v8  ;;  %v2093_v6 = vor.u32 %v2092_v23, %v6834_v33  ;;  %v2110_v28 = vshll.u32 %v6832_v5, 16  ;;  %v2114_v56 = vshrl.u32 %v6832_v5, 16  ;;  %v5188_v8 = vld [vmem:[%s6184_s23 + $0x48] sm:$0xf]  ;;  %v6867_v1 = vld [vmem:[%s6184_s23 + $0x4c] sm:$0xf] }
  0x7f   : > { %v2103_v50 = vrot.slane %v2101_v20, 4  ;;  %v2106_v51 = vrot.slane %v2104_v60, 5  ;;  %v8904_v3 = vcombine.low %v6245_v53, %v6249_v58  ;;  %v5091_v55 = vcombine.low %v6817_v18, %v6826_v4 }
  0x80   : > { %v6846_v45 = vrot.slane %v2110_v28, 5  ;;  %v2116_v11 = vrot.slane %v2114_v56, 4  ;;  %v2051_v63 = vsel %vm6228_vm4, %v2046_v12, %v2050_v62  ;;  %v2065_v52 = vsel %vm6228_vm4, %v2060_v14, %v6805_v17 }
  0x81   : > { %5838 = vmatmul.mubr.msk.bf16.gmra.mxu0 %vm658_vm3, %v5085_v61  ;;  %v6849_v61 = vld [vmem:[%s6184_s23 + $0x40] sm:$0xf]  ;;  %v8905_v53 = vcombine.low %v6283_v35, %v6294_v46  ;;  %v2075_v58 = vsel %vm6228_vm4, %v2070_v15, %v2074_v16  ;;  %v2084_v23 = vrot.slane %v2083_v57, 4  ;;  %v2107_v20 = vor.u32 %v2106_v51, %v2103_v50  ;;  %v6901_v50 = vld [vmem:[%s6184_s23 + $0x44] sm:$0x1] }
  0x82   : > { %5841 = vmatprep.mubr.msk.bf16.mxu0 %vm658_vm3, %v5086_v40  ;;  %v2041_v40 = vsel %vm6228_vm4, %v2036_v34, %v6789_v30  ;;  %v2094_v30 = vrot.slane %v2093_v6, 4  ;;  %v2098_v34 = vrot.slane %v2096_v32, 5  ;;  %v2120_v62 = vshll.u32 %v6840_v41, 16  ;;  %v5191_v51 = vld [vmem:[%s6184_s23 + $0x54] sm:$0xf] }
  0x83   : > { %v2125_v12 = vshrl.u32 %v5185_v13, 16  ;;  %v2128_v17 = vshll.u32 %v5185_v13, 16  ;;  %v6878_v14 = vsel %vm707_vm0, %v6609_v22, 0  ;;  %v2117_v35 = vor.u32 %v2116_v11, %v6846_v45 }
  0x84   : > { %5804 = vmatmul.mubr.msk.bf16.gmra.mxu1 %vm658_vm3, %v8904_v3  ;;  %v2134_v46 = vshll.u32 %v6849_v61, 16  ;;  %v2138_v16 = vshrl.u32 %v6849_v61, 16  ;;  %v6883_v15 = vcombine.low %v2041_v40, %v2051_v63  ;;  %v6887_v32 = vsel %vm707_vm0, %v6581_v24, 0  ;;  %v6910_v40 = vld [vmem:[%s6184_s23 + $0x58] sm:$0xf] }
  0x85   : > { %5807 = vmatprep.mubr.msk.bf16.mxu1 %vm658_vm3, %v8905_v53  ;;  %v2149_v60 = vshrl.u32 %v5188_v8, 16  ;;  %v2152_v57 = vshll.u32 %v5188_v8, 16  ;;  %v8906_v6 = vcombine.low %v6696_v25, %v6706_v54  ;;  %v6893_v22 = vcombine.low %v2065_v52, %v2075_v58  ;;  %v6915_v8 = vld [vmem:[%s6184_s23 + $0x50] sm:$0x1] }
  0x86   : > { %v2089_v28 = vsel %vm6228_vm4, %v2084_v23, %v6834_v33  ;;  %v2099_v56 = vsel %vm6228_vm4, %v2094_v30, %v2098_v34  ;;  %v2158_v24 = vshll.u32 %v6867_v1, 16  ;;  %v8907_v25 = vcombine.low %v6710_v39, %v6720_v27  ;;  %v5194_v34 = vld [vmem:[%s6184_s23 + $0x60] sm:$0xf] }
  0x87   : > { %v2108_v54 = vrot.slane %v2107_v20, 4  ;;  %v2122_v13 = vrot.slane %v2120_v62, 5  ;;  %v2127_v11 = vrot.slane %v2125_v12, 4  ;;  %v2130_v3 = vrot.slane %v2128_v17, 5 }
  0x88   : > { %v2118_v33 = vrot.slane %v2117_v35, 4  ;;  %v6912_v63 = vrot.slane %v2134_v46, 5  ;;  %v2140_v52 = vrot.slane %v2138_v16, 4  ;;  %v2162_v53 = vshrl.u32 %v6867_v1, 16  ;;  %v6932_v35 = vld [vmem:[%s6184_s23 + $0x5c] sm:$0x1] }
  0x89   : > { %5842 = vmatmul.mubr.msk.bf16.gmra.mxu0 %vm658_vm3, %v8906_v6  ;;  %v8908_v39 = vcombine.low %v6333_v36, %v6340_v43  ;;  %v2151_v27 = vrot.slane %v2149_v60, 4  ;;  %v2154_v58 = vrot.slane %v2152_v57, 5  ;;  %v2173_v23 = vshrl.u32 %v5191_v51, 16 }
  0x8a   : > { %5845 = vmatprep.mubr.msk.bf16.mxu0 %vm658_vm3, %v8907_v25  ;;  %v2176_v30 = vshll.u32 %v5191_v51, 16  ;;  %v8909_v20 = vcombine.low %v8892_v2, %v8891_v10  ;;  %v6927_v62 = vcombine.low %v2089_v28, %v2099_v56  ;;  %v6929_v12 = vrot.slane %v2158_v24, 5  ;;  %v6945_v28 = vld [vmem:[%s6184_s23 + $0x64] sm:$0xf] }
  0x8b   : > { %v2164_v17 = vrot.slane %v2162_v53, 4  ;;  %v2182_v36 = vshll.u32 %v6910_v40, 16  ;;  %v2144_v43 = vshll.u32 %v6901_v50, 16  ;;  %v2175_v46 = vrot.slane %v2173_v23, 4 }
  0x8c   : > { %5808 = vmatmul.mubr.msk.bf16.gmra.mxu1 %vm658_vm3, %v8908_v39  ;;  %v2178_v16 = vrot.slane %v2176_v30, 5  ;;  %v2186_v60 = vshrl.u32 %v6910_v40, 16  ;;  %v2113_v10 = vsel %vm6228_vm4, %v2108_v54, %v6846_v45  ;;  %v2123_v2 = vsel %vm6228_vm4, %v2118_v33, %v2122_v13  ;;  %v6967_v30 = vld [vmem:[%s6184_s23 + $0x68] sm:$0x1] }
  0x8d   : > { %5811 = vmatprep.mubr.msk.bf16.mxu1 %vm658_vm3, %v8909_v20  ;;  %v2131_v57 = vor.u32 %v2130_v3, %v2127_v11  ;;  %v6942_v6 = vrot.slane %v2182_v36, 5  ;;  %v2141_v56 = vor.u32 %v2140_v52, %v6912_v63  ;;  %v2155_v24 = vor.u32 %v2154_v58, %v2151_v27  ;;  %v5197_v3 = vld [vmem:[%s6184_s23 + $0x6c] sm:$0xf]  ;;  %v6964_v27 = vld [vmem:[%s6184_s23 + $0x70] sm:$0xf] }
  0x8e   : > { %v2168_v51 = vshll.u32 %v6915_v8, 16  ;;  %v2188_v25 = vrot.slane %v2186_v60, 4  ;;  %v8910_v53 = vcombine.low %v6730_v19, %v6750_v9  ;;  %v2165_v45 = vor.u32 %v2164_v17, %v6929_v12 }
  0x8f   : > { %v2179_v54 = vor.u32 %v2178_v16, %v2175_v46  ;;  %v2197_v13 = vshrl.u32 %v5194_v34, 16  ;;  %v2200_v11 = vshll.u32 %v5194_v34, 16  ;;  %v8911_v33 = vcombine.low %v6742_v59, %v6766_v7  ;;  %v5200_v16 = vld [vmem:[%s6184_s23 + $0x78] sm:$0xf] }
  0x90   : > { %v2189_v52 = vor.u32 %v2188_v25, %v6942_v6  ;;  %v2192_v39 = vshll.u32 %v6932_v35, 16  ;;  %v2206_v19 = vshll.u32 %v6945_v28, 16  ;;  %v2210_v9 = vshrl.u32 %v6945_v28, 16 }
  0x91   : > { %5846 = vmatmul.mubr.msk.bf16.gmra.mxu0 %vm658_vm3, %v8910_v53  ;;  %v2132_v58 = vrot.slane %v2131_v57, 4  ;;  %v2146_v23 = vrot.slane %v2144_v43, 5  ;;  %v2199_v34 = vrot.slane %v2197_v13, 4  ;;  %v2202_v20 = vrot.slane %v2200_v11, 5 }
  0x92   : > { %5849 = vmatprep.mubr.msk.bf16.mxu0 %vm658_vm3, %v8911_v33  ;;  %v8912_v59 = vcombine.low %v8895_v26, %v8894_v38  ;;  %v6973_v7 = vcombine.low %v2113_v10, %v2123_v2  ;;  %v2142_v17 = vrot.slane %v2141_v56, 4  ;;  %v2156_v36 = vrot.slane %v2155_v24, 4  ;;  %v6983_v2 = vld [vmem:[%s6184_s23 + $0x7c] sm:$0xf] }
  0x93   : > { %v6975_v46 = vrot.slane %v2206_v19, 5  ;;  %v8913_v43 = vcombine.low %v8898_v42, %v8897_v48  ;;  %v2166_v60 = vrot.slane %v2165_v45, 4  ;;  %v2170_v57 = vrot.slane %v2168_v51, 5  ;;  %8914 = vst [vmem:[#allocation3_spill] sm:$0xff] %v6983_v2  ;;  %v5203_v19 = vld [vmem:[%s6184_s23 + $0x84] sm:$0xf] }
  0x94   : > { %5812 = vmatmul.mubr.msk.bf16.gmra.mxu1 %vm658_vm3, %v8912_v59  ;;  %v2180_v25 = vrot.slane %v2179_v54, 4  ;;  %v2212_v38 = vrot.slane %v2210_v9, 4  ;;  %v2190_v26 = vrot.slane %v2189_v52, 4  ;;  %v2194_v53 = vrot.slane %v2192_v39, 5 }
  0x95   : > { %5815 = vmatprep.mubr.msk.bf16.mxu1 %vm658_vm3, %v8913_v43  ;;  %v2203_v13 = vor.u32 %v2202_v20, %v2199_v34  ;;  %v2221_v10 = vshrl.u32 %v5197_v3, 16  ;;  %v2137_v56 = vsel %vm6228_vm4, %v2132_v58, %v6912_v63  ;;  %v2224_v24 = vshll.u32 %v5197_v3, 16  ;;  %v6094_v63 = vld [vmem:[%s6184_s23 + $0xc] sm:$0xff]   ;;  %v7017_v34 = vld [vmem:[%s6184_s23 + $0x88] sm:$0xf] }
  0x96   : > { %v2230_v48 = vshll.u32 %v6964_v27, 16  ;;  %v2234_v42 = vshrl.u32 %v6964_v27, 16  ;;  %v2147_v51 = vsel %vm6228_vm4, %v2142_v17, %v2146_v23  ;;  %v2161_v45 = vsel %vm6228_vm4, %v2156_v36, %v6929_v12  ;;  %8915 = vst [vmem:[#allocation5_spill] sm:$0xff] %v7017_v34  ;;  %v7026_v36 = vld [vmem:[%s6184_s23 + $0x74] sm:$0x1] }
  0x97   : > { %v2213_v54 = vor.u32 %v2212_v38, %v6975_v46  ;;  %v2216_v11 = vshll.u32 %v6967_v30, 16  ;;  %v2171_v3 = vsel %vm6228_vm4, %v2166_v60, %v2170_v57  ;;  %v2185_v33 = vsel %vm6228_vm4, %v2180_v25, %v6942_v6  ;;  %8917 = vst [vmem:[#allocation4_spill] sm:$0xff] %v7026_v36  ;;  %v7036_v38 = vld [vmem:[%s6184_s23 + $0x80] sm:$0x1] }
  0x98   : > { %v2245_v52 = vshrl.u32 %v5200_v16, 16  ;;  %v2248_v12 = vshll.u32 %v5200_v16, 16  ;;  %v2195_v18 = vsel %vm6228_vm4, %v2190_v26, %v2194_v53  ;;  %v2204_v4 = vrot.slane %v2203_v13, 4  ;;  %8918 = vst [vmem:[#allocation6_spill] sm:$0xff] %v7036_v38  ;;  %v7039_v26 = vld [vmem:[%s6184_s23 + $0x8c] sm:$0x1] }
  0x99   : > { %5850 = vmatmul.mubr.msk.bf16.gmra.mxu0 %vm658_vm3, %v5091_v55  ;;  %v2223_v55 = vrot.slane %v2221_v10, 4  ;;  %v2254_v39 = vshll.u32 %v6983_v2, 16  ;;  %v2226_v9 = vrot.slane %v2224_v24, 5  ;;  %v7013_v58 = vrot.slane %v2230_v48, 5  ;;  %8919 = vst [vmem:[#allocation8_spill] sm:$0xff] %v7039_v26  ;;  %v6095_v10 = vld [vmem:[%s6184_s23 + $0x18] sm:$0xff]  }
  0x9a   : > { %5889 = vmatprep.mubr.msk.bf16.mxu0 %vm658_vm3, %v6883_v15  ;;  %v2236_v23 = vrot.slane %v2234_v42, 4  ;;  %v2258_v6 = vshrl.u32 %v6983_v2, 16  ;;  %v8916_v15 = vcombine.low %v8900_v29, %v6493_v37  ;;  %v7023_v20 = vcombine.low %v2137_v56, %v2147_v51  ;;  %v5206_v51 = vld [vmem:[%s6184_s23 + $0x90] sm:$0xf] }
  0x9b   : > { %v2214_v59 = vrot.slane %v2213_v54, 4  ;;  %v2218_v17 = vrot.slane %v2216_v11, 5  ;;  %v2247_v16 = vrot.slane %v2245_v52, 4  ;;  %v2250_v43 = vrot.slane %v2248_v12, 5 }
  0x9c   : > { %5816 = vmatmul.mubr.msk.bf16.gmra.mxu1 %vm658_vm3, %v8916_v15  ;;  %v7029_v60 = vrot.slane %v2254_v39, 5  ;;  %v2260_v57 = vrot.slane %v2258_v6, 4  ;;  %v2269_v25 = vshrl.u32 %v5203_v19, 16  ;;  %v7031_v37 = vcombine.low %v2161_v45, %v2171_v3  ;;  %v7050_v45 = vld [vmem:[%s6184_s23 + $0x94] sm:$0xf] }
  0x9d   : > { %5855 = vmatprep.mubr.msk.bf16.mxu1 %vm658_vm3, %v6094_v63  ;;  %v7033_v29 = vcombine.low %v2185_v33, %v2195_v18  ;;  %v2272_v53 = vshll.u32 %v5203_v19, 16  ;;  %v2278_v13 = vshll.u32 %v7017_v34, 16  ;;  %v2209_v56 = vsel %vm6228_vm4, %v2204_v4, %v6975_v46  ;;  %8920 = vst [vmem:[#allocation7_spill] sm:$0xff] %v7050_v45  ;;  %v7058_v33 = vld [vmem:[%s8834_s1 + $0x10] sm:$0x3]  ;;  %v6096_v46 = vld [vmem:[%s6184_s23 + $0x24] sm:$0xff]  }
  0x9e   : > { %v2227_v24 = vor.u32 %v2226_v9, %v2223_v55  ;;  %v2237_v48 = vor.u32 %v2236_v23, %v7013_v58  ;;  %v2240_v42 = vshll.u32 %v7026_v36, 16  ;;  %v2271_v54 = vrot.slane %v2269_v25, 4  ;;  %8921 = vst [vmem:[#allocation9_spill] sm:$0xff] %v7058_v33 }
  0x9f   : > { %v2274_v11 = vrot.slane %v2272_v53, 5  ;;  %v7052_v63 = vrot.slane %v2278_v13, 5  ;;  %v2282_v3 = vshrl.u32 %v7017_v34, 16  ;;  %v2219_v52 = vsel %vm6228_vm4, %v2214_v59, %v2218_v17 }
  0xa0   : > { %v2251_v12 = vor.u32 %v2250_v43, %v2247_v16  ;;  %v2261_v18 = vor.u32 %v2260_v57, %v7029_v60  ;;  %v2264_v4 = vshll.u32 %v7036_v38, 16  ;;  %v2293_v19 = vshrl.u32 %v5206_v51, 16  ;;  %v7092_v57 = vld [vmem:[%s6184_s23 + $0xa0] sm:$0xf] }
  0xa1   : > { %5890 = vmatmul.mubr.msk.bf16.vlgmr.msra.gmra.mxu0 %vm658_vm3, %v6893_v22  ;;  %v2275_v55 = vor.u32 %v2274_v11, %v2271_v54  ;;  %v2284_v39 = vrot.slane %v2282_v3, 4  ;;  %v2296_v9 = vshll.u32 %v5206_v51, 16  ;;  %v5209_v22 = vld [vmem:[%s6184_s23 + $0x9c] sm:$0xf]  ;;  %v7071_v23 = vrot.slane %v2227_v24, 4  ;;  %8923 = vst [vmem:[#allocation10_spill] sm:$0xff] %v7092_v57 }
  0xa2   : > { %5956 = vmatpush3.bf16.msra.mxu0 %v6887_v32  ;;  %5893 = vmatprep.mubr.msk.bf16.mxu0 %vm658_vm3, %v6927_v62  ;;  %v7073_v6 = vrot.slane %v2240_v42, 5  ;;  %v2288_v15 = vshll.u32 %v7039_v26, 16  ;;  %v2302_v59 = vshll.u32 %v7050_v45, 16  ;;  %v7080_v32 = vld [vmem:[%s8834_s1 + $0xe] sm:$0x3]  ;;  %v7085_v62 = vcombine.low %v2209_v56, %v2219_v52 }
  0xa3   : > { %8922 = vst [vmem:[#allocation11_spill] sm:$0xff] %v7080_v32  ;;  %6068 = vmatprep.subr.msk.bf16.mxu0 %vm707_vm0, %v7058_v33  ;;  %v7087_v17 = vrot.slane %v2237_v48, 4  ;;  %v2285_v16 = vor.u32 %v2284_v39, %v7052_v63  ;;  %v2306_v43 = vshrl.u32 %v7050_v45, 16  ;;  %v7096_v25 = vrot.slane %v2251_v12, 4  ;;  %v7105_v56 = vld [vmem:[%s6184_s23 + $0x98] sm:$0x1] }
  0xa4   : > { %5856 = vmatmul.mubr.msk.bf16.vlgmr.msra.gmra.mxu1 %vm658_vm3, %v6095_v10  ;;  %v7098_v53 = vrot.slane %v2261_v18, 4  ;;  %v7100_v13 = vrot.slane %v2264_v4, 5  ;;  %v7102_v10 = vrot.slane %v2275_v55, 4  ;;  %8924 = vst [vmem:[#allocation12_spill] sm:$0xff] %v7105_v56  ;;  %v2295_v24 = vrot.slane %v2293_v19, 4  ;;  %v6098_v19 = vld [vmem:[%s6184_s23 + $0x3c] sm:$0xff]  }
  0xa5   : > { %5922 = vmatpush3.bf16.msra.mxu1 %v6878_v14  ;;  %5859 = vmatprep.mubr.msk.bf16.mxu1 %vm658_vm3, %v6096_v46  ;;  %v2298_v48 = vrot.slane %v2296_v9, 5  ;;  %v2317_v42 = vshrl.u32 %v5209_v22, 16  ;;  %v2320_v51 = vshll.u32 %v5209_v22, 16  ;;  %v6097_v14 = vld [vmem:[%s6184_s23 + $0x30] sm:$0xff]   ;;  %v7114_v11 = vrot.slane %v2288_v15, 5 }
  0xa6   : > { %6067 = vmatprep.subr.msk.bf16.mxu1 %vm707_vm0, %v7080_v32  ;;  %v7116_v3 = vrot.slane %v2302_v59, 5  ;;  %v2326_v46 = vshll.u32 %v7092_v57, 16  ;;  %v5212_v52 = vld [vmem:[%s6184_s23 + $0xa8] sm:$0xf]  ;;  %v7120_v12 = vrot.slane %v2285_v16, 4  ;;  %v2308_v18 = vrot.slane %v2306_v43, 4 }
  0xa7   : > { %v2312_v4 = vshll.u32 %v7105_v56, 16  ;;  %v2330_v55 = vshrl.u32 %v7092_v57, 16  ;;  %v7125_v39 = vld [vmem:[%s6184_s23 + $0xac] sm:$0xf]  ;;  %v2299_v59 = vor.u32 %v2298_v48, %v2295_v24  ;;  %v7149_v16 = vld [vmem:[%s6184_s23 + $0xa4] sm:$0x1] }
  0xa8   : > { %8925 = vst [vmem:[#allocation13_spill] sm:$0xff] %v7125_v39  ;;  %8926 = vst [vmem:[#allocation2_spill] sm:$0xff] %v7149_v16  ;;  %v2319_v43 = vrot.slane %v2317_v42, 4  ;;  %v2322_v22 = vrot.slane %v2320_v51, 5  ;;  %v2341_v54 = vshrl.u32 %v5212_v52, 16  ;;  %v7151_v9 = vrot.slane %v2326_v46, 5 }
  0xa9   : > { %5894 = vmatmul.mubr.msk.bf16.gmra.mxu0 %vm658_vm3, %v6973_v7  ;;  %v2332_v32 = vrot.slane %v2330_v55, 4  ;;  %v2344_v15 = vshll.u32 %v5212_v52, 16  ;;  %v2350_v33 = vshll.u32 %v7125_v39, 16  ;;  %v5215_v57 = vld [vmem:[%s6184_s23 + $0xb4] sm:$0xf]  ;;  %v2309_v24 = vor.u32 %v2308_v18, %v7116_v3 }
  0xaa   : > { %5897 = vmatprep.mubr.msk.bf16.mxu0 %vm658_vm3, %v7023_v20  ;;  %v2291_v20 = vsel %vm6228_vm4, %v7120_v12, %v7114_v11  ;;  %v7161_v48 = vrot.slane %v2312_v4, 5  ;;  %v7164_v42 = vld [vmem:[%s6184_s23 + $0xb0] sm:$0x1]  ;;  %v2343_v51 = vrot.slane %v2341_v54, 4  ;;  %v7167_v46 = vld [vmem:[%s6184_s23 + $0xb8] sm:$0xf]  ;;  %v2323_v18 = vor.u32 %v2322_v22, %v2319_v43 }
  0xab   : > { %8927 = vst [vmem:[#allocation14_spill] sm:$0xff] %v7164_v42  ;;  %8928 = vst [vmem:[#allocation15_spill] sm:$0xff] %v7167_v46  ;;  %v2346_v52 = vrot.slane %v2344_v15, 5  ;;  %v7171_v55 = vrot.slane %v2350_v33, 5  ;;  %v2354_v11 = vshrl.u32 %v7125_v39, 16  ;;  %v7174_v12 = vrot.slane %v2299_v59, 4 }
  0xac   : > { %5860 = vmatmul.mubr.msk.bf16.gmra.mxu1 %vm658_vm3, %v6097_v14  ;;  %v2336_v14 = vshll.u32 %v7149_v16, 16  ;;  %v7177_v4 = vld [vmem:[%s6184_s23 + $0xbc] sm:$0x1]  ;;  %v2365_v54 = vshrl.u32 %v5215_v57, 16  ;;  %v2368_v7 = vshll.u32 %v5215_v57, 16  ;;  %v2333_v56 = vor.u32 %v2332_v32, %v7151_v9  ;;  %v6099_v16 = vld [vmem:[%s6184_s23 + $0x48] sm:$0xff]  }
  0xad   : > { %5863 = vmatprep.mubr.msk.bf16.mxu1 %vm658_vm3, %v6098_v19  ;;  %v2356_v45 = vrot.slane %v2354_v11, 4  ;;  %v2360_v19 = vshll.u32 %v7164_v42, 16  ;;  %v2374_v15 = vshll.u32 %v7167_v46, 16  ;;  %v5218_v33 = vld [vmem:[%s6184_s23 + $0xc0] sm:$0xf]  ;;  %v2347_v26 = vor.u32 %v2346_v52, %v2343_v51  ;;  %v6100_v57 = vld [vmem:[%s6184_s23 + $0x54] sm:$0xff]  }
  0xae   : > { %v2367_v39 = vrot.slane %v2365_v54, 4  ;;  %v2370_v34 = vrot.slane %v2368_v7, 5  ;;  %v2378_v59 = vshrl.u32 %v7167_v46, 16  ;;  %v7186_v22 = vld [vmem:[%s6184_s23 + $0xc4] sm:$0xf]  ;;  %v2310_v43 = vrot.slane %v2309_v24, 4 }
  0xaf   : > { %v2338_v32 = vrot.slane %v2336_v14, 5  ;;  %v2357_v11 = vor.u32 %v2356_v45, %v7171_v55  ;;  %v2376_v42 = vrot.slane %v2374_v15, 5  ;;  %v2384_v7 = vshll.u32 %v7177_v4, 16  ;;  %v7198_v45 = vld [vmem:[%s6184_s23 + $0xc8] sm:$0x1] }
  0xb0   : > { %v2371_v51 = vor.u32 %v2370_v34, %v2367_v39  ;;  %v2380_v52 = vrot.slane %v2378_v59, 4  ;;  %v2389_v54 = vshrl.u32 %v5218_v33, 16  ;;  %v2324_v46 = vrot.slane %v2323_v18, 4 }
  0xb1   : > { %5898 = vmatmul.mubr.msk.bf16.gmra.mxu0 %vm658_vm3, %v7031_v37  ;;  %v2334_v38 = vrot.slane %v2333_v56, 4  ;;  %v2392_v2 = vshll.u32 %v5218_v33, 16  ;;  %v2398_v37 = vshll.u32 %v7186_v22, 16  ;;  %v2348_v24 = vrot.slane %v2347_v26, 4 }
  0xb2   : > { %5901 = vmatprep.mubr.msk.bf16.mxu0 %vm658_vm3, %v7033_v29  ;;  %v2362_v14 = vrot.slane %v2360_v19, 5  ;;  %v2381_v36 = vor.u32 %v2380_v52, %v2376_v42  ;;  %v2391_v15 = vrot.slane %v2389_v54, 4  ;;  %v2358_v34 = vrot.slane %v2357_v11, 4 }
  0xb3   : > { %v2394_v29 = vrot.slane %v2392_v2, 5  ;;  %v7201_v39 = vrot.slane %v2398_v37, 5  ;;  %v2402_v56 = vshrl.u32 %v7186_v22, 16  ;;  %v8929_v26 = vsel %vm6228_vm4, %v7087_v17, %v7073_v6 }
  0xb4   : > { %5864 = vmatmul.mubr.msk.bf16.gmra.mxu1 %vm658_vm3, %v6099_v16  ;;  %v8930_v16 = vsel %vm6228_vm4, %v7071_v23, %v7013_v58  ;;  %v2372_v19 = vrot.slane %v2371_v51, 4  ;;  %v2382_v33 = vrot.slane %v2381_v36, 4  ;;  %v2386_v2 = vrot.slane %v2384_v7, 5  ;;  %v6101_v23 = vld [vmem:[%s6184_s23 + $0x60] sm:$0xff]  }
  0xb5   : > { %5867 = vmatprep.mubr.msk.bf16.mxu1 %vm658_vm3, %v6100_v57  ;;  %v5230_v18 = vcombine.low %v8930_v16, %v8929_v26  ;;  %v8931_v59 = vsel %vm6228_vm4, %v7098_v53, %v7100_v13  ;;  %v8932_v6 = vsel %vm6228_vm4, %v7096_v25, %v7029_v60  ;;  %v2395_v57 = vor.u32 %v2394_v29, %v2391_v15  ;;  %v5256_v13 = vld [vmem:[%s6184_s23 + $0x24] sm:$0xe]  ;;  %v5259_v26 = vld [vmem:[%s6184_s23 + $0x48] sm:$0xe] }
  0xb6   : > { %v5231_v17 = vcombine.low %v8932_v6, %v8931_v59  ;;  %v2404_v11 = vrot.slane %v2402_v56, 4  ;;  %v2408_v58 = vshll.u32 %v7198_v45, 16  ;;  %v8933_v36 = vsel %vm6228_vm4, %v7102_v10, %v7052_v63  ;;  %v6102_v63 = vld [vmem:[%s6184_s23 + $0x6c] sm:$0xff]   ;;  %v5260_v6 = vld [vmem:[%s6184_s23 + $0x54] sm:$0xe] }
  0xb7   : > { %v5232_v51 = vcombine.low %v8933_v36, %v2291_v20  ;;  %v2305_v53 = vsel %vm6228_vm4, %v7174_v12, %v7116_v3  ;;  %v2315_v60 = vsel %vm6228_vm4, %v2310_v43, %v7161_v48  ;;  %v2329_v25 = vsel %vm6228_vm4, %v2324_v46, %v7151_v9  ;;  %v7254_v12 = vld [vmem:[%s6184_s23 + $0xc] sm:$0xe] }
  0xb8   : > { %v2339_v10 = vsel %vm6228_vm4, %v2334_v38, %v2338_v32  ;;  %v2353_v3 = vsel %vm6228_vm4, %v2348_v24, %v7171_v55  ;;  %v2363_v20 = vsel %vm6228_vm4, %v2358_v34, %v2362_v14  ;;  %v2405_v48 = vor.u32 %v2404_v11, %v7201_v39  ;;  %v5257_v55 = vld [vmem:[%s6184_s23 + $0x30] sm:$0xe]  ;;  %v5258_v14 = vld [vmem:[%s6184_s23 + $0x3c] sm:$0xe] }
  0xb9   : > { %5902 = vmatmul.mubr.msk.bf16.gmra.mxu0 %vm658_vm3, %v7085_v62  ;;  %v2377_v62 = vsel %vm6228_vm4, %v2372_v19, %v2376_v42  ;;  %v2387_v38 = vsel %vm6228_vm4, %v2382_v33, %v2386_v2  ;;  %v7261_v9 = vrot.slane %v2395_v57, 4  ;;  %v2772_v46 = vrot.slane %v6745_v49, 5  ;;  %v6103_v57 = vld [vmem:[%s6184_s23 + $0x78] sm:$0xff]  }
  0xba   : > { %5905 = vmatprep.mubr.msk.bf16.mxu0 %vm658_vm3, %v5230_v18  ;;  %v7265_v43 = vcombine.low %v2305_v53, %v2315_v60  ;;  %v7267_v32 = vrot.slane %v2405_v48, 4  ;;  %v7269_v52 = vrot.slane %v2408_v58, 5  ;;  %v5272_v7 = vrot.slane %v5256_v13, 9  ;;  %v6104_v53 = vld [vmem:[%s6184_s23 + $0x84] sm:$0xff]   ;;  %v5261_v13 = vld [vmem:[%s6184_s23 + $0x60] sm:$0xe] }
  0xbb   : > { %v7272_v54 = vcombine.low %v2329_v25, %v2339_v10  ;;  %v7274_v42 = vcombine.low %v2353_v3, %v2363_v20  ;;  %v5270_v37 = vrot.slane %v7254_v12, 9  ;;  %v2786_v24 = vrot.slane %v6794_v44, 5  ;;  %v6110_v49 = vld [vmem:[%s6184_s23 + $0x18] sm:$0xff]  }
  0xbc   : > { %5868 = vmatmul.mubr.msk.bf16.gmra.mxu1 %vm658_vm3, %v6101_v23  ;;  %v7280_v15 = vcombine.low %v2377_v62, %v2387_v38  ;;  %v2775_v34 = vrot.slane %v6781_v47, 5  ;;  %v2789_v29 = vrot.slane %v6809_v21, 5  ;;  %v5273_v56 = vrot.slane %v5257_v55, 9  ;;  %v5263_v55 = vld [vmem:[%s6184_s23 + $0x78] sm:$0xe] }
  0xbd   : > { %5871 = vmatprep.mubr.msk.bf16.mxu1 %vm658_vm3, %v6102_v63  ;;  %v2401_v16 = vsel %vm6228_vm4, %v7261_v9, %v7201_v39  ;;  %v7291_v44 = vrot.slane %v2772_v46, 4  ;;  %v7295_v18 = vsel %vm6514_vm7, %v5272_v7, %v2786_v24  ;;  %v2788_v19 = vrot.slane %v2786_v24, 4 }
  0xbe   : > { %v2411_v21 = vsel %vm6228_vm4, %v7267_v32, %v7269_v52  ;;  %v2793_v33 = vrot.slane %v6832_v5, 5  ;;  %v2796_v2 = vrot.slane %v6840_v41, 5  ;;  %v5274_v59 = vrot.slane %v5258_v14, 9  ;;  %v6109_v52 = vld [vmem:[%s6184_s23 + $0xc0] sm:$0xff]  }
  0xbf   : > { %v7307_v11 = vsel %vm6514_vm7, %v2788_v19, %v2789_v29  ;;  %v2800_v58 = vrot.slane %v6849_v61, 5  ;;  %v2803_v23 = vrot.slane %v6901_v50, 5  ;;  %v5275_v36 = vrot.slane %v5259_v26, 9  ;;  %v5264_v19 = vld [vmem:[%s6184_s23 + $0x84] sm:$0xe] }
  0xc0   : > { %v5289_v5 = vcombine.low %v7295_v18, %v7307_v11  ;;  %v7317_v41 = vsel %vm6514_vm7, %v5273_v56, %v2793_v33  ;;  %v2795_v60 = vrot.slane %v2793_v33, 4  ;;  %v2807_v25 = vrot.slane %v6867_v1, 5 }
  0xc1   : > { %5906 = vmatmul.mubr.msk.bf16.gmra.mxu0 %vm658_vm3, %v5231_v17  ;;  %v7324_v61 = vsel %vm6514_vm7, %v5274_v59, %v2800_v58  ;;  %v2802_v50 = vrot.slane %v2800_v58, 4  ;;  %v2810_v17 = vrot.slane %v6915_v8, 5  ;;  %v5276_v63 = vrot.slane %v5260_v6, 9  ;;  %v8934_v59 = vld [vmem:[#allocation4_spill] sm:$0xff] }
  0xc2   : > { %5909 = vmatprep.mubr.msk.bf16.mxu0 %vm658_vm3, %v5232_v51  ;;  %v7329_v10 = vsel %vm6514_vm7, %v2795_v60, %v2796_v2  ;;  %v7333_v3 = vsel %vm6514_vm7, %v5275_v36, %v2807_v25  ;;  %v2809_v1 = vrot.slane %v2807_v25, 4  ;;  %v2814_v20 = vrot.slane %v6910_v40, 5  ;;  %v5262_v51 = vld [vmem:[%s6184_s23 + $0x6c] sm:$0xe]  ;;  %v6105_v58 = vld [vmem:[%s6184_s23 + $0x90] sm:$0xff]  }
  0xc3   : > { %v5290_v48 = vcombine.low %v7317_v41, %v7329_v10  ;;  %v7342_v8 = vsel %vm6514_vm7, %v2802_v50, %v2803_v23  ;;  %v2817_v62 = vrot.slane %v6932_v35, 5  ;;  %v5277_v38 = vrot.slane %v5261_v13, 9  ;;  %v8935_v36 = vld [vmem:[#allocation3_spill] sm:$0xff]  ;;  %v5265_v60 = vld [vmem:[%s6184_s23 + $0x90] sm:$0xe]  ;;  %v8936_v50 = vld [vmem:[#allocation6_spill] sm:$0xff] }
  0xc4   : > { %5872 = vmatmul.mubr.msk.bf16.gmra.mxu1 %vm658_vm3, %v6103_v57  ;;  %v5291_v40 = vcombine.low %v7324_v61, %v7342_v8  ;;  %v7351_v7 = vsel %vm6514_vm7, %v2809_v1, %v2810_v17  ;;  %v7355_v24 = vsel %vm6514_vm7, %v5276_v63, %v2814_v20  ;;  %v2816_v14 = vrot.slane %v2814_v20, 4 }
  0xc5   : > { %5875 = vmatprep.mubr.msk.bf16.mxu1 %vm658_vm3, %v6104_v53  ;;  %v5292_v35 = vcombine.low %v7333_v3, %v7351_v7  ;;  %v2821_v29 = vrot.slane %v6945_v28, 5  ;;  %v2824_v56 = vrot.slane %v6967_v30, 5  ;;  %v5278_v26 = vrot.slane %v5262_v51, 9  ;;  %v8937_v51 = vld [vmem:[#allocation5_spill] sm:$0xff]  ;;  %v5396_v3 = vld [vmem:[%s6184_s23 + $0x48] sm:$0xf] }
  0xc6   : > { %v7364_v33 = vsel %vm6514_vm7, %v2816_v14, %v2817_v62  ;;  %v2828_v2 = vrot.slane %v6964_v27, 5  ;;  %v2831_v6 = vrot.slane %v8934_v59, 5  ;;  %v5279_v57 = vrot.slane %v5263_v55, 9  ;;  %v6106_v27 = vld [vmem:[%s6184_s23 + $0x9c] sm:$0xff]   ;;  %v8945_v55 = vld [vmem:[#allocation15_spill] sm:$0xff] }
  0xc7   : > { %v5293_v23 = vcombine.low %v7355_v24, %v7364_v33  ;;  %v7373_v28 = vsel %vm6514_vm7, %v5277_v38, %v2821_v29  ;;  %v2823_v30 = vrot.slane %v2821_v29, 4  ;;  %v2835_v53 = vrot.slane %v8935_v36, 5  ;;  %v5266_v38 = vld [vmem:[%s6184_s23 + $0x9c] sm:$0xe]  ;;  %v8940_v36 = vld [vmem:[#allocation12_spill] sm:$0xff] }
  0xc8   : > { %v7382_v25 = vsel %vm6514_vm7, %v5278_v26, %v2828_v2  ;;  %v2830_v13 = vrot.slane %v2828_v2, 4  ;;  %v2838_v17 = vrot.slane %v8936_v50, 5  ;;  %v5280_v63 = vrot.slane %v5264_v19, 9  ;;  %v5267_v26 = vld [vmem:[%s6184_s23 + $0xa8] sm:$0xe] }
  0xc9   : > { %5910 = vmatmul.mubr.msk.bf16.gmra.mxu0 %vm658_vm3, %v7265_v43  ;;  %v7389_v1 = vsel %vm6514_vm7, %v2823_v30, %v2824_v56  ;;  %v7393_v43 = vsel %vm6514_vm7, %v5279_v57, %v2835_v53  ;;  %v2837_v20 = vrot.slane %v2835_v53, 4  ;;  %v2842_v62 = vrot.slane %v8937_v51, 5  ;;  %v5269_v57 = vld [vmem:[%s6184_s23 + $0xc0] sm:$0xe]  ;;  %v6107_v19 = vld [vmem:[%s6184_s23 + $0xa8] sm:$0xff]  }
  0xca   : > { %5913 = vmatprep.mubr.msk.bf16.mxu0 %vm658_vm3, %v7272_v54  ;;  %v7401_v14 = vsel %vm6514_vm7, %v2830_v13, %v2831_v6  ;;  %v8938_v54 = vld [vmem:[#allocation8_spill] sm:$0xff]  ;;  %v5281_v56 = vrot.slane %v5265_v60, 9  ;;  %v2852_v53 = vrot.slane %v8940_v36, 5  ;;  %v5282_v60 = vrot.slane %v5266_v38, 9  ;;  %v8943_v38 = vld [vmem:[#allocation13_spill] sm:$0xff] }
  0xcb   : > { %v2845_v29 = vrot.slane %v8938_v54, 5  ;;  %v7410_v2 = vsel %vm6514_vm7, %v2837_v20, %v2838_v17  ;;  %v7414_v59 = vsel %vm6514_vm7, %v5280_v63, %v2842_v62  ;;  %v2844_v6 = vrot.slane %v2842_v62, 4  ;;  %v5268_v13 = vld [vmem:[%s6184_s23 + $0xb4] sm:$0xe]  ;;  %v8941_v17 = vld [vmem:[#allocation10_spill] sm:$0xff] }
  0xcc   : > { %5876 = vmatmul.mubr.msk.bf16.gmra.mxu1 %vm658_vm3, %v6105_v58  ;;  %v8939_v58 = vld [vmem:[#allocation7_spill] sm:$0xff]  ;;  %v2856_v63 = vrot.slane %v8941_v17, 5  ;;  %v8942_v20 = vld [vmem:[#allocation2_spill] sm:$0xff]  ;;  %v5283_v62 = vrot.slane %v5267_v26, 9  ;;  %v2863_v36 = vrot.slane %v8943_v38, 5  ;;  %v5284_v26 = vrot.slane %v5268_v13, 9 }
  0xcd   : > { %5879 = vmatprep.mubr.msk.bf16.mxu1 %vm658_vm3, %v6106_v27  ;;  %v2849_v30 = vrot.slane %v8939_v58, 5  ;;  %v7424_v50 = vsel %vm6514_vm7, %v2844_v6, %v2845_v29  ;;  %v2859_v51 = vrot.slane %v8942_v20, 5  ;;  %v8944_v17 = vld [vmem:[#allocation14_spill] sm:$0xff]  ;;  %v6108_v27 = vld [vmem:[%s6184_s23 + $0xb4] sm:$0xff]   ;;  %v2776_v39 = vsel %vm6514_vm7, %v7291_v44, %v2775_v34  ;;  %v7641_v7 = vld [vmem:[%s6184_s23 + $0x4c] sm:$0xf] }
  0xce   : > { %v7439_v29 = vsel %vm6514_vm7, %v5282_v60, %v2856_v63  ;;  %v2858_v6 = vrot.slane %v2856_v63, 4  ;;  %v2866_v20 = vrot.slane %v8944_v17, 5  ;;  %v2865_v38 = vrot.slane %v2863_v36, 4  ;;  %v6127_v44 = vld [vmem:[%s6184_s23 + $0x20] sm:$0x1] }
  0xcf   : > { %v7432_v54 = vsel %vm6514_vm7, %v5281_v56, %v2849_v30  ;;  %v2851_v58 = vrot.slane %v2849_v30, 4  ;;  %v7451_v30 = vsel %vm6514_vm7, %v5283_v62, %v2863_v36  ;;  %v2870_v60 = vrot.slane %v8945_v55, 5 }
  0xd0   : > { %v5285_v63 = vrot.slane %v5269_v57, 9  ;;  %v7467_v55 = vsel %vm6514_vm7, %v2865_v38, %v2866_v20  ;;  %v2877_v57 = vrot.slane %v7186_v22, 5  ;;  %v2773_v22 = vsel %vm6514_vm7, %v5270_v37, %v2772_v46  ;;  %v6112_v38 = vld [vmem:[%s6184_s23 + $0x30] sm:$0xff]  }
  0xd1   : > { %5914 = vmatmul.mubr.msk.bf16.gmra.mxu0 %vm658_vm3, %v7274_v42  ;;  %v7447_v56 = vsel %vm6514_vm7, %v2851_v58, %v2852_v53  ;;  %v7460_v42 = vsel %vm6514_vm7, %v2858_v6, %v2859_v51  ;;  %v2873_v53 = vrot.slane %v7177_v4, 5  ;;  %v2872_v58 = vrot.slane %v2870_v60, 4 }
  0xd2   : > { %5917 = vmatprep.mubr.msk.bf16.mxu0 %vm658_vm3, %v7280_v15  ;;  %v7471_v15 = vsel %vm6514_vm7, %v5284_v26, %v2870_v60  ;;  %v2880_v51 = vrot.slane %v7198_v45, 5  ;;  %v5255_v45 = vld [vmem:[%s6184_s23 + $0x18] sm:$0xe]  ;;  %v7511_v9 = vsel %vm6514_vm7, %v5285_v63, %v2877_v57  ;;  %v2879_v46 = vrot.slane %v2877_v57, 4  ;;  %v6111_v26 = vld [vmem:[%s6184_s23 + $0x24] sm:$0xff]  }
  0xd3   : > { %v7499_v32 = vsel %vm6514_vm7, %v2872_v58, %v2873_v53  ;;  %v5271_v37 = vrot.slane %v5255_v45, 9  ;;  %v5287_v34 = vcombine.low %v2773_v22, %v2776_v39  ;;  %v8946_v60 = vld [vmem:[#allocation9_spill] sm:$0xff] }
  0xd4   : > { %5880 = vmatmul.mubr.msk.bf16.gmra.mxu1 %vm658_vm3, %v6107_v19  ;;  %v5237_v19 = vcombine.low %v2401_v16, %v2411_v21  ;;  %v7516_v47 = vsel %vm6514_vm7, %v2879_v46, %v2880_v51  ;;  %v2782_v21 = vrot.slane %v6127_v44, 5  ;;  %v4536_v53 = vsel %vm707_vm0, %v8946_v60, 0  ;;  %v5384_v63 = vld [vmem:[%s6184_s23 + $0x18] sm:$0xf]  ;;  %v5385_v57 = vld [vmem:[%s6184_s23 + $0x1c] sm:$0xf] }
  0xd5   : > { %5883 = vmatprep.mubr.msk.bf16.mxu1 %vm658_vm3, %v6108_v27  ;;  %v6126_v27 = vld [vmem:[%s6184_s23 + $0x1c] sm:$0xf]  ;;  %v5387_v51 = vld [vmem:[%s6184_s23 + $0x24] sm:$0xf]  ;;  %v3584_v45 = vshrl.u32 %v5384_v63, 16  ;;  %v3593_v39 = vshll.u32 %v5385_v57, 16 }
  0xd6   : > { %v2779_v36 = vrot.slane %v6126_v27, 5  ;;  %v3587_v27 = vshll.u32 %v5384_v63, 16  ;;  %v3608_v46 = vshrl.u32 %v5387_v51, 16  ;;  %v6114_v44 = vld [vmem:[%s6184_s23 + $0x48] sm:$0xff]   ;;  %v5465_v60 = vld [vmem:[%s6184_s23 + $0x18] sm:$0xe] }
  0xd7   : > { %v7557_v63 = vld [vmem:[%s6184_s23 + $0x2c] sm:$0x1] }
  0xd8   : > { %v2781_v16 = vrot.slane %v2779_v36, 4  ;;  %v2780_v17 = vsel %vm6514_vm7, %v5271_v37, %v2779_v36  ;;  %v7541_v36 = vld [vmem:[%s6184_s23 + $0x28] sm:$0xf]  ;;  %v6113_v37 = vld [vmem:[%s6184_s23 + $0x3c] sm:$0xff]   ;;  %v3610_v18 = vrot.slane %v3608_v46, 4 }
  0xd9   : > { %5918 = vmatmul.mubr.msk.bf16.gmra.mxu0 %vm658_vm3, %v5237_v19  ;;  %v8947_v19 = vld [vmem:[#allocation11_spill] sm:$0xff] }
  0xda   : > { %5957 = vmatprep.mubr.msk.bf16.mxu0 %vm658_vm3, %v6110_v49  ;;  %v2783_v20 = vsel %vm6514_vm7, %v2781_v16, %v2782_v21  ;;  %v4066_v22 = vsel %vm707_vm0, %v8947_v19, 0  ;;  %v3597_v49 = vshrl.u32 %v5385_v57, 16  ;;  %v3621_v16 = vshrl.u32 %v7541_v36, 16  ;;  %v5386_v21 = vld [vmem:[%s6184_s23 + $0x20] sm:$0x1] }
  0xdb   : > { %v5288_v58 = vcombine.low %v2780_v17, %v2783_v20  ;;  %v3586_v17 = vrot.slane %v3584_v45, 4  ;;  %v3589_v20 = vrot.slane %v3587_v27, 5  ;;  %v5390_v19 = vld [vmem:[%s6184_s23 + $0x30] sm:$0xf]  ;;  %v3603_v45 = vshll.u32 %v5386_v21, 16 }
  0xdc   : > { %5884 = vmatmul.mubr.msk.bf16.gmra.mxu1 %vm658_vm3, %v6109_v52  ;;  %v3611_v52 = vshll.u32 %v5387_v51, 16  ;;  %v3623_v51 = vrot.slane %v3621_v16, 4  ;;  %v5481_v27 = vrot.slane %v5465_v60, 9  ;;  %v4330_v46 = vrot.slane %v5386_v21, 5  ;;  %v5466_v16 = vld [vmem:[%s6184_s23 + $0x24] sm:$0xe] }
  0xdd   : > { %5923 = vmatprep.mubr.msk.bf16.mxu1 %vm658_vm3, %v5287_v34  ;;  %v3617_v34 = vshll.u32 %v7541_v36, 16  ;;  %v6115_v21 = vld [vmem:[%s6184_s23 + $0x54] sm:$0xff]   ;;  %v3635_v10 = vshll.u32 %v5390_v19, 16  ;;  %v6116_v60 = vld [vmem:[%s6184_s23 + $0x60] sm:$0xff]  }
  0xde   : > { %v3613_v11 = vrot.slane %v3611_v52, 5  ;;  %v3627_v52 = vshll.u32 %v7557_v63, 16 }
  0xe1   : > { %5958 = vmatmul.mubr.msk.bf16.vlgmr.msra.gmra.mxu0 %vm658_vm3, %v6111_v26  ;;  %v7553_v26 = vrot.slane %v3593_v39, 5 }
  0xe2   : > { %6024 = vmatpush3.bf16.msra.mxu0 %v4536_v53  ;;  %5961 = vmatprep.mubr.msk.bf16.mxu0 %vm658_vm3, %v6112_v38  ;;  %v3599_v38 = vrot.slane %v3597_v49, 4  ;;  %v4327_v53 = vrot.slane %v5385_v57, 5  ;;  %v7567_v57 = vld [vmem:[%s6184_s23 + $0x34] sm:$0xf] }
  0xe4   : > { %5924 = vmatmul.mubr.msk.bf16.vlgmr.msra.gmra.mxu1 %vm658_vm3, %v5288_v58  ;;  %v7562_v58 = vrot.slane %v3617_v34, 5  ;;  %v3600_v39 = vor.u32 %v3599_v38, %v7553_v26  ;;  %v4329_v49 = vrot.slane %v4327_v53, 4  ;;  %v3614_v34 = vor.u32 %v3613_v11, %v3610_v18 }
  0xe5   : > { %5990 = vmatpush3.bf16.msra.mxu1 %v4066_v22  ;;  %5927 = vmatprep.mubr.msk.bf16.mxu1 %vm658_vm3, %v5289_v5  ;;  %v7560_v5 = vpop.f32.mrf.mxu0  ;;  %v3590_v22 = vor.u32 %v3589_v20, %v3586_v17  ;;  %v3632_v17 = vshrl.u32 %v5390_v19, 16  ;;  %v3645_v38 = vshrl.u32 %v7567_v57, 16  ;;  %v7592_v61 = vsel %vm6514_vm7, %v5481_v27, %v4327_v53  ;;  %v5393_v19 = vld [vmem:[%s6184_s23 + $0x3c] sm:$0xf] }
  0xe6   : > { %v3624_v41 = vor.u32 %v3623_v51, %v7562_v58  ;;  %v3601_v8 = vrot.slane %v3600_v39, 4  ;;  %v3629_v11 = vrot.slane %v3627_v52, 5  ;;  %v5482_v51 = vrot.slane %v5466_v16, 9  ;;  %v7606_v39 = vld [vmem:[%s6184_s23 + $0x38] sm:$0x1] }
  0xe7   : > { %v7584_v20 = vpop.f32.mrf.mxu0  ;;  %v3591_v18 = vrot.slane %v3590_v22, 4  ;;  %v3615_v12 = vrot.slane %v3614_v34, 4  ;;  %v4337_v22 = vrot.slane %v7557_v63, 5  ;;  %v3647_v52 = vrot.slane %v3645_v38, 4 }
  0xe8   : > { %v3625_v27 = vrot.slane %v3624_v41, 4  ;;  %v3656_v34 = vshrl.u32 %v5393_v19, 16  ;;  %v3659_v16 = vshll.u32 %v5393_v19, 16  ;;  %v7619_v41 = vld [vmem:[%s6184_s23 + $0x40] sm:$0xf] }
  0xe9   : > { %5962 = vmatmul.mubr.msk.bf16.gmra.mxu0 %vm658_vm3, %v6113_v37  ;;  %v7603_v53 = vpop.f32.mrf.mxu0  ;;  %v3596_v63 = vsel %vm6228_vm4, %v3591_v18, %v7553_v26  ;;  %v3620_v26 = vsel %vm6228_vm4, %v3615_v12, %v7562_v58  ;;  %v5467_v18 = vld [vmem:[%s6184_s23 + $0x30] sm:$0xe]  ;;  %v3665_v24 = vshll.u32 %v7619_v41, 16  ;;  %v3669_v33 = vshrl.u32 %v7619_v41, 16 }
  0xea   : > { %5965 = vmatprep.mubr.msk.bf16.mxu0 %vm658_vm3, %v6114_v44  ;;  %v7575_v37 = vpop.f32.mrf.mxu1  ;;  %v4334_v44 = vrot.slane %v7541_v36, 5  ;;  %v3605_v36 = vrot.slane %v3603_v45, 5  ;;  %v3634_v45 = vrot.slane %v3632_v17, 4  ;;  %v3630_v58 = vsel %vm6228_vm4, %v3625_v27, %v3629_v11 }
  0xeb   : > { %8948 = vst [vmem:[#allocation4_spill] sm:$0xff] %v7575_v37  ;;  %v7648_v12 = vpop.f32.mrf.mxu0  ;;  %v3661_v19 = vrot.slane %v3659_v16, 5  ;;  %v3693_v11 = vshrl.u32 %v7641_v7, 16 }
  0xec   : > { %5928 = vmatmul.mubr.msk.bf16.gmra.mxu1 %vm658_vm3, %v5290_v48  ;;  %v3641_v48 = vshll.u32 %v7567_v57, 16  ;;  %v7599_v6 = vpop.f32.mrf.mxu1  ;;  %v4336_v4 = vrot.slane %v4334_v44, 4  ;;  %v3606_v17 = vsel %vm6228_vm4, %v3601_v8, %v3605_v36  ;;  %v4341_v36 = vrot.slane %v7567_v57, 5  ;;  %v6118_v8 = vld [vmem:[%s6184_s23 + $0x78] sm:$0xff]  }
  0xed   : > { %5931 = vmatprep.mubr.msk.bf16.mxu1 %vm658_vm3, %v5291_v40  ;;  %v7596_v40 = vsel %vm6514_vm7, %v4329_v49, %v4330_v46  ;;  %8949 = vst [vmem:[#allocation3_spill] sm:$0xff] %v7599_v6  ;;  %v3637_v49 = vrot.slane %v3635_v10, 5  ;;  %v7662_v27 = vcombine.low %v3596_v63, %v3606_v17  ;;  %v7664_v57 = vcombine.low %v3620_v26, %v3630_v58  ;;  %v7678_v17 = vld [vmem:[%s6184_s23 + $0x58] sm:$0xf]  ;;  %v7684_v58 = vld [vmem:[%s6184_s23 + $0x44] sm:$0x1] }
  0xee   : > { %v7608_v46 = vrot.slane %v3641_v48, 5  ;;  %v7625_v10 = vpop.f32.mrf.mxu1  ;;  %v7632_v48 = vsel %vm6514_vm7, %v5482_v51, %v4334_v44  ;;  %v7636_v38 = vsel %vm6514_vm7, %v4336_v4, %v4337_v22  ;;  %v3658_v51 = vrot.slane %v3656_v34, 4  ;;  %v5399_v34 = vld [vmem:[%s6184_s23 + $0x54] sm:$0xf] }
  0xef   : > { %8950 = vst [vmem:[#allocation6_spill] sm:$0xff] %v7625_v10  ;;  %v3638_v44 = vor.u32 %v3637_v49, %v3634_v45  ;;  %v3683_v22 = vshll.u32 %v5396_v3, 16  ;;  %v4343_v13 = vrot.slane %v4341_v36, 4  ;;  %v4344_v63 = vrot.slane %v7606_v39, 5  ;;  %v5468_v49 = vld [vmem:[%s6184_s23 + $0x3c] sm:$0xe] }
  0xf0   : > { %v3648_v4 = vor.u32 %v3647_v52, %v7608_v46  ;;  %v7660_v45 = vpop.f32.mrf.mxu1  ;;  %v5483_v52 = vrot.slane %v5467_v18, 9  ;;  %v3662_v18 = vor.u32 %v3661_v19, %v3658_v51  ;;  %v8953_v6 = vcombine.low %v7373_v28, %v7389_v1 }
  0xf1   : > { %5966 = vmatmul.mubr.msk.bf16.gmra.mxu0 %vm658_vm3, %v6115_v21  ;;  %v3689_v21 = vshll.u32 %v7641_v7, 16  ;;  %8951 = vst [vmem:[#allocation5_spill] sm:$0xff] %v7660_v45  ;;  %v3685_v45 = vrot.slane %v3683_v22, 5  ;;  %v3704_v51 = vshrl.u32 %v5399_v34, 16  ;;  %v3707_v19 = vshll.u32 %v5399_v34, 16 }
  0xf2   : > { %5969 = vmatprep.mubr.msk.bf16.mxu0 %vm658_vm3, %v6116_v60  ;;  %v3651_v60 = vshll.u32 %v7606_v39, 16  ;;  %v7681_v26 = vrot.slane %v3648_v4, 4  ;;  %v3695_v39 = vrot.slane %v3693_v11, 4  ;;  %v7719_v22 = vsel %vm6514_vm7, %v4343_v13, %v4344_v63 }
  0xf3   : > { %v7689_v10 = vrot.slane %v3689_v21, 5  ;;  %v8955_v21 = vcombine.low %v7382_v25, %v7401_v14  ;;  %v4348_v25 = vrot.slane %v7619_v41, 5  ;;  %v6120_v14 = vld [vmem:[%s6184_s23 + $0x90] sm:$0xff]   ;;  %v5484_v1 = vrot.slane %v5468_v49, 9  ;;  %v5402_v41 = vld [vmem:[%s6184_s23 + $0x60] sm:$0xf] }
  0xf4   : > { %5932 = vmatmul.mubr.msk.bf16.gmra.mxu1 %vm658_vm3, %v5292_v35  ;;  %v6117_v35 = vld [vmem:[%s6184_s23 + $0x6c] sm:$0xff]   ;;  %v7674_v62 = vrot.slane %v3651_v60, 5  ;;  %v3706_v37 = vrot.slane %v3704_v51, 4 }
  0xf5   : > { %5935 = vmatprep.mubr.msk.bf16.mxu1 %vm658_vm3, %v5293_v23  ;;  %v3680_v23 = vshrl.u32 %v5396_v3, 16  ;;  %v7672_v3 = vrot.slane %v3638_v44, 4  ;;  %v3671_v44 = vrot.slane %v3669_v33, 4  ;;  %v3717_v33 = vshrl.u32 %v7678_v17, 16 }
  0xf6   : > { %v7670_v16 = vpop.f32.mrf.mxu0  ;;  %v3696_v13 = vor.u32 %v3695_v39, %v7689_v10  ;;  %v4355_v39 = vrot.slane %v7641_v7, 5  ;;  %v8959_v7 = vcombine.low %v7393_v43, %v7410_v2  ;;  %v8961_v43 = vcombine.low %v7414_v59, %v7424_v50  ;;  %v6121_v2 = vld [vmem:[%s6184_s23 + $0x9c] sm:$0xff]  }
  0xf7   : > { %8952 = vst [vmem:[#allocation8_spill] sm:$0xff] %v7670_v16  ;;  %v3682_v60 = vrot.slane %v3680_v23, 4  ;;  %v6119_v23 = vld [vmem:[%s6184_s23 + $0x84] sm:$0xff]   ;;  %v7746_v16 = vld [vmem:[%s6184_s23 + $0x5c] sm:$0x1]  ;;  %v4362_v59 = vrot.slane %v7678_v17, 5 }
  0xf8   : > { %v7707_v28 = vpop.f32.mrf.mxu0 }
  0xf9   : > { %5970 = vmatmul.mubr.msk.bf16.gmra.mxu0 %vm658_vm3, %v6117_v35  ;;  %v7686_v35 = vrot.slane %v3665_v24, 5  ;;  %v3713_v24 = vshll.u32 %v7678_v17, 16  ;;  %8956 = vst [vmem:[#allocation12_spill] sm:$0xff] %v7707_v28  ;;  %v3709_v28 = vrot.slane %v3707_v19, 5 }
  0xfa   : > { %5973 = vmatprep.mubr.msk.bf16.mxu0 %vm658_vm3, %v6118_v8  ;;  %v7695_v4 = vpop.f32.mrf.mxu1  ;;  %v7698_v8 = vld [vmem:[%s6184_s23 + $0x50] sm:$0x1]  ;;  %v7739_v49 = vpop.f32.mrf.mxu0 }
  0xfb   : > { %8954 = vst [vmem:[#allocation7_spill] sm:$0xff] %v7695_v4  ;;  %v3672_v34 = vor.u32 %v3671_v44, %v7686_v35  ;;  %v7729_v4 = vrot.slane %v3662_v18, 4  ;;  %v7736_v11 = vrot.slane %v3713_v24, 5  ;;  %v3719_v44 = vrot.slane %v3717_v33, 4  ;;  %8958 = vst [vmem:[#allocation2_spill] sm:$0xff] %v7739_v49 }
  0xfc   : > { %5936 = vmatmul.mubr.msk.bf16.gmra.mxu1 %vm658_vm3, %v8953_v6  ;;  %v7715_v6 = vsel %vm6514_vm7, %v5483_v52, %v4341_v36  ;;  %v3686_v36 = vor.u32 %v3685_v45, %v3682_v60  ;;  %v3699_v52 = vshll.u32 %v7698_v8, 16  ;;  %v7734_v63 = vpop.f32.mrf.mxu1  ;;  %v4350_v18 = vrot.slane %v4348_v25, 4  ;;  %v5469_v24 = vld [vmem:[%s6184_s23 + $0x48] sm:$0xe] }
  0xfd   : > { %5939 = vmatprep.mubr.msk.bf16.mxu1 %vm658_vm3, %v8955_v21  ;;  %v3675_v21 = vshll.u32 %v7684_v58, 16  ;;  %8957 = vst [vmem:[#allocation10_spill] sm:$0xff] %v7734_v63  ;;  %v4351_v60 = vrot.slane %v7684_v58, 5  ;;  %v3673_v51 = vrot.slane %v3672_v34, 4  ;;  %v3728_v33 = vshrl.u32 %v5402_v41, 16 }
  0xfe   : > { %v7752_v63 = vsel %vm6514_vm7, %v5484_v1, %v4348_v25  ;;  %v3687_v45 = vrot.slane %v3686_v36, 4  ;;  %v3697_v49 = vrot.slane %v3696_v13, 4  ;;  %v3701_v58 = vrot.slane %v3699_v52, 5  ;;  %v7767_v36 = vld [vmem:[%s6184_s23 + $0x64] sm:$0xf]  ;;  %v7774_v13 = vpop.f32.mrf.mxu0 }
  0xff   : > { %v3677_v19 = vrot.slane %v3675_v21, 5  ;;  %v3668_v34 = vsel %vm6228_vm4, %v7729_v4, %v7686_v35  ;;  %v3710_v21 = vor.u32 %v3709_v28, %v3706_v37  ;;  %v3720_v1 = vor.u32 %v3719_v44, %v7736_v11  ;;  %8962 = vst [vmem:[#allocation14_spill] sm:$0xff] %v7774_v13  ;;  %v5470_v28 = vld [vmem:[%s6184_s23 + $0x54] sm:$0xe]  ;;  %v6125_v13 = vld [vmem:[%s6184_s23 + $0xcc] sm:$0xff]  }
 0x100   : > { %v3723_v25 = vshll.u32 %v7746_v16, 16  ;;  %v7778_v52 = vsel %vm6514_vm7, %v4350_v18, %v4351_v60  ;;  %v5485_v35 = vrot.slane %v5469_v24, 9  ;;  %v4357_v37 = vrot.slane %v4355_v39, 4 }
 0x101   : > { %5974 = vmatmul.mubr.msk.bf16.gmra.mxu0 %vm658_vm3, %v6119_v23  ;;  %v3731_v23 = vshll.u32 %v5402_v41, 16  ;;  %v4358_v4 = vrot.slane %v7698_v8, 5  ;;  %v6122_v41 = vld [vmem:[%s6184_s23 + $0xa8] sm:$0xff]   ;;  %v3678_v44 = vsel %vm6228_vm4, %v3673_v51, %v3677_v19  ;;  %v3730_v50 = vrot.slane %v3728_v33, 4 }
 0x102   : > { %5977 = vmatprep.mubr.msk.bf16.mxu0 %vm658_vm3, %v6120_v14  ;;  %v7758_v14 = vpop.f32.mrf.mxu1  ;;  %v3702_v18 = vsel %vm6228_vm4, %v3697_v49, %v3701_v58  ;;  %v3737_v60 = vshll.u32 %v7767_v36, 16  ;;  %v3741_v8 = vshrl.u32 %v7767_v36, 16  ;;  %v3721_v51 = vrot.slane %v3720_v1, 4  ;;  %v7796_v33 = vld [vmem:[%s6184_s23 + $0x68] sm:$0x1] }
 0x103   : > { %8960 = vst [vmem:[#allocation13_spill] sm:$0xff] %v7758_v14  ;;  %v3711_v14 = vrot.slane %v3710_v21, 4  ;;  %v3725_v17 = vrot.slane %v3723_v25, 5  ;;  %v5486_v19 = vrot.slane %v5470_v28, 9  ;;  %v8965_v49 = vsel %vm6228_vm4, %v7681_v26, %v7674_v62  ;;  %v5405_v25 = vld [vmem:[%s6184_s23 + $0x6c] sm:$0xf] }
 0x104   : > { %5940 = vmatmul.mubr.msk.bf16.gmra.mxu1 %vm658_vm3, %v8959_v7  ;;  %v3733_v7 = vrot.slane %v3731_v23, 5  ;;  %v7793_v24 = vpop.f32.mrf.mxu1  ;;  %v7817_v21 = vsel %vm6514_vm7, %v5485_v35, %v4355_v39  ;;  %v7821_v1 = vsel %vm6514_vm7, %v4357_v37, %v4358_v4  ;;  %v7824_v62 = vcombine.low %v3668_v34, %v3678_v44  ;;  %v5471_v4 = vld [vmem:[%s6184_s23 + $0x60] sm:$0xe]  ;;  %v5411_v44 = vld [vmem:[%s6184_s23 + $0x84] sm:$0xf] }
 0x105   : > { %5943 = vmatprep.mubr.msk.bf16.mxu1 %vm658_vm3, %v8961_v43  ;;  %v3692_v43 = vsel %vm6228_vm4, %v3687_v45, %v7689_v10  ;;  %8963 = vst [vmem:[#allocation15_spill] sm:$0xff] %v7793_v24  ;;  %v8966_v45 = vsel %vm6228_vm4, %v7672_v3, %v7608_v46  ;;  %v4364_v46 = vrot.slane %v4362_v59, 4  ;;  %v4365_v3 = vrot.slane %v7746_v16, 5 }
 0x106   : > { %v7811_v23 = vcombine.low %v8966_v45, %v8965_v49  ;;  %8967 = vst [vmem:[#allocation11_spill] sm:$0xff] %v7824_v62  ;;  %v3734_v26 = vor.u32 %v3733_v7, %v3730_v50  ;;  %v7831_v28 = vcombine.low %v3692_v43, %v3702_v18  ;;  %v7833_v39 = vrot.slane %v3737_v60, 5 }
 0x107   : > { %v7799_v10 = vpop.f32.mrf.mxu0  ;;  %v7835_v35 = vrot.slane %v3741_v8, 4  ;;  %v3747_v37 = vshll.u32 %v7796_v33, 16  ;;  %v8969_v34 = vcombine.low %v7432_v54, %v7447_v56  ;;  %v3716_v50 = vsel %vm6228_vm4, %v3711_v14, %v7736_v11  ;;  %v5408_v54 = vld [vmem:[%s6184_s23 + $0x78] sm:$0xf] }
 0x108   : > { %8964 = vst [vmem:[#allocation9_spill] sm:$0xff] %v7799_v10  ;;  %8968 = vst [vmem:[#allocation16_spill] sm:$0xff] %v7831_v28  ;;  %v3726_v7 = vsel %vm6228_vm4, %v3721_v51, %v3725_v17  ;;  %v7855_v43 = vsel %vm6514_vm7, %v5486_v19, %v4362_v59  ;;  %v8971_v56 = vcombine.low %v7439_v29, %v7460_v42  ;;  %v3752_v60 = vshrl.u32 %v5405_v25, 16  ;;  %v7867_v51 = vld [vmem:[%s6184_s23 + $0x7c] sm:$0xf]  ;;  %v6124_v59 = vld [vmem:[%s6184_s23 + $0xc0] sm:$0xff]  }
 0x109   : > { %5978 = vmatmul.mubr.msk.bf16.gmra.mxu0 %vm658_vm3, %v6121_v2  ;;  %v7829_v2 = vld [vmem:[%s6184_s23 + $0x70] sm:$0xf]  ;;  %v7862_v18 = vpop.f32.mrf.mxu0  ;;  %v3755_v8 = vshll.u32 %v5405_v25, 16  ;;  %v7872_v17 = vsel %vm6514_vm7, %v4364_v46, %v4365_v3  ;;  %v7874_v29 = vrot.slane %v3734_v26, 4  ;;  %v5487_v42 = vrot.slane %v5471_v4, 9 }
 0x10a   : > { %5981 = vmatprep.mubr.msk.bf16.mxu0 %vm658_vm3, %v6122_v41  ;;  %v6123_v41 = vld [vmem:[%s6184_s23 + $0xb4] sm:$0xff]   ;;  %8972 = vst [vmem:[#allocation18_spill] sm:$0xff] %v7862_v18  ;;  %v3761_v11 = vshll.u32 %v7829_v2, 16  ;;  %v3765_v14 = vshrl.u32 %v7829_v2, 16  ;;  %v4369_v19 = vrot.slane %v7767_v36, 5  ;;  %v7877_v49 = vcombine.low %v3716_v50, %v3726_v7 }
 0x10b   : > { %v3744_v45 = vor.u32 %v7835_v35, %v7833_v39  ;;  %v7881_v25 = vrot.slane %v3747_v37, 5  ;;  %v3776_v46 = vshrl.u32 %v5408_v54, 16  ;;  %v3779_v3 = vshll.u32 %v5408_v54, 16  ;;  %v7893_v4 = vld [vmem:[%s6184_s23 + $0x88] sm:$0xf]  ;;  %v7896_v35 = vpop.f32.mrf.mxu0 }
 0x10c   : > { %5944 = vmatmul.mubr.msk.bf16.gmra.mxu1 %vm658_vm3, %v8969_v34  ;;  %v7843_v16 = vpop.f32.mrf.mxu1  ;;  %8973 = vst [vmem:[#allocation19_spill] sm:$0xff] %v7877_v49  ;;  %v4372_v34 = vrot.slane %v7796_v33, 5  ;;  %v3785_v36 = vshll.u32 %v7867_v51, 16  ;;  %v3789_v26 = vshrl.u32 %v7867_v51, 16  ;;  %8975 = vst [vmem:[#allocation21_spill] sm:$0xff] %v7896_v35  ;;  %v3754_v33 = vrot.slane %v3752_v60, 4 }
 0x10d   : > { %8970 = vst [vmem:[#allocation17_spill] sm:$0xff] %v7843_v16  ;;  %5947 = vmatprep.mubr.msk.bf16.mxu1 %vm658_vm3, %v8971_v56  ;;  %v7885_v56 = vld [vmem:[%s6184_s23 + $0x74] sm:$0x1]  ;;  %v3757_v37 = vrot.slane %v3755_v8, 5  ;;  %v7898_v50 = vrot.slane %v3761_v11, 5  ;;  %v3767_v7 = vrot.slane %v3765_v14, 4  ;;  %v8976_v54 = vcombine.low %v7451_v30, %v7467_v55  ;;  %v7926_v49 = vpop.f32.mrf.mxu0 }
 0x10e   : > { %v7888_v58 = vpop.f32.mrf.mxu1  ;;  %v4371_v16 = vrot.slane %v4369_v19, 4  ;;  %v7911_v60 = vld [vmem:[%s6184_s23 + $0x80] sm:$0x1]  ;;  %v7914_v8 = vld [vmem:[%s6184_s23 + $0x6c] sm:$0xe]  ;;  %v3800_v11 = vshrl.u32 %v5411_v44, 16 }
 0x10f   : > { %8974 = vst [vmem:[#allocation20_spill] sm:$0xff] %v7888_v58  ;;  %v7907_v58 = vsel %vm6514_vm7, %v5487_v42, %v4369_v19  ;;  %v3803_v14 = vshll.u32 %v5411_v44, 16  ;;  %v3813_v24 = vshrl.u32 %v7893_v4, 16  ;;  %v3778_v19 = vrot.slane %v3776_v46, 4  ;;  %8978 = vst [vmem:[#allocation23_spill] sm:$0xff] %v7926_v49 }
 0x110   : > { %v7922_v42 = vpop.f32.mrf.mxu1  ;;  %v3781_v35 = vrot.slane %v3779_v3, 5  ;;  %v7924_v18 = vrot.slane %v3785_v36, 5  ;;  %v3791_v10 = vrot.slane %v3789_v26, 4  ;;  %v8979_v44 = vcombine.low %v7471_v15, %v7499_v32  ;;  %v7945_v32 = vld [vmem:[%s6184_s23 + $0x8c] sm:$0x1] }
 0x111   : > { %5982 = vmatmul.mubr.msk.bf16.gmra.mxu0 %vm658_vm3, %v6123_v41  ;;  %v3771_v41 = vshll.u32 %v7885_v56, 16  ;;  %8977 = vst [vmem:[#allocation22_spill] sm:$0xff] %v7922_v42  ;;  %v3758_v30 = vor.u32 %v3757_v37, %v3754_v33  ;;  %v3768_v55 = vor.u32 %v3767_v7, %v7898_v50  ;;  %v3795_v46 = vshll.u32 %v7911_v60, 16  ;;  %v5473_v33 = vld [vmem:[%s6184_s23 + $0x78] sm:$0xe] }
 0x112   : > { %5985 = vmatprep.mubr.msk.bf16.mxu0 %vm658_vm3, %v6124_v59  ;;  %v3809_v59 = vshll.u32 %v7893_v4, 16  ;;  %v7936_v3 = vrot.slane %v3744_v45, 4  ;;  %v7940_v36 = vsel %vm6514_vm7, %v4371_v16, %v4372_v34  ;;  %v5488_v26 = vrot.slane %v7914_v8, 9  ;;  %v7950_v42 = vpop.f32.mrf.mxu1  ;;  %v5414_v8 = vld [vmem:[%s6184_s23 + $0x90] sm:$0xf] }
 0x113   : > { %v4383_v15 = vrot.slane %v7867_v51, 5  ;;  %v3802_v37 = vrot.slane %v3800_v11, 4  ;;  %v3805_v7 = vrot.slane %v3803_v14, 5  ;;  %8980 = vst [vmem:[#allocation24_spill] sm:$0xff] %v7950_v42  ;;  %v3773_v45 = vrot.slane %v3771_v41, 5 }
 0x114   : > { %5948 = vmatmul.mubr.msk.bf16.gmra.mxu1 %vm658_vm3, %v8976_v54  ;;  %v4376_v54 = vrot.slane %v7829_v2, 5  ;;  %v7948_v2 = vrot.slane %v3809_v59, 5  ;;  %v4379_v49 = vrot.slane %v7885_v56, 5  ;;  %v3782_v16 = vor.u32 %v3781_v35, %v3778_v19  ;;  %v7959_v59 = vld [vmem:[%s6184_s23 + $0x94] sm:$0xf] }
 0x115   : > { %5951 = vmatprep.mubr.msk.bf16.mxu1 %vm658_vm3, %v8979_v44  ;;  %v3815_v44 = vrot.slane %v3813_v24, 4  ;;  %v3792_v34 = vor.u32 %v3791_v10, %v7924_v18  ;;  %v3759_v51 = vrot.slane %v3758_v30, 4  ;;  %v3769_v11 = vrot.slane %v3768_v55, 4 }
 0x116   : > { %v4378_v62 = vrot.slane %v4376_v54, 4  ;;  %v3797_v14 = vrot.slane %v3795_v46, 5  ;;  %v8981_v24 = vcombine.low %v7592_v61, %v7596_v40  ;;  %v5489_v56 = vrot.slane %v5473_v33, 9 }
 0x117   : > { %v4385_v35 = vrot.slane %v4383_v15, 4  ;;  %v4386_v10 = vrot.slane %v7911_v60, 5  ;;  %v3819_v41 = vshll.u32 %v7945_v32, 16  ;;  %v3816_v30 = vor.u32 %v3815_v44, %v7948_v2 }
 0x118   : > { %v3824_v55 = vshrl.u32 %v5414_v8, 16  ;;  %v3827_v46 = vshll.u32 %v5414_v8, 16  ;;  %v8983_v61 = vcombine.low %v7511_v9, %v7516_v47  ;;  %v3783_v40 = vrot.slane %v3782_v16, 4 }
 0x119   : > { %v7955_v28 = vpop.f32.mrf.mxu0  ;;  %5986 = vmatmul.mubr.msk.bf16.gmra.mxu0 %vm658_vm3, %v6125_v13  ;;  %v3806_v13 = vor.u32 %v3805_v7, %v3802_v37  ;;  %v3793_v33 = vrot.slane %v3792_v34, 4  ;;  %v3833_v60 = vshll.u32 %v7959_v59, 16  ;;  %v3750_v37 = vsel %vm6228_vm4, %v7936_v3, %v7881_v25 }
 0x11a   : > { %6025 = vmatprep.mubr.msk.bf16.mxu0 %vm658_vm3, %v8981_v24  ;;  %v3837_v24 = vshrl.u32 %v7959_v59, 16  ;;  %v3764_v9 = vsel %vm6228_vm4, %v3759_v51, %v7898_v50  ;;  %v7991_v47 = vsel %vm6514_vm7, %v5488_v26, %v4376_v54  ;;  %v7995_v7 = vsel %vm6514_vm7, %v4378_v62, %v4379_v49  ;;  %v5474_v54 = vld [vmem:[%s6184_s23 + $0x84] sm:$0xe]  ;;  %v9022_v31 = vld [vmem:[#allocation24_spill] sm:$0xff] }
 0x11b   : > { %v7967_v19 = vpop.f32.mrf.mxu0  ;;  %v8003_v25 = vsel %vm6514_vm7, %v5489_v56, %v4383_v15  ;;  %v8007_v50 = vsel %vm6514_vm7, %v4385_v35, %v4386_v10  ;;  %v3821_v3 = vrot.slane %v3819_v41, 5  ;;  %v3807_v62 = vrot.slane %v3806_v13, 4  ;;  %v8031_v13 = vld [vmem:[%s6184_s23 + $0x98] sm:$0x1] }
 0x11c   : > { %8982 = vst [vmem:[#allocation25_spill] sm:$0xff] %v7967_v19  ;;  %v7970_v42 = vpop.f32.mrf.mxu1  ;;  %5952 = vmatmul.mubr.msk.bf16.gmra.mxu1 %vm658_vm3, %v8983_v61  ;;  %v3817_v49 = vrot.slane %v3816_v30, 4  ;;  %v3826_v16 = vrot.slane %v3824_v55, 4  ;;  %v3829_v34 = vrot.slane %v3827_v46, 5  ;;  %v3788_v15 = vsel %vm6228_vm4, %v3783_v40, %v7924_v18  ;;  %v5417_v30 = vld [vmem:[%s6184_s23 + $0x9c] sm:$0xf] }
 0x11d   : > { %v7978_v19 = vpop.f32.mrf.mxu0  ;;  %5991 = vmatprep.mubr.msk.bf16.mxu1 %vm658_vm3, %v7662_v27  ;;  %v3774_v27 = vsel %vm6228_vm4, %v3769_v11, %v3773_v45  ;;  %v3798_v45 = vsel %vm6228_vm4, %v3793_v33, %v3797_v14  ;;  %v8019_v51 = vrot.slane %v3833_v60, 5  ;;  %v3839_v11 = vrot.slane %v3837_v24, 4  ;;  %v8062_v24 = vld [vmem:[%s6184_s23 + $0xa0] sm:$0xf] }
 0x11e   : > { %v7997_v44 = vpop.f32.mrf.mxu1  ;;  %v8984_v35 = vcombine.low %v7632_v48, %v7636_v38  ;;  %v5503_v10 = vcombine.low %v7855_v43, %v7872_v17  ;;  %v5504_v41 = vcombine.low %v7907_v58, %v7940_v36  ;;  %v5490_v18 = vrot.slane %v5474_v54, 9 }
 0x11f   : > { %v8010_v26 = vpop.f32.mrf.mxu0  ;;  %v4390_v14 = vrot.slane %v7893_v4, 5  ;;  %v8985_v48 = vcombine.low %v7715_v6, %v7719_v22  ;;  %v8986_v38 = vsel %vm6228_vm4, %v7874_v29, %v7833_v39  ;;  %v8047_v61 = vcombine.low %v3764_v9, %v3774_v27  ;;  %v5475_v29 = vld [vmem:[%s6184_s23 + $0x90] sm:$0xe]  ;;  %v8993_v4 = vld [vmem:[#allocation2_spill] sm:$0xff] }
 0x120   : > { %v8012_v8 = vpop.f32.mrf.mxu1  ;;  %v8045_v46 = vcombine.low %v8986_v38, %v3750_v37  ;;  %v8053_v60 = vcombine.low %v3788_v15, %v3798_v45  ;;  %v3812_v6 = vsel %vm6228_vm4, %v3807_v62, %v7948_v2  ;;  %v3822_v22 = vsel %vm6228_vm4, %v3817_v49, %v3821_v3 }
 0x121   : > { %v5823_v56 = vpop.f32.mrf.mxu0  ;;  %6026 = vmatmul.mubr.msk.bf16.vlgmr.msra.gmra.mxu0 %vm658_vm3, %v8984_v35  ;;  %v3830_v39 = vor.u32 %v3829_v34, %v3826_v16  ;;  %v3840_v9 = vor.u32 %v3839_v11, %v8019_v51  ;;  %v3843_v27 = vshll.u32 %v8031_v13, 16  ;;  %v3848_v54 = vshrl.u32 %v5417_v30, 16 }
 0x122   : > { %v8034_v55 = vpop.f32.mrf.mxu1  ;;  %6029 = vmatprep.mubr.msk.bf16.mxu0 %vm658_vm3, %v8985_v48  ;;  %v3851_v15 = vshll.u32 %v5417_v30, 16  ;;  %v8073_v3 = vsel %vm6514_vm7, %v5490_v18, %v4390_v14  ;;  %v4392_v62 = vrot.slane %v4390_v14, 4  ;;  %v4393_v49 = vrot.slane %v7945_v32, 5 }
 0x123   : > { %v1462_v33 = vpop.f32.mrf.mxu0  ;;  %v5491_v16 = vrot.slane %v5475_v29, 9  ;;  %v4397_v34 = vrot.slane %v7959_v59, 5  ;;  %v3857_v11 = vshll.u32 %v8062_v24, 16  ;;  %v3861_v35 = vshrl.u32 %v8062_v24, 16 }
 0x124   : > { %v5789_v37 = vpop.f32.mrf.mxu1  ;;  %5992 = vmatmul.mubr.msk.bf16.vlgmr.msra.gmra.mxu1 %vm658_vm3, %v7664_v57  ;;  %v8082_v48 = vcombine.low %v3812_v6, %v3822_v22  ;;  %v8084_v18 = vrot.slane %v3830_v39, 4  ;;  %v3841_v32 = vrot.slane %v3840_v9, 4  ;;  %v3845_v38 = vrot.slane %v3843_v27, 5  ;;  %v5420_v22 = vld [vmem:[%s6184_s23 + $0xa8] sm:$0xf] }
 0x125   : > { %v1046_v45 = vadd.f32 %v5789_v37, %v7560_v5  ;;  %v5824_v2 = vpop.f32.mrf.mxu0  ;;  %5995 = vmatprep.mubr.msk.bf16.mxu1 %vm658_vm3, %v7811_v23  ;;  %v3850_v29 = vrot.slane %v3848_v54, 4  ;;  %v3853_v59 = vrot.slane %v3851_v15, 5  ;;  %v4400_v6 = vrot.slane %v8031_v13, 5  ;;  %v8110_v27 = vld [vmem:[%s6184_s23 + $0xac] sm:$0xf] }
 0x126   : > { %v1037_v57 = vpop.f32.mrf.mxu1  ;;  %v3863_v9 = vrot.slane %v3861_v35, 4  ;;  %v8990_v35 = vld [vmem:[#allocation8_spill] sm:$0xff] }
 0x127   : > { %v8079_v5 = vadd.f32 %v5823_v56, %v1046_v45  ;;  %v1038_v23 = vadd.f32 %v1037_v57, %v7584_v20  ;;  %v1465_v30 = vpop.f32.mrf.mxu0  ;;  %v8987_v45 = vcombine.low %v7752_v63, %v7778_v52  ;;  %v8095_v20 = vsel %vm6514_vm7, %v4392_v62, %v4393_v49  ;;  %v5476_v62 = vld [vmem:[%s6184_s23 + $0x9c] sm:$0xe] }
 0x128   : > { %v5790_v14 = vpop.f32.mrf.mxu1  ;;  %v4399_v63 = vrot.slane %v4397_v34, 4  ;;  %v8107_v52 = vrot.slane %v3857_v11, 5  ;;  %v4404_v49 = vrot.slane %v8062_v24, 5  ;;  %v3881_v24 = vshll.u32 %v8110_v27, 16 }
 0x129   : > { %v8086_v37 = vadd.f32 %v1462_v33, %v1038_v23  ;;  %v1049_v40 = vadd.f32 %v5790_v14, %v7603_v53  ;;  %v5827_v56 = vpop.f32.mrf.mxu0  ;;  %6030 = vmatmul.mubr.msk.bf16.gmra.mxu0 %vm658_vm3, %v8987_v45  ;;  %v8988_v33 = vcombine.low %v7817_v21, %v7821_v1  ;;  %v8105_v53 = vsel %vm6514_vm7, %v5491_v16, %v4397_v34  ;;  %v5419_v1 = vld [vmem:[%s6184_s23 + $0xa4] sm:$0x1]  ;;  %v8989_v16 = vld [vmem:[#allocation11_spill] sm:$0xff] }
 0x12a   : > { %v1040_v39 = vpop.f32.mrf.mxu1  ;;  %v3836_v21 = vsel %vm6228_vm4, %v8084_v18, %v8019_v51  ;;  %v3872_v34 = vshrl.u32 %v5420_v22, 16  ;;  %v8991_v51 = vld [vmem:[#allocation16_spill] sm:$0xff]  ;;  %v3885_v18 = vshrl.u32 %v8110_v27, 16 }
 0x12b   : > { %6033 = vmatprep.mubr.msk.bf16.mxu0 %vm658_vm3, %v8988_v33  ;;  %v8112_v54 = vadd.f32 %v5824_v2, %v1049_v40  ;;  %v1041_v13 = vadd.f32 %v1040_v39, %v7648_v12  ;;  %v1478_v15 = vpop.f32.mrf.mxu0  ;;  %v3846_v40 = vsel %vm6228_vm4, %v3841_v32, %v3845_v38  ;;  %v3854_v2 = vor.u32 %v3853_v59, %v3850_v29  ;;  %v8992_v59 = vld [vmem:[#allocation12_spill] sm:$0xff] }
 0x12c   : > { %v5793_v57 = vpop.f32.mrf.mxu1  ;;  %5996 = vmatmul.mubr.msk.bf16.gmra.mxu1 %vm658_vm3, %v8989_v16  ;;  %v3875_v12 = vshll.u32 %v5420_v22, 16  ;;  %v8135_v39 = vsel %vm6514_vm7, %v4399_v63, %v4400_v6  ;;  %v3864_v32 = vor.u32 %v3863_v9, %v8107_v52  ;;  %v3867_v38 = vshll.u32 %v5419_v1, 16 }
 0x12d   : > { %v8126_v11 = vadd.f32 %v1465_v30, %v1041_v13  ;;  %v1062_v23 = vadd.f32 %v5793_v57, %v8990_v35  ;;  %v5828_v14 = vpop.f32.mrf.mxu0  ;;  %5999 = vmatprep.mubr.msk.bf16.mxu1 %vm658_vm3, %v8991_v51  ;;  %v5492_v30 = vrot.slane %v5476_v62, 9  ;;  %v4406_v13 = vrot.slane %v4404_v49, 4 }
 0x12e   : > { %v1053_v45 = vpop.f32.mrf.mxu1  ;;  %v4407_v57 = vrot.slane %v5419_v1, 5  ;;  %v8143_v51 = vrot.slane %v3854_v2, 4  ;;  %v3874_v6 = vrot.slane %v3872_v34, 4  ;;  %v3877_v63 = vrot.slane %v3875_v12, 5  ;;  %v8153_v1 = vld [vmem:[%s6184_s23 + $0xb0] sm:$0x1] }
 0x12f   : > { %v8138_v29 = vadd.f32 %v5827_v56, %v1062_v23  ;;  %v1054_v22 = vadd.f32 %v1053_v45, %v8992_v59  ;;  %v1481_v33 = vpop.f32.mrf.mxu0  ;;  %v8155_v23 = vrot.slane %v3881_v24, 5  ;;  %v3887_v2 = vrot.slane %v3885_v18, 4  ;;  %v8994_v12 = vld [vmem:[#allocation14_spill] sm:$0xff] }
 0x130   : > { %v5794_v16 = vpop.f32.mrf.mxu1  ;;  %v8165_v43 = vrot.slane %v3864_v32, 4  ;;  %v8167_v17 = vrot.slane %v3867_v38, 5  ;;  %v8175_v58 = vsel %vm6514_vm7, %v5492_v30, %v4404_v49  ;;  %v8179_v36 = vsel %vm6514_vm7, %v4406_v13, %v4407_v57  ;;  %v8191_v30 = vld [vmem:[%s6184_s23 + $0xb8] sm:$0xf] }
 0x131   : > { %v8145_v9 = vadd.f32 %v1478_v15, %v1054_v22  ;;  %v1065_v62 = vadd.f32 %v5794_v16, %v8993_v4  ;;  %v5831_v56 = vpop.f32.mrf.mxu0  ;;  %6034 = vmatmul.mubr.msk.bf16.gmra.mxu0 %vm658_vm3, %v5503_v10  ;;  %v8161_v15 = vcombine.low %v3836_v21, %v3846_v40  ;;  %v5477_v10 = vld [vmem:[%s6184_s23 + $0xa8] sm:$0xe]  ;;  %v3878_v32 = vor.u32 %v3877_v63, %v3874_v6  ;;  %v8996_v22 = vld [vmem:[#allocation9_spill] sm:$0xff] }
 0x132   : > { %v1056_v45 = vpop.f32.mrf.mxu1  ;;  %6037 = vmatprep.mubr.msk.bf16.mxu0 %vm658_vm3, %v5504_v41  ;;  %v5423_v41 = vld [vmem:[%s6184_s23 + $0xb4] sm:$0xf]  ;;  %v8995_v40 = vld [vmem:[#allocation19_spill] sm:$0xff]  ;;  %v3891_v38 = vshll.u32 %v8153_v1, 16  ;;  %v4411_v49 = vrot.slane %v8110_v27, 5  ;;  %v3888_v16 = vor.u32 %v3887_v2, %v8155_v23  ;;  %v3870_v27 = vsel %vm6228_vm4, %v8165_v43, %v8167_v17 }
 0x133   : > { %v8170_v34 = vadd.f32 %v5828_v14, %v1065_v62  ;;  %v1057_v24 = vadd.f32 %v1056_v45, %v8994_v12  ;;  %v1494_v18 = vpop.f32.mrf.mxu0  ;;  %v5493_v62 = vrot.slane %v5477_v10, 9  ;;  %v3896_v6 = vshrl.u32 %v5423_v41, 16 }
 0x134   : > { %v5797_v21 = vpop.f32.mrf.mxu1  ;;  %6000 = vmatmul.mubr.msk.bf16.gmra.mxu1 %vm658_vm3, %v8995_v40  ;;  %v3899_v63 = vshll.u32 %v5423_v41, 16  ;;  %v3905_v2 = vshll.u32 %v8191_v30, 16  ;;  %v3909_v10 = vshrl.u32 %v8191_v30, 16  ;;  %v5426_v40 = vld [vmem:[%s6184_s23 + $0xc0] sm:$0xf]  ;;  %v3879_v4 = vrot.slane %v3878_v32, 4 }
 0x135   : > { %v8193_v59 = vadd.f32 %v1481_v33, %v1057_v24  ;;  %v1078_v13 = vadd.f32 %v5797_v21, %v8996_v22  ;;  %v5832_v57 = vpop.f32.mrf.mxu0  ;;  %6003 = vmatprep.mubr.msk.bf16.mxu1 %vm658_vm3, %v8045_v46  ;;  %v8998_v24 = vld [vmem:[#allocation18_spill] sm:$0xff]  ;;  %v3893_v43 = vrot.slane %v3891_v38, 5  ;;  %v4413_v17 = vrot.slane %v4411_v49, 4 }
 0x136   : > { %v1069_v45 = vpop.f32.mrf.mxu1  ;;  %v4414_v33 = vrot.slane %v8153_v1, 5  ;;  %v8221_v14 = vsel %vm6514_vm7, %v5493_v62, %v4411_v49  ;;  %v8224_v32 = vld [vmem:[%s6184_s23 + $0xc4] sm:$0xf]  ;;  %v9002_v1 = vcombine.low %v8003_v25, %v8007_v50  ;;  %v8236_v62 = vrot.slane %v3905_v2, 5 }
 0x137   : > { %v8205_v12 = vadd.f32 %v5831_v56, %v1078_v13  ;;  %v1070_v21 = vadd.f32 %v1069_v45, %v8998_v24  ;;  %v1497_v46 = vpop.f32.mrf.mxu0  ;;  %v9000_v56 = vld [vmem:[#allocation21_spill] sm:$0xff]  ;;  %v9001_v45 = vcombine.low %v7991_v47, %v7995_v7  ;;  %v3889_v24 = vrot.slane %v3888_v16, 4  ;;  %v9003_v16 = vld [vmem:[#allocation23_spill] sm:$0xff] }
 0x138   : > { %v5798_v22 = vpop.f32.mrf.mxu1  ;;  %v3920_v47 = vshrl.u32 %v5426_v40, 16  ;;  %v3923_v7 = vshll.u32 %v5426_v40, 16  ;;  %v3884_v25 = vsel %vm6228_vm4, %v3879_v4, %v8155_v23  ;;  %v8245_v50 = vsel %vm6514_vm7, %v4413_v17, %v4414_v33  ;;  %v5478_v40 = vld [vmem:[%s6184_s23 + $0xb4] sm:$0xe] }
 0x139   : > { %8997 = vst [vmem:[#allocation11_spill] sm:$0xff] %v8205_v12  ;;  %v8212_v35 = vadd.f32 %v1494_v18, %v1070_v21  ;;  %v1081_v41 = vadd.f32 %v5798_v22, %v9000_v56  ;;  %v5835_v13 = vpop.f32.mrf.mxu0  ;;  %6038 = vmatmul.mubr.msk.bf16.gmra.mxu0 %vm658_vm3, %v9001_v45  ;;  %v8231_v18 = vld [vmem:[%s6184_s23 + $0xbc] sm:$0x1]  ;;  %v3898_v21 = vrot.slane %v3896_v6, 4  ;;  %v3901_v22 = vrot.slane %v3899_v63, 5 }
 0x13a   : > { %v1072_v38 = vpop.f32.mrf.mxu1  ;;  %6041 = vmatprep.mubr.msk.bf16.mxu0 %vm658_vm3, %v9002_v1  ;;  %v3933_v6 = vshrl.u32 %v8224_v32, 16  ;;  %v3915_v23 = vshll.u32 %v8231_v18, 16  ;;  %v4418_v17 = vrot.slane %v8191_v30, 5  ;;  %v9004_v1 = vld [vmem:[#allocation25_spill] sm:$0xff] }
 0x13b   : > { %8999 = vst [vmem:[#allocation8_spill] sm:$0xff] %v8212_v35  ;;  %v8233_v56 = vadd.f32 %v5832_v57, %v1081_v41  ;;  %v1073_v45 = vadd.f32 %v1072_v38, %v9003_v16  ;;  %v1510_v49 = vpop.f32.mrf.mxu0  ;;  %v3911_v35 = vrot.slane %v3909_v10, 4  ;;  %v3929_v57 = vshll.u32 %v8224_v32, 16 }
 0x13c   : > { %v5801_v12 = vpop.f32.mrf.mxu1  ;;  %6004 = vmatmul.mubr.msk.bf16.gmra.mxu1 %vm658_vm3, %v8047_v61  ;;  %v3894_v61 = vsel %vm6228_vm4, %v3889_v24, %v3893_v43  ;;  %v3902_v33 = vor.u32 %v3901_v22, %v3898_v21  ;;  %v3922_v41 = vrot.slane %v3920_v47, 4  ;;  %v3925_v38 = vrot.slane %v3923_v7, 5 }
 0x13d   : > { %v8249_v63 = vadd.f32 %v1497_v46, %v1073_v45  ;;  %v1094_v2 = vadd.f32 %v5801_v12, %v7955_v28  ;;  %v5836_v10 = vpop.f32.mrf.mxu0  ;;  %6007 = vmatprep.mubr.msk.bf16.mxu1 %vm658_vm3, %v8053_v60  ;;  %v9005_v60 = vsel %vm6228_vm4, %v8143_v51, %v8107_v52  ;;  %v3912_v24 = vor.u32 %v3911_v35, %v8236_v62 }
 0x13e   : > { %v1085_v4 = vpop.f32.mrf.mxu1  ;;  %v8267_v43 = vcombine.low %v9005_v60, %v3870_v27  ;;  %v8270_v30 = vcombine.low %v3884_v25, %v3894_v61  ;;  %v8274_v22 = vrot.slane %v3929_v57, 5  ;;  %v3935_v47 = vrot.slane %v3933_v6, 4  ;;  %v5428_v27 = vld [vmem:[%s6184_s23 + $0xc8] sm:$0x1] }
 0x13f   : > { %v8259_v46 = vadd.f32 %v5835_v13, %v1094_v2  ;;  %v1086_v28 = vadd.f32 %v1085_v4, %v9004_v1  ;;  %v1513_v12 = vpop.f32.mrf.mxu0  ;;  %v5510_v13 = vcombine.low %v8221_v14, %v8245_v50  ;;  %v9006_v52 = vcombine.low %v8073_v3, %v8095_v20  ;;  %v5429_v14 = vld [vmem:[%s6184_s23 + $0xcc] sm:$0xf]  ;;  %v8295_v20 = vld [vmem:[%s6184_s23 + $0xd0] sm:$0xf]  ;;  %v5479_v4 = vld [vmem:[%s6184_s23 + $0xc0] sm:$0xe] }
 0x140   : > { %v5802_v21 = vpop.f32.mrf.mxu1  ;;  %v8283_v35 = vrot.slane %v3915_v23, 5  ;;  %v5494_v51 = vrot.slane %v5478_v40, 9  ;;  %v9007_v50 = vcombine.low %v8105_v53, %v8135_v39  ;;  %v4421_v57 = vrot.slane %v8231_v18, 5 }
 0x141   : > { %v8276_v7 = vadd.f32 %v1510_v49, %v1086_v28  ;;  %v1097_v16 = vadd.f32 %v5802_v21, %v7978_v19  ;;  %v5839_v45 = vpop.f32.mrf.mxu0  ;;  %6042 = vmatmul.mubr.msk.bf16.gmra.mxu0 %vm658_vm3, %v9006_v52  ;;  %v8291_v49 = vrot.slane %v3902_v33, 4  ;;  %v4420_v19 = vrot.slane %v4418_v17, 4 }
 0x142   : > { %v1088_v25 = vpop.f32.mrf.mxu1  ;;  %6045 = vmatprep.mubr.msk.bf16.mxu0 %vm658_vm3, %v9007_v50  ;;  %v3926_v3 = vor.u32 %v3925_v38, %v3922_v41  ;;  %v8300_v23 = vrot.slane %v3912_v24, 4  ;;  %v4425_v53 = vrot.slane %v8224_v32, 5  ;;  %v3936_v33 = vor.u32 %v3935_v47, %v8274_v22 }
 0x143   : > { %v8297_v6 = vadd.f32 %v5836_v10, %v1097_v16  ;;  %v1089_v2 = vadd.f32 %v1088_v25, %v8010_v26  ;;  %v1526_v61 = vpop.f32.mrf.mxu0  ;;  %v3939_v18 = vshll.u32 %v5428_v27, 16  ;;  %v3944_v40 = vshrl.u32 %v5429_v14, 16  ;;  %v9010_v10 = vld [vmem:[#allocation4_spill] sm:$0xff]  ;;  %v9011_v16 = vld [vmem:[#allocation3_spill] sm:$0xff] }
 0x144   : > { %v5805_v39 = vpop.f32.mrf.mxu1  ;;  %6008 = vmatmul.mubr.msk.bf16.gmra.mxu1 %vm658_vm3, %v8082_v48  ;;  %v3947_v41 = vshll.u32 %v5429_v14, 16  ;;  %v3953_v28 = vshll.u32 %v8295_v20, 16  ;;  %v3957_v32 = vshrl.u32 %v8295_v20, 16  ;;  %v4419_v48 = vsel %vm6514_vm7, %v5494_v51, %v4418_v17  ;;  %v9012_v17 = vld [vmem:[#allocation6_spill] sm:$0xff] }
 0x145   : > { %9008 = vst [vmem:[#allocation16_spill] sm:$0xff] %v8297_v6  ;;  %v8307_v38 = vadd.f32 %v1513_v12, %v1089_v2  ;;  %v1110_v1 = vadd.f32 %v5805_v39, %v9010_v10  ;;  %v5840_v26 = vpop.f32.mrf.mxu0  ;;  %6011 = vmatprep.mubr.msk.bf16.mxu1 %vm658_vm3, %v8161_v15  ;;  %v4422_v24 = vsel %vm6514_vm7, %v4420_v19, %v4421_v57  ;;  %v3927_v21 = vrot.slane %v3926_v3, 4 }
 0x146   : > { %v1101_v60 = vpop.f32.mrf.mxu1  ;;  %v5495_v12 = vrot.slane %v5479_v4, 9  ;;  %v4427_v25 = vrot.slane %v4425_v53, 4  ;;  %v4428_v15 = vrot.slane %v5428_v27, 5  ;;  %v3937_v2 = vrot.slane %v3936_v33, 4  ;;  %v5431_v33 = vld [vmem:[%s6184_s23 + $0xd4] sm:$0x1] }
 0x147   : > { %9009 = vst [vmem:[#allocation12_spill] sm:$0xff] %v8307_v38  ;;  %v8318_v47 = vadd.f32 %v5839_v45, %v1110_v1  ;;  %v1102_v52 = vadd.f32 %v1101_v60, %v9011_v16  ;;  %v1529_v14 = vpop.f32.mrf.mxu0  ;;  %v3941_v39 = vrot.slane %v3939_v18, 5  ;;  %v3946_v10 = vrot.slane %v3944_v40, 4  ;;  %v9014_v18 = vld [vmem:[#allocation5_spill] sm:$0xff] }
 0x148   : > { %v5806_v50 = vpop.f32.mrf.mxu1  ;;  %v3949_v38 = vrot.slane %v3947_v41, 5  ;;  %v9013_v45 = vcombine.low %v8175_v58, %v8179_v36  ;;  %v8328_v57 = vrot.slane %v3953_v28, 5  ;;  %v3959_v27 = vrot.slane %v3957_v32, 4 }
 0x149   : > { %v8321_v6 = vadd.f32 %v1526_v61, %v1102_v52  ;;  %v1113_v51 = vadd.f32 %v5806_v50, %v9012_v17  ;;  %v5843_v19 = vpop.f32.mrf.mxu0  ;;  %v3908_v61 = vsel %vm6228_vm4, %v8291_v49, %v8236_v62  ;;  %v3918_v4 = vsel %vm6228_vm4, %v8300_v23, %v8283_v35  ;;  %v5480_v62 = vld [vmem:[%s6184_s23 + $0xcc] sm:$0xe] }
 0x14a   : > { %6046 = vmatmul.mubr.msk.bf16.gmra.mxu0 %vm658_vm3, %v9013_v45  ;;  %v1104_v3 = vpop.f32.mrf.mxu1  ;;  %v4432_v58 = vrot.slane %v8295_v20, 5  ;;  %v4429_v1 = vsel %vm6514_vm7, %v4427_v25, %v4428_v15  ;;  %v5511_v35 = vcombine.low %v4419_v48, %v4422_v24  ;;  %v3932_v20 = vsel %vm6228_vm4, %v3927_v21, %v8274_v22  ;;  %v9016_v25 = vld [vmem:[#allocation10_spill] sm:$0xff] }
 0x14b   : > { %6049 = vmatprep.mubr.msk.bf16.mxu0 %vm658_vm3, %v5510_v13  ;;  %v8341_v36 = vadd.f32 %v5840_v26, %v1113_v51  ;;  %v1105_v40 = vadd.f32 %v1104_v3, %v9014_v18  ;;  %v1542_v41 = vpop.f32.mrf.mxu0  ;;  %v4426_v13 = vsel %vm6514_vm7, %v5495_v12, %v4425_v53  ;;  %v3942_v23 = vsel %vm6228_vm4, %v3937_v2, %v3941_v39  ;;  %v9015_v53 = vld [vmem:[#allocation7_spill] sm:$0xff] }
 0x14c   : > { %v5809_v49 = vpop.f32.mrf.mxu1  ;;  %6012 = vmatmul.mubr.msk.bf16.gmra.mxu1 %vm658_vm3, %v8267_v43  ;;  %v3950_v26 = vor.u32 %v3949_v38, %v3946_v10  ;;  %v3960_v12 = vor.u32 %v3959_v27, %v8328_v57  ;;  %v3963_v43 = vshll.u32 %v5431_v33, 16  ;;  %v5512_v24 = vcombine.low %v4426_v13, %v4429_v1 }
 0x14d   : > { %v8356_v28 = vadd.f32 %v1529_v14, %v1105_v40  ;;  %v1126_v32 = vadd.f32 %v5809_v49, %v9015_v53  ;;  %v5844_v60 = vpop.f32.mrf.mxu0  ;;  %6015 = vmatprep.mubr.msk.bf16.mxu1 %vm658_vm3, %v8270_v30  ;;  %v5496_v16 = vrot.slane %v5480_v62, 9  ;;  %v4434_v52 = vrot.slane %v4432_v58, 4  ;;  %v9017_v30 = vld [vmem:[#allocation13_spill] sm:$0xff] }
 0x14e   : > { %v1117_v48 = vpop.f32.mrf.mxu1  ;;  %v4435_v22 = vrot.slane %v5431_v33, 5  ;;  %v5446_v50 = vcombine.low %v3908_v61, %v3918_v4  ;;  %v5447_v2 = vcombine.low %v3932_v20, %v3942_v23  ;;  %v3951_v39 = vrot.slane %v3950_v26, 4  ;;  %v9018_v33 = vld [vmem:[#allocation15_spill] sm:$0xff]  ;;  %v9019_v62 = vld [vmem:[#allocation17_spill] sm:$0xff]  ;;  %v9020_v26 = vld [vmem:[#allocation20_spill] sm:$0xff] }
 0x14f   : > { %v8362_v21 = vadd.f32 %v5843_v19, %v1126_v32  ;;  %v1118_v38 = vadd.f32 %v1117_v48, %v9016_v25  ;;  %v1545_v14 = vpop.f32.mrf.mxu0  ;;  %v3961_v45 = vrot.slane %v3960_v12, 4  ;;  %v3965_v27 = vrot.slane %v3963_v43, 5  ;;  %v9021_v43 = vld [vmem:[#allocation22_spill] sm:$0xff] }
 0x150   : > { %v5810_v15 = vpop.f32.mrf.mxu1  ;;  %v4433_v19 = vsel %vm6514_vm7, %v5496_v16, %v4432_v58  ;;  %v4436_v61 = vsel %vm6514_vm7, %v4434_v52, %v4435_v22  ;;  %v3956_v13 = vsel %vm6228_vm4, %v3951_v39, %v8328_v57 }
 0x151   : > { %v8365_v10 = vadd.f32 %v1542_v41, %v1118_v38  ;;  %v1129_v17 = vadd.f32 %v5810_v15, %v9017_v30  ;;  %v5847_v51 = vpop.f32.mrf.mxu0  ;;  %v3966_v0 = vsel %vm6228_vm4, %v3961_v45, %v3965_v27 }
 0x152   : > { %6050 = vmatmul.mubr.msk.bf16.gmra.mxu0 %vm658_vm3, %v5511_v35  ;;  %v1120_v3 = vpop.f32.mrf.mxu1  ;;  %v5513_v35 = vcombine.low %v4433_v19, %v4436_v61  ;;  %v5448_v12 = vcombine.low %v3956_v13, %v3966_v0 }
 0x153   : > { %6053 = vmatprep.mubr.msk.bf16.mxu0 %vm658_vm3, %v5512_v24  ;;  %v8374_v4 = vadd.f32 %v5844_v60, %v1129_v17  ;;  %v1121_v18 = vadd.f32 %v1120_v3, %v9018_v33  ;;  %v1558_v40 = vpop.f32.mrf.mxu0 }
 0x154   : > { %v5813_v41 = vpop.f32.mrf.mxu1  ;;  %6016 = vmatmul.mubr.msk.bf16.gmra.mxu1 %vm658_vm3, %v5446_v50 }
 0x155   : > { %v8381_v1 = vadd.f32 %v1545_v14, %v1121_v18  ;;  %v1142_v49 = vadd.f32 %v5813_v41, %v9019_v62  ;;  %v5848_v58 = vpop.f32.mrf.mxu0  ;;  %6019 = vmatprep.mubr.msk.bf16.mxu1 %vm658_vm3, %v5447_v2 }
 0x156   : > { %v1133_v20 = vpop.f32.mrf.mxu1 }
 0x157   : > { %v8387_v23 = vadd.f32 %v5847_v51, %v1142_v49  ;;  %v1134_v53 = vadd.f32 %v1133_v20, %v9020_v26  ;;  %v1561_v32 = vpop.f32.mrf.mxu0 }
 0x158   : > { %v5814_v60 = vpop.f32.mrf.mxu1 }
 0x159   : > { %v8390_v57 = vadd.f32 %v1558_v40, %v1134_v53  ;;  %v1145_v48 = vadd.f32 %v5814_v60, %v9021_v43  ;;  %v5851_v24 = vpop.f32.mrf.mxu0 }
 0x15a   : > { %6054 = vmatmul.mubr.msk.bf16.gmra.mxu0 %vm658_vm3, %v5513_v35  ;;  %v1136_v16 = vpop.f32.mrf.mxu1 }
 0x15b   : > { %v8394_v52 = vadd.f32 %v5848_v58, %v1145_v48  ;;  %v1137_v22 = vadd.f32 %v1136_v16, %v9022_v31  ;;  %v1574_v25 = vpop.f32.mrf.mxu0 }
 0x15c   : > { %v5817_v38 = vpop.f32.mrf.mxu1  ;;  %6020 = vmatmul.mubr.msk.bf16.gmra.mxu1 %vm658_vm3, %v5448_v12 }
 0x15d   : > { %v8398_v14 = vadd.f32 %v1561_v32, %v1137_v22  ;;  %v1158_v15 = vadd.f32 %v5817_v38, %v7970_v42  ;;  %v5852_v50 = vpop.f32.mrf.mxu0 }
 0x15e   : > { %v1149_v2 = vpop.f32.mrf.mxu1 }
 0x15f   : > { %v8401_v39 = vadd.f32 %v5851_v24, %v1158_v15  ;;  %v1150_v30 = vadd.f32 %v1149_v2, %v7997_v44  ;;  %v1577_v17 = vpop.f32.mrf.mxu0 }
 0x160   : > { %v5818_v51 = vpop.f32.mrf.mxu1 }
 0x161   : > { %v8404_v45 = vadd.f32 %v1574_v25, %v1150_v30  ;;  %v1161_v27 = vadd.f32 %v5818_v51, %v8012_v8  ;;  %v5891_v3 = vpop.f32.mrf.mxu0  ;;  %v9023_v30 = vld [vmem:[#allocation11_spill] sm:$0xff] }
 0x162   : > { %v1152_v19 = vpop.f32.mrf.mxu1 }
 0x163   : > { %v8407_v61 = vadd.f32 %v5852_v50, %v1161_v27  ;;  %v1153_v33 = vadd.f32 %v1152_v19, %v8034_v55  ;;  %v2547_v18 = vpop.f32.mrf.mxu0 }
 0x164   : > { %v5857_v42 = vpop.f32.mrf.mxu1 }
 0x165   : > { %v8410_v40 = vadd.f32 %v1577_v17, %v1153_v33  ;;  %v1950_v41 = vadd.f32 %v5857_v42, %v8079_v5  ;;  %v5892_v13 = vpop.f32.mrf.mxu0 }
 0x166   : > { %v1821_v44 = vpop.f32.mrf.mxu1 }
 0x167   : > { %v8413_v62 = vadd.f32 %v5891_v3, %v1950_v41  ;;  %v1948_v49 = vadd.f32 %v1821_v44, %v8086_v37  ;;  %v2550_v58 = vpop.f32.mrf.mxu0  ;;  %v9024_v3 = vld [vmem:[#allocation8_spill] sm:$0xff] }
 0x168   : > { %v5858_v8 = vpop.f32.mrf.mxu1 }
 0x169   : > { %v8416_v0 = vadd.f32 %v2547_v18, %v1948_v49  ;;  %v1951_v35 = vadd.f32 %v5858_v8, %v8112_v54  ;;  %v5895_v20 = vpop.f32.mrf.mxu0 }
 0x16a   : > { %v1824_v55 = vpop.f32.mrf.mxu1 }
 0x16b   : > { %v8419_v26 = vadd.f32 %v5892_v13, %v1951_v35  ;;  %v1949_v53 = vadd.f32 %v1824_v55, %v8126_v11  ;;  %v2563_v32 = vpop.f32.mrf.mxu0 }
 0x16c   : > { %v5861_v5 = vpop.f32.mrf.mxu1 }
 0x16d   : > { %v8422_v60 = vadd.f32 %v2550_v58, %v1949_v53  ;;  %v1954_v12 = vadd.f32 %v5861_v5, %v8138_v29  ;;  %v5896_v43 = vpop.f32.mrf.mxu0 }
 0x16e   : > { %v1837_v37 = vpop.f32.mrf.mxu1 }
 0x16f   : > { %v8425_v48 = vadd.f32 %v5895_v20, %v1954_v12  ;;  %v1952_v24 = vadd.f32 %v1837_v37, %v8145_v9  ;;  %v2566_v16 = vpop.f32.mrf.mxu0 }
 0x170   : > { %v5862_v54 = vpop.f32.mrf.mxu1 }
 0x171   : > { %v8428_v31 = vadd.f32 %v2563_v32, %v1952_v24  ;;  %v1955_v22 = vadd.f32 %v5862_v54, %v8170_v34  ;;  %v5899_v25 = vpop.f32.mrf.mxu0  ;;  %v9026_v54 = vld [vmem:[#allocation12_spill] sm:$0xff] }
 0x172   : > { %v1840_v11 = vpop.f32.mrf.mxu1 }
 0x173   : > { %v8431_v38 = vadd.f32 %v5896_v43, %v1955_v22  ;;  %v1953_v15 = vadd.f32 %v1840_v11, %v8193_v59  ;;  %v2579_v50 = vpop.f32.mrf.mxu0  ;;  %v9025_v43 = vld [vmem:[#allocation16_spill] sm:$0xff] }
 0x174   : > { %v5865_v29 = vpop.f32.mrf.mxu1 }
 0x175   : > { %v8434_v2 = vadd.f32 %v2566_v16, %v1953_v15  ;;  %v1958_v17 = vadd.f32 %v5865_v29, %v9023_v30  ;;  %v5900_v51 = vpop.f32.mrf.mxu0 }
 0x176   : > { %v1853_v9 = vpop.f32.mrf.mxu1 }
 0x177   : > { %v8437_v27 = vadd.f32 %v5899_v25, %v1958_v17  ;;  %v1956_v19 = vadd.f32 %v1853_v9, %v9024_v3  ;;  %v2582_v33 = vpop.f32.mrf.mxu0 }
 0x178   : > { %v5866_v34 = vpop.f32.mrf.mxu1 }
 0x179   : > { %v8440_v18 = vadd.f32 %v2579_v50, %v1956_v19  ;;  %v1959_v42 = vadd.f32 %v5866_v34, %v8233_v56  ;;  %v5903_v41 = vpop.f32.mrf.mxu0 }
 0x17a   : > { %v1856_v59 = vpop.f32.mrf.mxu1 }
 0x17b   : > { %v8443_v13 = vadd.f32 %v5900_v51, %v1959_v42  ;;  %v1957_v44 = vadd.f32 %v1856_v59, %v8249_v63  ;;  %v2595_v49 = vpop.f32.mrf.mxu0 }
 0x17c   : > { %v5869_v58 = vpop.f32.mrf.mxu1 }
 0x17d   : > { %v8446_v8 = vadd.f32 %v2582_v33, %v1957_v44  ;;  %v1962_v35 = vadd.f32 %v5869_v58, %v8259_v46  ;;  %v5904_v20 = vpop.f32.mrf.mxu0 }
 0x17e   : > { %v1869_v55 = vpop.f32.mrf.mxu1 }
 0x17f   : > { %v8449_v53 = vadd.f32 %v5903_v41, %v1962_v35  ;;  %v1960_v32 = vadd.f32 %v1869_v55, %v8276_v7  ;;  %v2598_v5 = vpop.f32.mrf.mxu0 }
 0x180   : > { %v5870_v56 = vpop.f32.mrf.mxu1 }
 0x181   : > { %v8452_v12 = vadd.f32 %v2595_v49, %v1960_v32  ;;  %v1963_v37 = vadd.f32 %v5870_v56, %v9025_v43  ;;  %v5907_v24 = vpop.f32.mrf.mxu0 }
 0x182   : > { %v1872_v63 = vpop.f32.mrf.mxu1 }
 0x183   : > { %v8455_v16 = vadd.f32 %v5904_v20, %v1963_v37  ;;  %v1961_v22 = vadd.f32 %v1872_v63, %v9026_v54  ;;  %v2611_v25 = vpop.f32.mrf.mxu0 }
 0x184   : > { %v5873_v46 = vpop.f32.mrf.mxu1 }
 0x185   : > { %v8458_v11 = vadd.f32 %v2598_v5, %v1961_v22  ;;  %v1966_v15 = vadd.f32 %v5873_v46, %v8318_v47  ;;  %v5908_v50 = vpop.f32.mrf.mxu0 }
 0x186   : > { %v1885_v7 = vpop.f32.mrf.mxu1 }
 0x187   : > { %v8461_v29 = vadd.f32 %v5907_v24, %v1966_v15  ;;  %v1964_v30 = vadd.f32 %v1885_v7, %v8321_v6  ;;  %v2614_v17 = vpop.f32.mrf.mxu0 }
 0x188   : > { %v5874_v51 = vpop.f32.mrf.mxu1 }
 0x189   : > { %v8464_v9 = vadd.f32 %v2611_v25, %v1964_v30  ;;  %v1967_v3 = vadd.f32 %v5874_v51, %v8341_v36  ;;  %v5911_v19 = vpop.f32.mrf.mxu0 }
 0x18a   : > { %v1888_v33 = vpop.f32.mrf.mxu1 }
 0x18b   : > { %v8467_v34 = vadd.f32 %v5908_v50, %v1967_v3  ;;  %v1965_v42 = vadd.f32 %v1888_v33, %v8356_v28  ;;  %v2627_v41 = vpop.f32.mrf.mxu0 }
 0x18c   : > { %v5877_v47 = vpop.f32.mrf.mxu1 }
 0x18d   : > { %9027 = vst [vmem:[#allocation2_spill] sm:$0xff] %v8467_v34  ;;  %v8470_v59 = vadd.f32 %v2614_v17, %v1965_v42  ;;  %v1970_v44 = vadd.f32 %v5877_v47, %v8362_v21  ;;  %v5912_v49 = vpop.f32.mrf.mxu0 }
 0x18e   : > { %v1901_v6 = vpop.f32.mrf.mxu1 }
 0x18f   : > { %9028 = vst [vmem:[#allocation14_spill] sm:$0xff] %v8470_v59  ;;  %v8473_v58 = vadd.f32 %v5911_v19, %v1970_v44  ;;  %v1968_v35 = vadd.f32 %v1901_v6, %v8365_v10  ;;  %v2630_v20 = vpop.f32.mrf.mxu0 }
 0x190   : > { %v5878_v36 = vpop.f32.mrf.mxu1 }
 0x191   : > { %9029 = vst [vmem:[#allocation19_spill] sm:$0xff] %v8473_v58  ;;  %v8476_v55 = vadd.f32 %v2627_v41, %v1968_v35  ;;  %v1971_v32 = vadd.f32 %v5878_v36, %v8374_v4  ;;  %v5915_v5 = vpop.f32.mrf.mxu0 }
 0x192   : > { %v1904_v28 = vpop.f32.mrf.mxu1 }
 0x193   : > { %9030 = vst [vmem:[#allocation9_spill] sm:$0xff] %v8476_v55  ;;  %v8479_v56 = vadd.f32 %v5912_v49, %v1971_v32  ;;  %v1969_v43 = vadd.f32 %v1904_v28, %v8381_v1  ;;  %v2643_v37 = vpop.f32.mrf.mxu0 }
 0x194   : > { %v5881_v21 = vpop.f32.mrf.mxu1 }
 0x195   : > { %9031 = vst [vmem:[#allocation18_spill] sm:$0xff] %v8479_v56  ;;  %v8482_v24 = vadd.f32 %v2630_v20, %v1969_v43  ;;  %v1974_v63 = vadd.f32 %v5881_v21, %v8387_v23  ;;  %v5916_v54 = vpop.f32.mrf.mxu0 }
 0x196   : > { %v1917_v10 = vpop.f32.mrf.mxu1 }
 0x197   : > { %9032 = vst [vmem:[#allocation21_spill] sm:$0xff] %v8482_v24  ;;  %v8485_v22 = vadd.f32 %v5915_v5, %v1974_v63  ;;  %v1972_v25 = vadd.f32 %v1917_v10, %v8390_v57  ;;  %v2646_v46 = vpop.f32.mrf.mxu0 }
 0x198   : > { %v5882_v4 = vpop.f32.mrf.mxu1 }
 0x199   : > { %9033 = vst [vmem:[#allocation23_spill] sm:$0xff] %v8485_v22  ;;  %v8488_v15 = vadd.f32 %v2643_v37, %v1972_v25  ;;  %v1975_v50 = vadd.f32 %v5882_v4, %v8394_v52  ;;  %v5919_v7 = vpop.f32.mrf.mxu0 }
 0x19a   : > { %v1920_v1 = vpop.f32.mrf.mxu1 }
 0x19b   : > { %9034 = vst [vmem:[#allocation25_spill] sm:$0xff] %v8488_v15  ;;  %v8491_v30 = vadd.f32 %v5916_v54, %v1975_v50  ;;  %v1973_v17 = vadd.f32 %v1920_v1, %v8398_v14  ;;  %v2659_v51 = vpop.f32.mrf.mxu0 }
 0x19c   : > { %v5885_v23 = vpop.f32.mrf.mxu1 }
 0x19d   : > { %9035 = vst [vmem:[#allocation4_spill] sm:$0xff] %v8491_v30  ;;  %v8494_v3 = vadd.f32 %v2646_v46, %v1973_v17  ;;  %v1978_v19 = vadd.f32 %v5885_v23, %v8401_v39  ;;  %v5920_v33 = vpop.f32.mrf.mxu0 }
 0x19e   : > { %v1933_v57 = vpop.f32.mrf.mxu1 }
 0x19f   : > { %9036 = vst [vmem:[#allocation3_spill] sm:$0xff] %v8494_v3  ;;  %v8497_v42 = vadd.f32 %v5919_v7, %v1978_v19  ;;  %v1976_v41 = vadd.f32 %v1933_v57, %v8404_v45  ;;  %v2662_v47 = vpop.f32.mrf.mxu0 }
 0x1a0   : > { %v5886_v52 = vpop.f32.mrf.mxu1 }
 0x1a1   : > { %9037 = vst [vmem:[#allocation6_spill] sm:$0xff] %v8497_v42  ;;  %v8500_v44 = vadd.f32 %v2659_v51, %v1976_v41  ;;  %v1979_v49 = vadd.f32 %v5886_v52, %v8407_v61  ;;  %v8503_v6 = vpop.f32.mrf.mxu0 }
 0x1a2   : > { %v1936_v14 = vpop.f32.mrf.mxu1 }
 0x1a3   : > { %9038 = vst [vmem:[#allocation5_spill] sm:$0xff] %v8500_v44  ;;  %v8505_v35 = vadd.f32 %v5920_v33, %v1979_v49  ;;  %v1977_v20 = vadd.f32 %v1936_v14, %v8410_v40  ;;  %v8508_v39 = vpop.f32.mrf.mxu0 }
 0x1a4   : > { %v5925_v36 = vpop.f32.mrf.mxu1 }
 0x1a5   : > { %9039 = vst [vmem:[#allocation7_spill] sm:$0xff] %v8505_v35  ;;  %v8510_v32 = vadd.f32 %v2662_v47, %v1977_v20  ;;  %v8512_v5 = vpop.f32.mrf.mxu0 }
 0x1a6   : > { %v3017_v45 = vpop.f32.mrf.mxu1 }
 0x1a7   : > { %9040 = vst [vmem:[#allocation10_spill] sm:$0xff] %v8510_v32  ;;  %v8514_v28 = vpop.f32.mrf.mxu0 }
 0x1a8   : > { %v5926_v43 = vpop.f32.mrf.mxu1 }
 0x1a9   : > { %v8516_v37 = vpop.f32.mrf.mxu0 }
 0x1aa   : > { %v8518_v61 = vpop.f32.mrf.mxu1 }
 0x1ab   : > { %v8520_v21 = vpop.f32.mrf.mxu0 }
 0x1ac   : > { %v8522_v63 = vpop.f32.mrf.mxu1 }
 0x1ad   : > { %v8524_v40 = vpop.f32.mrf.mxu0 }
 0x1ae   : > { %v8526_v54 = vpop.f32.mrf.mxu1 }
 0x1af   : > { %v8528_v10 = vpop.f32.mrf.mxu0 }
 0x1b0   : > { %v8530_v25 = vpop.f32.mrf.mxu1 }
 0x1b1   : > { %v8532_v46 = vpop.f32.mrf.mxu0 }
 0x1b2   : > { %v8534_v4 = vpop.f32.mrf.mxu1 }
 0x1b3   : > { %v8536_v50 = vpop.f32.mrf.mxu0 }
 0x1b4   : > { %v8538_v7 = vpop.f32.mrf.mxu1 }
 0x1b5   : > { %v8540_v1 = vpop.f32.mrf.mxu0 }
 0x1b6   : > { %v8542_v17 = vpop.f32.mrf.mxu1 }
 0x1b7   : > { %v8544_v51 = vpop.f32.mrf.mxu0 }
 0x1b8   : > { %v8546_v23 = vpop.f32.mrf.mxu1 }
 0x1b9   : > { %v8548_v19 = vpop.f32.mrf.mxu0 }
 0x1ba   : > { %v8550_v33 = vpop.f32.mrf.mxu1 }
 0x1bb   : > { %v8552_v57 = vpop.f32.mrf.mxu0 }
 0x1bc   : > { %v8554_v41 = vpop.f32.mrf.mxu1 }
 0x1bd   : > { %v8556_v47 = vpop.f32.mrf.mxu0 }
 0x1be   : > { %v8558_v52 = vpop.f32.mrf.mxu1 }
 0x1bf   : > { %v8560_v49 = vpop.f32.mrf.mxu0 }
 0x1c0   : > { %v8562_v14 = vpop.f32.mrf.mxu1 }
 0x1c1   : > { %v8564_v20 = vpop.f32.mrf.mxu0 }
 0x1c2   : > { %v8566_v32 = vpop.f32.mrf.mxu1 }
 0x1c3   : > { %v8568_v35 = vpop.f32.mrf.mxu0 }
 0x1c4   : > { %9041 = vst [vmem:[#allocation13_spill] sm:$0xff] %v8568_v35  ;;  %v8570_v44 = vpop.f32.mrf.mxu1 }
 0x1c5   : > { %v8572_v42 = vpop.f32.mrf.mxu0 }
 0x1c6   : > { %9042 = vst [vmem:[#allocation15_spill] sm:$0xff] %v8572_v42  ;;  %v8574_v3 = vpop.f32.mrf.mxu1 }
 0x1c7   : > { %v8576_v30 = vpop.f32.mrf.mxu0 }
 0x1c8   : > { %9043 = vst [vmem:[#allocation17_spill] sm:$0xff] %v8576_v30  ;;  %v8578_v15 = vpop.f32.mrf.mxu1 }
 0x1c9   : > { %9044 = vst [vmem:[#allocation20_spill] sm:$0xff] %v8578_v15  ;;  %v8580_v22 = vpop.f32.mrf.mxu0 }
 0x1ca   : > { %9045 = vst [vmem:[#allocation22_spill] sm:$0xff] %v8580_v22  ;;  %v8582_v24 = vpop.f32.mrf.mxu1 }
 0x1cb   : > { %9046 = vst [vmem:[#allocation24_spill] sm:$0xff] %v8582_v24  ;;  %v8584_v56 = vpop.f32.mrf.mxu0 }
 0x1cc   : > { %9047 = vst [vmem:[#allocation11_spill] sm:$0xff] %v8584_v56  ;;  %v8586_v55 = vpop.f32.mrf.mxu1 }
 0x1cd   : > { %9048 = vst [vmem:[#allocation8_spill] sm:$0xff] %v8586_v55  ;;  %v8588_v58 = vpop.f32.mrf.mxu0 }
 0x1ce   : > { %9049 = vst [vmem:[#allocation16_spill] sm:$0xff] %v8588_v58  ;;  %v8590_v59 = vpop.f32.mrf.mxu1 }
 0x1cf   : > { %9050 = vst [vmem:[#allocation12_spill] sm:$0xff] %v8590_v59  ;;  %v8592_v35 = vpop.f32.mrf.mxu0 }
 0x1d0   : > { %9051 = vst [vmem:[#allocation26_spill] sm:$0xff] %v8592_v35  ;;  %v8594_v42 = vpop.f32.mrf.mxu1 }
 0x1d1   : > { %9052 = vst [vmem:[#allocation27_spill] sm:$0xff] %v8594_v42  ;;  %v8596_v34 = vpop.f32.mrf.mxu0 }
 0x1d2   : > { %9053 = vst [vmem:[#allocation28_spill] sm:$0xff] %v8596_v34  ;;  %v8598_v30 = vpop.f32.mrf.mxu1 }
 0x1d3   : > { %9054 = vst [vmem:[#allocation29_spill] sm:$0xff] %v8598_v30  ;;  %v8600_v15 = vpop.f32.mrf.mxu0 }
 0x1d4   : > { %9055 = vst [vmem:[#allocation30_spill] sm:$0xff] %v8600_v15  ;;  %v8602_v22 = vpop.f32.mrf.mxu1 }
 0x1d5   : > { %9056 = vst [vmem:[#allocation31_spill] sm:$0xff] %v8602_v22  ;;  %v8604_v24 = vpop.f32.mrf.mxu0 }
 0x1d6   : > { %9057 = vst [vmem:[#allocation32_spill] sm:$0xff] %v8604_v24  ;;  %v8606_v56 = vpop.f32.mrf.mxu1  ;;  %v3146_v24 = vadd.f32 %v5925_v36, %v8413_v62  ;;  %v3145_v62 = vadd.f32 %v8518_v61, %v8422_v60  ;;  %v3148_v60 = vadd.f32 %v8526_v54, %v8428_v31 }
 0x1d7   : > { %9058 = vst [vmem:[#allocation33_spill] sm:$0xff] %v8606_v56  ;;  %v8608_v55 = vpop.f32.mrf.mxu0 }
 0x1d8   : > { %9059 = vst [vmem:[#allocation34_spill] sm:$0xff] %v8608_v55  ;;  %v8610_v58 = vpop.f32.mrf.mxu1  ;;  %v3144_v55 = vadd.f32 %v3017_v45, %v8416_v0  ;;  %v8642_v0 = vld [vmem:[%s8835_s2] ss:$0 sm:$0xff] }
 0x1d9   : > { %9060 = vst [vmem:[#allocation35_spill] sm:$0xff] %v8610_v58  ;;  %v8612_v59 = vpop.f32.mrf.mxu0 }
 0x1da   : > { %9061 = vst [vmem:[#allocation36_spill] sm:$0xff] %v8612_v59  ;;  %v8614_v35 = vpop.f32.mrf.mxu1 }
 0x1db   : > { %9062 = vst [vmem:[#allocation37_spill] sm:$0xff] %v8614_v35  ;;  %v8616_v42 = vpop.f32.mrf.mxu0 }
 0x1dc   : > { %9063 = vst [vmem:[#allocation38_spill] sm:$0xff] %v8616_v42  ;;  %v8618_v34 = vpop.f32.mrf.mxu1  ;;  %v3505_v42 = vadd.f32 %v8503_v6, %v3146_v24 }
 0x1dd   : > { %9064 = vst [vmem:[#allocation39_spill] sm:$0xff] %v8618_v34  ;;  %v8620_v30 = vpop.f32.mrf.mxu0  ;;  %v3147_v34 = vadd.f32 %v5926_v43, %v8419_v26 }
 0x1de   : > { %9065 = vst [vmem:[#allocation40_spill] sm:$0xff] %v8620_v30  ;;  %v8622_v15 = vpop.f32.mrf.mxu1 }
 0x1df   : > { %9066 = vst [vmem:[#allocation41_spill] sm:$0xff] %v8622_v15  ;;  %v8625_v22 = vpop.f32.mrf.mxu0  ;;  %v3503_v15 = vadd.f32 %v8508_v39, %v3144_v55  ;;  %v3506_v26 = vadd.f32 %v8512_v5, %v3147_v34  ;;  %v3151_v34 = vadd.f32 %v8530_v25, %v8431_v38  ;;  %v3149_v38 = vadd.f32 %v8534_v4, %v8434_v2 }
 0x1e0   : > { %9067 = vst [vmem:[#allocation42_spill] sm:$0xff] %v8625_v22  ;;  %v8627_v56 = vpop.f32.mrf.mxu1 }
 0x1e1   : > { %9068 = vst [vmem:[#allocation43_spill] sm:$0xff] %v8627_v56  ;;  %v6027_v59 = vpop.f32.mrf.mxu0  ;;  %v3150_v56 = vadd.f32 %v8522_v63, %v8425_v48 }
 0x1e2   : > { %v8630_v58 = vpop.f32.mrf.mxu1 }
 0x1e3   : > { %v4572_v35 = vpop.f32.mrf.mxu0  ;;  %v3509_v63 = vadd.f32 %v8516_v37, %v3150_v56  ;;  %v3507_v56 = vadd.f32 %v8520_v21, %v3148_v60 }
 0x1e4   : > { %v5993_v30 = vpop.f32.mrf.mxu1 }
 0x1e5   : > { %v4231_v36 = vadd.f32 %v5993_v30, %v3505_v42  ;;  %v6028_v22 = vpop.f32.mrf.mxu0  ;;  %v3504_v42 = vadd.f32 %v8514_v28, %v3145_v62 }
 0x1e6   : > { %v4102_v24 = vpop.f32.mrf.mxu1 }
 0x1e7   : > { %v4701_v6 = vadd.f32 %v6027_v59, %v4231_v36  ;;  %v4229_v45 = vadd.f32 %v4102_v24, %v3503_v15  ;;  %v4575_v55 = vpop.f32.mrf.mxu0 }
 0x1e8   : > { %v5994_v30 = vpop.f32.mrf.mxu1 }
 0x1e9   : > { %v4740_v48 = vadd.f32 %v8642_v0, %v4701_v6  ;;  %v4699_v39 = vadd.f32 %v4572_v35, %v4229_v45  ;;  %v4232_v43 = vadd.f32 %v5994_v30, %v3506_v26  ;;  %v6031_v61 = vpop.f32.mrf.mxu0  ;;  %v3510_v26 = vadd.f32 %v8524_v40, %v3151_v34 }
 0x1ea   : > { %v4105_v31 = vpop.f32.mrf.mxu1  ;;  %v3508_v30 = vadd.f32 %v8528_v10, %v3149_v38  ;;  %v3158_v38 = vadd.f32 %v8554_v41, %v8449_v53 }
 0x1eb   : > { %v5568_v59 = vpack.c.bf16 %v4740_v48, %v4740_v48  ;;  %v4738_v15 = vadd.f32 %v8642_v0, %v4699_v39  ;;  %v4702_v35 = vadd.f32 %v6028_v22, %v4232_v43  ;;  %v4230_v5 = vadd.f32 %v4105_v31, %v3504_v42  ;;  %v4588_v28 = vpop.f32.mrf.mxu0 }
 0x1ec   : > { %v5997_v37 = vpop.f32.mrf.mxu1  ;;  %v3154_v22 = vadd.f32 %v8538_v7, %v8437_v27 }
 0x1ed   : > { %4901 = vst.msk [vmem:[%s8656_s15 + $0x8] sm:$0xf] %vm4898_vm8, %v5568_v59  ;;  %v5566_v54 = vpack.c.bf16 %v4738_v15, %v4738_v15  ;;  %v4741_v25 = vadd.f32 %v8642_v0, %v4702_v35  ;;  %v4700_v62 = vadd.f32 %v4575_v55, %v4230_v5  ;;  %v4235_v36 = vadd.f32 %v5997_v37, %v3509_v63  ;;  %v6032_v24 = vpop.f32.mrf.mxu0 }
 0x1ee   : > { %v4118_v6 = vpop.f32.mrf.mxu1  ;;  %v3152_v55 = vadd.f32 %v8542_v17, %v8440_v18  ;;  %v3513_v43 = vadd.f32 %v8532_v46, %v3154_v22  ;;  %v3153_v15 = vadd.f32 %v8550_v33, %v8446_v8 }
 0x1ef   : > { %4899 = vst.msk [vmem:[%s8656_s15] sm:$0xf] %vm4898_vm8, %v5566_v54  ;;  %v5569_v21 = vpack.c.bf16 %v4741_v25, %v4741_v25  ;;  %v4739_v2 = vadd.f32 %v8642_v0, %v4700_v62  ;;  %v4705_v4 = vadd.f32 %v6031_v61, %v4235_v36  ;;  %v4233_v45 = vadd.f32 %v4118_v6, %v3507_v56  ;;  %v4591_v60 = vpop.f32.mrf.mxu0 }
 0x1f0   : > { %v5998_v42 = vpop.f32.mrf.mxu1  ;;  %v3155_v61 = vadd.f32 %v8546_v23, %v8443_v13  ;;  %v3511_v59 = vadd.f32 %v8536_v50, %v3152_v55  ;;  %v3512_v62 = vadd.f32 %v8544_v51, %v3153_v15  ;;  %v3156_v36 = vadd.f32 %v8558_v52, %v8452_v12 }
 0x1f1   : > { %4902 = vst.msk [vmem:[%s8656_s15 + $0xc] sm:$0xf] %vm4898_vm8, %v5569_v21  ;;  %v5567_v40 = vpack.c.bf16 %v4739_v2, %v4739_v2  ;;  %v4744_v27 = vadd.f32 %v8642_v0, %v4705_v4  ;;  %v4703_v7 = vadd.f32 %v4588_v28, %v4233_v45  ;;  %v4236_v48 = vadd.f32 %v5998_v42, %v3510_v26  ;;  %v6035_v39 = vpop.f32.mrf.mxu0 }
 0x1f2   : > { %v4121_v63 = vpop.f32.mrf.mxu1  ;;  %v3514_v56 = vadd.f32 %v8540_v1, %v3155_v61  ;;  %v3517_v6 = vadd.f32 %v8548_v19, %v3158_v38  ;;  %v3159_v21 = vadd.f32 %v8562_v14, %v8455_v16 }
 0x1f3   : > { %4900 = vst.msk [vmem:[%s8656_s15 + $0x4] sm:$0xf] %vm4898_vm8, %v5567_v40  ;;  %v5572_v10 = vpack.c.bf16 %v4744_v27, %v4744_v27  ;;  %v4742_v18 = vadd.f32 %v8642_v0, %v4703_v7  ;;  %v4706_v17 = vadd.f32 %v6032_v24, %v4236_v48  ;;  %v4234_v34 = vadd.f32 %v4121_v63, %v3508_v30  ;;  %v4604_v31 = vpop.f32.mrf.mxu0 }
 0x1f4   : > { %v6001_v35 = vpop.f32.mrf.mxu1  ;;  %v3157_v30 = vadd.f32 %v8566_v32, %v8458_v11  ;;  %v3518_v27 = vadd.f32 %v8556_v47, %v3159_v21  ;;  %v3162_v7 = vadd.f32 %v8570_v44, %v8461_v29  ;;  %v3160_v63 = vadd.f32 %v8574_v3, %v8464_v9 }
 0x1f5   : > { %4905 = vst.msk [vmem:[%s8656_s15 + $0x18] sm:$0xf] %vm4898_vm8, %v5572_v10  ;;  %v5570_v46 = vpack.c.bf16 %v4742_v18, %v4742_v18  ;;  %v4745_v13 = vadd.f32 %v8642_v0, %v4706_v17  ;;  %v4704_v23 = vadd.f32 %v4591_v60, %v4234_v34  ;;  %v4239_v5 = vadd.f32 %v6001_v35, %v3513_v43  ;;  %v6036_v28 = vpop.f32.mrf.mxu0 }
 0x1f6   : > { %v4134_v37 = vpop.f32.mrf.mxu1  ;;  %v3515_v60 = vadd.f32 %v8552_v57, %v3156_v36  ;;  %v3516_v61 = vadd.f32 %v8560_v49, %v3157_v30  ;;  %v3521_v34 = vadd.f32 %v8564_v20, %v3162_v7  ;;  %v9075_v36 = vld [vmem:[#allocation19_spill] sm:$0xff] }
 0x1f7   : > { %4903 = vst.msk [vmem:[%s8656_s15 + $0x10] sm:$0xf] %vm4898_vm8, %v5570_v46  ;;  %v5573_v50 = vpack.c.bf16 %v4745_v13, %v4745_v13  ;;  %v4743_v8 = vadd.f32 %v8642_v0, %v4704_v23  ;;  %v4709_v33 = vadd.f32 %v6035_v39, %v4239_v5  ;;  %v4237_v54 = vadd.f32 %v4134_v37, %v3511_v59  ;;  %v4607_v25 = vpop.f32.mrf.mxu0  ;;  %v9070_v59 = vld [vmem:[#allocation20_spill] sm:$0xff]  ;;  %v9071_v23 = vld [vmem:[#allocation13_spill] sm:$0xff] }
 0x1f8   : > { %v6002_v24 = vpop.f32.mrf.mxu1  ;;  %v3519_v5 = vadd.f32 %v9071_v23, %v3160_v63 }
 0x1f9   : > { %4906 = vst.msk [vmem:[%s8656_s15 + $0x1c] sm:$0xf] %vm4898_vm8, %v5573_v50  ;;  %v5571_v1 = vpack.c.bf16 %v4743_v8, %v4743_v8  ;;  %v4748_v53 = vadd.f32 %v8642_v0, %v4709_v33  ;;  %v4707_v41 = vadd.f32 %v4604_v31, %v4237_v54  ;;  %v4240_v26 = vadd.f32 %v6002_v24, %v3514_v56  ;;  %v6039_v22 = vpop.f32.mrf.mxu0  ;;  %v9069_v31 = vld [vmem:[#allocation2_spill] sm:$0xff]  ;;  %v9073_v56 = vld [vmem:[#allocation24_spill] sm:$0xff] }
 0x1fa   : > { %v4137_v2 = vpop.f32.mrf.mxu1  ;;  %v3163_v15 = vadd.f32 %v9070_v59, %v9069_v31  ;;  %v9076_v24 = vld [vmem:[#allocation8_spill] sm:$0xff] }
 0x1fb   : > { %4904 = vst.msk [vmem:[%s8656_s15 + $0x14] sm:$0xf] %vm4898_vm8, %v5571_v1  ;;  %v5576_v51 = vpack.c.bf16 %v4748_v53, %v4748_v53  ;;  %v4746_v12 = vadd.f32 %v8642_v0, %v4707_v41  ;;  %v4710_v52 = vadd.f32 %v6036_v28, %v4240_v26  ;;  %v4238_v4 = vadd.f32 %v4137_v2, %v3512_v62  ;;  %v4620_v45 = vpop.f32.mrf.mxu0  ;;  %v9072_v28 = vld [vmem:[#allocation14_spill] sm:$0xff]  ;;  %v9077_v2 = vld [vmem:[#allocation17_spill] sm:$0xff] }
 0x1fc   : > { %v6005_v55 = vpop.f32.mrf.mxu1  ;;  %v3161_v38 = vadd.f32 %v9073_v56, %v9072_v28  ;;  %v3166_v1 = vadd.f32 %v9076_v24, %v9075_v36 }
 0x1fd   : > { %4909 = vst.msk [vmem:[%s8656_s15 + $0x28] sm:$0xf] %vm4898_vm8, %v5576_v51  ;;  %v5574_v19 = vpack.c.bf16 %v4746_v12, %v4746_v12  ;;  %v4749_v16 = vadd.f32 %v8642_v0, %v4710_v52  ;;  %v4708_v14 = vadd.f32 %v4607_v25, %v4238_v4  ;;  %v4243_v42 = vadd.f32 %v6005_v55, %v3517_v6  ;;  %v6040_v40 = vpop.f32.mrf.mxu0  ;;  %v9074_v25 = vld [vmem:[#allocation15_spill] sm:$0xff]  ;;  %v9078_v12 = vld [vmem:[#allocation9_spill] sm:$0xff]  ;;  %v9079_v52 = vld [vmem:[#allocation12_spill] sm:$0xff] }
 0x1fe   : > { %v4150_v48 = vpop.f32.mrf.mxu1  ;;  %v3522_v62 = vadd.f32 %v9074_v25, %v3163_v15  ;;  %v3520_v51 = vadd.f32 %v9077_v2, %v3161_v38  ;;  %v3164_v4 = vadd.f32 %v9079_v52, %v9078_v12  ;;  %v9086_v15 = vld [vmem:[#allocation16_spill] sm:$0xff]  ;;  %v9089_v38 = vld [vmem:[#allocation26_spill] sm:$0xff] }
 0x1ff   : > { %4907 = vst.msk [vmem:[%s8656_s15 + $0x20] sm:$0xf] %vm4898_vm8, %v5574_v19  ;;  %v5577_v57 = vpack.c.bf16 %v4749_v16, %v4749_v16  ;;  %v4747_v11 = vadd.f32 %v8642_v0, %v4708_v14  ;;  %v4713_v32 = vadd.f32 %v6039_v22, %v4243_v42  ;;  %v4241_v39 = vadd.f32 %v4150_v48, %v3515_v60  ;;  %v4623_v43 = vpop.f32.mrf.mxu0  ;;  %v9080_v14 = vld [vmem:[#allocation22_spill] sm:$0xff] }
 0x200   : > { %v6006_v10 = vpop.f32.mrf.mxu1  ;;  %v3525_v42 = vadd.f32 %v9080_v14, %v3166_v1  ;;  %v9092_v1 = vld [vmem:[#allocation28_spill] sm:$0xff] }
 0x201   : > { %4910 = vst.msk [vmem:[%s8656_s15 + $0x2c] sm:$0xf] %vm4898_vm8, %v5577_v57  ;;  %v5575_v47 = vpack.c.bf16 %v4747_v11, %v4747_v11  ;;  %v4752_v29 = vadd.f32 %v8642_v0, %v4713_v32  ;;  %v4711_v44 = vadd.f32 %v4620_v45, %v4241_v39  ;;  %v4244_v18 = vadd.f32 %v6006_v10, %v3518_v27  ;;  %v6043_v17 = vpop.f32.mrf.mxu0  ;;  %v9082_v27 = vld [vmem:[#allocation27_spill] sm:$0xff]  ;;  %v9084_v10 = vld [vmem:[#allocation21_spill] sm:$0xff] }
 0x202   : > { %v4153_v35 = vpop.f32.mrf.mxu1 }
 0x203   : > { %4908 = vst.msk [vmem:[%s8656_s15 + $0x24] sm:$0xf] %vm4898_vm8, %v5575_v47  ;;  %v5580_v49 = vpack.c.bf16 %v4752_v29, %v4752_v29  ;;  %v4750_v9 = vadd.f32 %v8642_v0, %v4711_v44  ;;  %v4714_v3 = vadd.f32 %v6040_v40, %v4244_v18  ;;  %v4242_v46 = vadd.f32 %v4153_v35, %v3516_v61  ;;  %v4636_v13 = vpop.f32.mrf.mxu0  ;;  %v9081_v40 = vld [vmem:[#allocation18_spill] sm:$0xff]  ;;  %v9083_v61 = vld [vmem:[#allocation11_spill] sm:$0xff]  ;;  %v9085_v47 = vld [vmem:[#allocation29_spill] sm:$0xff] }
 0x204   : > { %v6009_v37 = vpop.f32.mrf.mxu1  ;;  %v3167_v7 = vadd.f32 %v9082_v27, %v9081_v40  ;;  %v3523_v63 = vadd.f32 %v9083_v61, %v3164_v4  ;;  %v3165_v29 = vadd.f32 %v9085_v47, %v9084_v10  ;;  %v9095_v4 = vld [vmem:[#allocation30_spill] sm:$0xff] }
 0x205   : > { %4913 = vst.msk [vmem:[%s8656_s15 + $0x38] sm:$0xf] %vm4898_vm8, %v5580_v49  ;;  %v5578_v20 = vpack.c.bf16 %v4750_v9, %v4750_v9  ;;  %v4753_v50 = vadd.f32 %v8642_v0, %v4714_v3  ;;  %v4712_v8 = vadd.f32 %v4623_v43, %v4242_v46  ;;  %v4247_v33 = vadd.f32 %v6009_v37, %v3521_v34  ;;  %v6044_v54 = vpop.f32.mrf.mxu0  ;;  %v9087_v49 = vld [vmem:[#allocation23_spill] sm:$0xff] }
 0x206   : > { %v4166_v53 = vpop.f32.mrf.mxu1  ;;  %v3526_v35 = vadd.f32 %v9086_v15, %v3167_v7  ;;  %v9088_v9 = vld [vmem:[#allocation31_spill] sm:$0xff]  ;;  %v3524_v37 = vadd.f32 %v9089_v38, %v3165_v29  ;;  %v9098_v7 = vld [vmem:[#allocation32_spill] sm:$0xff]  ;;  %v9101_v29 = vld [vmem:[#allocation34_spill] sm:$0xff] }
 0x207   : > { %4911 = vst.msk [vmem:[%s8656_s15 + $0x30] sm:$0xf] %vm4898_vm8, %v5578_v20  ;;  %v5581_v41 = vpack.c.bf16 %v4753_v50, %v4753_v50  ;;  %v4751_v26 = vadd.f32 %v8642_v0, %v4712_v8  ;;  %v4717_v22 = vadd.f32 %v6043_v17, %v4247_v33  ;;  %v4245_v6 = vadd.f32 %v4166_v53, %v3519_v5  ;;  %v4639_v21 = vpop.f32.mrf.mxu0  ;;  %v9090_v20 = vld [vmem:[#allocation25_spill] sm:$0xff] }
 0x208   : > { %v6010_v45 = vpop.f32.mrf.mxu1  ;;  %v3170_v3 = vadd.f32 %v9088_v9, %v9087_v49  ;;  %v9091_v50 = vld [vmem:[#allocation33_spill] sm:$0xff] }
 0x209   : > { %4914 = vst.msk [vmem:[%s8656_s15 + $0x3c] sm:$0xf] %vm4898_vm8, %v5581_v41  ;;  %v5579_v60 = vpack.c.bf16 %v4751_v26, %v4751_v26  ;;  %v4756_v30 = vadd.f32 %v8642_v0, %v4717_v22  ;;  %v4715_v55 = vadd.f32 %v4636_v13, %v4245_v6  ;;  %v4248_v19 = vadd.f32 %v6010_v45, %v3522_v62  ;;  %v9093_v41 = vld [vmem:[#allocation4_spill] sm:$0xff]  ;;  %v9094_v26 = vld [vmem:[#allocation35_spill] sm:$0xff] }
 0x20a   : > { %v6047_v16 = vpop.f32.mrf.mxu0  ;;  %v4169_v48 = vpop.f32.mrf.mxu1  ;;  %v3168_v8 = vadd.f32 %v9091_v50, %v9090_v20  ;;  %v3529_v53 = vadd.f32 %v9092_v1, %v3170_v3  ;;  %v3171_v22 = vadd.f32 %v9094_v26, %v9093_v41  ;;  %v9104_v3 = vld [vmem:[#allocation36_spill] sm:$0xff]  ;;  %v9107_v50 = vld [vmem:[#allocation38_spill] sm:$0xff] }
 0x20b   : > { %4912 = vst.msk [vmem:[%s8656_s15 + $0x34] sm:$0xf] %vm4898_vm8, %v5579_v60  ;;  %v5584_v57 = vpack.c.bf16 %v4756_v30, %v4756_v30  ;;  %v4754_v11 = vadd.f32 %v8642_v0, %v4715_v55  ;;  %v4718_v32 = vadd.f32 %v6044_v54, %v4248_v19  ;;  %v4246_v39 = vadd.f32 %v4169_v48, %v3520_v51  ;;  %v9096_v60 = vld [vmem:[#allocation3_spill] sm:$0xff]  ;;  %v9097_v30 = vld [vmem:[#allocation37_spill] sm:$0xff]  ;;  %v9109_v41 = vld [vmem:[#allocation40_spill] sm:$0xff] }
 0x20c   : > { %v4652_v43 = vpop.f32.mrf.mxu0  ;;  %v6013_v44 = vpop.f32.mrf.mxu1  ;;  %v3527_v45 = vadd.f32 %v9095_v4, %v3168_v8  ;;  %v3169_v55 = vadd.f32 %v9097_v30, %v9096_v60  ;;  %v3530_v48 = vadd.f32 %v9098_v7, %v3171_v22 }
 0x20d   : > { %4917 = vst.msk [vmem:[%s8656_s15 + $0x48] sm:$0xf] %vm4898_vm8, %v5584_v57  ;;  %v5582_v18 = vpack.c.bf16 %v4754_v11, %v4754_v11  ;;  %v4757_v17 = vadd.f32 %v8642_v0, %v4718_v32  ;;  %v4716_v34 = vadd.f32 %v4639_v21, %v4246_v39  ;;  %v4251_v31 = vadd.f32 %v6013_v44, %v3525_v42  ;;  %v9099_v57 = vld [vmem:[#allocation6_spill] sm:$0xff]  ;;  %v9100_v11 = vld [vmem:[#allocation39_spill] sm:$0xff] }
 0x20e   : > { %v6048_v59 = vpop.f32.mrf.mxu0  ;;  %v4182_v46 = vpop.f32.mrf.mxu1  ;;  %v3174_v32 = vadd.f32 %v9100_v11, %v9099_v57  ;;  %v3528_v44 = vadd.f32 %v9101_v29, %v3169_v55 }
 0x20f   : > { %4915 = vst.msk [vmem:[%s8656_s15 + $0x40] sm:$0xf] %vm4898_vm8, %v5582_v18  ;;  %v5585_v13 = vpack.c.bf16 %v4757_v17, %v4757_v17  ;;  %v4755_v23 = vadd.f32 %v8642_v0, %v4716_v34  ;;  %v4721_v5 = vadd.f32 %v6047_v16, %v4251_v31  ;;  %v4249_v28 = vadd.f32 %v4182_v46, %v3523_v63  ;;  %v9102_v18 = vld [vmem:[#allocation5_spill] sm:$0xff] }
 0x210   : > { %v4655_v56 = vpop.f32.mrf.mxu0  ;;  %v6014_v33 = vpop.f32.mrf.mxu1  ;;  %v9103_v17 = vld [vmem:[#allocation41_spill] sm:$0xff]  ;;  %v3533_v46 = vadd.f32 %v9104_v3, %v3174_v32 }
 0x211   : > { %4918 = vst.msk [vmem:[%s8656_s15 + $0x4c] sm:$0xf] %vm4898_vm8, %v5585_v13  ;;  %v5583_v54 = vpack.c.bf16 %v4755_v23, %v4755_v23  ;;  %v4760_v25 = vadd.f32 %v8642_v0, %v4721_v5  ;;  %v4719_v62 = vadd.f32 %v4652_v43, %v4249_v28  ;;  %v4252_v36 = vadd.f32 %v6014_v33, %v3526_v35  ;;  %v9105_v13 = vld [vmem:[#allocation7_spill] sm:$0xff]  ;;  %v9108_v33 = vld [vmem:[#allocation10_spill] sm:$0xff] }
 0x212   : > { %v6051_v24 = vpop.f32.mrf.mxu0  ;;  %v4185_v6 = vpop.f32.mrf.mxu1  ;;  %v3172_v34 = vadd.f32 %v9103_v17, %v9102_v18  ;;  %v9106_v23 = vld [vmem:[#allocation43_spill] sm:$0xff] }
 0x213   : > { %4916 = vst.msk [vmem:[%s8656_s15 + $0x44] sm:$0xf] %vm4898_vm8, %v5583_v54  ;;  %v5588_v21 = vpack.c.bf16 %v4760_v25, %v4760_v25  ;;  %v4758_v2 = vadd.f32 %v8642_v0, %v4719_v62  ;;  %v4722_v51 = vadd.f32 %v6048_v59, %v4252_v36  ;;  %v4250_v12 = vadd.f32 %v4185_v6, %v3524_v37 }
 0x214   : > { %v4668_v52 = vpop.f32.mrf.mxu0  ;;  %v6017_v19 = vpop.f32.mrf.mxu1  ;;  %v3175_v5 = vadd.f32 %v9106_v23, %v9105_v13  ;;  %v3531_v8 = vadd.f32 %v9107_v50, %v3172_v34  ;;  %v3173_v54 = vadd.f32 %v8630_v58, %v9108_v33 }
 0x215   : > { %4921 = vst.msk [vmem:[%s8656_s15 + $0x58] sm:$0xf] %vm4898_vm8, %v5588_v21  ;;  %v5586_v16 = vpack.c.bf16 %v4758_v2, %v4758_v2  ;;  %v4761_v14 = vadd.f32 %v8642_v0, %v4722_v51  ;;  %v4720_v42 = vadd.f32 %v4655_v56, %v4250_v12  ;;  %v4255_v40 = vadd.f32 %v6017_v19, %v3529_v53  ;;  %v9110_v51 = vld [vmem:[#allocation42_spill] sm:$0xff] }
 0x216   : > { %v6052_v27 = vpop.f32.mrf.mxu0  ;;  %v4198_v39 = vpop.f32.mrf.mxu1  ;;  %v3534_v26 = vadd.f32 %v9109_v41, %v3175_v5  ;;  %v3532_v12 = vadd.f32 %v9110_v51, %v3173_v54 }
 0x217   : > { %4919 = vst.msk [vmem:[%s8656_s15 + $0x50] sm:$0xf] %vm4898_vm8, %v5586_v16  ;;  %v5589_v43 = vpack.c.bf16 %v4761_v14, %v4761_v14  ;;  %v4759_v61 = vadd.f32 %v8642_v0, %v4720_v42  ;;  %v4725_v63 = vadd.f32 %v6051_v24, %v4255_v40  ;;  %v4253_v10 = vadd.f32 %v4198_v39, %v3527_v45 }
 0x218   : > { %v4671_v47 = vpop.f32.mrf.mxu0  ;;  %v6018_v31 = vpop.f32.mrf.mxu1 }
 0x219   : > { %4922 = vst.msk [vmem:[%s8656_s15 + $0x5c] sm:$0xf] %vm4898_vm8, %v5589_v43  ;;  %v5587_v59 = vpack.c.bf16 %v4759_v61, %v4759_v61  ;;  %v4764_v15 = vadd.f32 %v8642_v0, %v4725_v63  ;;  %v4723_v35 = vadd.f32 %v4668_v52, %v4253_v10  ;;  %v4256_v49 = vadd.f32 %v6018_v31, %v3530_v48 }
 0x21a   : > { %v6055_v9 = vpop.f32.mrf.mxu0  ;;  %v4201_v28 = vpop.f32.mrf.mxu1 }
 0x21b   : > { %4920 = vst.msk [vmem:[%s8656_s15 + $0x54] sm:$0xf] %vm4898_vm8, %v5587_v59  ;;  %v5592_v56 = vpack.c.bf16 %v4764_v15, %v4764_v15  ;;  %v4762_v38 = vadd.f32 %v8642_v0, %v4723_v35  ;;  %v4726_v37 = vadd.f32 %v6052_v27, %v4256_v49  ;;  %v4254_v20 = vadd.f32 %v4201_v28, %v3528_v44 }
 0x21c   : > { %v6021_v25 = vpop.f32.mrf.mxu1  ;;  %v4684_v62 = vpop.f32.mrf.mxu0 }
 0x21d   : > { %4925 = vst.msk [vmem:[%s8656_s15 + $0x68] sm:$0xf] %vm4898_vm8, %v5592_v56  ;;  %v5590_v36 = vpack.c.bf16 %v4762_v38, %v4762_v38  ;;  %v4765_v24 = vadd.f32 %v8642_v0, %v4726_v37  ;;  %v4724_v1 = vadd.f32 %v4671_v47, %v4254_v20  ;;  %v4259_v53 = vadd.f32 %v6021_v25, %v3533_v46 }
 0x21e   : > { %v4214_v22 = vpop.f32.mrf.mxu1  ;;  %v6056_v4 = vpop.f32.mrf.mxu0 }
 0x21f   : > { %4923 = vst.msk [vmem:[%s8656_s15 + $0x60] sm:$0xf] %vm4898_vm8, %v5590_v36  ;;  %v5593_v6 = vpack.c.bf16 %v4765_v24, %v4765_v24  ;;  %v4763_v21 = vadd.f32 %v8642_v0, %v4724_v1  ;;  %v4729_v58 = vadd.f32 %v6055_v9, %v4259_v53  ;;  %v4257_v2 = vadd.f32 %v4214_v22, %v3531_v8 }
 0x220   : > { %v6022_v52 = vpop.f32.mrf.mxu1  ;;  %v4687_v27 = vpop.f32.mrf.mxu0 }
 0x221   : > { %4926 = vst.msk [vmem:[%s8656_s15 + $0x6c] sm:$0xf] %vm4898_vm8, %v5593_v6  ;;  %v5591_v45 = vpack.c.bf16 %v4763_v21, %v4763_v21  ;;  %v4768_v60 = vadd.f32 %v8642_v0, %v4729_v58  ;;  %v4727_v30 = vadd.f32 %v4684_v62, %v4257_v2  ;;  %v4260_v55 = vadd.f32 %v6022_v52, %v3534_v26 }
 0x222   : > { %v4217_v19 = vpop.f32.mrf.mxu1 }
 0x223   : > { %4924 = vst.msk [vmem:[%s8656_s15 + $0x64] sm:$0xf] %vm4898_vm8, %v5591_v45  ;;  %v5596_v16 = vpack.c.bf16 %v4768_v60, %v4768_v60  ;;  %v4766_v14 = vadd.f32 %v8642_v0, %v4727_v30  ;;  %v4730_v42 = vadd.f32 %v6056_v4, %v4260_v55  ;;  %v4258_v40 = vadd.f32 %v4217_v19, %v3532_v12 }
 0x225   : > { %4929 = vst.msk [vmem:[%s8656_s15 + $0x78] sm:$0xf] %vm4898_vm8, %v5596_v16  ;;  %v5594_v7 = vpack.c.bf16 %v4766_v14, %v4766_v14  ;;  %v4769_v48 = vadd.f32 %v8642_v0, %v4730_v42  ;;  %v4728_v57 = vadd.f32 %v4687_v27, %v4258_v40 }
 0x227   : > { %4927 = vst.msk [vmem:[%s8656_s15 + $0x70] sm:$0xf] %vm4898_vm8, %v5594_v7  ;;  %v5597_v11 = vpack.c.bf16 %v4769_v48, %v4769_v48  ;;  %v4767_v32 = vadd.f32 %v8642_v0, %v4728_v57 }
 0x229   : > { %4930 = vst.msk [vmem:[%s8656_s15 + $0x7c] sm:$0xf] %vm4898_vm8, %v5597_v11  ;;  %v5595_v39 = vpack.c.bf16 %v4767_v32, %v4767_v32 }
 0x22b   : > { %4928 = vst.msk [vmem:[%s8656_s15 + $0x74] sm:$0xf] %vm4898_vm8, %v5595_v39 }
 0x22c PF: > { %s13_s12 = sadd.s32 1, %s6134_s12  }
 0x22d   : > { %p10_p4 = scmp.ge.s32.totalorder %s13_s12, 4  }
 0x22f   :  { %12 = sbr.rel (!%p10_p4) target bundleno = 1 (0x1), region = 72 }

// kernel: psa_p_forward.3
= control target key start
LH: loop header
LB: loop body
LE: loop exit
PB: predicated region body
PF: predicated region fallthrough
CT: control target
= control target key end

     0   :  { %s6508_s12 = smov 0   ;;  %s9436_s0 = inlined_call_operand.vmem [shape: bf16[2,18,18,4], index: 0, kind: input, shape index: {}]   ;;  %s9437_s1 = inlined_call_operand.vmem [shape: bf16[9,4,4], index: 1, kind: input, shape index: {}]   ;;  %s9438_s2 = inlined_call_operand.vmem [shape: f32[1,4], index: 2, kind: input, shape index: {}]   ;;  %s9439_s3 = inlined_call_operand.vmem [shape: bf16[2,256,4], index: 3, kind: output, shape index: {}]  }
   0x1 LB: > { %s5274_s13 = sadd.s32 4294967295, %s6486_s12   ;;  %p5278_p0 = scmp.ge.s32.totalorder %s6486_s12, 1  ;;  %s6486_s12 = sphi %s6508_s12, %s13_s12  }
   0x2   : > { %p137_p1 = scmp.lt.s32.totalorder %s6486_s12, 3 }
   0x4   : > { %p138_p2 = pnand %p5278_p0, %p137_p1 }
   0x6   : > { %141 = sbr.rel (%p138_p2) target bundleno = 618 (0x26a), region = 32 }
   0xb   : > { %v5282_v0 = vld [vmem:[%s9437_s1 + $0x2] sm:$0x3]  ;;  %vm707_vm0 = vcmask 1041408   ;;  %p161_p3 = scmp.lt.s32.totalorder %s5274_s13, 1  ;;  %v204_v2 = vld [vmem:[%s9437_s1] sm:$0x3] }
   0xc   : > { %6348 = vmatprep.subr.msk.bf16.mxu1 %vm707_vm0, %v5282_v0  ;;  %6347 = vmatprep.subr.msk.bf16.mxu0 %vm707_vm0, %v5282_v0  ;;  %v709_v1 = vsel %vm707_vm0, %v5282_v0, 0  ;;  %v5363_v3 = vld [vmem:[%s9437_s1 + $0x4] sm:$0x3]  ;;  %vm221_vm1 = vsmask.f32 3328  ;;  %v6539_v4 = vsel %vm707_vm0, %v204_v2, 0 }
   0xd   : > { %6346 = vmatpush3.bf16.msra.mxu1 %v709_v1  ;;  %6040 = vmatpush3.bf16.msra.mxu0 %v709_v1  ;;  %s9653_s13 = smov (!%p161_p3, %s5274_s13), 1  ;;  %vm222_vm2 = vsmask.f32 7440  ;;  %vm658_vm3 = vcmask 31744   ;;  %v6565_v16 = vsel %vm707_vm0, %v5363_v3, 0  ;;  %vm1212_vm5 = vcmask 1042432  }
   0xe   : > { %6349 = vmatprep.subr.msk.bf16.mxu1 %vm707_vm0, %v204_v2  ;;  %6350 = vmatprep.subr.msk.bf16.mxu0 %vm707_vm0, %v5363_v3  ;;  %s6357_s20 = smul.u32 216, %s9653_s13  ;;  %vm6580_vm4 = vmor %vm221_vm1, %vm222_vm2  ;;  %vm1213_vm6 = vcmask 1046532   ;;  %vm5186_vm8 = vcmask 27648   ;;  %s5853_s11 = sshll.u32 %s9653_s13, 7 }
   0xf   : > { %vm6866_vm7 = vmor %vm1212_vm5, %vm1213_vm6  ;;  %s9131_s15 = scalar_lea.vmem %s9439_s3, %s5853_s11 }
  0x10   : > { %s6536_s23 = scalar_lea.vmem %s9436_s0, %s6357_s20 }
  0x11   : > { %v6542_v5 = vld [vmem:[%s6536_s23] sm:$0xf]  ;;  %v6545_v6 = vld [vmem:[%s6536_s23 + $0x4] sm:$0xf]  ;;  %v6548_v7 = vld [vmem:[%s6536_s23 + $0x8] sm:$0x1] }
  0x12   : > { %v225_v8 = vshrl.u32 %v6542_v5, 16  ;;  %v228_v9 = vshll.u32 %v6542_v5, 16  ;;  %v234_v10 = vshll.u32 %v6545_v6, 16  ;;  %v238_v11 = vshrl.u32 %v6545_v6, 16  ;;  %v6555_v12 = vld [vmem:[%s6536_s23 + $0x60] sm:$0xf] }
  0x13   : > { %v244_v13 = vshll.u32 %v6548_v7, 16  ;;  %v6559_v14 = vld [vmem:[%s6536_s23 + $0x64] sm:$0xf]  ;;  %v6562_v15 = vld [vmem:[%s6536_s23 + $0x68] sm:$0x1]  ;;  %v417_v22 = vshrl.u32 %v6555_v12, 16 }
  0x14   : > { %v227_v17 = vrot.slane %v225_v8, 4  ;;  %v230_v18 = vrot.slane %v228_v9, 5  ;;  %v236_v19 = vrot.slane %v234_v10, 5  ;;  %v240_v20 = vrot.slane %v238_v11, 4  ;;  %v6573_v29 = vld [vmem:[%s6536_s23 + $0xc] sm:$0xf] }
  0x15   : > { %v246_v21 = vrot.slane %v244_v13, 5  ;;  %v420_v23 = vshll.u32 %v6555_v12, 16  ;;  %v426_v24 = vshll.u32 %v6559_v14, 16  ;;  %v430_v27 = vshrl.u32 %v6559_v14, 16  ;;  %v6576_v30 = vld [vmem:[%s6536_s23 + $0x10] sm:$0xf] }
  0x16   : > { %v231_v25 = vor.u32 %v230_v18, %v227_v17  ;;  %v241_v26 = vor.u32 %v240_v20, %v236_v19  ;;  %v436_v28 = vshll.u32 %v6562_v15, 16  ;;  %v419_v33 = vrot.slane %v417_v22, 4  ;;  %v6586_v41 = vld [vmem:[%s6536_s23 + $0x14] sm:$0x1]  ;;  %v6597_v53 = vld [vmem:[%s6536_s23 + $0x6c] sm:$0xf] }
  0x17   : > { %v422_v34 = vrot.slane %v420_v23, 5  ;;  %v428_v35 = vrot.slane %v426_v24, 5  ;;  %v432_v38 = vrot.slane %v430_v27, 4  ;;  %v249_v42 = vshrl.u32 %v6573_v29, 16  ;;  %v6601_v58 = vld [vmem:[%s6536_s23 + $0x70] sm:$0xf] }
  0x18   : > { %v232_v36 = vrot.slane %v231_v25, 4  ;;  %v242_v37 = vrot.slane %v241_v26, 4  ;;  %v438_v39 = vrot.slane %v436_v28, 5  ;;  %v252_v43 = vshll.u32 %v6573_v29, 16  ;;  %v6609_v63 = vld [vmem:[%s6536_s23 + $0x74] sm:$0x1] }
  0x19   : > { %v423_v40 = vor.u32 %v422_v34, %v419_v33  ;;  %v258_v44 = vshll.u32 %v6576_v30, 16  ;;  %v433_v47 = vor.u32 %v432_v38, %v428_v35  ;;  %v262_v48 = vshrl.u32 %v6576_v30, 16  ;;  %v6615_v8 = vld [vmem:[%s6536_s23 + $0x18] sm:$0xf]  ;;  %v6628_v25 = vld [vmem:[%s6536_s23 + $0x20] sm:$0x1] }
  0x1a   : > { %v237_v45 = vsel %vm6580_vm4, %v232_v36, %v236_v19  ;;  %v247_v46 = vsel %vm6580_vm4, %v242_v37, %v246_v21  ;;  %v251_v51 = vrot.slane %v249_v42, 4  ;;  %v254_v52 = vrot.slane %v252_v43, 5  ;;  %v6622_v21 = vld [vmem:[%s6536_s23 + $0x1c] sm:$0xf] }
  0x1b   : > { %v5283_v49 = vcombine.low %v237_v45, %v247_v46  ;;  %v424_v50 = vrot.slane %v423_v40, 4  ;;  %v434_v54 = vrot.slane %v433_v47, 4  ;;  %v260_v55 = vrot.slane %v258_v44, 5  ;;  %v6641_v40 = vld [vmem:[%s9437_s1 + $0x8] sm:$0x3] }
  0x1c   : > { %v264_v56 = vrot.slane %v262_v48, 4  ;;  %v268_v57 = vshll.u32 %v6586_v41, 16  ;;  %v255_v60 = vor.u32 %v254_v52, %v251_v51  ;;  %v441_v3 = vshrl.u32 %v6597_v53, 16  ;;  %v6646_v46 = vld [vmem:[%s6536_s23 + $0x7c] sm:$0xf] }
  0x1d   : > { %6041 = vmatprep.mubr.msk.bf16.mxu0 %vm658_vm3, %v5283_v49  ;;  %v429_v59 = vsel %vm6580_vm4, %v424_v50, %v428_v35  ;;  %v439_v0 = vsel %vm6580_vm4, %v434_v54, %v438_v39  ;;  %v444_v11 = vshll.u32 %v6597_v53, 16  ;;  %v450_v13 = vshll.u32 %v6601_v58, 16  ;;  %v6635_v35 = vld [vmem:[%s6536_s23 + $0x78] sm:$0xf] }
  0x1e   : > { %v265_v1 = vor.u32 %v264_v56, %v260_v55  ;;  %v270_v2 = vrot.slane %v268_v57, 5  ;;  %v5291_v9 = vcombine.low %v429_v59, %v439_v0  ;;  %v256_v10 = vrot.slane %v255_v60, 4  ;;  %v6653_v56 = vld [vmem:[%s6536_s23 + $0x80] sm:$0x1] }
  0x1f   : > { %v443_v18 = vrot.slane %v441_v3, 4  ;;  %v454_v19 = vshrl.u32 %v6601_v58, 16  ;;  %v460_v20 = vshll.u32 %v6609_v63, 16  ;;  %v446_v23 = vrot.slane %v444_v11, 5  ;;  %9475 = vst [vmem:[#allocation2_spill] sm:$0xff] %v6653_v56 }
  0x20   : > { %v266_v17 = vrot.slane %v265_v1, 4  ;;  %6057 = vmatprep.mubr.msk.bf16.mxu1 %vm658_vm3, %v5291_v9  ;;  %v261_v22 = vsel %vm6580_vm4, %v256_v10, %v260_v55  ;;  %v452_v24 = vrot.slane %v450_v13, 5  ;;  %v273_v26 = vshrl.u32 %v6615_v8, 16  ;;  %v6659_v1 = vld [vmem:[%s6536_s23 + $0x24] sm:$0xf] }
  0x21   : > { %v456_v28 = vrot.slane %v454_v19, 4  ;;  %v462_v33 = vrot.slane %v460_v20, 5  ;;  %v276_v34 = vshll.u32 %v6615_v8, 16  ;;  %v447_v37 = vor.u32 %v446_v23, %v443_v18  ;;  %v6667_v10 = vld [vmem:[%s6536_s23 + $0x28] sm:$0xf] }
  0x22   : > { %v271_v27 = vsel %vm6580_vm4, %v266_v17, %v270_v2  ;;  %v275_v38 = vrot.slane %v273_v26, 4  ;;  %v282_v39 = vshll.u32 %v6622_v21, 16  ;;  %v286_v44 = vshrl.u32 %v6622_v21, 16  ;;  %v6673_v19 = vld [vmem:[%s9437_s1 + $0x6] sm:$0x3] }
  0x23   : > { %v5284_v36 = vcombine.low %v261_v22, %v271_v27  ;;  %v457_v42 = vor.u32 %v456_v28, %v452_v24  ;;  %v278_v43 = vrot.slane %v276_v34, 5  ;;  %v292_v45 = vshll.u32 %v6628_v25, 16 }
  0x24   : > { %v448_v47 = vrot.slane %v447_v37, 4  ;;  %v284_v48 = vrot.slane %v282_v39, 5  ;;  %v465_v49 = vshrl.u32 %v6635_v35, 16  ;;  %v468_v50 = vshll.u32 %v6635_v35, 16 }
  0x25   : > { %6042 = vmatmul.mubr.msk.bf16.vlgmr.msra.gmra.mxu0 %vm658_vm3, %v5284_v36  ;;  %v458_v51 = vrot.slane %v457_v42, 4  ;;  %v279_v52 = vor.u32 %v278_v43, %v275_v38  ;;  %v288_v54 = vrot.slane %v286_v44, 4  ;;  %v294_v55 = vrot.slane %v292_v45, 5  ;;  %v6685_v36 = vld [vmem:[%s6536_s23 + $0x84] sm:$0xf] }
  0x26   : > { %6108 = vmatpush3.bf16.msra.mxu0 %v6565_v16  ;;  %v453_v57 = vsel %vm6580_vm4, %v448_v47, %v452_v24  ;;  %v467_v59 = vrot.slane %v465_v49, 4  ;;  %v470_v60 = vrot.slane %v468_v50, 5  ;;  %v474_v0 = vshll.u32 %v6646_v46, 16  ;;  %v6678_v24 = vld [vmem:[%s6536_s23 + $0x2c] sm:$0x1] }
  0x27   : > { %6352 = vmatprep.subr.msk.bf16.mxu0 %vm707_vm0, %v6641_v40  ;;  %v463_v16 = vsel %vm6580_vm4, %v458_v51, %v462_v33  ;;  %v280_v2 = vrot.slane %v279_v52, 4  ;;  %v289_v3 = vor.u32 %v288_v54, %v284_v48  ;;  %v478_v9 = vshrl.u32 %v6646_v46, 16  ;;  %v6692_v43 = vld [vmem:[%s6536_s23 + $0x88] sm:$0xf]  ;;  %v6700_v51 = vld [vmem:[%s6536_s23 + $0x8c] sm:$0x1] }
  0x28   : > { %v5292_v11 = vcombine.low %v453_v57, %v463_v16  ;;  %v471_v13 = vor.u32 %v470_v60, %v467_v59  ;;  %v476_v17 = vrot.slane %v474_v0, 5  ;;  %v484_v18 = vshll.u32 %v6653_v56, 16  ;;  %9476 = vst [vmem:[#allocation3_spill] sm:$0xff] %v6700_v51  ;;  %v6708_v60 = vld [vmem:[%s6536_s23 + $0x30] sm:$0xf] }
  0x29   : > { %v285_v20 = vsel %vm6580_vm4, %v280_v2, %v284_v48  ;;  %v290_v22 = vrot.slane %v289_v3, 4  ;;  %v480_v23 = vrot.slane %v478_v9, 4  ;;  %v297_v26 = vshrl.u32 %v6659_v1, 16  ;;  %v6713_v9 = vld [vmem:[%s6536_s23 + $0x34] sm:$0xf] }
  0x2a   : > { %6058 = vmatmul.mubr.msk.bf16.vlgmr.msra.gmra.mxu1 %vm658_vm3, %v5292_v11  ;;  %v472_v27 = vrot.slane %v471_v13, 4  ;;  %v486_v28 = vrot.slane %v484_v18, 5  ;;  %v300_v33 = vshll.u32 %v6659_v1, 16  ;;  %v306_v34 = vshll.u32 %v6667_v10, 16 }
  0x2b   : > { %6074 = vmatpush3.bf16.msra.mxu1 %v6539_v4  ;;  %v295_v37 = vsel %vm6580_vm4, %v290_v22, %v294_v55  ;;  %v481_v38 = vor.u32 %v480_v23, %v476_v17  ;;  %v299_v39 = vrot.slane %v297_v26, 4  ;;  %v310_v42 = vshrl.u32 %v6667_v10, 16 }
  0x2c   : > { %v5285_v44 = vcombine.low %v285_v20, %v295_v37  ;;  %v477_v45 = vsel %vm6580_vm4, %v472_v27, %v476_v17  ;;  %v302_v47 = vrot.slane %v300_v33, 5  ;;  %v308_v48 = vrot.slane %v306_v34, 5  ;;  %6351 = vmatprep.subr.msk.bf16.mxu1 %vm707_vm0, %v6673_v19  ;;  %v6721_v33 = vld [vmem:[%s6536_s23 + $0x38] sm:$0x1] }
  0x2d   : > { %v482_v4 = vrot.slane %v481_v38, 4  ;;  %v312_v49 = vrot.slane %v310_v42, 4  ;;  %v316_v50 = vshll.u32 %v6678_v24, 16  ;;  %v489_v52 = vshrl.u32 %v6685_v36, 16  ;;  %v6726_v38 = vld [vmem:[%s6536_s23 + $0x90] sm:$0xf] }
  0x2e   : > { %6045 = vmatprep.mubr.msk.bf16.mxu0 %vm658_vm3, %v5285_v44  ;;  %v303_v54 = vor.u32 %v302_v47, %v299_v39  ;;  %v492_v55 = vshll.u32 %v6685_v36, 16  ;;  %v498_v57 = vshll.u32 %v6692_v43, 16  ;;  %v502_v59 = vshrl.u32 %v6692_v43, 16  ;;  %9477 = vst [vmem:[#allocation4_spill] sm:$0xff] %v6726_v38  ;;  %v6731_v47 = vld [vmem:[%s6536_s23 + $0x94] sm:$0xf] }
  0x2f   : > { %v487_v0 = vsel %vm6580_vm4, %v482_v4, %v486_v28  ;;  %v313_v16 = vor.u32 %v312_v49, %v308_v48  ;;  %v318_v2 = vrot.slane %v316_v50, 5  ;;  %v491_v3 = vrot.slane %v489_v52, 4  ;;  %9478 = vst [vmem:[#allocation5_spill] sm:$0xff] %v6731_v47 }
  0x30   : > { %v5293_v11 = vcombine.low %v477_v45, %v487_v0  ;;  %v304_v13 = vrot.slane %v303_v54, 4  ;;  %v494_v17 = vrot.slane %v492_v55, 5  ;;  %v500_v18 = vrot.slane %v498_v57, 5 }
  0x31   : > { %v314_v20 = vrot.slane %v313_v16, 4  ;;  %v504_v22 = vrot.slane %v502_v59, 4  ;;  %v508_v23 = vshll.u32 %v6700_v51, 16  ;;  %v321_v26 = vshrl.u32 %v6708_v60, 16  ;;  %v6740_v16 = vld [vmem:[%s6536_s23 + $0x98] sm:$0x1] }
  0x32   : > { %6061 = vmatprep.mubr.msk.bf16.mxu1 %vm658_vm3, %v5293_v11  ;;  %v309_v27 = vsel %vm6580_vm4, %v304_v13, %v308_v48  ;;  %v495_v28 = vor.u32 %v494_v17, %v491_v3  ;;  %v324_v34 = vshll.u32 %v6708_v60, 16  ;;  %v330_v37 = vshll.u32 %v6713_v9, 16  ;;  %9479 = vst [vmem:[#allocation6_spill] sm:$0xff] %v6740_v16  ;;  %v6745_v11 = vld [vmem:[%s6536_s23 + $0x3c] sm:$0xf] }
  0x33   : > { %v319_v39 = vsel %vm6580_vm4, %v314_v20, %v318_v2  ;;  %v505_v42 = vor.u32 %v504_v22, %v500_v18  ;;  %v510_v44 = vrot.slane %v508_v23, 5  ;;  %v323_v45 = vrot.slane %v321_v26, 4  ;;  %v6750_v23 = vld [vmem:[%s6536_s23 + $0x40] sm:$0xf]  ;;  %v1165_v51 = vld [vmem:[%s6536_s23 + $0xc] sm:$0xe] }
  0x34   : > { %v5286_v48 = vcombine.low %v309_v27, %v319_v39  ;;  %v496_v4 = vrot.slane %v495_v28, 4  ;;  %v326_v49 = vrot.slane %v324_v34, 5  ;;  %v332_v50 = vrot.slane %v330_v37, 5 }
  0x35   : > { %v506_v52 = vrot.slane %v505_v42, 4  ;;  %v334_v54 = vshrl.u32 %v6713_v9, 16  ;;  %v340_v55 = vshll.u32 %v6721_v33, 16  ;;  %v513_v57 = vshrl.u32 %v6726_v38, 16 }
  0x36   : > { %6046 = vmatmul.mubr.msk.bf16.gmra.mxu0 %vm658_vm3, %v5286_v48  ;;  %v501_v59 = vsel %vm6580_vm4, %v496_v4, %v500_v18  ;;  %v327_v0 = vor.u32 %v326_v49, %v323_v45  ;;  %v516_v2 = vshll.u32 %v6726_v38, 16  ;;  %v522_v3 = vshll.u32 %v6731_v47, 16  ;;  %v6759_v48 = vld [vmem:[%s6536_s23 + $0x44] sm:$0x1] }
  0x37   : > { %v511_v13 = vsel %vm6580_vm4, %v506_v52, %v510_v44  ;;  %v336_v17 = vrot.slane %v334_v54, 4  ;;  %v342_v20 = vrot.slane %v340_v55, 5  ;;  %v515_v22 = vrot.slane %v513_v57, 4  ;;  %v6764_v52 = vld [vmem:[%s6536_s23 + $0x9c] sm:$0xf] }
  0x38   : > { %v5294_v18 = vcombine.low %v501_v59, %v511_v13  ;;  %v328_v26 = vrot.slane %v327_v0, 4  ;;  %v518_v27 = vrot.slane %v516_v2, 5  ;;  %v524_v28 = vrot.slane %v522_v3, 5  ;;  %9480 = vst [vmem:[#allocation7_spill] sm:$0xff] %v6764_v52  ;;  %v6768_v13 = vld [vmem:[%s6536_s23 + $0xa0] sm:$0xf] }
  0x39   : > { %v337_v34 = vor.u32 %v336_v17, %v332_v50  ;;  %v526_v37 = vshrl.u32 %v6731_v47, 16  ;;  %v532_v39 = vshll.u32 %v6740_v16, 16  ;;  %v345_v42 = vshrl.u32 %v6745_v11, 16  ;;  %9481 = vst [vmem:[#allocation8_spill] sm:$0xff] %v6768_v13 }
  0x3a   : > { %6062 = vmatmul.mubr.msk.bf16.gmra.mxu1 %vm658_vm3, %v5294_v18  ;;  %v333_v44 = vsel %vm6580_vm4, %v328_v26, %v332_v50  ;;  %v519_v45 = vor.u32 %v518_v27, %v515_v22  ;;  %v348_v4 = vshll.u32 %v6745_v11, 16  ;;  %v354_v49 = vshll.u32 %v6750_v23, 16  ;;  %v6774_v26 = vld [vmem:[%s6536_s23 + $0xa4] sm:$0x1] }
  0x3b   : > { %v338_v54 = vrot.slane %v337_v34, 4  ;;  %v528_v55 = vrot.slane %v526_v37, 4  ;;  %v534_v57 = vrot.slane %v532_v39, 5  ;;  %v347_v59 = vrot.slane %v345_v42, 4  ;;  %9482 = vst [vmem:[#allocation9_spill] sm:$0xff] %v6774_v26 }
  0x3c   : > { %v520_v0 = vrot.slane %v519_v45, 4  ;;  %v350_v2 = vrot.slane %v348_v4, 5  ;;  %v356_v3 = vrot.slane %v354_v49, 5  ;;  %v358_v50 = vshrl.u32 %v6750_v23, 16  ;;  %v6778_v34 = vld [vmem:[%s6536_s23 + $0x48] sm:$0xf] }
  0x3d   : > { %v343_v17 = vsel %vm6580_vm4, %v338_v54, %v342_v20  ;;  %v529_v22 = vor.u32 %v528_v55, %v524_v28  ;;  %v364_v18 = vshll.u32 %v6759_v48, 16  ;;  %v537_v27 = vshrl.u32 %v6764_v52, 16 }
  0x3e   : > { %v5287_v37 = vcombine.low %v333_v44, %v343_v17  ;;  %v525_v39 = vsel %vm6580_vm4, %v520_v0, %v524_v28  ;;  %v351_v42 = vor.u32 %v350_v2, %v347_v59  ;;  %v360_v45 = vrot.slane %v358_v50, 4  ;;  %v6787_v17 = vld [vmem:[%s6536_s23 + $0x4c] sm:$0xf]  ;;  %v6793_v2 = vld [vmem:[%s6536_s23 + $0x50] sm:$0x1] }
  0x3f   : > { %v530_v4 = vrot.slane %v529_v22, 4  ;;  %v366_v49 = vrot.slane %v364_v18, 5  ;;  %v539_v20 = vrot.slane %v537_v27, 4  ;;  %v540_v54 = vshll.u32 %v6764_v52, 16 }
  0x40   : > { %6049 = vmatprep.mubr.msk.bf16.mxu0 %vm658_vm3, %v5287_v37  ;;  %v352_v55 = vrot.slane %v351_v42, 4  ;;  %v361_v62 = vor.u32 %v360_v45, %v356_v3  ;;  %v546_v32 = vshll.u32 %v6768_v13, 16  ;;  %v550_v44 = vshrl.u32 %v6768_v13, 16  ;;  %v6799_v42 = vld [vmem:[%s6536_s23 + $0xa8] sm:$0xf] }
  0x41   : > { %v535_v28 = vsel %vm6580_vm4, %v530_v4, %v534_v57  ;;  %v542_v59 = vrot.slane %v540_v54, 5  ;;  %v556_v0 = vshll.u32 %v6774_v26, 16  ;;  %v369_v50 = vshrl.u32 %v6778_v34, 16  ;;  %9483 = vst [vmem:[#allocation10_spill] sm:$0xff] %v6799_v42 }
  0x42   : > { %v5295_v22 = vcombine.low %v525_v39, %v535_v28  ;;  %v357_v18 = vsel %vm6580_vm4, %v352_v55, %v356_v3  ;;  %v362_v27 = vrot.slane %v361_v62, 4  ;;  %v548_v37 = vrot.slane %v546_v32, 5 }
  0x43   : > { %v543_v45 = vor.u32 %v542_v59, %v539_v20  ;;  %v552_v61 = vrot.slane %v550_v44, 4  ;;  %v558_v57 = vrot.slane %v556_v0, 5  ;;  %v371_v4 = vrot.slane %v369_v50, 4  ;;  %v6809_v44 = vld [vmem:[%s6536_s23 + $0xac] sm:$0xf] }
  0x44   : > { %6065 = vmatprep.mubr.msk.bf16.mxu1 %vm658_vm3, %v5295_v22  ;;  %v367_v54 = vsel %vm6580_vm4, %v362_v27, %v366_v49  ;;  %v372_v39 = vshll.u32 %v6778_v34, 16  ;;  %v378_v28 = vshll.u32 %v6787_v17, 16  ;;  %v382_v62 = vshrl.u32 %v6787_v17, 16  ;;  %9484 = vst [vmem:[#allocation11_spill] sm:$0xff] %v6809_v44  ;;  %v6812_v22 = vld [vmem:[%s6536_s23 + $0xb0] sm:$0x1] }
  0x45   : > { %v5288_v3 = vcombine.low %v357_v18, %v367_v54  ;;  %v544_v32 = vrot.slane %v543_v45, 4  ;;  %v553_v55 = vor.u32 %v552_v61, %v548_v37  ;;  %v388_v20 = vshll.u32 %v6793_v2, 16  ;;  %9485 = vst [vmem:[#allocation12_spill] sm:$0xff] %v6812_v22 }
  0x46   : > { %v374_v59 = vrot.slane %v372_v39, 5  ;;  %v380_v0 = vrot.slane %v378_v28, 5  ;;  %v384_v50 = vrot.slane %v382_v62, 4  ;;  %v561_v49 = vshrl.u32 %v6799_v42, 16  ;;  %v6821_v62 = vld [vmem:[%s6536_s23 + $0x54] sm:$0xf] }
  0x47   : > { %6050 = vmatmul.mubr.msk.bf16.gmra.mxu0 %vm658_vm3, %v5288_v3  ;;  %v549_v18 = vsel %vm6580_vm4, %v544_v32, %v548_v37  ;;  %v554_v27 = vrot.slane %v553_v55, 4  ;;  %v390_v61 = vrot.slane %v388_v20, 5  ;;  %v564_v45 = vshll.u32 %v6799_v42, 16  ;;  %v6828_v55 = vld [vmem:[%s6536_s23 + $0x58] sm:$0xf] }
  0x48   : > { %v375_v54 = vor.u32 %v374_v59, %v371_v4  ;;  %v385_v56 = vor.u32 %v384_v50, %v380_v0  ;;  %v563_v39 = vrot.slane %v561_v49, 4  ;;  %v570_v28 = vshll.u32 %v6809_v44, 16  ;;  %v6831_v49 = vld [vmem:[%s6536_s23 + $0x5c] sm:$0x1] }
  0x49   : > { %v559_v3 = vsel %vm6580_vm4, %v554_v27, %v558_v57  ;;  %v566_v26 = vrot.slane %v564_v45, 5  ;;  %v574_v37 = vshrl.u32 %v6809_v44, 16  ;;  %v580_v32 = vshll.u32 %v6812_v22, 16  ;;  %v1164_v22 = vld [vmem:[%s6536_s23] sm:$0xe] }
  0x4a   : > { %v5296_v4 = vcombine.low %v549_v18, %v559_v3  ;;  %v376_v20 = vrot.slane %v375_v54, 4  ;;  %v386_v59 = vrot.slane %v385_v56, 4  ;;  %v572_v50 = vrot.slane %v570_v28, 5  ;;  %v6842_v54 = vld [vmem:[%s6536_s23 + $0xb4] sm:$0xf] }
  0x4b   : > { %v567_v42 = vor.u32 %v566_v26, %v563_v39  ;;  %v576_v52 = vrot.slane %v574_v37, 4  ;;  %v582_v13 = vrot.slane %v580_v32, 5  ;;  %v393_v57 = vshrl.u32 %v6821_v62, 16  ;;  %9486 = vst [vmem:[#allocation13_spill] sm:$0xff] %v6842_v54  ;;  %v6845_v37 = vld [vmem:[%s6536_s23 + $0xb8] sm:$0xf] }
  0x4c   : > { %6066 = vmatmul.mubr.msk.bf16.gmra.mxu1 %vm658_vm3, %v5296_v4  ;;  %v381_v27 = vsel %vm6580_vm4, %v376_v20, %v380_v0  ;;  %v391_v18 = vsel %vm6580_vm4, %v386_v59, %v390_v61  ;;  %v396_v56 = vshll.u32 %v6821_v62, 16  ;;  %v402_v45 = vshll.u32 %v6828_v55, 16  ;;  %v6850_v61 = vld [vmem:[%s6536_s23 + $0xbc] sm:$0x1] }
  0x4d   : > { %v5289_v26 = vcombine.low %v381_v27, %v391_v18  ;;  %v568_v39 = vrot.slane %v567_v42, 4  ;;  %v577_v28 = vor.u32 %v576_v52, %v572_v50  ;;  %v395_v3 = vrot.slane %v393_v57, 4 }
  0x4e   : > { %v398_v32 = vrot.slane %v396_v56, 5  ;;  %v404_v4 = vrot.slane %v402_v45, 5  ;;  %v406_v0 = vshrl.u32 %v6828_v55, 16  ;;  %v412_v20 = vshll.u32 %v6831_v49, 16 }
  0x4f   : > { %6053 = vmatprep.mubr.msk.bf16.mxu0 %vm658_vm3, %v5289_v26  ;;  %v573_v59 = vsel %vm6580_vm4, %v568_v39, %v572_v50  ;;  %v578_v27 = vrot.slane %v577_v28, 4  ;;  %v585_v52 = vshrl.u32 %v6842_v54, 16  ;;  %v588_v42 = vshll.u32 %v6842_v54, 16 }
  0x50   : > { %v399_v57 = vor.u32 %v398_v32, %v395_v3  ;;  %v408_v18 = vrot.slane %v406_v0, 4  ;;  %v414_v56 = vrot.slane %v412_v20, 5  ;;  %v594_v45 = vshll.u32 %v6845_v37, 16 }
  0x51   : > { %v583_v44 = vsel %vm6580_vm4, %v578_v27, %v582_v13  ;;  %v587_v16 = vrot.slane %v585_v52, 4  ;;  %v590_v26 = vrot.slane %v588_v42, 5  ;;  %v598_v38 = vshrl.u32 %v6845_v37, 16 }
  0x52   : > { %v5297_v50 = vcombine.low %v573_v59, %v583_v44  ;;  %v400_v39 = vrot.slane %v399_v57, 4  ;;  %v409_v28 = vor.u32 %v408_v18, %v404_v4  ;;  %v596_v47 = vrot.slane %v594_v45, 5  ;;  %v1166_v57 = vld [vmem:[%s6536_s23 + $0x18] sm:$0xe] }
  0x53   : > { %v591_v54 = vor.u32 %v590_v26, %v587_v16  ;;  %v600_v3 = vrot.slane %v598_v38, 4  ;;  %v604_v32 = vshll.u32 %v6850_v61, 16  ;;  %v5347_v13 = vrot.slane %v1164_v22, 9 }
  0x54   : > { %6069 = vmatprep.mubr.msk.bf16.mxu1 %vm658_vm3, %v5297_v50  ;;  %v405_v44 = vsel %vm6580_vm4, %v400_v39, %v404_v4  ;;  %v410_v20 = vrot.slane %v409_v28, 4  ;;  %v1217_v59 = vrot.slane %v6545_v6, 5  ;;  %v5316_v38 = vcombine.low %v6573_v29, %v6576_v30 }
  0x55   : > { %v592_v16 = vrot.slane %v591_v54, 4  ;;  %v601_v27 = vor.u32 %v600_v3, %v596_v47  ;;  %v606_v52 = vrot.slane %v604_v32, 5  ;;  %v5348_v42 = vrot.slane %v1165_v51, 9 }
  0x56   : > { %v415_v18 = vsel %vm6580_vm4, %v410_v20, %v414_v56  ;;  %v1218_v22 = vsel %vm6866_vm7, %v5347_v13, %v1217_v59  ;;  %v1219_v45 = vrot.slane %v1217_v59, 4  ;;  %v9489_v4 = vrot.slane %v6576_v30, 5 }
  0x57   : > { %v5290_v50 = vcombine.low %v405_v44, %v415_v18  ;;  %v597_v54 = vsel %vm6580_vm4, %v592_v16, %v596_v47  ;;  %v602_v39 = vrot.slane %v601_v27, 4  ;;  %v5315_v51 = vcombine.low %v6542_v5, %v6545_v6  ;;  %v1167_v27 = vld [vmem:[%s6536_s23 + $0x24] sm:$0xe] }
  0x58   : > { %v1226_v26 = vrot.slane %v9489_v4, 4  ;;  %v9490_v28 = vrot.slane %v6548_v7, 5  ;;  %v9491_v3 = vmov %v9489_v4  ;;  %v5317_v13 = vcombine.low %v6615_v8, %v6622_v21  ;;  %v1169_v4 = vld [vmem:[%s6536_s23 + $0x3c] sm:$0xe] }
  0x59   : > { %v1225_v32 = vsel %vm6866_vm7, %v5348_v42, %v9491_v3  ;;  %v5349_v44 = vrot.slane %v1166_v57, 9  ;;  %6054 = vmatmul.mubr.msk.bf16.gmra.mxu0 %vm658_vm3, %v5290_v50  ;;  %v607_v47 = vsel %vm6580_vm4, %v602_v39, %v606_v52  ;;  %v9492_v6 = vrot.slane %v6586_v41, 5  ;;  %v1168_v42 = vld [vmem:[%s6536_s23 + $0x30] sm:$0xe]  ;;  %v1170_v39 = vld [vmem:[%s6536_s23 + $0x48] sm:$0xe] }
  0x5a   : > { %v1221_v56 = vsel %vm6866_vm7, %v1219_v45, %v9490_v28  ;;  %v1231_v20 = vrot.slane %v6622_v21, 5  ;;  %v5298_v59 = vcombine.low %v597_v54, %v607_v47  ;;  %v1234_v16 = vrot.slane %v6628_v25, 5  ;;  %v1171_v47 = vld [vmem:[%s6536_s23 + $0x54] sm:$0xe]  ;;  %v7161_v21 = vld [vmem:[%s6536_s23 + $0x2c] sm:$0x1] }
  0x5b   : > { %v5364_v5 = vcombine.low %v1218_v22, %v1221_v56  ;;  %v1228_v7 = vsel %vm6866_vm7, %v1226_v26, %v9492_v6  ;;  %v1785_v52 = vsel %vm707_vm0, %v6673_v19, 0  ;;  %v1238_v18 = vrot.slane %v6667_v10, 5 }
  0x5c   : > { %v1232_v41 = vsel %vm6866_vm7, %v5349_v44, %v1231_v20  ;;  %v1233_v57 = vrot.slane %v1231_v20, 4  ;;  %6070 = vmatmul.mubr.msk.bf16.gmra.mxu1 %vm658_vm3, %v5298_v59  ;;  %v5365_v22 = vcombine.low %v1225_v32, %v1228_v7  ;;  %v2511_v25 = vsel %vm707_vm0, %v6641_v40, 0 }
  0x5d   : > { %6109 = vmatprep.mubr.msk.bf16.mxu0 %vm658_vm3, %v5364_v5  ;;  %v1245_v45 = vrot.slane %v6713_v9, 5  ;;  %6075 = vmatprep.mubr.msk.bf16.mxu1 %vm658_vm3, %v5315_v51  ;;  %v5350_v26 = vrot.slane %v1167_v27, 9  ;;  %v1241_v50 = vrot.slane %v6678_v24, 5  ;;  %v5351_v54 = vrot.slane %v1168_v42, 9  ;;  %v6933_v24 = vld [vmem:[%s9437_s1 + $0xc] sm:$0x3] }
  0x5e   : > { %v1235_v19 = vsel %vm6866_vm7, %v1233_v57, %v1234_v16  ;;  %v1240_v56 = vrot.slane %v1238_v18, 4  ;;  %v1248_v32 = vrot.slane %v6721_v33, 5  ;;  %v5352_v44 = vrot.slane %v1169_v4, 9 }
  0x5f   : > { %v5366_v28 = vcombine.low %v1232_v41, %v1235_v19  ;;  %v1247_v3 = vrot.slane %v1245_v45, 4  ;;  %v1252_v40 = vrot.slane %v6750_v23, 5  ;;  %v1276_v5 = vrot.slane %v6562_v15, 5 }
  0x60   : > { %v1255_v51 = vrot.slane %v6759_v48, 5  ;;  %v5353_v6 = vrot.slane %v1170_v39, 9  ;;  %v1259_v7 = vrot.slane %v6787_v17, 5  ;;  %v5318_v33 = vcombine.low %v6659_v1, %v6667_v10  ;;  %v1172_v1 = vld [vmem:[%s6536_s23 + $0x60] sm:$0xe] }
  0x61   : > { %6110 = vmatmul.mubr.msk.bf16.vlgmr.msra.gmra.mxu0 %vm658_vm3, %v5365_v22  ;;  %v1239_v20 = vsel %vm6866_vm7, %v5350_v26, %v1238_v18  ;;  %v1254_v59 = vrot.slane %v1252_v40, 4  ;;  %v1262_v16 = vrot.slane %v6793_v2, 5  ;;  %v1242_v48 = vsel %vm6866_vm7, %v1240_v56, %v1241_v50  ;;  %v6961_v22 = vld [vmem:[%s9437_s1 + $0xa] sm:$0x3]  ;;  %v6986_v50 = vld [vmem:[%s6536_s23 + $0x6c] sm:$0xe] }
  0x62   : > { %6176 = vmatpush3.bf16.msra.mxu0 %v2511_v25  ;;  %6113 = vmatprep.mubr.msk.bf16.mxu0 %vm658_vm3, %v5366_v28  ;;  %v1246_v27 = vsel %vm6866_vm7, %v5351_v54, %v1245_v45  ;;  %v1249_v42 = vsel %vm6866_vm7, %v1247_v3, %v1248_v32  ;;  %v1261_v41 = vrot.slane %v1259_v7, 4  ;;  %v6951_v10 = vsel %vm6866_vm7, %v5352_v44, %v1252_v40  ;;  %v1175_v39 = vld [vmem:[%s6536_s23 + $0x84] sm:$0xe]  ;;  %v7015_v44 = vld [vmem:[%s6536_s23 + $0x78] sm:$0xe] }
  0x63   : > { %v6955_v2 = vsel %vm6866_vm7, %v5353_v6, %v1259_v7  ;;  %v5354_v57 = vrot.slane %v1171_v47, 9  ;;  %v1266_v18 = vrot.slane %v6828_v55, 5  ;;  %6354 = vmatprep.subr.msk.bf16.mxu0 %vm707_vm0, %v6933_v24  ;;  %v6971_v25 = vsel %vm6866_vm7, %v1254_v59, %v1255_v51  ;;  %v1176_v40 = vld [vmem:[%s6536_s23 + $0x90] sm:$0xe] }
  0x64   : > { %6076 = vmatmul.mubr.msk.bf16.vlgmr.msra.gmra.mxu1 %vm658_vm3, %v5316_v38  ;;  %v6975_v45 = vsel %vm6866_vm7, %v1261_v41, %v1262_v16  ;;  %v1269_v4 = vrot.slane %v6831_v49, 5  ;;  %v1273_v19 = vrot.slane %v6559_v14, 5  ;;  %v5367_v29 = vcombine.low %v1239_v20, %v1242_v48  ;;  %v9493_v48 = vld [vmem:[#allocation3_spill] sm:$0xff] }
  0x65   : > { %6142 = vmatpush3.bf16.msra.mxu1 %v1785_v52  ;;  %6079 = vmatprep.mubr.msk.bf16.mxu1 %vm658_vm3, %v5317_v13  ;;  %v5319_v30 = vcombine.low %v6708_v60, %v6713_v9  ;;  %v1268_v38 = vrot.slane %v1266_v18, 4  ;;  %v5355_v26 = vrot.slane %v1172_v1, 9  ;;  %v5368_v49 = vcombine.low %v1246_v27, %v1249_v42  ;;  %v1177_v42 = vld [vmem:[%s6536_s23 + $0x9c] sm:$0xe] }
  0x66   : > { %v5320_v52 = vcombine.low %v6745_v11, %v6750_v23  ;;  %v5321_v8 = vcombine.low %v6778_v34, %v6787_v17  ;;  %6353 = vmatprep.subr.msk.bf16.mxu1 %vm707_vm0, %v6961_v22  ;;  %v5369_v60 = vcombine.low %v6951_v10, %v6971_v25  ;;  %v5370_v9 = vcombine.low %v6955_v2, %v6975_v45  ;;  %v9494_v10 = vld [vmem:[#allocation5_spill] sm:$0xff]  ;;  %v9495_v2 = vld [vmem:[#allocation4_spill] sm:$0xff] }
  0x67   : > { %v1275_v54 = vrot.slane %v1273_v19, 4  ;;  %v7005_v28 = vsel %vm6866_vm7, %v5354_v57, %v1266_v18  ;;  %v7009_v56 = vsel %vm6866_vm7, %v1268_v38, %v1269_v4  ;;  %v5356_v32 = vrot.slane %v6986_v50, 9  ;;  %v1178_v18 = vld [vmem:[%s6536_s23 + $0xa8] sm:$0xe]  ;;  %v9497_v38 = vld [vmem:[#allocation8_spill] sm:$0xff] }
  0x68   : > { %v7021_v47 = vsel %vm6866_vm7, %v5355_v26, %v1273_v19  ;;  %v1280_v51 = vrot.slane %v6601_v58, 5  ;;  %v1283_v6 = vrot.slane %v6609_v63, 5  ;;  %v5358_v59 = vrot.slane %v1175_v39, 9  ;;  %v9496_v19 = vld [vmem:[#allocation6_spill] sm:$0xff]  ;;  %v9498_v26 = vld [vmem:[#allocation7_spill] sm:$0xff] }
  0x69   : > { %6114 = vmatmul.mubr.msk.bf16.gmra.mxu0 %vm658_vm3, %v5367_v29  ;;  %v1294_v16 = vrot.slane %v6692_v43, 5  ;;  %v1297_v27 = vrot.slane %v9493_v48, 5  ;;  %v5371_v41 = vcombine.low %v7005_v28, %v7009_v56  ;;  %v7039_v63 = vsel %vm6866_vm7, %v1275_v54, %v1276_v5  ;;  %v9500_v48 = vld [vmem:[#allocation11_spill] sm:$0xff] }
  0x6a   : > { %6117 = vmatprep.mubr.msk.bf16.mxu0 %vm658_vm3, %v5368_v49  ;;  %v5357_v1 = vrot.slane %v7015_v44, 9  ;;  %v5359_v4 = vrot.slane %v1176_v40, 9  ;;  %v1301_v15 = vrot.slane %v9494_v10, 5  ;;  %v1282_v5 = vrot.slane %v1280_v51, 4  ;;  %v5461_v57 = vld [vmem:[%s6536_s23 + $0xc] sm:$0xf] }
  0x6b   : > { %v7048_v25 = vsel %vm6866_vm7, %v5358_v59, %v1294_v16  ;;  %v1296_v45 = vrot.slane %v1294_v16, 4  ;;  %v1304_v29 = vrot.slane %v9496_v19, 5  ;;  %v5360_v49 = vrot.slane %v1177_v42, 9  ;;  %v9499_v59 = vld [vmem:[#allocation9_spill] sm:$0xff]  ;;  %v9501_v42 = vld [vmem:[#allocation10_spill] sm:$0xff] }
  0x6c   : > { %6080 = vmatmul.mubr.msk.bf16.gmra.mxu1 %vm658_vm3, %v5318_v33  ;;  %v1287_v33 = vrot.slane %v6646_v46, 5  ;;  %v7062_v39 = vsel %vm6866_vm7, %v5359_v4, %v1301_v15  ;;  %v1303_v44 = vrot.slane %v1301_v15, 4  ;;  %v1308_v40 = vrot.slane %v9497_v38, 5  ;;  %v9502_v15 = vld [vmem:[#allocation12_spill] sm:$0xff] }
  0x6d   : > { %6083 = vmatprep.mubr.msk.bf16.mxu1 %vm658_vm3, %v5319_v30  ;;  %v7058_v54 = vsel %vm6866_vm7, %v1296_v45, %v1297_v27  ;;  %v1311_v16 = vrot.slane %v9499_v59, 5  ;;  %v5361_v45 = vrot.slane %v1178_v18, 9  ;;  %v1315_v4 = vrot.slane %v9500_v48, 5 }
  0x6e   : > { %v7072_v27 = vsel %vm6866_vm7, %v1303_v44, %v1304_v29  ;;  %v1318_v50 = vrot.slane %v9502_v15, 5  ;;  %v7082_v19 = vsel %vm6866_vm7, %v5360_v49, %v1308_v40  ;;  %v1310_v7 = vrot.slane %v1308_v40, 4  ;;  %v9503_v29 = vld [vmem:[#allocation13_spill] sm:$0xff]  ;;  %v9504_v15 = vld [vmem:[#allocation2_spill] sm:$0xff]  ;;  %v7097_v49 = vld [vmem:[%s6536_s23 + $0x10] sm:$0xf] }
  0x6f   : > { %v7089_v18 = vsel %vm6866_vm7, %v5356_v32, %v1280_v51  ;;  %v7094_v59 = vsel %vm6866_vm7, %v5361_v45, %v1315_v4  ;;  %v1317_v30 = vrot.slane %v1315_v4, 4  ;;  %v5464_v40 = vld [vmem:[%s6536_s23 + $0x18] sm:$0xf]  ;;  %v1289_v20 = vrot.slane %v1287_v33, 4 }
  0x70   : > { %v2029_v44 = vshrl.u32 %v5461_v57, 16  ;;  %v2032_v32 = vshll.u32 %v5461_v57, 16  ;;  %v5372_v51 = vcombine.low %v7021_v47, %v7039_v63  ;;  %v7112_v45 = vsel %vm6866_vm7, %v1282_v5, %v1283_v6  ;;  %v1179_v57 = vld [vmem:[%s6536_s23 + $0xb4] sm:$0xe]  ;;  %v7133_v47 = vld [vmem:[%s6536_s23 + $0x14] sm:$0x1] }
  0x71   : > { %6118 = vmatmul.mubr.msk.bf16.gmra.mxu0 %vm658_vm3, %v5369_v60  ;;  %v1290_v60 = vrot.slane %v9504_v15, 5  ;;  %v7127_v11 = vsel %vm6866_vm7, %v5357_v1, %v1287_v33  ;;  %v2038_v6 = vshll.u32 %v7097_v49, 16  ;;  %v5465_v63 = vld [vmem:[%s6536_s23 + $0x1c] sm:$0xf]  ;;  %v2042_v17 = vshrl.u32 %v7097_v49, 16 }
  0x72   : > { %6121 = vmatprep.mubr.msk.bf16.mxu0 %vm658_vm3, %v5370_v9  ;;  %v7102_v9 = vsel %vm6866_vm7, %v1310_v7, %v1311_v16  ;;  %v7118_v7 = vsel %vm6866_vm7, %v1317_v30, %v1318_v50  ;;  %v2031_v5 = vrot.slane %v2029_v44, 4  ;;  %v2034_v34 = vrot.slane %v2032_v32, 5  ;;  %v5467_v15 = vld [vmem:[%s6536_s23 + $0x24] sm:$0xf]  ;;  %v7146_v44 = vld [vmem:[%s6536_s23 + $0x28] sm:$0xf] }
  0x73   : > { %v2053_v50 = vshrl.u32 %v5464_v40, 16  ;;  %v1291_v1 = vsel %vm6866_vm7, %v1289_v20, %v1290_v60  ;;  %v5362_v33 = vrot.slane %v1179_v57, 9  ;;  %v7141_v30 = vrot.slane %v2038_v6, 5 }
  0x74   : > { %6084 = vmatmul.mubr.msk.bf16.gmra.mxu1 %vm658_vm3, %v5320_v52  ;;  %v1322_v52 = vrot.slane %v6845_v37, 5  ;;  %v2056_v16 = vshll.u32 %v5464_v40, 16  ;;  %v1325_v23 = vrot.slane %v6850_v61, 5  ;;  %v2044_v4 = vrot.slane %v2042_v17, 4 }
  0x75   : > { %6087 = vmatprep.mubr.msk.bf16.mxu1 %vm658_vm3, %v5321_v8  ;;  %v5466_v8 = vld [vmem:[%s6536_s23 + $0x20] sm:$0x1]  ;;  %v2055_v3 = vrot.slane %v2053_v50, 4  ;;  %v2062_v13 = vshll.u32 %v5465_v63, 16  ;;  %v2048_v20 = vshll.u32 %v7133_v47, 16  ;;  %v2066_v57 = vshrl.u32 %v5465_v63, 16 }
  0x76   : > { %v1324_v32 = vrot.slane %v1322_v52, 4  ;;  %v2058_v60 = vrot.slane %v2056_v16, 5  ;;  %v5373_v61 = vcombine.low %v7089_v18, %v7112_v45  ;;  %v5374_v40 = vcombine.low %v7127_v11, %v1291_v1 }
  0x77   : > { %v2035_v6 = vor.u32 %v2034_v34, %v2031_v5  ;;  %v7157_v17 = vrot.slane %v2062_v13, 5  ;;  %v2045_v28 = vor.u32 %v2044_v4, %v7141_v30  ;;  %v2072_v50 = vshll.u32 %v5466_v8, 16  ;;  %v7184_v5 = vld [vmem:[%s6536_s23 + $0x34] sm:$0xf] }
  0x78   : > { %v2059_v56 = vor.u32 %v2058_v60, %v2055_v3  ;;  %v7169_v18 = vsel %vm6866_vm7, %v5362_v33, %v1322_v52  ;;  %v2077_v13 = vshrl.u32 %v5467_v15, 16  ;;  %v2080_v45 = vshll.u32 %v5467_v15, 16  ;;  %v5470_v52 = vld [vmem:[%s6536_s23 + $0x30] sm:$0xf] }
  0x79   : > { %6122 = vmatmul.mubr.msk.bf16.gmra.mxu0 %vm658_vm3, %v5371_v41  ;;  %v2068_v41 = vrot.slane %v2066_v57, 4  ;;  %v2086_v11 = vshll.u32 %v7146_v44, 16  ;;  %v9506_v3 = vcombine.low %v6555_v12, %v6559_v14  ;;  %v7178_v4 = vsel %vm6866_vm7, %v1324_v32, %v1325_v23 }
  0x7a   : > { %6125 = vmatprep.mubr.msk.bf16.mxu0 %vm658_vm3, %v5372_v51  ;;  %v9505_v51 = vcombine.low %v6821_v62, %v6828_v55  ;;  %v2050_v62 = vrot.slane %v2048_v20, 5  ;;  %v2090_v63 = vshrl.u32 %v7146_v44, 16  ;;  %v2036_v34 = vrot.slane %v2035_v6, 4 }
  0x7b   : > { %v2069_v55 = vor.u32 %v2068_v41, %v7157_v17  ;;  %v2079_v8 = vrot.slane %v2077_v13, 4  ;;  %v2082_v1 = vrot.slane %v2080_v45, 5  ;;  %v7186_v33 = vrot.slane %v2086_v11, 5  ;;  %v7192_v41 = vld [vmem:[%s6536_s23 + $0x38] sm:$0x1] }
  0x7c   : > { %6088 = vmatmul.mubr.msk.bf16.gmra.mxu1 %vm658_vm3, %v9505_v51  ;;  %v2046_v12 = vrot.slane %v2045_v28, 4  ;;  %v2060_v14 = vrot.slane %v2059_v56, 4  ;;  %v2074_v16 = vrot.slane %v2072_v50, 5  ;;  %v2092_v23 = vrot.slane %v2090_v63, 4  ;;  %v5473_v13 = vld [vmem:[%s6536_s23 + $0x3c] sm:$0xf] }
  0x7d   : > { %6091 = vmatprep.mubr.msk.bf16.mxu1 %vm658_vm3, %v9506_v3  ;;  %v2070_v15 = vrot.slane %v2069_v55, 4  ;;  %v2096_v32 = vshll.u32 %v7161_v21, 16  ;;  %v2101_v20 = vshrl.u32 %v5470_v52, 16  ;;  %v2104_v60 = vshll.u32 %v5470_v52, 16 }
  0x7e   : > { %v2083_v57 = vor.u32 %v2082_v1, %v2079_v8  ;;  %v2093_v6 = vor.u32 %v2092_v23, %v7186_v33  ;;  %v2110_v28 = vshll.u32 %v7184_v5, 16  ;;  %v2114_v56 = vshrl.u32 %v7184_v5, 16  ;;  %v5476_v8 = vld [vmem:[%s6536_s23 + $0x48] sm:$0xf]  ;;  %v7219_v1 = vld [vmem:[%s6536_s23 + $0x4c] sm:$0xf] }
  0x7f   : > { %v2103_v50 = vrot.slane %v2101_v20, 4  ;;  %v2106_v51 = vrot.slane %v2104_v60, 5  ;;  %v9507_v3 = vcombine.low %v6597_v53, %v6601_v58  ;;  %v5379_v55 = vcombine.low %v7169_v18, %v7178_v4 }
  0x80   : > { %v7198_v45 = vrot.slane %v2110_v28, 5  ;;  %v2116_v11 = vrot.slane %v2114_v56, 4  ;;  %v2051_v63 = vsel %vm6580_vm4, %v2046_v12, %v2050_v62  ;;  %v2065_v52 = vsel %vm6580_vm4, %v2060_v14, %v7157_v17 }
  0x81   : > { %6126 = vmatmul.mubr.msk.bf16.gmra.mxu0 %vm658_vm3, %v5373_v61  ;;  %v7201_v61 = vld [vmem:[%s6536_s23 + $0x40] sm:$0xf]  ;;  %v9508_v53 = vcombine.low %v6635_v35, %v6646_v46  ;;  %v2075_v58 = vsel %vm6580_vm4, %v2070_v15, %v2074_v16  ;;  %v2084_v23 = vrot.slane %v2083_v57, 4  ;;  %v2107_v20 = vor.u32 %v2106_v51, %v2103_v50  ;;  %v7253_v50 = vld [vmem:[%s6536_s23 + $0x44] sm:$0x1] }
  0x82   : > { %6129 = vmatprep.mubr.msk.bf16.mxu0 %vm658_vm3, %v5374_v40  ;;  %v2041_v40 = vsel %vm6580_vm4, %v2036_v34, %v7141_v30  ;;  %v2094_v30 = vrot.slane %v2093_v6, 4  ;;  %v2098_v34 = vrot.slane %v2096_v32, 5  ;;  %v2120_v62 = vshll.u32 %v7192_v41, 16  ;;  %v5479_v51 = vld [vmem:[%s6536_s23 + $0x54] sm:$0xf] }
  0x83   : > { %v2125_v12 = vshrl.u32 %v5473_v13, 16  ;;  %v2128_v17 = vshll.u32 %v5473_v13, 16  ;;  %v7230_v14 = vsel %vm707_vm0, %v6961_v22, 0  ;;  %v2117_v35 = vor.u32 %v2116_v11, %v7198_v45 }
  0x84   : > { %6092 = vmatmul.mubr.msk.bf16.gmra.mxu1 %vm658_vm3, %v9507_v3  ;;  %v2134_v46 = vshll.u32 %v7201_v61, 16  ;;  %v2138_v16 = vshrl.u32 %v7201_v61, 16  ;;  %v7235_v15 = vcombine.low %v2041_v40, %v2051_v63  ;;  %v7239_v32 = vsel %vm707_vm0, %v6933_v24, 0  ;;  %v7262_v40 = vld [vmem:[%s6536_s23 + $0x58] sm:$0xf] }
  0x85   : > { %6095 = vmatprep.mubr.msk.bf16.mxu1 %vm658_vm3, %v9508_v53  ;;  %v2149_v60 = vshrl.u32 %v5476_v8, 16  ;;  %v2152_v57 = vshll.u32 %v5476_v8, 16  ;;  %v9509_v6 = vcombine.low %v7048_v25, %v7058_v54  ;;  %v7245_v22 = vcombine.low %v2065_v52, %v2075_v58  ;;  %v7267_v8 = vld [vmem:[%s6536_s23 + $0x50] sm:$0x1] }
  0x86   : > { %v2089_v28 = vsel %vm6580_vm4, %v2084_v23, %v7186_v33  ;;  %v2099_v56 = vsel %vm6580_vm4, %v2094_v30, %v2098_v34  ;;  %v2158_v24 = vshll.u32 %v7219_v1, 16  ;;  %v9510_v25 = vcombine.low %v7062_v39, %v7072_v27  ;;  %v5482_v34 = vld [vmem:[%s6536_s23 + $0x60] sm:$0xf] }
  0x87   : > { %v2108_v54 = vrot.slane %v2107_v20, 4  ;;  %v2122_v13 = vrot.slane %v2120_v62, 5  ;;  %v2127_v11 = vrot.slane %v2125_v12, 4  ;;  %v2130_v3 = vrot.slane %v2128_v17, 5 }
  0x88   : > { %v2118_v33 = vrot.slane %v2117_v35, 4  ;;  %v7264_v63 = vrot.slane %v2134_v46, 5  ;;  %v2140_v52 = vrot.slane %v2138_v16, 4  ;;  %v2162_v53 = vshrl.u32 %v7219_v1, 16  ;;  %v7284_v35 = vld [vmem:[%s6536_s23 + $0x5c] sm:$0x1] }
  0x89   : > { %6130 = vmatmul.mubr.msk.bf16.gmra.mxu0 %vm658_vm3, %v9509_v6  ;;  %v9511_v39 = vcombine.low %v6685_v36, %v6692_v43  ;;  %v2151_v27 = vrot.slane %v2149_v60, 4  ;;  %v2154_v58 = vrot.slane %v2152_v57, 5  ;;  %v2173_v23 = vshrl.u32 %v5479_v51, 16 }
  0x8a   : > { %6133 = vmatprep.mubr.msk.bf16.mxu0 %vm658_vm3, %v9510_v25  ;;  %v2176_v30 = vshll.u32 %v5479_v51, 16  ;;  %v9512_v20 = vcombine.low %v9495_v2, %v9494_v10  ;;  %v7279_v62 = vcombine.low %v2089_v28, %v2099_v56  ;;  %v7281_v12 = vrot.slane %v2158_v24, 5  ;;  %v7297_v28 = vld [vmem:[%s6536_s23 + $0x64] sm:$0xf] }
  0x8b   : > { %v2164_v17 = vrot.slane %v2162_v53, 4  ;;  %v2182_v36 = vshll.u32 %v7262_v40, 16  ;;  %v2144_v43 = vshll.u32 %v7253_v50, 16  ;;  %v2175_v46 = vrot.slane %v2173_v23, 4 }
  0x8c   : > { %6096 = vmatmul.mubr.msk.bf16.gmra.mxu1 %vm658_vm3, %v9511_v39  ;;  %v2178_v16 = vrot.slane %v2176_v30, 5  ;;  %v2186_v60 = vshrl.u32 %v7262_v40, 16  ;;  %v2113_v10 = vsel %vm6580_vm4, %v2108_v54, %v7198_v45  ;;  %v2123_v2 = vsel %vm6580_vm4, %v2118_v33, %v2122_v13  ;;  %v7319_v30 = vld [vmem:[%s6536_s23 + $0x68] sm:$0x1] }
  0x8d   : > { %6099 = vmatprep.mubr.msk.bf16.mxu1 %vm658_vm3, %v9512_v20  ;;  %v2131_v57 = vor.u32 %v2130_v3, %v2127_v11  ;;  %v7294_v6 = vrot.slane %v2182_v36, 5  ;;  %v2141_v56 = vor.u32 %v2140_v52, %v7264_v63  ;;  %v2155_v24 = vor.u32 %v2154_v58, %v2151_v27  ;;  %v5485_v3 = vld [vmem:[%s6536_s23 + $0x6c] sm:$0xf]  ;;  %v7316_v27 = vld [vmem:[%s6536_s23 + $0x70] sm:$0xf] }
  0x8e   : > { %v2168_v51 = vshll.u32 %v7267_v8, 16  ;;  %v2188_v25 = vrot.slane %v2186_v60, 4  ;;  %v9513_v53 = vcombine.low %v7082_v19, %v7102_v9  ;;  %v2165_v45 = vor.u32 %v2164_v17, %v7281_v12 }
  0x8f   : > { %v2179_v54 = vor.u32 %v2178_v16, %v2175_v46  ;;  %v2197_v13 = vshrl.u32 %v5482_v34, 16  ;;  %v2200_v11 = vshll.u32 %v5482_v34, 16  ;;  %v9514_v33 = vcombine.low %v7094_v59, %v7118_v7  ;;  %v5488_v16 = vld [vmem:[%s6536_s23 + $0x78] sm:$0xf] }
  0x90   : > { %v2189_v52 = vor.u32 %v2188_v25, %v7294_v6  ;;  %v2192_v39 = vshll.u32 %v7284_v35, 16  ;;  %v2206_v19 = vshll.u32 %v7297_v28, 16  ;;  %v2210_v9 = vshrl.u32 %v7297_v28, 16 }
  0x91   : > { %6134 = vmatmul.mubr.msk.bf16.gmra.mxu0 %vm658_vm3, %v9513_v53  ;;  %v2132_v58 = vrot.slane %v2131_v57, 4  ;;  %v2146_v23 = vrot.slane %v2144_v43, 5  ;;  %v2199_v34 = vrot.slane %v2197_v13, 4  ;;  %v2202_v20 = vrot.slane %v2200_v11, 5 }
  0x92   : > { %6137 = vmatprep.mubr.msk.bf16.mxu0 %vm658_vm3, %v9514_v33  ;;  %v9515_v59 = vcombine.low %v9498_v26, %v9497_v38  ;;  %v7325_v7 = vcombine.low %v2113_v10, %v2123_v2  ;;  %v2142_v17 = vrot.slane %v2141_v56, 4  ;;  %v2156_v36 = vrot.slane %v2155_v24, 4  ;;  %v7335_v2 = vld [vmem:[%s6536_s23 + $0x7c] sm:$0xf] }
  0x93   : > { %v7327_v46 = vrot.slane %v2206_v19, 5  ;;  %v9516_v43 = vcombine.low %v9501_v42, %v9500_v48  ;;  %v2166_v60 = vrot.slane %v2165_v45, 4  ;;  %v2170_v57 = vrot.slane %v2168_v51, 5  ;;  %9517 = vst [vmem:[#allocation3_spill] sm:$0xff] %v7335_v2  ;;  %v5491_v19 = vld [vmem:[%s6536_s23 + $0x84] sm:$0xf] }
  0x94   : > { %6100 = vmatmul.mubr.msk.bf16.gmra.mxu1 %vm658_vm3, %v9515_v59  ;;  %v2180_v25 = vrot.slane %v2179_v54, 4  ;;  %v2212_v38 = vrot.slane %v2210_v9, 4  ;;  %v2190_v26 = vrot.slane %v2189_v52, 4  ;;  %v2194_v53 = vrot.slane %v2192_v39, 5 }
  0x95   : > { %6103 = vmatprep.mubr.msk.bf16.mxu1 %vm658_vm3, %v9516_v43  ;;  %v2203_v13 = vor.u32 %v2202_v20, %v2199_v34  ;;  %v2221_v10 = vshrl.u32 %v5485_v3, 16  ;;  %v2137_v56 = vsel %vm6580_vm4, %v2132_v58, %v7264_v63  ;;  %v2224_v24 = vshll.u32 %v5485_v3, 16  ;;  %v6382_v63 = vld [vmem:[%s6536_s23 + $0xc] sm:$0xff]   ;;  %v7369_v34 = vld [vmem:[%s6536_s23 + $0x88] sm:$0xf] }
  0x96   : > { %v2230_v48 = vshll.u32 %v7316_v27, 16  ;;  %v2234_v42 = vshrl.u32 %v7316_v27, 16  ;;  %v2147_v51 = vsel %vm6580_vm4, %v2142_v17, %v2146_v23  ;;  %v2161_v45 = vsel %vm6580_vm4, %v2156_v36, %v7281_v12  ;;  %9518 = vst [vmem:[#allocation5_spill] sm:$0xff] %v7369_v34  ;;  %v7378_v36 = vld [vmem:[%s6536_s23 + $0x74] sm:$0x1] }
  0x97   : > { %v2213_v54 = vor.u32 %v2212_v38, %v7327_v46  ;;  %v2216_v11 = vshll.u32 %v7319_v30, 16  ;;  %v2171_v3 = vsel %vm6580_vm4, %v2166_v60, %v2170_v57  ;;  %v2185_v33 = vsel %vm6580_vm4, %v2180_v25, %v7294_v6  ;;  %9520 = vst [vmem:[#allocation4_spill] sm:$0xff] %v7378_v36  ;;  %v7388_v38 = vld [vmem:[%s6536_s23 + $0x80] sm:$0x1] }
  0x98   : > { %v2245_v52 = vshrl.u32 %v5488_v16, 16  ;;  %v2248_v12 = vshll.u32 %v5488_v16, 16  ;;  %v2195_v18 = vsel %vm6580_vm4, %v2190_v26, %v2194_v53  ;;  %v2204_v4 = vrot.slane %v2203_v13, 4  ;;  %9521 = vst [vmem:[#allocation6_spill] sm:$0xff] %v7388_v38  ;;  %v7391_v26 = vld [vmem:[%s6536_s23 + $0x8c] sm:$0x1] }
  0x99   : > { %6138 = vmatmul.mubr.msk.bf16.gmra.mxu0 %vm658_vm3, %v5379_v55  ;;  %v2223_v55 = vrot.slane %v2221_v10, 4  ;;  %v2254_v39 = vshll.u32 %v7335_v2, 16  ;;  %v2226_v9 = vrot.slane %v2224_v24, 5  ;;  %v7365_v58 = vrot.slane %v2230_v48, 5  ;;  %9522 = vst [vmem:[#allocation8_spill] sm:$0xff] %v7391_v26  ;;  %v6383_v10 = vld [vmem:[%s6536_s23 + $0x18] sm:$0xff]  }
  0x9a   : > { %6177 = vmatprep.mubr.msk.bf16.mxu0 %vm658_vm3, %v7235_v15  ;;  %v2236_v23 = vrot.slane %v2234_v42, 4  ;;  %v2258_v6 = vshrl.u32 %v7335_v2, 16  ;;  %v9519_v15 = vcombine.low %v9503_v29, %v6845_v37  ;;  %v7375_v20 = vcombine.low %v2137_v56, %v2147_v51  ;;  %v5494_v51 = vld [vmem:[%s6536_s23 + $0x90] sm:$0xf] }
  0x9b   : > { %v2214_v59 = vrot.slane %v2213_v54, 4  ;;  %v2218_v17 = vrot.slane %v2216_v11, 5  ;;  %v2247_v16 = vrot.slane %v2245_v52, 4  ;;  %v2250_v43 = vrot.slane %v2248_v12, 5 }
  0x9c   : > { %6104 = vmatmul.mubr.msk.bf16.gmra.mxu1 %vm658_vm3, %v9519_v15  ;;  %v7381_v60 = vrot.slane %v2254_v39, 5  ;;  %v2260_v57 = vrot.slane %v2258_v6, 4  ;;  %v2269_v25 = vshrl.u32 %v5491_v19, 16  ;;  %v7383_v37 = vcombine.low %v2161_v45, %v2171_v3  ;;  %v7402_v45 = vld [vmem:[%s6536_s23 + $0x94] sm:$0xf] }
  0x9d   : > { %6143 = vmatprep.mubr.msk.bf16.mxu1 %vm658_vm3, %v6382_v63  ;;  %v7385_v29 = vcombine.low %v2185_v33, %v2195_v18  ;;  %v2272_v53 = vshll.u32 %v5491_v19, 16  ;;  %v2278_v13 = vshll.u32 %v7369_v34, 16  ;;  %v2209_v56 = vsel %vm6580_vm4, %v2204_v4, %v7327_v46  ;;  %9523 = vst [vmem:[#allocation7_spill] sm:$0xff] %v7402_v45  ;;  %v7410_v33 = vld [vmem:[%s9437_s1 + $0x10] sm:$0x3]  ;;  %v6384_v46 = vld [vmem:[%s6536_s23 + $0x24] sm:$0xff]  }
  0x9e   : > { %v2227_v24 = vor.u32 %v2226_v9, %v2223_v55  ;;  %v2237_v48 = vor.u32 %v2236_v23, %v7365_v58  ;;  %v2240_v42 = vshll.u32 %v7378_v36, 16  ;;  %v2271_v54 = vrot.slane %v2269_v25, 4  ;;  %9524 = vst [vmem:[#allocation9_spill] sm:$0xff] %v7410_v33 }
  0x9f   : > { %v2274_v11 = vrot.slane %v2272_v53, 5  ;;  %v7404_v63 = vrot.slane %v2278_v13, 5  ;;  %v2282_v3 = vshrl.u32 %v7369_v34, 16  ;;  %v2219_v52 = vsel %vm6580_vm4, %v2214_v59, %v2218_v17 }
  0xa0   : > { %v2251_v12 = vor.u32 %v2250_v43, %v2247_v16  ;;  %v2261_v18 = vor.u32 %v2260_v57, %v7381_v60  ;;  %v2264_v4 = vshll.u32 %v7388_v38, 16  ;;  %v2293_v19 = vshrl.u32 %v5494_v51, 16  ;;  %v7444_v57 = vld [vmem:[%s6536_s23 + $0xa0] sm:$0xf] }
  0xa1   : > { %6178 = vmatmul.mubr.msk.bf16.vlgmr.msra.gmra.mxu0 %vm658_vm3, %v7245_v22  ;;  %v2275_v55 = vor.u32 %v2274_v11, %v2271_v54  ;;  %v2284_v39 = vrot.slane %v2282_v3, 4  ;;  %v2296_v9 = vshll.u32 %v5494_v51, 16  ;;  %v5497_v22 = vld [vmem:[%s6536_s23 + $0x9c] sm:$0xf]  ;;  %v7423_v23 = vrot.slane %v2227_v24, 4  ;;  %9526 = vst [vmem:[#allocation10_spill] sm:$0xff] %v7444_v57 }
  0xa2   : > { %6244 = vmatpush3.bf16.msra.mxu0 %v7239_v32  ;;  %6181 = vmatprep.mubr.msk.bf16.mxu0 %vm658_vm3, %v7279_v62  ;;  %v7425_v6 = vrot.slane %v2240_v42, 5  ;;  %v2288_v15 = vshll.u32 %v7391_v26, 16  ;;  %v2302_v59 = vshll.u32 %v7402_v45, 16  ;;  %v7432_v32 = vld [vmem:[%s9437_s1 + $0xe] sm:$0x3]  ;;  %v7437_v62 = vcombine.low %v2209_v56, %v2219_v52 }
  0xa3   : > { %9525 = vst [vmem:[#allocation11_spill] sm:$0xff] %v7432_v32  ;;  %6356 = vmatprep.subr.msk.bf16.mxu0 %vm707_vm0, %v7410_v33  ;;  %v7439_v17 = vrot.slane %v2237_v48, 4  ;;  %v2285_v16 = vor.u32 %v2284_v39, %v7404_v63  ;;  %v2306_v43 = vshrl.u32 %v7402_v45, 16  ;;  %v7448_v25 = vrot.slane %v2251_v12, 4  ;;  %v7457_v56 = vld [vmem:[%s6536_s23 + $0x98] sm:$0x1] }
  0xa4   : > { %6144 = vmatmul.mubr.msk.bf16.vlgmr.msra.gmra.mxu1 %vm658_vm3, %v6383_v10  ;;  %v7450_v53 = vrot.slane %v2261_v18, 4  ;;  %v7452_v13 = vrot.slane %v2264_v4, 5  ;;  %v7454_v10 = vrot.slane %v2275_v55, 4  ;;  %9527 = vst [vmem:[#allocation12_spill] sm:$0xff] %v7457_v56  ;;  %v2295_v24 = vrot.slane %v2293_v19, 4  ;;  %v6386_v19 = vld [vmem:[%s6536_s23 + $0x3c] sm:$0xff]  }
  0xa5   : > { %6210 = vmatpush3.bf16.msra.mxu1 %v7230_v14  ;;  %6147 = vmatprep.mubr.msk.bf16.mxu1 %vm658_vm3, %v6384_v46  ;;  %v2298_v48 = vrot.slane %v2296_v9, 5  ;;  %v2317_v42 = vshrl.u32 %v5497_v22, 16  ;;  %v2320_v51 = vshll.u32 %v5497_v22, 16  ;;  %v6385_v14 = vld [vmem:[%s6536_s23 + $0x30] sm:$0xff]   ;;  %v7466_v11 = vrot.slane %v2288_v15, 5 }
  0xa6   : > { %6355 = vmatprep.subr.msk.bf16.mxu1 %vm707_vm0, %v7432_v32  ;;  %v7468_v3 = vrot.slane %v2302_v59, 5  ;;  %v2326_v46 = vshll.u32 %v7444_v57, 16  ;;  %v5500_v52 = vld [vmem:[%s6536_s23 + $0xa8] sm:$0xf]  ;;  %v7472_v12 = vrot.slane %v2285_v16, 4  ;;  %v2308_v18 = vrot.slane %v2306_v43, 4 }
  0xa7   : > { %v2312_v4 = vshll.u32 %v7457_v56, 16  ;;  %v2330_v55 = vshrl.u32 %v7444_v57, 16  ;;  %v7477_v39 = vld [vmem:[%s6536_s23 + $0xac] sm:$0xf]  ;;  %v2299_v59 = vor.u32 %v2298_v48, %v2295_v24  ;;  %v7501_v16 = vld [vmem:[%s6536_s23 + $0xa4] sm:$0x1] }
  0xa8   : > { %9528 = vst [vmem:[#allocation13_spill] sm:$0xff] %v7477_v39  ;;  %9529 = vst [vmem:[#allocation2_spill] sm:$0xff] %v7501_v16  ;;  %v2319_v43 = vrot.slane %v2317_v42, 4  ;;  %v2322_v22 = vrot.slane %v2320_v51, 5  ;;  %v2341_v54 = vshrl.u32 %v5500_v52, 16  ;;  %v7503_v9 = vrot.slane %v2326_v46, 5 }
  0xa9   : > { %6182 = vmatmul.mubr.msk.bf16.gmra.mxu0 %vm658_vm3, %v7325_v7  ;;  %v2332_v32 = vrot.slane %v2330_v55, 4  ;;  %v2344_v15 = vshll.u32 %v5500_v52, 16  ;;  %v2350_v33 = vshll.u32 %v7477_v39, 16  ;;  %v5503_v57 = vld [vmem:[%s6536_s23 + $0xb4] sm:$0xf]  ;;  %v2309_v24 = vor.u32 %v2308_v18, %v7468_v3 }
  0xaa   : > { %6185 = vmatprep.mubr.msk.bf16.mxu0 %vm658_vm3, %v7375_v20  ;;  %v2291_v20 = vsel %vm6580_vm4, %v7472_v12, %v7466_v11  ;;  %v7513_v48 = vrot.slane %v2312_v4, 5  ;;  %v7516_v42 = vld [vmem:[%s6536_s23 + $0xb0] sm:$0x1]  ;;  %v2343_v51 = vrot.slane %v2341_v54, 4  ;;  %v7519_v46 = vld [vmem:[%s6536_s23 + $0xb8] sm:$0xf]  ;;  %v2323_v18 = vor.u32 %v2322_v22, %v2319_v43 }
  0xab   : > { %9530 = vst [vmem:[#allocation14_spill] sm:$0xff] %v7516_v42  ;;  %9531 = vst [vmem:[#allocation15_spill] sm:$0xff] %v7519_v46  ;;  %v2346_v52 = vrot.slane %v2344_v15, 5  ;;  %v7523_v55 = vrot.slane %v2350_v33, 5  ;;  %v2354_v11 = vshrl.u32 %v7477_v39, 16  ;;  %v7526_v12 = vrot.slane %v2299_v59, 4 }
  0xac   : > { %6148 = vmatmul.mubr.msk.bf16.gmra.mxu1 %vm658_vm3, %v6385_v14  ;;  %v2336_v14 = vshll.u32 %v7501_v16, 16  ;;  %v7529_v4 = vld [vmem:[%s6536_s23 + $0xbc] sm:$0x1]  ;;  %v2365_v54 = vshrl.u32 %v5503_v57, 16  ;;  %v2368_v7 = vshll.u32 %v5503_v57, 16  ;;  %v2333_v56 = vor.u32 %v2332_v32, %v7503_v9  ;;  %v6387_v16 = vld [vmem:[%s6536_s23 + $0x48] sm:$0xff]  }
  0xad   : > { %6151 = vmatprep.mubr.msk.bf16.mxu1 %vm658_vm3, %v6386_v19  ;;  %v2356_v45 = vrot.slane %v2354_v11, 4  ;;  %v2360_v19 = vshll.u32 %v7516_v42, 16  ;;  %v2374_v15 = vshll.u32 %v7519_v46, 16  ;;  %v5506_v33 = vld [vmem:[%s6536_s23 + $0xc0] sm:$0xf]  ;;  %v2347_v26 = vor.u32 %v2346_v52, %v2343_v51  ;;  %v6388_v57 = vld [vmem:[%s6536_s23 + $0x54] sm:$0xff]  }
  0xae   : > { %v2367_v39 = vrot.slane %v2365_v54, 4  ;;  %v2370_v34 = vrot.slane %v2368_v7, 5  ;;  %v2378_v59 = vshrl.u32 %v7519_v46, 16  ;;  %v7538_v22 = vld [vmem:[%s6536_s23 + $0xc4] sm:$0xf]  ;;  %v2310_v43 = vrot.slane %v2309_v24, 4 }
  0xaf   : > { %v2338_v32 = vrot.slane %v2336_v14, 5  ;;  %v2357_v11 = vor.u32 %v2356_v45, %v7523_v55  ;;  %v2376_v42 = vrot.slane %v2374_v15, 5  ;;  %v2384_v7 = vshll.u32 %v7529_v4, 16  ;;  %v7550_v45 = vld [vmem:[%s6536_s23 + $0xc8] sm:$0x1] }
  0xb0   : > { %v2371_v51 = vor.u32 %v2370_v34, %v2367_v39  ;;  %v2380_v52 = vrot.slane %v2378_v59, 4  ;;  %v2389_v54 = vshrl.u32 %v5506_v33, 16  ;;  %v2324_v46 = vrot.slane %v2323_v18, 4 }
  0xb1   : > { %6186 = vmatmul.mubr.msk.bf16.gmra.mxu0 %vm658_vm3, %v7383_v37  ;;  %v2334_v38 = vrot.slane %v2333_v56, 4  ;;  %v2392_v2 = vshll.u32 %v5506_v33, 16  ;;  %v2398_v37 = vshll.u32 %v7538_v22, 16  ;;  %v2348_v24 = vrot.slane %v2347_v26, 4 }
  0xb2   : > { %6189 = vmatprep.mubr.msk.bf16.mxu0 %vm658_vm3, %v7385_v29  ;;  %v2362_v14 = vrot.slane %v2360_v19, 5  ;;  %v2381_v36 = vor.u32 %v2380_v52, %v2376_v42  ;;  %v2391_v15 = vrot.slane %v2389_v54, 4  ;;  %v2358_v34 = vrot.slane %v2357_v11, 4 }
  0xb3   : > { %v2394_v29 = vrot.slane %v2392_v2, 5  ;;  %v7553_v39 = vrot.slane %v2398_v37, 5  ;;  %v2402_v56 = vshrl.u32 %v7538_v22, 16  ;;  %v9532_v26 = vsel %vm6580_vm4, %v7439_v17, %v7425_v6 }
  0xb4   : > { %6152 = vmatmul.mubr.msk.bf16.gmra.mxu1 %vm658_vm3, %v6387_v16  ;;  %v9533_v16 = vsel %vm6580_vm4, %v7423_v23, %v7365_v58  ;;  %v2372_v19 = vrot.slane %v2371_v51, 4  ;;  %v2382_v33 = vrot.slane %v2381_v36, 4  ;;  %v2386_v2 = vrot.slane %v2384_v7, 5  ;;  %v6389_v23 = vld [vmem:[%s6536_s23 + $0x60] sm:$0xff]  }
  0xb5   : > { %6155 = vmatprep.mubr.msk.bf16.mxu1 %vm658_vm3, %v6388_v57  ;;  %v5518_v18 = vcombine.low %v9533_v16, %v9532_v26  ;;  %v9534_v59 = vsel %vm6580_vm4, %v7450_v53, %v7452_v13  ;;  %v9535_v6 = vsel %vm6580_vm4, %v7448_v25, %v7381_v60  ;;  %v2395_v57 = vor.u32 %v2394_v29, %v2391_v15  ;;  %v5544_v13 = vld [vmem:[%s6536_s23 + $0x24] sm:$0xe]  ;;  %v5547_v26 = vld [vmem:[%s6536_s23 + $0x48] sm:$0xe] }
  0xb6   : > { %v5519_v17 = vcombine.low %v9535_v6, %v9534_v59  ;;  %v2404_v11 = vrot.slane %v2402_v56, 4  ;;  %v2408_v58 = vshll.u32 %v7550_v45, 16  ;;  %v9536_v36 = vsel %vm6580_vm4, %v7454_v10, %v7404_v63  ;;  %v6390_v63 = vld [vmem:[%s6536_s23 + $0x6c] sm:$0xff]   ;;  %v5548_v6 = vld [vmem:[%s6536_s23 + $0x54] sm:$0xe] }
  0xb7   : > { %v5520_v51 = vcombine.low %v9536_v36, %v2291_v20  ;;  %v2305_v53 = vsel %vm6580_vm4, %v7526_v12, %v7468_v3  ;;  %v2315_v60 = vsel %vm6580_vm4, %v2310_v43, %v7513_v48  ;;  %v2329_v25 = vsel %vm6580_vm4, %v2324_v46, %v7503_v9  ;;  %v7606_v12 = vld [vmem:[%s6536_s23 + $0xc] sm:$0xe] }
  0xb8   : > { %v2339_v10 = vsel %vm6580_vm4, %v2334_v38, %v2338_v32  ;;  %v2353_v3 = vsel %vm6580_vm4, %v2348_v24, %v7523_v55  ;;  %v2363_v20 = vsel %vm6580_vm4, %v2358_v34, %v2362_v14  ;;  %v2405_v48 = vor.u32 %v2404_v11, %v7553_v39  ;;  %v5545_v55 = vld [vmem:[%s6536_s23 + $0x30] sm:$0xe]  ;;  %v5546_v14 = vld [vmem:[%s6536_s23 + $0x3c] sm:$0xe] }
  0xb9   : > { %6190 = vmatmul.mubr.msk.bf16.gmra.mxu0 %vm658_vm3, %v7437_v62  ;;  %v2377_v62 = vsel %vm6580_vm4, %v2372_v19, %v2376_v42  ;;  %v2387_v38 = vsel %vm6580_vm4, %v2382_v33, %v2386_v2  ;;  %v7613_v9 = vrot.slane %v2395_v57, 4  ;;  %v2772_v46 = vrot.slane %v7097_v49, 5  ;;  %v6391_v57 = vld [vmem:[%s6536_s23 + $0x78] sm:$0xff]  }
  0xba   : > { %6193 = vmatprep.mubr.msk.bf16.mxu0 %vm658_vm3, %v5518_v18  ;;  %v7617_v43 = vcombine.low %v2305_v53, %v2315_v60  ;;  %v7619_v32 = vrot.slane %v2405_v48, 4  ;;  %v7621_v52 = vrot.slane %v2408_v58, 5  ;;  %v5560_v7 = vrot.slane %v5544_v13, 9  ;;  %v6392_v53 = vld [vmem:[%s6536_s23 + $0x84] sm:$0xff]   ;;  %v5549_v13 = vld [vmem:[%s6536_s23 + $0x60] sm:$0xe] }
  0xbb   : > { %v7624_v54 = vcombine.low %v2329_v25, %v2339_v10  ;;  %v7626_v42 = vcombine.low %v2353_v3, %v2363_v20  ;;  %v5558_v37 = vrot.slane %v7606_v12, 9  ;;  %v2786_v24 = vrot.slane %v7146_v44, 5  ;;  %v6398_v49 = vld [vmem:[%s6536_s23 + $0x18] sm:$0xff]  }
  0xbc   : > { %6156 = vmatmul.mubr.msk.bf16.gmra.mxu1 %vm658_vm3, %v6389_v23  ;;  %v7632_v15 = vcombine.low %v2377_v62, %v2387_v38  ;;  %v2775_v34 = vrot.slane %v7133_v47, 5  ;;  %v2789_v29 = vrot.slane %v7161_v21, 5  ;;  %v5561_v56 = vrot.slane %v5545_v55, 9  ;;  %v5551_v55 = vld [vmem:[%s6536_s23 + $0x78] sm:$0xe] }
  0xbd   : > { %6159 = vmatprep.mubr.msk.bf16.mxu1 %vm658_vm3, %v6390_v63  ;;  %v2401_v16 = vsel %vm6580_vm4, %v7613_v9, %v7553_v39  ;;  %v7643_v44 = vrot.slane %v2772_v46, 4  ;;  %v7647_v18 = vsel %vm6866_vm7, %v5560_v7, %v2786_v24  ;;  %v2788_v19 = vrot.slane %v2786_v24, 4 }
  0xbe   : > { %v2411_v21 = vsel %vm6580_vm4, %v7619_v32, %v7621_v52  ;;  %v2793_v33 = vrot.slane %v7184_v5, 5  ;;  %v2796_v2 = vrot.slane %v7192_v41, 5  ;;  %v5562_v59 = vrot.slane %v5546_v14, 9  ;;  %v6397_v52 = vld [vmem:[%s6536_s23 + $0xc0] sm:$0xff]  }
  0xbf   : > { %v7659_v11 = vsel %vm6866_vm7, %v2788_v19, %v2789_v29  ;;  %v2800_v58 = vrot.slane %v7201_v61, 5  ;;  %v2803_v23 = vrot.slane %v7253_v50, 5  ;;  %v5563_v36 = vrot.slane %v5547_v26, 9  ;;  %v5552_v19 = vld [vmem:[%s6536_s23 + $0x84] sm:$0xe] }
  0xc0   : > { %v5577_v5 = vcombine.low %v7647_v18, %v7659_v11  ;;  %v7669_v41 = vsel %vm6866_vm7, %v5561_v56, %v2793_v33  ;;  %v2795_v60 = vrot.slane %v2793_v33, 4  ;;  %v2807_v25 = vrot.slane %v7219_v1, 5 }
  0xc1   : > { %6194 = vmatmul.mubr.msk.bf16.gmra.mxu0 %vm658_vm3, %v5519_v17  ;;  %v7676_v61 = vsel %vm6866_vm7, %v5562_v59, %v2800_v58  ;;  %v2802_v50 = vrot.slane %v2800_v58, 4  ;;  %v2810_v17 = vrot.slane %v7267_v8, 5  ;;  %v5564_v63 = vrot.slane %v5548_v6, 9  ;;  %v9537_v59 = vld [vmem:[#allocation4_spill] sm:$0xff] }
  0xc2   : > { %6197 = vmatprep.mubr.msk.bf16.mxu0 %vm658_vm3, %v5520_v51  ;;  %v7681_v10 = vsel %vm6866_vm7, %v2795_v60, %v2796_v2  ;;  %v7685_v3 = vsel %vm6866_vm7, %v5563_v36, %v2807_v25  ;;  %v2809_v1 = vrot.slane %v2807_v25, 4  ;;  %v2814_v20 = vrot.slane %v7262_v40, 5  ;;  %v5550_v51 = vld [vmem:[%s6536_s23 + $0x6c] sm:$0xe]  ;;  %v6393_v58 = vld [vmem:[%s6536_s23 + $0x90] sm:$0xff]  }
  0xc3   : > { %v5578_v48 = vcombine.low %v7669_v41, %v7681_v10  ;;  %v7694_v8 = vsel %vm6866_vm7, %v2802_v50, %v2803_v23  ;;  %v2817_v62 = vrot.slane %v7284_v35, 5  ;;  %v5565_v38 = vrot.slane %v5549_v13, 9  ;;  %v9538_v36 = vld [vmem:[#allocation3_spill] sm:$0xff]  ;;  %v5553_v60 = vld [vmem:[%s6536_s23 + $0x90] sm:$0xe]  ;;  %v9539_v50 = vld [vmem:[#allocation6_spill] sm:$0xff] }
  0xc4   : > { %6160 = vmatmul.mubr.msk.bf16.gmra.mxu1 %vm658_vm3, %v6391_v57  ;;  %v5579_v40 = vcombine.low %v7676_v61, %v7694_v8  ;;  %v7703_v7 = vsel %vm6866_vm7, %v2809_v1, %v2810_v17  ;;  %v7707_v24 = vsel %vm6866_vm7, %v5564_v63, %v2814_v20  ;;  %v2816_v14 = vrot.slane %v2814_v20, 4 }
  0xc5   : > { %6163 = vmatprep.mubr.msk.bf16.mxu1 %vm658_vm3, %v6392_v53  ;;  %v5580_v35 = vcombine.low %v7685_v3, %v7703_v7  ;;  %v2821_v29 = vrot.slane %v7297_v28, 5  ;;  %v2824_v56 = vrot.slane %v7319_v30, 5  ;;  %v5566_v26 = vrot.slane %v5550_v51, 9  ;;  %v9540_v51 = vld [vmem:[#allocation5_spill] sm:$0xff]  ;;  %v5684_v3 = vld [vmem:[%s6536_s23 + $0x48] sm:$0xf] }
  0xc6   : > { %v7716_v33 = vsel %vm6866_vm7, %v2816_v14, %v2817_v62  ;;  %v2828_v2 = vrot.slane %v7316_v27, 5  ;;  %v2831_v6 = vrot.slane %v9537_v59, 5  ;;  %v5567_v57 = vrot.slane %v5551_v55, 9  ;;  %v6394_v27 = vld [vmem:[%s6536_s23 + $0x9c] sm:$0xff]   ;;  %v9548_v55 = vld [vmem:[#allocation15_spill] sm:$0xff] }
  0xc7   : > { %v5581_v23 = vcombine.low %v7707_v24, %v7716_v33  ;;  %v7725_v28 = vsel %vm6866_vm7, %v5565_v38, %v2821_v29  ;;  %v2823_v30 = vrot.slane %v2821_v29, 4  ;;  %v2835_v53 = vrot.slane %v9538_v36, 5  ;;  %v5554_v38 = vld [vmem:[%s6536_s23 + $0x9c] sm:$0xe]  ;;  %v9543_v36 = vld [vmem:[#allocation12_spill] sm:$0xff] }
  0xc8   : > { %v7734_v25 = vsel %vm6866_vm7, %v5566_v26, %v2828_v2  ;;  %v2830_v13 = vrot.slane %v2828_v2, 4  ;;  %v2838_v17 = vrot.slane %v9539_v50, 5  ;;  %v5568_v63 = vrot.slane %v5552_v19, 9  ;;  %v5555_v26 = vld [vmem:[%s6536_s23 + $0xa8] sm:$0xe] }
  0xc9   : > { %6198 = vmatmul.mubr.msk.bf16.gmra.mxu0 %vm658_vm3, %v7617_v43  ;;  %v7741_v1 = vsel %vm6866_vm7, %v2823_v30, %v2824_v56  ;;  %v7745_v43 = vsel %vm6866_vm7, %v5567_v57, %v2835_v53  ;;  %v2837_v20 = vrot.slane %v2835_v53, 4  ;;  %v2842_v62 = vrot.slane %v9540_v51, 5  ;;  %v5557_v57 = vld [vmem:[%s6536_s23 + $0xc0] sm:$0xe]  ;;  %v6395_v19 = vld [vmem:[%s6536_s23 + $0xa8] sm:$0xff]  }
  0xca   : > { %6201 = vmatprep.mubr.msk.bf16.mxu0 %vm658_vm3, %v7624_v54  ;;  %v7753_v14 = vsel %vm6866_vm7, %v2830_v13, %v2831_v6  ;;  %v9541_v54 = vld [vmem:[#allocation8_spill] sm:$0xff]  ;;  %v5569_v56 = vrot.slane %v5553_v60, 9  ;;  %v2852_v53 = vrot.slane %v9543_v36, 5  ;;  %v5570_v60 = vrot.slane %v5554_v38, 9  ;;  %v9546_v38 = vld [vmem:[#allocation13_spill] sm:$0xff] }
  0xcb   : > { %v2845_v29 = vrot.slane %v9541_v54, 5  ;;  %v7762_v2 = vsel %vm6866_vm7, %v2837_v20, %v2838_v17  ;;  %v7766_v59 = vsel %vm6866_vm7, %v5568_v63, %v2842_v62  ;;  %v2844_v6 = vrot.slane %v2842_v62, 4  ;;  %v5556_v13 = vld [vmem:[%s6536_s23 + $0xb4] sm:$0xe]  ;;  %v9544_v17 = vld [vmem:[#allocation10_spill] sm:$0xff] }
  0xcc   : > { %6164 = vmatmul.mubr.msk.bf16.gmra.mxu1 %vm658_vm3, %v6393_v58  ;;  %v9542_v58 = vld [vmem:[#allocation7_spill] sm:$0xff]  ;;  %v2856_v63 = vrot.slane %v9544_v17, 5  ;;  %v9545_v20 = vld [vmem:[#allocation2_spill] sm:$0xff]  ;;  %v5571_v62 = vrot.slane %v5555_v26, 9  ;;  %v2863_v36 = vrot.slane %v9546_v38, 5  ;;  %v5572_v26 = vrot.slane %v5556_v13, 9 }
  0xcd   : > { %6167 = vmatprep.mubr.msk.bf16.mxu1 %vm658_vm3, %v6394_v27  ;;  %v2849_v30 = vrot.slane %v9542_v58, 5  ;;  %v7776_v50 = vsel %vm6866_vm7, %v2844_v6, %v2845_v29  ;;  %v2859_v51 = vrot.slane %v9545_v20, 5  ;;  %v9547_v17 = vld [vmem:[#allocation14_spill] sm:$0xff]  ;;  %v6396_v27 = vld [vmem:[%s6536_s23 + $0xb4] sm:$0xff]   ;;  %v2776_v39 = vsel %vm6866_vm7, %v7643_v44, %v2775_v34  ;;  %v7993_v7 = vld [vmem:[%s6536_s23 + $0x4c] sm:$0xf] }
  0xce   : > { %v7791_v29 = vsel %vm6866_vm7, %v5570_v60, %v2856_v63  ;;  %v2858_v6 = vrot.slane %v2856_v63, 4  ;;  %v2866_v20 = vrot.slane %v9547_v17, 5  ;;  %v2865_v38 = vrot.slane %v2863_v36, 4  ;;  %v6479_v44 = vld [vmem:[%s6536_s23 + $0x20] sm:$0x1] }
  0xcf   : > { %v7784_v54 = vsel %vm6866_vm7, %v5569_v56, %v2849_v30  ;;  %v2851_v58 = vrot.slane %v2849_v30, 4  ;;  %v7803_v30 = vsel %vm6866_vm7, %v5571_v62, %v2863_v36  ;;  %v2870_v60 = vrot.slane %v9548_v55, 5 }
  0xd0   : > { %v5573_v63 = vrot.slane %v5557_v57, 9  ;;  %v7819_v55 = vsel %vm6866_vm7, %v2865_v38, %v2866_v20  ;;  %v2877_v57 = vrot.slane %v7538_v22, 5  ;;  %v2773_v22 = vsel %vm6866_vm7, %v5558_v37, %v2772_v46  ;;  %v6400_v38 = vld [vmem:[%s6536_s23 + $0x30] sm:$0xff]  }
  0xd1   : > { %6202 = vmatmul.mubr.msk.bf16.gmra.mxu0 %vm658_vm3, %v7626_v42  ;;  %v7799_v56 = vsel %vm6866_vm7, %v2851_v58, %v2852_v53  ;;  %v7812_v42 = vsel %vm6866_vm7, %v2858_v6, %v2859_v51  ;;  %v2873_v53 = vrot.slane %v7529_v4, 5  ;;  %v2872_v58 = vrot.slane %v2870_v60, 4 }
  0xd2   : > { %6205 = vmatprep.mubr.msk.bf16.mxu0 %vm658_vm3, %v7632_v15  ;;  %v7823_v15 = vsel %vm6866_vm7, %v5572_v26, %v2870_v60  ;;  %v2880_v51 = vrot.slane %v7550_v45, 5  ;;  %v5543_v45 = vld [vmem:[%s6536_s23 + $0x18] sm:$0xe]  ;;  %v7863_v9 = vsel %vm6866_vm7, %v5573_v63, %v2877_v57  ;;  %v2879_v46 = vrot.slane %v2877_v57, 4  ;;  %v6399_v26 = vld [vmem:[%s6536_s23 + $0x24] sm:$0xff]  }
  0xd3   : > { %v7851_v32 = vsel %vm6866_vm7, %v2872_v58, %v2873_v53  ;;  %v5559_v37 = vrot.slane %v5543_v45, 9  ;;  %v5575_v34 = vcombine.low %v2773_v22, %v2776_v39  ;;  %v9549_v60 = vld [vmem:[#allocation9_spill] sm:$0xff] }
  0xd4   : > { %6168 = vmatmul.mubr.msk.bf16.gmra.mxu1 %vm658_vm3, %v6395_v19  ;;  %v5525_v19 = vcombine.low %v2401_v16, %v2411_v21  ;;  %v7868_v47 = vsel %vm6866_vm7, %v2879_v46, %v2880_v51  ;;  %v2782_v21 = vrot.slane %v6479_v44, 5  ;;  %v4536_v53 = vsel %vm707_vm0, %v9549_v60, 0  ;;  %v5672_v63 = vld [vmem:[%s6536_s23 + $0x18] sm:$0xf]  ;;  %v5673_v57 = vld [vmem:[%s6536_s23 + $0x1c] sm:$0xf] }
  0xd5   : > { %6171 = vmatprep.mubr.msk.bf16.mxu1 %vm658_vm3, %v6396_v27  ;;  %v6478_v27 = vld [vmem:[%s6536_s23 + $0x1c] sm:$0xf]  ;;  %v5675_v51 = vld [vmem:[%s6536_s23 + $0x24] sm:$0xf]  ;;  %v3584_v45 = vshrl.u32 %v5672_v63, 16  ;;  %v3593_v39 = vshll.u32 %v5673_v57, 16 }
  0xd6   : > { %v2779_v36 = vrot.slane %v6478_v27, 5  ;;  %v3587_v27 = vshll.u32 %v5672_v63, 16  ;;  %v3608_v46 = vshrl.u32 %v5675_v51, 16  ;;  %v6402_v44 = vld [vmem:[%s6536_s23 + $0x48] sm:$0xff]   ;;  %v5753_v60 = vld [vmem:[%s6536_s23 + $0x18] sm:$0xe] }
  0xd7   : > { %v7909_v63 = vld [vmem:[%s6536_s23 + $0x2c] sm:$0x1] }
  0xd8   : > { %v2781_v16 = vrot.slane %v2779_v36, 4  ;;  %v2780_v17 = vsel %vm6866_vm7, %v5559_v37, %v2779_v36  ;;  %v7893_v36 = vld [vmem:[%s6536_s23 + $0x28] sm:$0xf]  ;;  %v6401_v37 = vld [vmem:[%s6536_s23 + $0x3c] sm:$0xff]   ;;  %v3610_v18 = vrot.slane %v3608_v46, 4 }
  0xd9   : > { %6206 = vmatmul.mubr.msk.bf16.gmra.mxu0 %vm658_vm3, %v5525_v19  ;;  %v9550_v19 = vld [vmem:[#allocation11_spill] sm:$0xff] }
  0xda   : > { %6245 = vmatprep.mubr.msk.bf16.mxu0 %vm658_vm3, %v6398_v49  ;;  %v2783_v20 = vsel %vm6866_vm7, %v2781_v16, %v2782_v21  ;;  %v4066_v22 = vsel %vm707_vm0, %v9550_v19, 0  ;;  %v3597_v49 = vshrl.u32 %v5673_v57, 16  ;;  %v3621_v16 = vshrl.u32 %v7893_v36, 16  ;;  %v5674_v21 = vld [vmem:[%s6536_s23 + $0x20] sm:$0x1] }
  0xdb   : > { %v5576_v58 = vcombine.low %v2780_v17, %v2783_v20  ;;  %v3586_v17 = vrot.slane %v3584_v45, 4  ;;  %v3589_v20 = vrot.slane %v3587_v27, 5  ;;  %v5678_v19 = vld [vmem:[%s6536_s23 + $0x30] sm:$0xf]  ;;  %v3603_v45 = vshll.u32 %v5674_v21, 16 }
  0xdc   : > { %6172 = vmatmul.mubr.msk.bf16.gmra.mxu1 %vm658_vm3, %v6397_v52  ;;  %v3611_v52 = vshll.u32 %v5675_v51, 16  ;;  %v3623_v51 = vrot.slane %v3621_v16, 4  ;;  %v5769_v27 = vrot.slane %v5753_v60, 9  ;;  %v4330_v46 = vrot.slane %v5674_v21, 5  ;;  %v5754_v16 = vld [vmem:[%s6536_s23 + $0x24] sm:$0xe] }
  0xdd   : > { %6211 = vmatprep.mubr.msk.bf16.mxu1 %vm658_vm3, %v5575_v34  ;;  %v3617_v34 = vshll.u32 %v7893_v36, 16  ;;  %v6403_v21 = vld [vmem:[%s6536_s23 + $0x54] sm:$0xff]   ;;  %v3635_v10 = vshll.u32 %v5678_v19, 16  ;;  %v6404_v60 = vld [vmem:[%s6536_s23 + $0x60] sm:$0xff]  }
  0xde   : > { %v3613_v11 = vrot.slane %v3611_v52, 5  ;;  %v3627_v52 = vshll.u32 %v7909_v63, 16 }
  0xe1   : > { %6246 = vmatmul.mubr.msk.bf16.vlgmr.msra.gmra.mxu0 %vm658_vm3, %v6399_v26  ;;  %v7905_v26 = vrot.slane %v3593_v39, 5 }
  0xe2   : > { %6312 = vmatpush3.bf16.msra.mxu0 %v4536_v53  ;;  %6249 = vmatprep.mubr.msk.bf16.mxu0 %vm658_vm3, %v6400_v38  ;;  %v3599_v38 = vrot.slane %v3597_v49, 4  ;;  %v4327_v53 = vrot.slane %v5673_v57, 5  ;;  %v7919_v57 = vld [vmem:[%s6536_s23 + $0x34] sm:$0xf] }
  0xe4   : > { %6212 = vmatmul.mubr.msk.bf16.vlgmr.msra.gmra.mxu1 %vm658_vm3, %v5576_v58  ;;  %v7914_v58 = vrot.slane %v3617_v34, 5  ;;  %v3600_v39 = vor.u32 %v3599_v38, %v7905_v26  ;;  %v4329_v49 = vrot.slane %v4327_v53, 4  ;;  %v3614_v34 = vor.u32 %v3613_v11, %v3610_v18 }
  0xe5   : > { %6278 = vmatpush3.bf16.msra.mxu1 %v4066_v22  ;;  %6215 = vmatprep.mubr.msk.bf16.mxu1 %vm658_vm3, %v5577_v5  ;;  %v7912_v5 = vpop.f32.mrf.mxu0  ;;  %v3590_v22 = vor.u32 %v3589_v20, %v3586_v17  ;;  %v3632_v17 = vshrl.u32 %v5678_v19, 16  ;;  %v3645_v38 = vshrl.u32 %v7919_v57, 16  ;;  %v7944_v61 = vsel %vm6866_vm7, %v5769_v27, %v4327_v53  ;;  %v5681_v19 = vld [vmem:[%s6536_s23 + $0x3c] sm:$0xf] }
  0xe6   : > { %v3624_v41 = vor.u32 %v3623_v51, %v7914_v58  ;;  %v3601_v8 = vrot.slane %v3600_v39, 4  ;;  %v3629_v11 = vrot.slane %v3627_v52, 5  ;;  %v5770_v51 = vrot.slane %v5754_v16, 9  ;;  %v7958_v39 = vld [vmem:[%s6536_s23 + $0x38] sm:$0x1] }
  0xe7   : > { %v7936_v20 = vpop.f32.mrf.mxu0  ;;  %v3591_v18 = vrot.slane %v3590_v22, 4  ;;  %v3615_v12 = vrot.slane %v3614_v34, 4  ;;  %v4337_v22 = vrot.slane %v7909_v63, 5  ;;  %v3647_v52 = vrot.slane %v3645_v38, 4 }
  0xe8   : > { %v3625_v27 = vrot.slane %v3624_v41, 4  ;;  %v3656_v34 = vshrl.u32 %v5681_v19, 16  ;;  %v3659_v16 = vshll.u32 %v5681_v19, 16  ;;  %v7971_v41 = vld [vmem:[%s6536_s23 + $0x40] sm:$0xf] }
  0xe9   : > { %6250 = vmatmul.mubr.msk.bf16.gmra.mxu0 %vm658_vm3, %v6401_v37  ;;  %v7955_v53 = vpop.f32.mrf.mxu0  ;;  %v3596_v63 = vsel %vm6580_vm4, %v3591_v18, %v7905_v26  ;;  %v3620_v26 = vsel %vm6580_vm4, %v3615_v12, %v7914_v58  ;;  %v5755_v18 = vld [vmem:[%s6536_s23 + $0x30] sm:$0xe]  ;;  %v3665_v24 = vshll.u32 %v7971_v41, 16  ;;  %v3669_v33 = vshrl.u32 %v7971_v41, 16 }
  0xea   : > { %6253 = vmatprep.mubr.msk.bf16.mxu0 %vm658_vm3, %v6402_v44  ;;  %v7927_v37 = vpop.f32.mrf.mxu1  ;;  %v4334_v44 = vrot.slane %v7893_v36, 5  ;;  %v3605_v36 = vrot.slane %v3603_v45, 5  ;;  %v3634_v45 = vrot.slane %v3632_v17, 4  ;;  %v3630_v58 = vsel %vm6580_vm4, %v3625_v27, %v3629_v11 }
  0xeb   : > { %9551 = vst [vmem:[#allocation4_spill] sm:$0xff] %v7927_v37  ;;  %v8000_v12 = vpop.f32.mrf.mxu0  ;;  %v3661_v19 = vrot.slane %v3659_v16, 5  ;;  %v3693_v11 = vshrl.u32 %v7993_v7, 16 }
  0xec   : > { %6216 = vmatmul.mubr.msk.bf16.gmra.mxu1 %vm658_vm3, %v5578_v48  ;;  %v3641_v48 = vshll.u32 %v7919_v57, 16  ;;  %v7951_v6 = vpop.f32.mrf.mxu1  ;;  %v4336_v4 = vrot.slane %v4334_v44, 4  ;;  %v3606_v17 = vsel %vm6580_vm4, %v3601_v8, %v3605_v36  ;;  %v4341_v36 = vrot.slane %v7919_v57, 5  ;;  %v6406_v8 = vld [vmem:[%s6536_s23 + $0x78] sm:$0xff]  }
  0xed   : > { %6219 = vmatprep.mubr.msk.bf16.mxu1 %vm658_vm3, %v5579_v40  ;;  %v7948_v40 = vsel %vm6866_vm7, %v4329_v49, %v4330_v46  ;;  %9552 = vst [vmem:[#allocation3_spill] sm:$0xff] %v7951_v6  ;;  %v3637_v49 = vrot.slane %v3635_v10, 5  ;;  %v8014_v27 = vcombine.low %v3596_v63, %v3606_v17  ;;  %v8016_v57 = vcombine.low %v3620_v26, %v3630_v58  ;;  %v8030_v17 = vld [vmem:[%s6536_s23 + $0x58] sm:$0xf]  ;;  %v8036_v58 = vld [vmem:[%s6536_s23 + $0x44] sm:$0x1] }
  0xee   : > { %v7960_v46 = vrot.slane %v3641_v48, 5  ;;  %v7977_v10 = vpop.f32.mrf.mxu1  ;;  %v7984_v48 = vsel %vm6866_vm7, %v5770_v51, %v4334_v44  ;;  %v7988_v38 = vsel %vm6866_vm7, %v4336_v4, %v4337_v22  ;;  %v3658_v51 = vrot.slane %v3656_v34, 4  ;;  %v5687_v34 = vld [vmem:[%s6536_s23 + $0x54] sm:$0xf] }
  0xef   : > { %9553 = vst [vmem:[#allocation6_spill] sm:$0xff] %v7977_v10  ;;  %v3638_v44 = vor.u32 %v3637_v49, %v3634_v45  ;;  %v3683_v22 = vshll.u32 %v5684_v3, 16  ;;  %v4343_v13 = vrot.slane %v4341_v36, 4  ;;  %v4344_v63 = vrot.slane %v7958_v39, 5  ;;  %v5756_v49 = vld [vmem:[%s6536_s23 + $0x3c] sm:$0xe] }
  0xf0   : > { %v3648_v4 = vor.u32 %v3647_v52, %v7960_v46  ;;  %v8012_v45 = vpop.f32.mrf.mxu1  ;;  %v5771_v52 = vrot.slane %v5755_v18, 9  ;;  %v3662_v18 = vor.u32 %v3661_v19, %v3658_v51  ;;  %v9556_v6 = vcombine.low %v7725_v28, %v7741_v1 }
  0xf1   : > { %6254 = vmatmul.mubr.msk.bf16.gmra.mxu0 %vm658_vm3, %v6403_v21  ;;  %v3689_v21 = vshll.u32 %v7993_v7, 16  ;;  %9554 = vst [vmem:[#allocation5_spill] sm:$0xff] %v8012_v45  ;;  %v3685_v45 = vrot.slane %v3683_v22, 5  ;;  %v3704_v51 = vshrl.u32 %v5687_v34, 16  ;;  %v3707_v19 = vshll.u32 %v5687_v34, 16 }
  0xf2   : > { %6257 = vmatprep.mubr.msk.bf16.mxu0 %vm658_vm3, %v6404_v60  ;;  %v3651_v60 = vshll.u32 %v7958_v39, 16  ;;  %v8033_v26 = vrot.slane %v3648_v4, 4  ;;  %v3695_v39 = vrot.slane %v3693_v11, 4  ;;  %v8071_v22 = vsel %vm6866_vm7, %v4343_v13, %v4344_v63 }
  0xf3   : > { %v8041_v10 = vrot.slane %v3689_v21, 5  ;;  %v9558_v21 = vcombine.low %v7734_v25, %v7753_v14  ;;  %v4348_v25 = vrot.slane %v7971_v41, 5  ;;  %v6408_v14 = vld [vmem:[%s6536_s23 + $0x90] sm:$0xff]   ;;  %v5772_v1 = vrot.slane %v5756_v49, 9  ;;  %v5690_v41 = vld [vmem:[%s6536_s23 + $0x60] sm:$0xf] }
  0xf4   : > { %6220 = vmatmul.mubr.msk.bf16.gmra.mxu1 %vm658_vm3, %v5580_v35  ;;  %v6405_v35 = vld [vmem:[%s6536_s23 + $0x6c] sm:$0xff]   ;;  %v8026_v62 = vrot.slane %v3651_v60, 5  ;;  %v3706_v37 = vrot.slane %v3704_v51, 4 }
  0xf5   : > { %6223 = vmatprep.mubr.msk.bf16.mxu1 %vm658_vm3, %v5581_v23  ;;  %v3680_v23 = vshrl.u32 %v5684_v3, 16  ;;  %v8024_v3 = vrot.slane %v3638_v44, 4  ;;  %v3671_v44 = vrot.slane %v3669_v33, 4  ;;  %v3717_v33 = vshrl.u32 %v8030_v17, 16 }
  0xf6   : > { %v8022_v16 = vpop.f32.mrf.mxu0  ;;  %v3696_v13 = vor.u32 %v3695_v39, %v8041_v10  ;;  %v4355_v39 = vrot.slane %v7993_v7, 5  ;;  %v9562_v7 = vcombine.low %v7745_v43, %v7762_v2  ;;  %v9564_v43 = vcombine.low %v7766_v59, %v7776_v50  ;;  %v6409_v2 = vld [vmem:[%s6536_s23 + $0x9c] sm:$0xff]  }
  0xf7   : > { %9555 = vst [vmem:[#allocation8_spill] sm:$0xff] %v8022_v16  ;;  %v3682_v60 = vrot.slane %v3680_v23, 4  ;;  %v6407_v23 = vld [vmem:[%s6536_s23 + $0x84] sm:$0xff]   ;;  %v8098_v16 = vld [vmem:[%s6536_s23 + $0x5c] sm:$0x1]  ;;  %v4362_v59 = vrot.slane %v8030_v17, 5 }
  0xf8   : > { %v8059_v28 = vpop.f32.mrf.mxu0 }
  0xf9   : > { %6258 = vmatmul.mubr.msk.bf16.gmra.mxu0 %vm658_vm3, %v6405_v35  ;;  %v8038_v35 = vrot.slane %v3665_v24, 5  ;;  %v3713_v24 = vshll.u32 %v8030_v17, 16  ;;  %9559 = vst [vmem:[#allocation12_spill] sm:$0xff] %v8059_v28  ;;  %v3709_v28 = vrot.slane %v3707_v19, 5 }
  0xfa   : > { %6261 = vmatprep.mubr.msk.bf16.mxu0 %vm658_vm3, %v6406_v8  ;;  %v8047_v4 = vpop.f32.mrf.mxu1  ;;  %v8050_v8 = vld [vmem:[%s6536_s23 + $0x50] sm:$0x1]  ;;  %v8091_v49 = vpop.f32.mrf.mxu0 }
  0xfb   : > { %9557 = vst [vmem:[#allocation7_spill] sm:$0xff] %v8047_v4  ;;  %v3672_v34 = vor.u32 %v3671_v44, %v8038_v35  ;;  %v8081_v4 = vrot.slane %v3662_v18, 4  ;;  %v8088_v11 = vrot.slane %v3713_v24, 5  ;;  %v3719_v44 = vrot.slane %v3717_v33, 4  ;;  %9561 = vst [vmem:[#allocation2_spill] sm:$0xff] %v8091_v49 }
  0xfc   : > { %6224 = vmatmul.mubr.msk.bf16.gmra.mxu1 %vm658_vm3, %v9556_v6  ;;  %v8067_v6 = vsel %vm6866_vm7, %v5771_v52, %v4341_v36  ;;  %v3686_v36 = vor.u32 %v3685_v45, %v3682_v60  ;;  %v3699_v52 = vshll.u32 %v8050_v8, 16  ;;  %v8086_v63 = vpop.f32.mrf.mxu1  ;;  %v4350_v18 = vrot.slane %v4348_v25, 4  ;;  %v5757_v24 = vld [vmem:[%s6536_s23 + $0x48] sm:$0xe] }
  0xfd   : > { %6227 = vmatprep.mubr.msk.bf16.mxu1 %vm658_vm3, %v9558_v21  ;;  %v3675_v21 = vshll.u32 %v8036_v58, 16  ;;  %9560 = vst [vmem:[#allocation10_spill] sm:$0xff] %v8086_v63  ;;  %v4351_v60 = vrot.slane %v8036_v58, 5  ;;  %v3673_v51 = vrot.slane %v3672_v34, 4  ;;  %v3728_v33 = vshrl.u32 %v5690_v41, 16 }
  0xfe   : > { %v8104_v63 = vsel %vm6866_vm7, %v5772_v1, %v4348_v25  ;;  %v3687_v45 = vrot.slane %v3686_v36, 4  ;;  %v3697_v49 = vrot.slane %v3696_v13, 4  ;;  %v3701_v58 = vrot.slane %v3699_v52, 5  ;;  %v8119_v36 = vld [vmem:[%s6536_s23 + $0x64] sm:$0xf]  ;;  %v8126_v13 = vpop.f32.mrf.mxu0 }
  0xff   : > { %v3677_v19 = vrot.slane %v3675_v21, 5  ;;  %v3668_v34 = vsel %vm6580_vm4, %v8081_v4, %v8038_v35  ;;  %v3710_v21 = vor.u32 %v3709_v28, %v3706_v37  ;;  %v3720_v1 = vor.u32 %v3719_v44, %v8088_v11  ;;  %9565 = vst [vmem:[#allocation14_spill] sm:$0xff] %v8126_v13  ;;  %v5758_v28 = vld [vmem:[%s6536_s23 + $0x54] sm:$0xe]  ;;  %v6413_v13 = vld [vmem:[%s6536_s23 + $0xcc] sm:$0xff]  }
 0x100   : > { %v3723_v25 = vshll.u32 %v8098_v16, 16  ;;  %v8130_v52 = vsel %vm6866_vm7, %v4350_v18, %v4351_v60  ;;  %v5773_v35 = vrot.slane %v5757_v24, 9  ;;  %v4357_v37 = vrot.slane %v4355_v39, 4 }
 0x101   : > { %6262 = vmatmul.mubr.msk.bf16.gmra.mxu0 %vm658_vm3, %v6407_v23  ;;  %v3731_v23 = vshll.u32 %v5690_v41, 16  ;;  %v4358_v4 = vrot.slane %v8050_v8, 5  ;;  %v6410_v41 = vld [vmem:[%s6536_s23 + $0xa8] sm:$0xff]   ;;  %v3678_v44 = vsel %vm6580_vm4, %v3673_v51, %v3677_v19  ;;  %v3730_v50 = vrot.slane %v3728_v33, 4 }
 0x102   : > { %6265 = vmatprep.mubr.msk.bf16.mxu0 %vm658_vm3, %v6408_v14  ;;  %v8110_v14 = vpop.f32.mrf.mxu1  ;;  %v3702_v18 = vsel %vm6580_vm4, %v3697_v49, %v3701_v58  ;;  %v3737_v60 = vshll.u32 %v8119_v36, 16  ;;  %v3741_v8 = vshrl.u32 %v8119_v36, 16  ;;  %v3721_v51 = vrot.slane %v3720_v1, 4  ;;  %v8148_v33 = vld [vmem:[%s6536_s23 + $0x68] sm:$0x1] }
 0x103   : > { %9563 = vst [vmem:[#allocation13_spill] sm:$0xff] %v8110_v14  ;;  %v3711_v14 = vrot.slane %v3710_v21, 4  ;;  %v3725_v17 = vrot.slane %v3723_v25, 5  ;;  %v5774_v19 = vrot.slane %v5758_v28, 9  ;;  %v9568_v49 = vsel %vm6580_vm4, %v8033_v26, %v8026_v62  ;;  %v5693_v25 = vld [vmem:[%s6536_s23 + $0x6c] sm:$0xf] }
 0x104   : > { %6228 = vmatmul.mubr.msk.bf16.gmra.mxu1 %vm658_vm3, %v9562_v7  ;;  %v3733_v7 = vrot.slane %v3731_v23, 5  ;;  %v8145_v24 = vpop.f32.mrf.mxu1  ;;  %v8169_v21 = vsel %vm6866_vm7, %v5773_v35, %v4355_v39  ;;  %v8173_v1 = vsel %vm6866_vm7, %v4357_v37, %v4358_v4  ;;  %v8176_v62 = vcombine.low %v3668_v34, %v3678_v44  ;;  %v5759_v4 = vld [vmem:[%s6536_s23 + $0x60] sm:$0xe]  ;;  %v5699_v44 = vld [vmem:[%s6536_s23 + $0x84] sm:$0xf] }
 0x105   : > { %6231 = vmatprep.mubr.msk.bf16.mxu1 %vm658_vm3, %v9564_v43  ;;  %v3692_v43 = vsel %vm6580_vm4, %v3687_v45, %v8041_v10  ;;  %9566 = vst [vmem:[#allocation15_spill] sm:$0xff] %v8145_v24  ;;  %v9569_v45 = vsel %vm6580_vm4, %v8024_v3, %v7960_v46  ;;  %v4364_v46 = vrot.slane %v4362_v59, 4  ;;  %v4365_v3 = vrot.slane %v8098_v16, 5 }
 0x106   : > { %v8163_v23 = vcombine.low %v9569_v45, %v9568_v49  ;;  %9570 = vst [vmem:[#allocation11_spill] sm:$0xff] %v8176_v62  ;;  %v3734_v26 = vor.u32 %v3733_v7, %v3730_v50  ;;  %v8183_v28 = vcombine.low %v3692_v43, %v3702_v18  ;;  %v8185_v39 = vrot.slane %v3737_v60, 5 }
 0x107   : > { %v8151_v10 = vpop.f32.mrf.mxu0  ;;  %v8187_v35 = vrot.slane %v3741_v8, 4  ;;  %v3747_v37 = vshll.u32 %v8148_v33, 16  ;;  %v9572_v34 = vcombine.low %v7784_v54, %v7799_v56  ;;  %v3716_v50 = vsel %vm6580_vm4, %v3711_v14, %v8088_v11  ;;  %v5696_v54 = vld [vmem:[%s6536_s23 + $0x78] sm:$0xf] }
 0x108   : > { %9567 = vst [vmem:[#allocation9_spill] sm:$0xff] %v8151_v10  ;;  %9571 = vst [vmem:[#allocation16_spill] sm:$0xff] %v8183_v28  ;;  %v3726_v7 = vsel %vm6580_vm4, %v3721_v51, %v3725_v17  ;;  %v8207_v43 = vsel %vm6866_vm7, %v5774_v19, %v4362_v59  ;;  %v9574_v56 = vcombine.low %v7791_v29, %v7812_v42  ;;  %v3752_v60 = vshrl.u32 %v5693_v25, 16  ;;  %v8219_v51 = vld [vmem:[%s6536_s23 + $0x7c] sm:$0xf]  ;;  %v6412_v59 = vld [vmem:[%s6536_s23 + $0xc0] sm:$0xff]  }
 0x109   : > { %6266 = vmatmul.mubr.msk.bf16.gmra.mxu0 %vm658_vm3, %v6409_v2  ;;  %v8181_v2 = vld [vmem:[%s6536_s23 + $0x70] sm:$0xf]  ;;  %v8214_v18 = vpop.f32.mrf.mxu0  ;;  %v3755_v8 = vshll.u32 %v5693_v25, 16  ;;  %v8224_v17 = vsel %vm6866_vm7, %v4364_v46, %v4365_v3  ;;  %v8226_v29 = vrot.slane %v3734_v26, 4  ;;  %v5775_v42 = vrot.slane %v5759_v4, 9 }
 0x10a   : > { %6269 = vmatprep.mubr.msk.bf16.mxu0 %vm658_vm3, %v6410_v41  ;;  %v6411_v41 = vld [vmem:[%s6536_s23 + $0xb4] sm:$0xff]   ;;  %9575 = vst [vmem:[#allocation18_spill] sm:$0xff] %v8214_v18  ;;  %v3761_v11 = vshll.u32 %v8181_v2, 16  ;;  %v3765_v14 = vshrl.u32 %v8181_v2, 16  ;;  %v4369_v19 = vrot.slane %v8119_v36, 5  ;;  %v8229_v49 = vcombine.low %v3716_v50, %v3726_v7 }
 0x10b   : > { %v3744_v45 = vor.u32 %v8187_v35, %v8185_v39  ;;  %v8233_v25 = vrot.slane %v3747_v37, 5  ;;  %v3776_v46 = vshrl.u32 %v5696_v54, 16  ;;  %v3779_v3 = vshll.u32 %v5696_v54, 16  ;;  %v8245_v4 = vld [vmem:[%s6536_s23 + $0x88] sm:$0xf]  ;;  %v8248_v35 = vpop.f32.mrf.mxu0 }
 0x10c   : > { %6232 = vmatmul.mubr.msk.bf16.gmra.mxu1 %vm658_vm3, %v9572_v34  ;;  %v8195_v16 = vpop.f32.mrf.mxu1  ;;  %9576 = vst [vmem:[#allocation19_spill] sm:$0xff] %v8229_v49  ;;  %v4372_v34 = vrot.slane %v8148_v33, 5  ;;  %v3785_v36 = vshll.u32 %v8219_v51, 16  ;;  %v3789_v26 = vshrl.u32 %v8219_v51, 16  ;;  %9578 = vst [vmem:[#allocation21_spill] sm:$0xff] %v8248_v35  ;;  %v3754_v33 = vrot.slane %v3752_v60, 4 }
 0x10d   : > { %9573 = vst [vmem:[#allocation17_spill] sm:$0xff] %v8195_v16  ;;  %6235 = vmatprep.mubr.msk.bf16.mxu1 %vm658_vm3, %v9574_v56  ;;  %v8237_v56 = vld [vmem:[%s6536_s23 + $0x74] sm:$0x1]  ;;  %v3757_v37 = vrot.slane %v3755_v8, 5  ;;  %v8250_v50 = vrot.slane %v3761_v11, 5  ;;  %v3767_v7 = vrot.slane %v3765_v14, 4  ;;  %v9579_v54 = vcombine.low %v7803_v30, %v7819_v55  ;;  %v8278_v49 = vpop.f32.mrf.mxu0 }
 0x10e   : > { %v8240_v58 = vpop.f32.mrf.mxu1  ;;  %v4371_v16 = vrot.slane %v4369_v19, 4  ;;  %v8263_v60 = vld [vmem:[%s6536_s23 + $0x80] sm:$0x1]  ;;  %v8266_v8 = vld [vmem:[%s6536_s23 + $0x6c] sm:$0xe]  ;;  %v3800_v11 = vshrl.u32 %v5699_v44, 16 }
 0x10f   : > { %9577 = vst [vmem:[#allocation20_spill] sm:$0xff] %v8240_v58  ;;  %v8259_v58 = vsel %vm6866_vm7, %v5775_v42, %v4369_v19  ;;  %v3803_v14 = vshll.u32 %v5699_v44, 16  ;;  %v3813_v24 = vshrl.u32 %v8245_v4, 16  ;;  %v3778_v19 = vrot.slane %v3776_v46, 4  ;;  %9581 = vst [vmem:[#allocation23_spill] sm:$0xff] %v8278_v49 }
 0x110   : > { %v8274_v42 = vpop.f32.mrf.mxu1  ;;  %v3781_v35 = vrot.slane %v3779_v3, 5  ;;  %v8276_v18 = vrot.slane %v3785_v36, 5  ;;  %v3791_v10 = vrot.slane %v3789_v26, 4  ;;  %v9582_v44 = vcombine.low %v7823_v15, %v7851_v32  ;;  %v8297_v32 = vld [vmem:[%s6536_s23 + $0x8c] sm:$0x1] }
 0x111   : > { %6270 = vmatmul.mubr.msk.bf16.gmra.mxu0 %vm658_vm3, %v6411_v41  ;;  %v3771_v41 = vshll.u32 %v8237_v56, 16  ;;  %9580 = vst [vmem:[#allocation22_spill] sm:$0xff] %v8274_v42  ;;  %v3758_v30 = vor.u32 %v3757_v37, %v3754_v33  ;;  %v3768_v55 = vor.u32 %v3767_v7, %v8250_v50  ;;  %v3795_v46 = vshll.u32 %v8263_v60, 16  ;;  %v5761_v33 = vld [vmem:[%s6536_s23 + $0x78] sm:$0xe] }
 0x112   : > { %6273 = vmatprep.mubr.msk.bf16.mxu0 %vm658_vm3, %v6412_v59  ;;  %v3809_v59 = vshll.u32 %v8245_v4, 16  ;;  %v8288_v3 = vrot.slane %v3744_v45, 4  ;;  %v8292_v36 = vsel %vm6866_vm7, %v4371_v16, %v4372_v34  ;;  %v5776_v26 = vrot.slane %v8266_v8, 9  ;;  %v8302_v42 = vpop.f32.mrf.mxu1  ;;  %v5702_v8 = vld [vmem:[%s6536_s23 + $0x90] sm:$0xf] }
 0x113   : > { %v4383_v15 = vrot.slane %v8219_v51, 5  ;;  %v3802_v37 = vrot.slane %v3800_v11, 4  ;;  %v3805_v7 = vrot.slane %v3803_v14, 5  ;;  %9583 = vst [vmem:[#allocation24_spill] sm:$0xff] %v8302_v42  ;;  %v3773_v45 = vrot.slane %v3771_v41, 5 }
 0x114   : > { %6236 = vmatmul.mubr.msk.bf16.gmra.mxu1 %vm658_vm3, %v9579_v54  ;;  %v4376_v54 = vrot.slane %v8181_v2, 5  ;;  %v8300_v2 = vrot.slane %v3809_v59, 5  ;;  %v4379_v49 = vrot.slane %v8237_v56, 5  ;;  %v3782_v16 = vor.u32 %v3781_v35, %v3778_v19  ;;  %v8311_v59 = vld [vmem:[%s6536_s23 + $0x94] sm:$0xf] }
 0x115   : > { %6239 = vmatprep.mubr.msk.bf16.mxu1 %vm658_vm3, %v9582_v44  ;;  %v3815_v44 = vrot.slane %v3813_v24, 4  ;;  %v3792_v34 = vor.u32 %v3791_v10, %v8276_v18  ;;  %v3759_v51 = vrot.slane %v3758_v30, 4  ;;  %v3769_v11 = vrot.slane %v3768_v55, 4 }
 0x116   : > { %v4378_v62 = vrot.slane %v4376_v54, 4  ;;  %v3797_v14 = vrot.slane %v3795_v46, 5  ;;  %v9584_v24 = vcombine.low %v7944_v61, %v7948_v40  ;;  %v5777_v56 = vrot.slane %v5761_v33, 9 }
 0x117   : > { %v4385_v35 = vrot.slane %v4383_v15, 4  ;;  %v4386_v10 = vrot.slane %v8263_v60, 5  ;;  %v3819_v41 = vshll.u32 %v8297_v32, 16  ;;  %v3816_v30 = vor.u32 %v3815_v44, %v8300_v2 }
 0x118   : > { %v3824_v55 = vshrl.u32 %v5702_v8, 16  ;;  %v3827_v46 = vshll.u32 %v5702_v8, 16  ;;  %v9586_v61 = vcombine.low %v7863_v9, %v7868_v47  ;;  %v3783_v40 = vrot.slane %v3782_v16, 4 }
 0x119   : > { %v8307_v28 = vpop.f32.mrf.mxu0  ;;  %6274 = vmatmul.mubr.msk.bf16.gmra.mxu0 %vm658_vm3, %v6413_v13  ;;  %v3806_v13 = vor.u32 %v3805_v7, %v3802_v37  ;;  %v3793_v33 = vrot.slane %v3792_v34, 4  ;;  %v3833_v60 = vshll.u32 %v8311_v59, 16  ;;  %v3750_v37 = vsel %vm6580_vm4, %v8288_v3, %v8233_v25 }
 0x11a   : > { %6313 = vmatprep.mubr.msk.bf16.mxu0 %vm658_vm3, %v9584_v24  ;;  %v3837_v24 = vshrl.u32 %v8311_v59, 16  ;;  %v3764_v9 = vsel %vm6580_vm4, %v3759_v51, %v8250_v50  ;;  %v8343_v47 = vsel %vm6866_vm7, %v5776_v26, %v4376_v54  ;;  %v8347_v7 = vsel %vm6866_vm7, %v4378_v62, %v4379_v49  ;;  %v5762_v54 = vld [vmem:[%s6536_s23 + $0x84] sm:$0xe]  ;;  %v9625_v31 = vld [vmem:[#allocation24_spill] sm:$0xff] }
 0x11b   : > { %v8319_v19 = vpop.f32.mrf.mxu0  ;;  %v8355_v25 = vsel %vm6866_vm7, %v5777_v56, %v4383_v15  ;;  %v8359_v50 = vsel %vm6866_vm7, %v4385_v35, %v4386_v10  ;;  %v3821_v3 = vrot.slane %v3819_v41, 5  ;;  %v3807_v62 = vrot.slane %v3806_v13, 4  ;;  %v8383_v13 = vld [vmem:[%s6536_s23 + $0x98] sm:$0x1] }
 0x11c   : > { %9585 = vst [vmem:[#allocation25_spill] sm:$0xff] %v8319_v19  ;;  %v8322_v42 = vpop.f32.mrf.mxu1  ;;  %6240 = vmatmul.mubr.msk.bf16.gmra.mxu1 %vm658_vm3, %v9586_v61  ;;  %v3817_v49 = vrot.slane %v3816_v30, 4  ;;  %v3826_v16 = vrot.slane %v3824_v55, 4  ;;  %v3829_v34 = vrot.slane %v3827_v46, 5  ;;  %v3788_v15 = vsel %vm6580_vm4, %v3783_v40, %v8276_v18  ;;  %v5705_v30 = vld [vmem:[%s6536_s23 + $0x9c] sm:$0xf] }
 0x11d   : > { %v8330_v19 = vpop.f32.mrf.mxu0  ;;  %6279 = vmatprep.mubr.msk.bf16.mxu1 %vm658_vm3, %v8014_v27  ;;  %v3774_v27 = vsel %vm6580_vm4, %v3769_v11, %v3773_v45  ;;  %v3798_v45 = vsel %vm6580_vm4, %v3793_v33, %v3797_v14  ;;  %v8371_v51 = vrot.slane %v3833_v60, 5  ;;  %v3839_v11 = vrot.slane %v3837_v24, 4  ;;  %v8414_v24 = vld [vmem:[%s6536_s23 + $0xa0] sm:$0xf] }
 0x11e   : > { %v8349_v44 = vpop.f32.mrf.mxu1  ;;  %v9587_v35 = vcombine.low %v7984_v48, %v7988_v38  ;;  %v5791_v10 = vcombine.low %v8207_v43, %v8224_v17  ;;  %v5792_v41 = vcombine.low %v8259_v58, %v8292_v36  ;;  %v5778_v18 = vrot.slane %v5762_v54, 9 }
 0x11f   : > { %v8362_v26 = vpop.f32.mrf.mxu0  ;;  %v4390_v14 = vrot.slane %v8245_v4, 5  ;;  %v9588_v48 = vcombine.low %v8067_v6, %v8071_v22  ;;  %v9589_v38 = vsel %vm6580_vm4, %v8226_v29, %v8185_v39  ;;  %v8399_v61 = vcombine.low %v3764_v9, %v3774_v27  ;;  %v5763_v29 = vld [vmem:[%s6536_s23 + $0x90] sm:$0xe]  ;;  %v9596_v4 = vld [vmem:[#allocation2_spill] sm:$0xff] }
 0x120   : > { %v8364_v8 = vpop.f32.mrf.mxu1  ;;  %v8397_v46 = vcombine.low %v9589_v38, %v3750_v37  ;;  %v8405_v60 = vcombine.low %v3788_v15, %v3798_v45  ;;  %v3812_v6 = vsel %vm6580_vm4, %v3807_v62, %v8300_v2  ;;  %v3822_v22 = vsel %vm6580_vm4, %v3817_v49, %v3821_v3 }
 0x121   : > { %v6111_v56 = vpop.f32.mrf.mxu0  ;;  %6314 = vmatmul.mubr.msk.bf16.vlgmr.msra.gmra.mxu0 %vm658_vm3, %v9587_v35  ;;  %v3830_v39 = vor.u32 %v3829_v34, %v3826_v16  ;;  %v3840_v9 = vor.u32 %v3839_v11, %v8371_v51  ;;  %v3843_v27 = vshll.u32 %v8383_v13, 16  ;;  %v3848_v54 = vshrl.u32 %v5705_v30, 16 }
 0x122   : > { %v8386_v55 = vpop.f32.mrf.mxu1  ;;  %6317 = vmatprep.mubr.msk.bf16.mxu0 %vm658_vm3, %v9588_v48  ;;  %v3851_v15 = vshll.u32 %v5705_v30, 16  ;;  %v8425_v3 = vsel %vm6866_vm7, %v5778_v18, %v4390_v14  ;;  %v4392_v62 = vrot.slane %v4390_v14, 4  ;;  %v4393_v49 = vrot.slane %v8297_v32, 5 }
 0x123   : > { %v1462_v33 = vpop.f32.mrf.mxu0  ;;  %v5779_v16 = vrot.slane %v5763_v29, 9  ;;  %v4397_v34 = vrot.slane %v8311_v59, 5  ;;  %v3857_v11 = vshll.u32 %v8414_v24, 16  ;;  %v3861_v35 = vshrl.u32 %v8414_v24, 16 }
 0x124   : > { %v6077_v37 = vpop.f32.mrf.mxu1  ;;  %6280 = vmatmul.mubr.msk.bf16.vlgmr.msra.gmra.mxu1 %vm658_vm3, %v8016_v57  ;;  %v8434_v48 = vcombine.low %v3812_v6, %v3822_v22  ;;  %v8436_v18 = vrot.slane %v3830_v39, 4  ;;  %v3841_v32 = vrot.slane %v3840_v9, 4  ;;  %v3845_v38 = vrot.slane %v3843_v27, 5  ;;  %v5708_v22 = vld [vmem:[%s6536_s23 + $0xa8] sm:$0xf] }
 0x125   : > { %v1046_v45 = vadd.f32 %v6077_v37, %v7912_v5  ;;  %v6112_v2 = vpop.f32.mrf.mxu0  ;;  %6283 = vmatprep.mubr.msk.bf16.mxu1 %vm658_vm3, %v8163_v23  ;;  %v3850_v29 = vrot.slane %v3848_v54, 4  ;;  %v3853_v59 = vrot.slane %v3851_v15, 5  ;;  %v4400_v6 = vrot.slane %v8383_v13, 5  ;;  %v8462_v27 = vld [vmem:[%s6536_s23 + $0xac] sm:$0xf] }
 0x126   : > { %v1037_v57 = vpop.f32.mrf.mxu1  ;;  %v3863_v9 = vrot.slane %v3861_v35, 4  ;;  %v9593_v35 = vld [vmem:[#allocation8_spill] sm:$0xff] }
 0x127   : > { %v8431_v5 = vadd.f32 %v6111_v56, %v1046_v45  ;;  %v1038_v23 = vadd.f32 %v1037_v57, %v7936_v20  ;;  %v1465_v30 = vpop.f32.mrf.mxu0  ;;  %v9590_v45 = vcombine.low %v8104_v63, %v8130_v52  ;;  %v8447_v20 = vsel %vm6866_vm7, %v4392_v62, %v4393_v49  ;;  %v5764_v62 = vld [vmem:[%s6536_s23 + $0x9c] sm:$0xe] }
 0x128   : > { %v6078_v14 = vpop.f32.mrf.mxu1  ;;  %v4399_v63 = vrot.slane %v4397_v34, 4  ;;  %v8459_v52 = vrot.slane %v3857_v11, 5  ;;  %v4404_v49 = vrot.slane %v8414_v24, 5  ;;  %v3881_v24 = vshll.u32 %v8462_v27, 16 }
 0x129   : > { %v8438_v37 = vadd.f32 %v1462_v33, %v1038_v23  ;;  %v1049_v40 = vadd.f32 %v6078_v14, %v7955_v53  ;;  %v6115_v56 = vpop.f32.mrf.mxu0  ;;  %6318 = vmatmul.mubr.msk.bf16.gmra.mxu0 %vm658_vm3, %v9590_v45  ;;  %v9591_v33 = vcombine.low %v8169_v21, %v8173_v1  ;;  %v8457_v53 = vsel %vm6866_vm7, %v5779_v16, %v4397_v34  ;;  %v5707_v1 = vld [vmem:[%s6536_s23 + $0xa4] sm:$0x1]  ;;  %v9592_v16 = vld [vmem:[#allocation11_spill] sm:$0xff] }
 0x12a   : > { %v1040_v39 = vpop.f32.mrf.mxu1  ;;  %v3836_v21 = vsel %vm6580_vm4, %v8436_v18, %v8371_v51  ;;  %v3872_v34 = vshrl.u32 %v5708_v22, 16  ;;  %v9594_v51 = vld [vmem:[#allocation16_spill] sm:$0xff]  ;;  %v3885_v18 = vshrl.u32 %v8462_v27, 16 }
 0x12b   : > { %6321 = vmatprep.mubr.msk.bf16.mxu0 %vm658_vm3, %v9591_v33  ;;  %v8464_v54 = vadd.f32 %v6112_v2, %v1049_v40  ;;  %v1041_v13 = vadd.f32 %v1040_v39, %v8000_v12  ;;  %v1478_v15 = vpop.f32.mrf.mxu0  ;;  %v3846_v40 = vsel %vm6580_vm4, %v3841_v32, %v3845_v38  ;;  %v3854_v2 = vor.u32 %v3853_v59, %v3850_v29  ;;  %v9595_v59 = vld [vmem:[#allocation12_spill] sm:$0xff] }
 0x12c   : > { %v6081_v57 = vpop.f32.mrf.mxu1  ;;  %6284 = vmatmul.mubr.msk.bf16.gmra.mxu1 %vm658_vm3, %v9592_v16  ;;  %v3875_v12 = vshll.u32 %v5708_v22, 16  ;;  %v8487_v39 = vsel %vm6866_vm7, %v4399_v63, %v4400_v6  ;;  %v3864_v32 = vor.u32 %v3863_v9, %v8459_v52  ;;  %v3867_v38 = vshll.u32 %v5707_v1, 16 }
 0x12d   : > { %v8478_v11 = vadd.f32 %v1465_v30, %v1041_v13  ;;  %v1062_v23 = vadd.f32 %v6081_v57, %v9593_v35  ;;  %v6116_v14 = vpop.f32.mrf.mxu0  ;;  %6287 = vmatprep.mubr.msk.bf16.mxu1 %vm658_vm3, %v9594_v51  ;;  %v5780_v30 = vrot.slane %v5764_v62, 9  ;;  %v4406_v13 = vrot.slane %v4404_v49, 4 }
 0x12e   : > { %v1053_v45 = vpop.f32.mrf.mxu1  ;;  %v4407_v57 = vrot.slane %v5707_v1, 5  ;;  %v8495_v51 = vrot.slane %v3854_v2, 4  ;;  %v3874_v6 = vrot.slane %v3872_v34, 4  ;;  %v3877_v63 = vrot.slane %v3875_v12, 5  ;;  %v8505_v1 = vld [vmem:[%s6536_s23 + $0xb0] sm:$0x1] }
 0x12f   : > { %v8490_v29 = vadd.f32 %v6115_v56, %v1062_v23  ;;  %v1054_v22 = vadd.f32 %v1053_v45, %v9595_v59  ;;  %v1481_v33 = vpop.f32.mrf.mxu0  ;;  %v8507_v23 = vrot.slane %v3881_v24, 5  ;;  %v3887_v2 = vrot.slane %v3885_v18, 4  ;;  %v9597_v12 = vld [vmem:[#allocation14_spill] sm:$0xff] }
 0x130   : > { %v6082_v16 = vpop.f32.mrf.mxu1  ;;  %v8517_v43 = vrot.slane %v3864_v32, 4  ;;  %v8519_v17 = vrot.slane %v3867_v38, 5  ;;  %v8527_v58 = vsel %vm6866_vm7, %v5780_v30, %v4404_v49  ;;  %v8531_v36 = vsel %vm6866_vm7, %v4406_v13, %v4407_v57  ;;  %v8543_v30 = vld [vmem:[%s6536_s23 + $0xb8] sm:$0xf] }
 0x131   : > { %v8497_v9 = vadd.f32 %v1478_v15, %v1054_v22  ;;  %v1065_v62 = vadd.f32 %v6082_v16, %v9596_v4  ;;  %v6119_v56 = vpop.f32.mrf.mxu0  ;;  %6322 = vmatmul.mubr.msk.bf16.gmra.mxu0 %vm658_vm3, %v5791_v10  ;;  %v8513_v15 = vcombine.low %v3836_v21, %v3846_v40  ;;  %v5765_v10 = vld [vmem:[%s6536_s23 + $0xa8] sm:$0xe]  ;;  %v3878_v32 = vor.u32 %v3877_v63, %v3874_v6  ;;  %v9599_v22 = vld [vmem:[#allocation9_spill] sm:$0xff] }
 0x132   : > { %v1056_v45 = vpop.f32.mrf.mxu1  ;;  %6325 = vmatprep.mubr.msk.bf16.mxu0 %vm658_vm3, %v5792_v41  ;;  %v5711_v41 = vld [vmem:[%s6536_s23 + $0xb4] sm:$0xf]  ;;  %v9598_v40 = vld [vmem:[#allocation19_spill] sm:$0xff]  ;;  %v3891_v38 = vshll.u32 %v8505_v1, 16  ;;  %v4411_v49 = vrot.slane %v8462_v27, 5  ;;  %v3888_v16 = vor.u32 %v3887_v2, %v8507_v23  ;;  %v3870_v27 = vsel %vm6580_vm4, %v8517_v43, %v8519_v17 }
 0x133   : > { %v8522_v34 = vadd.f32 %v6116_v14, %v1065_v62  ;;  %v1057_v24 = vadd.f32 %v1056_v45, %v9597_v12  ;;  %v1494_v18 = vpop.f32.mrf.mxu0  ;;  %v5781_v62 = vrot.slane %v5765_v10, 9  ;;  %v3896_v6 = vshrl.u32 %v5711_v41, 16 }
 0x134   : > { %v6085_v21 = vpop.f32.mrf.mxu1  ;;  %6288 = vmatmul.mubr.msk.bf16.gmra.mxu1 %vm658_vm3, %v9598_v40  ;;  %v3899_v63 = vshll.u32 %v5711_v41, 16  ;;  %v3905_v2 = vshll.u32 %v8543_v30, 16  ;;  %v3909_v10 = vshrl.u32 %v8543_v30, 16  ;;  %v5714_v40 = vld [vmem:[%s6536_s23 + $0xc0] sm:$0xf]  ;;  %v3879_v4 = vrot.slane %v3878_v32, 4 }
 0x135   : > { %v8545_v59 = vadd.f32 %v1481_v33, %v1057_v24  ;;  %v1078_v13 = vadd.f32 %v6085_v21, %v9599_v22  ;;  %v6120_v57 = vpop.f32.mrf.mxu0  ;;  %6291 = vmatprep.mubr.msk.bf16.mxu1 %vm658_vm3, %v8397_v46  ;;  %v9601_v24 = vld [vmem:[#allocation18_spill] sm:$0xff]  ;;  %v3893_v43 = vrot.slane %v3891_v38, 5  ;;  %v4413_v17 = vrot.slane %v4411_v49, 4 }
 0x136   : > { %v1069_v45 = vpop.f32.mrf.mxu1  ;;  %v4414_v33 = vrot.slane %v8505_v1, 5  ;;  %v8573_v14 = vsel %vm6866_vm7, %v5781_v62, %v4411_v49  ;;  %v8576_v32 = vld [vmem:[%s6536_s23 + $0xc4] sm:$0xf]  ;;  %v9605_v1 = vcombine.low %v8355_v25, %v8359_v50  ;;  %v8588_v62 = vrot.slane %v3905_v2, 5 }
 0x137   : > { %v8557_v12 = vadd.f32 %v6119_v56, %v1078_v13  ;;  %v1070_v21 = vadd.f32 %v1069_v45, %v9601_v24  ;;  %v1497_v46 = vpop.f32.mrf.mxu0  ;;  %v9603_v56 = vld [vmem:[#allocation21_spill] sm:$0xff]  ;;  %v9604_v45 = vcombine.low %v8343_v47, %v8347_v7  ;;  %v3889_v24 = vrot.slane %v3888_v16, 4  ;;  %v9606_v16 = vld [vmem:[#allocation23_spill] sm:$0xff] }
 0x138   : > { %v6086_v22 = vpop.f32.mrf.mxu1  ;;  %v3920_v47 = vshrl.u32 %v5714_v40, 16  ;;  %v3923_v7 = vshll.u32 %v5714_v40, 16  ;;  %v3884_v25 = vsel %vm6580_vm4, %v3879_v4, %v8507_v23  ;;  %v8597_v50 = vsel %vm6866_vm7, %v4413_v17, %v4414_v33  ;;  %v5766_v40 = vld [vmem:[%s6536_s23 + $0xb4] sm:$0xe] }
 0x139   : > { %9600 = vst [vmem:[#allocation11_spill] sm:$0xff] %v8557_v12  ;;  %v8564_v35 = vadd.f32 %v1494_v18, %v1070_v21  ;;  %v1081_v41 = vadd.f32 %v6086_v22, %v9603_v56  ;;  %v6123_v13 = vpop.f32.mrf.mxu0  ;;  %6326 = vmatmul.mubr.msk.bf16.gmra.mxu0 %vm658_vm3, %v9604_v45  ;;  %v8583_v18 = vld [vmem:[%s6536_s23 + $0xbc] sm:$0x1]  ;;  %v3898_v21 = vrot.slane %v3896_v6, 4  ;;  %v3901_v22 = vrot.slane %v3899_v63, 5 }
 0x13a   : > { %v1072_v38 = vpop.f32.mrf.mxu1  ;;  %6329 = vmatprep.mubr.msk.bf16.mxu0 %vm658_vm3, %v9605_v1  ;;  %v3933_v6 = vshrl.u32 %v8576_v32, 16  ;;  %v3915_v23 = vshll.u32 %v8583_v18, 16  ;;  %v4418_v17 = vrot.slane %v8543_v30, 5  ;;  %v9607_v1 = vld [vmem:[#allocation25_spill] sm:$0xff] }
 0x13b   : > { %9602 = vst [vmem:[#allocation8_spill] sm:$0xff] %v8564_v35  ;;  %v8585_v56 = vadd.f32 %v6120_v57, %v1081_v41  ;;  %v1073_v45 = vadd.f32 %v1072_v38, %v9606_v16  ;;  %v1510_v49 = vpop.f32.mrf.mxu0  ;;  %v3911_v35 = vrot.slane %v3909_v10, 4  ;;  %v3929_v57 = vshll.u32 %v8576_v32, 16 }
 0x13c   : > { %v6089_v12 = vpop.f32.mrf.mxu1  ;;  %6292 = vmatmul.mubr.msk.bf16.gmra.mxu1 %vm658_vm3, %v8399_v61  ;;  %v3894_v61 = vsel %vm6580_vm4, %v3889_v24, %v3893_v43  ;;  %v3902_v33 = vor.u32 %v3901_v22, %v3898_v21  ;;  %v3922_v41 = vrot.slane %v3920_v47, 4  ;;  %v3925_v38 = vrot.slane %v3923_v7, 5 }
 0x13d   : > { %v8601_v63 = vadd.f32 %v1497_v46, %v1073_v45  ;;  %v1094_v2 = vadd.f32 %v6089_v12, %v8307_v28  ;;  %v6124_v10 = vpop.f32.mrf.mxu0  ;;  %6295 = vmatprep.mubr.msk.bf16.mxu1 %vm658_vm3, %v8405_v60  ;;  %v9608_v60 = vsel %vm6580_vm4, %v8495_v51, %v8459_v52  ;;  %v3912_v24 = vor.u32 %v3911_v35, %v8588_v62 }
 0x13e   : > { %v1085_v4 = vpop.f32.mrf.mxu1  ;;  %v8619_v43 = vcombine.low %v9608_v60, %v3870_v27  ;;  %v8622_v30 = vcombine.low %v3884_v25, %v3894_v61  ;;  %v8626_v22 = vrot.slane %v3929_v57, 5  ;;  %v3935_v47 = vrot.slane %v3933_v6, 4  ;;  %v5716_v27 = vld [vmem:[%s6536_s23 + $0xc8] sm:$0x1] }
 0x13f   : > { %v8611_v46 = vadd.f32 %v6123_v13, %v1094_v2  ;;  %v1086_v28 = vadd.f32 %v1085_v4, %v9607_v1  ;;  %v1513_v12 = vpop.f32.mrf.mxu0  ;;  %v5798_v13 = vcombine.low %v8573_v14, %v8597_v50  ;;  %v9609_v52 = vcombine.low %v8425_v3, %v8447_v20  ;;  %v5717_v14 = vld [vmem:[%s6536_s23 + $0xcc] sm:$0xf]  ;;  %v8647_v20 = vld [vmem:[%s6536_s23 + $0xd0] sm:$0xf]  ;;  %v5767_v4 = vld [vmem:[%s6536_s23 + $0xc0] sm:$0xe] }
 0x140   : > { %v6090_v21 = vpop.f32.mrf.mxu1  ;;  %v8635_v35 = vrot.slane %v3915_v23, 5  ;;  %v5782_v51 = vrot.slane %v5766_v40, 9  ;;  %v9610_v50 = vcombine.low %v8457_v53, %v8487_v39  ;;  %v4421_v57 = vrot.slane %v8583_v18, 5 }
 0x141   : > { %v8628_v7 = vadd.f32 %v1510_v49, %v1086_v28  ;;  %v1097_v16 = vadd.f32 %v6090_v21, %v8330_v19  ;;  %v6127_v45 = vpop.f32.mrf.mxu0  ;;  %6330 = vmatmul.mubr.msk.bf16.gmra.mxu0 %vm658_vm3, %v9609_v52  ;;  %v8643_v49 = vrot.slane %v3902_v33, 4  ;;  %v4420_v19 = vrot.slane %v4418_v17, 4 }
 0x142   : > { %v1088_v25 = vpop.f32.mrf.mxu1  ;;  %6333 = vmatprep.mubr.msk.bf16.mxu0 %vm658_vm3, %v9610_v50  ;;  %v3926_v3 = vor.u32 %v3925_v38, %v3922_v41  ;;  %v8652_v23 = vrot.slane %v3912_v24, 4  ;;  %v4425_v53 = vrot.slane %v8576_v32, 5  ;;  %v3936_v33 = vor.u32 %v3935_v47, %v8626_v22 }
 0x143   : > { %v8649_v6 = vadd.f32 %v6124_v10, %v1097_v16  ;;  %v1089_v2 = vadd.f32 %v1088_v25, %v8362_v26  ;;  %v1526_v61 = vpop.f32.mrf.mxu0  ;;  %v3939_v18 = vshll.u32 %v5716_v27, 16  ;;  %v3944_v40 = vshrl.u32 %v5717_v14, 16  ;;  %v9613_v10 = vld [vmem:[#allocation4_spill] sm:$0xff]  ;;  %v9614_v16 = vld [vmem:[#allocation3_spill] sm:$0xff] }
 0x144   : > { %v6093_v39 = vpop.f32.mrf.mxu1  ;;  %6296 = vmatmul.mubr.msk.bf16.gmra.mxu1 %vm658_vm3, %v8434_v48  ;;  %v3947_v41 = vshll.u32 %v5717_v14, 16  ;;  %v3953_v28 = vshll.u32 %v8647_v20, 16  ;;  %v3957_v32 = vshrl.u32 %v8647_v20, 16  ;;  %v4419_v48 = vsel %vm6866_vm7, %v5782_v51, %v4418_v17  ;;  %v9615_v17 = vld [vmem:[#allocation6_spill] sm:$0xff] }
 0x145   : > { %9611 = vst [vmem:[#allocation16_spill] sm:$0xff] %v8649_v6  ;;  %v8659_v38 = vadd.f32 %v1513_v12, %v1089_v2  ;;  %v1110_v1 = vadd.f32 %v6093_v39, %v9613_v10  ;;  %v6128_v26 = vpop.f32.mrf.mxu0  ;;  %6299 = vmatprep.mubr.msk.bf16.mxu1 %vm658_vm3, %v8513_v15  ;;  %v4422_v24 = vsel %vm6866_vm7, %v4420_v19, %v4421_v57  ;;  %v3927_v21 = vrot.slane %v3926_v3, 4 }
 0x146   : > { %v1101_v60 = vpop.f32.mrf.mxu1  ;;  %v5783_v12 = vrot.slane %v5767_v4, 9  ;;  %v4427_v25 = vrot.slane %v4425_v53, 4  ;;  %v4428_v15 = vrot.slane %v5716_v27, 5  ;;  %v3937_v2 = vrot.slane %v3936_v33, 4  ;;  %v5719_v33 = vld [vmem:[%s6536_s23 + $0xd4] sm:$0x1] }
 0x147   : > { %9612 = vst [vmem:[#allocation12_spill] sm:$0xff] %v8659_v38  ;;  %v8670_v47 = vadd.f32 %v6127_v45, %v1110_v1  ;;  %v1102_v52 = vadd.f32 %v1101_v60, %v9614_v16  ;;  %v1529_v14 = vpop.f32.mrf.mxu0  ;;  %v3941_v39 = vrot.slane %v3939_v18, 5  ;;  %v3946_v10 = vrot.slane %v3944_v40, 4  ;;  %v9617_v18 = vld [vmem:[#allocation5_spill] sm:$0xff] }
 0x148   : > { %v6094_v50 = vpop.f32.mrf.mxu1  ;;  %v3949_v38 = vrot.slane %v3947_v41, 5  ;;  %v9616_v45 = vcombine.low %v8527_v58, %v8531_v36  ;;  %v8680_v57 = vrot.slane %v3953_v28, 5  ;;  %v3959_v27 = vrot.slane %v3957_v32, 4 }
 0x149   : > { %v8673_v6 = vadd.f32 %v1526_v61, %v1102_v52  ;;  %v1113_v51 = vadd.f32 %v6094_v50, %v9615_v17  ;;  %v6131_v19 = vpop.f32.mrf.mxu0  ;;  %v3908_v61 = vsel %vm6580_vm4, %v8643_v49, %v8588_v62  ;;  %v3918_v4 = vsel %vm6580_vm4, %v8652_v23, %v8635_v35  ;;  %v5768_v62 = vld [vmem:[%s6536_s23 + $0xcc] sm:$0xe] }
 0x14a   : > { %6334 = vmatmul.mubr.msk.bf16.gmra.mxu0 %vm658_vm3, %v9616_v45  ;;  %v1104_v3 = vpop.f32.mrf.mxu1  ;;  %v4432_v58 = vrot.slane %v8647_v20, 5  ;;  %v4429_v1 = vsel %vm6866_vm7, %v4427_v25, %v4428_v15  ;;  %v5799_v35 = vcombine.low %v4419_v48, %v4422_v24  ;;  %v3932_v20 = vsel %vm6580_vm4, %v3927_v21, %v8626_v22  ;;  %v9619_v25 = vld [vmem:[#allocation10_spill] sm:$0xff] }
 0x14b   : > { %6337 = vmatprep.mubr.msk.bf16.mxu0 %vm658_vm3, %v5798_v13  ;;  %v8693_v36 = vadd.f32 %v6128_v26, %v1113_v51  ;;  %v1105_v40 = vadd.f32 %v1104_v3, %v9617_v18  ;;  %v1542_v41 = vpop.f32.mrf.mxu0  ;;  %v4426_v13 = vsel %vm6866_vm7, %v5783_v12, %v4425_v53  ;;  %v3942_v23 = vsel %vm6580_vm4, %v3937_v2, %v3941_v39  ;;  %v9618_v53 = vld [vmem:[#allocation7_spill] sm:$0xff] }
 0x14c   : > { %v6097_v49 = vpop.f32.mrf.mxu1  ;;  %6300 = vmatmul.mubr.msk.bf16.gmra.mxu1 %vm658_vm3, %v8619_v43  ;;  %v3950_v26 = vor.u32 %v3949_v38, %v3946_v10  ;;  %v3960_v12 = vor.u32 %v3959_v27, %v8680_v57  ;;  %v3963_v43 = vshll.u32 %v5719_v33, 16  ;;  %v5800_v24 = vcombine.low %v4426_v13, %v4429_v1 }
 0x14d   : > { %v8708_v28 = vadd.f32 %v1529_v14, %v1105_v40  ;;  %v1126_v32 = vadd.f32 %v6097_v49, %v9618_v53  ;;  %v6132_v60 = vpop.f32.mrf.mxu0  ;;  %6303 = vmatprep.mubr.msk.bf16.mxu1 %vm658_vm3, %v8622_v30  ;;  %v5784_v16 = vrot.slane %v5768_v62, 9  ;;  %v4434_v52 = vrot.slane %v4432_v58, 4  ;;  %v9620_v30 = vld [vmem:[#allocation13_spill] sm:$0xff] }
 0x14e   : > { %v1117_v48 = vpop.f32.mrf.mxu1  ;;  %v4435_v22 = vrot.slane %v5719_v33, 5  ;;  %v5734_v50 = vcombine.low %v3908_v61, %v3918_v4  ;;  %v5735_v2 = vcombine.low %v3932_v20, %v3942_v23  ;;  %v3951_v39 = vrot.slane %v3950_v26, 4  ;;  %v9621_v33 = vld [vmem:[#allocation15_spill] sm:$0xff]  ;;  %v9622_v62 = vld [vmem:[#allocation17_spill] sm:$0xff]  ;;  %v9623_v26 = vld [vmem:[#allocation20_spill] sm:$0xff] }
 0x14f   : > { %v8714_v21 = vadd.f32 %v6131_v19, %v1126_v32  ;;  %v1118_v38 = vadd.f32 %v1117_v48, %v9619_v25  ;;  %v1545_v14 = vpop.f32.mrf.mxu0  ;;  %v3961_v45 = vrot.slane %v3960_v12, 4  ;;  %v3965_v27 = vrot.slane %v3963_v43, 5  ;;  %v9624_v43 = vld [vmem:[#allocation22_spill] sm:$0xff] }
 0x150   : > { %v6098_v15 = vpop.f32.mrf.mxu1  ;;  %v4433_v19 = vsel %vm6866_vm7, %v5784_v16, %v4432_v58  ;;  %v4436_v61 = vsel %vm6866_vm7, %v4434_v52, %v4435_v22  ;;  %v3956_v13 = vsel %vm6580_vm4, %v3951_v39, %v8680_v57 }
 0x151   : > { %v8717_v10 = vadd.f32 %v1542_v41, %v1118_v38  ;;  %v1129_v17 = vadd.f32 %v6098_v15, %v9620_v30  ;;  %v6135_v51 = vpop.f32.mrf.mxu0  ;;  %v3966_v0 = vsel %vm6580_vm4, %v3961_v45, %v3965_v27 }
 0x152   : > { %6338 = vmatmul.mubr.msk.bf16.gmra.mxu0 %vm658_vm3, %v5799_v35  ;;  %v1120_v3 = vpop.f32.mrf.mxu1  ;;  %v5801_v35 = vcombine.low %v4433_v19, %v4436_v61  ;;  %v5736_v12 = vcombine.low %v3956_v13, %v3966_v0 }
 0x153   : > { %6341 = vmatprep.mubr.msk.bf16.mxu0 %vm658_vm3, %v5800_v24  ;;  %v8726_v4 = vadd.f32 %v6132_v60, %v1129_v17  ;;  %v1121_v18 = vadd.f32 %v1120_v3, %v9621_v33  ;;  %v1558_v40 = vpop.f32.mrf.mxu0 }
 0x154   : > { %v6101_v41 = vpop.f32.mrf.mxu1  ;;  %6304 = vmatmul.mubr.msk.bf16.gmra.mxu1 %vm658_vm3, %v5734_v50 }
 0x155   : > { %v8733_v1 = vadd.f32 %v1545_v14, %v1121_v18  ;;  %v1142_v49 = vadd.f32 %v6101_v41, %v9622_v62  ;;  %v6136_v58 = vpop.f32.mrf.mxu0  ;;  %6307 = vmatprep.mubr.msk.bf16.mxu1 %vm658_vm3, %v5735_v2 }
 0x156   : > { %v1133_v20 = vpop.f32.mrf.mxu1 }
 0x157   : > { %v8739_v23 = vadd.f32 %v6135_v51, %v1142_v49  ;;  %v1134_v53 = vadd.f32 %v1133_v20, %v9623_v26  ;;  %v1561_v32 = vpop.f32.mrf.mxu0 }
 0x158   : > { %v6102_v60 = vpop.f32.mrf.mxu1 }
 0x159   : > { %v8742_v57 = vadd.f32 %v1558_v40, %v1134_v53  ;;  %v1145_v48 = vadd.f32 %v6102_v60, %v9624_v43  ;;  %v6139_v24 = vpop.f32.mrf.mxu0 }
 0x15a   : > { %6342 = vmatmul.mubr.msk.bf16.gmra.mxu0 %vm658_vm3, %v5801_v35  ;;  %v1136_v16 = vpop.f32.mrf.mxu1 }
 0x15b   : > { %v8746_v52 = vadd.f32 %v6136_v58, %v1145_v48  ;;  %v1137_v22 = vadd.f32 %v1136_v16, %v9625_v31  ;;  %v1574_v25 = vpop.f32.mrf.mxu0 }
 0x15c   : > { %v6105_v38 = vpop.f32.mrf.mxu1  ;;  %6308 = vmatmul.mubr.msk.bf16.gmra.mxu1 %vm658_vm3, %v5736_v12 }
 0x15d   : > { %v8750_v14 = vadd.f32 %v1561_v32, %v1137_v22  ;;  %v1158_v15 = vadd.f32 %v6105_v38, %v8322_v42  ;;  %v6140_v50 = vpop.f32.mrf.mxu0 }
 0x15e   : > { %v1149_v2 = vpop.f32.mrf.mxu1 }
 0x15f   : > { %v8753_v39 = vadd.f32 %v6139_v24, %v1158_v15  ;;  %v1150_v30 = vadd.f32 %v1149_v2, %v8349_v44  ;;  %v1577_v17 = vpop.f32.mrf.mxu0 }
 0x160   : > { %v6106_v51 = vpop.f32.mrf.mxu1 }
 0x161   : > { %v8756_v45 = vadd.f32 %v1574_v25, %v1150_v30  ;;  %v1161_v27 = vadd.f32 %v6106_v51, %v8364_v8  ;;  %v6179_v3 = vpop.f32.mrf.mxu0  ;;  %v9626_v30 = vld [vmem:[#allocation11_spill] sm:$0xff] }
 0x162   : > { %v1152_v19 = vpop.f32.mrf.mxu1 }
 0x163   : > { %v8759_v61 = vadd.f32 %v6140_v50, %v1161_v27  ;;  %v1153_v33 = vadd.f32 %v1152_v19, %v8386_v55  ;;  %v2547_v18 = vpop.f32.mrf.mxu0 }
 0x164   : > { %v6145_v42 = vpop.f32.mrf.mxu1 }
 0x165   : > { %v8762_v40 = vadd.f32 %v1577_v17, %v1153_v33  ;;  %v1950_v41 = vadd.f32 %v6145_v42, %v8431_v5  ;;  %v6180_v13 = vpop.f32.mrf.mxu0 }
 0x166   : > { %v1821_v44 = vpop.f32.mrf.mxu1 }
 0x167   : > { %v8765_v62 = vadd.f32 %v6179_v3, %v1950_v41  ;;  %v1948_v49 = vadd.f32 %v1821_v44, %v8438_v37  ;;  %v2550_v58 = vpop.f32.mrf.mxu0  ;;  %v9627_v3 = vld [vmem:[#allocation8_spill] sm:$0xff] }
 0x168   : > { %v6146_v8 = vpop.f32.mrf.mxu1 }
 0x169   : > { %v8768_v0 = vadd.f32 %v2547_v18, %v1948_v49  ;;  %v1951_v35 = vadd.f32 %v6146_v8, %v8464_v54  ;;  %v6183_v20 = vpop.f32.mrf.mxu0 }
 0x16a   : > { %v1824_v55 = vpop.f32.mrf.mxu1 }
 0x16b   : > { %v8771_v26 = vadd.f32 %v6180_v13, %v1951_v35  ;;  %v1949_v53 = vadd.f32 %v1824_v55, %v8478_v11  ;;  %v2563_v32 = vpop.f32.mrf.mxu0 }
 0x16c   : > { %v6149_v5 = vpop.f32.mrf.mxu1 }
 0x16d   : > { %v8774_v60 = vadd.f32 %v2550_v58, %v1949_v53  ;;  %v1954_v12 = vadd.f32 %v6149_v5, %v8490_v29  ;;  %v6184_v43 = vpop.f32.mrf.mxu0 }
 0x16e   : > { %v1837_v37 = vpop.f32.mrf.mxu1 }
 0x16f   : > { %v8777_v48 = vadd.f32 %v6183_v20, %v1954_v12  ;;  %v1952_v24 = vadd.f32 %v1837_v37, %v8497_v9  ;;  %v2566_v16 = vpop.f32.mrf.mxu0 }
 0x170   : > { %v6150_v54 = vpop.f32.mrf.mxu1 }
 0x171   : > { %v8780_v31 = vadd.f32 %v2563_v32, %v1952_v24  ;;  %v1955_v22 = vadd.f32 %v6150_v54, %v8522_v34  ;;  %v6187_v25 = vpop.f32.mrf.mxu0  ;;  %v9632_v54 = vld [vmem:[#allocation12_spill] sm:$0xff] }
 0x172   : > { %v1840_v11 = vpop.f32.mrf.mxu1 }
 0x173   : > { %v8783_v38 = vadd.f32 %v6184_v43, %v1955_v22  ;;  %v1953_v15 = vadd.f32 %v1840_v11, %v8545_v59  ;;  %v2579_v50 = vpop.f32.mrf.mxu0  ;;  %v9631_v43 = vld [vmem:[#allocation16_spill] sm:$0xff] }
 0x174   : > { %v6153_v29 = vpop.f32.mrf.mxu1 }
 0x175   : > { %v8786_v2 = vadd.f32 %v2566_v16, %v1953_v15  ;;  %v1958_v17 = vadd.f32 %v6153_v29, %v9626_v30  ;;  %v6188_v51 = vpop.f32.mrf.mxu0 }
 0x176   : > { %v1853_v9 = vpop.f32.mrf.mxu1 }
 0x177   : > { %v8789_v27 = vadd.f32 %v6187_v25, %v1958_v17  ;;  %v1956_v19 = vadd.f32 %v1853_v9, %v9627_v3  ;;  %v2582_v33 = vpop.f32.mrf.mxu0 }
 0x178   : > { %v6154_v34 = vpop.f32.mrf.mxu1 }
 0x179   : > { %v8792_v18 = vadd.f32 %v2579_v50, %v1956_v19  ;;  %v1959_v42 = vadd.f32 %v6154_v34, %v8585_v56  ;;  %v6191_v41 = vpop.f32.mrf.mxu0 }
 0x17a   : > { %v1856_v59 = vpop.f32.mrf.mxu1 }
 0x17b   : > { %v8795_v13 = vadd.f32 %v6188_v51, %v1959_v42  ;;  %v1957_v44 = vadd.f32 %v1856_v59, %v8601_v63  ;;  %v2595_v49 = vpop.f32.mrf.mxu0 }
 0x17c   : > { %v6157_v58 = vpop.f32.mrf.mxu1 }
 0x17d   : > { %9628 = vst [vmem:[#allocation2_spill] sm:$0xff] %v8795_v13  ;;  %v8798_v8 = vadd.f32 %v2582_v33, %v1957_v44  ;;  %v1962_v35 = vadd.f32 %v6157_v58, %v8611_v46  ;;  %v6192_v20 = vpop.f32.mrf.mxu0 }
 0x17e   : > { %v1869_v55 = vpop.f32.mrf.mxu1 }
 0x17f   : > { %9629 = vst [vmem:[#allocation14_spill] sm:$0xff] %v8798_v8  ;;  %v8801_v53 = vadd.f32 %v6191_v41, %v1962_v35  ;;  %v1960_v32 = vadd.f32 %v1869_v55, %v8628_v7  ;;  %v2598_v5 = vpop.f32.mrf.mxu0 }
 0x180   : > { %v6158_v56 = vpop.f32.mrf.mxu1 }
 0x181   : > { %9630 = vst [vmem:[#allocation19_spill] sm:$0xff] %v8801_v53  ;;  %v8804_v12 = vadd.f32 %v2595_v49, %v1960_v32  ;;  %v1963_v37 = vadd.f32 %v6158_v56, %v9631_v43  ;;  %v6195_v24 = vpop.f32.mrf.mxu0 }
 0x182   : > { %v1872_v63 = vpop.f32.mrf.mxu1 }
 0x183   : > { %v8807_v16 = vadd.f32 %v6192_v20, %v1963_v37  ;;  %v1961_v22 = vadd.f32 %v1872_v63, %v9632_v54  ;;  %v2611_v25 = vpop.f32.mrf.mxu0 }
 0x184   : > { %v6161_v46 = vpop.f32.mrf.mxu1 }
 0x185   : > { %v8810_v11 = vadd.f32 %v2598_v5, %v1961_v22  ;;  %v1966_v15 = vadd.f32 %v6161_v46, %v8670_v47  ;;  %v6196_v50 = vpop.f32.mrf.mxu0 }
 0x186   : > { %v1885_v7 = vpop.f32.mrf.mxu1 }
 0x187   : > { %v8813_v29 = vadd.f32 %v6195_v24, %v1966_v15  ;;  %v1964_v30 = vadd.f32 %v1885_v7, %v8673_v6  ;;  %v2614_v17 = vpop.f32.mrf.mxu0 }
 0x188   : > { %v6162_v51 = vpop.f32.mrf.mxu1 }
 0x189   : > { %v8816_v9 = vadd.f32 %v2611_v25, %v1964_v30  ;;  %v1967_v3 = vadd.f32 %v6162_v51, %v8693_v36  ;;  %v6199_v19 = vpop.f32.mrf.mxu0 }
 0x18a   : > { %v1888_v33 = vpop.f32.mrf.mxu1 }
 0x18b   : > { %v8819_v34 = vadd.f32 %v6196_v50, %v1967_v3  ;;  %v1965_v42 = vadd.f32 %v1888_v33, %v8708_v28  ;;  %v2627_v41 = vpop.f32.mrf.mxu0 }
 0x18c   : > { %v6165_v47 = vpop.f32.mrf.mxu1 }
 0x18d   : > { %v8822_v59 = vadd.f32 %v2614_v17, %v1965_v42  ;;  %v1970_v44 = vadd.f32 %v6165_v47, %v8714_v21  ;;  %v6200_v49 = vpop.f32.mrf.mxu0 }
 0x18e   : > { %v1901_v6 = vpop.f32.mrf.mxu1 }
 0x18f   : > { %v8825_v58 = vadd.f32 %v6199_v19, %v1970_v44  ;;  %v1968_v35 = vadd.f32 %v1901_v6, %v8717_v10  ;;  %v2630_v20 = vpop.f32.mrf.mxu0 }
 0x190   : > { %v6166_v36 = vpop.f32.mrf.mxu1 }
 0x191   : > { %v8828_v55 = vadd.f32 %v2627_v41, %v1968_v35  ;;  %v1971_v32 = vadd.f32 %v6166_v36, %v8726_v4  ;;  %v6203_v5 = vpop.f32.mrf.mxu0 }
 0x192   : > { %v1904_v28 = vpop.f32.mrf.mxu1 }
 0x193   : > { %v8831_v56 = vadd.f32 %v6200_v49, %v1971_v32  ;;  %v1969_v43 = vadd.f32 %v1904_v28, %v8733_v1  ;;  %v2643_v37 = vpop.f32.mrf.mxu0 }
 0x194   : > { %v6169_v21 = vpop.f32.mrf.mxu1 }
 0x195   : > { %v8834_v24 = vadd.f32 %v2630_v20, %v1969_v43  ;;  %v1974_v63 = vadd.f32 %v6169_v21, %v8739_v23  ;;  %v6204_v54 = vpop.f32.mrf.mxu0 }
 0x196   : > { %v1917_v10 = vpop.f32.mrf.mxu1 }
 0x197   : > { %v8837_v22 = vadd.f32 %v6203_v5, %v1974_v63  ;;  %v1972_v25 = vadd.f32 %v1917_v10, %v8742_v57  ;;  %v2646_v46 = vpop.f32.mrf.mxu0 }
 0x198   : > { %v6170_v4 = vpop.f32.mrf.mxu1 }
 0x199   : > { %v8840_v15 = vadd.f32 %v2643_v37, %v1972_v25  ;;  %v1975_v50 = vadd.f32 %v6170_v4, %v8746_v52  ;;  %v6207_v7 = vpop.f32.mrf.mxu0 }
 0x19a   : > { %v1920_v1 = vpop.f32.mrf.mxu1 }
 0x19b   : > { %v8843_v30 = vadd.f32 %v6204_v54, %v1975_v50  ;;  %v1973_v17 = vadd.f32 %v1920_v1, %v8750_v14  ;;  %v2659_v51 = vpop.f32.mrf.mxu0 }
 0x19c   : > { %v6173_v23 = vpop.f32.mrf.mxu1 }
 0x19d   : > { %v8846_v3 = vadd.f32 %v2646_v46, %v1973_v17  ;;  %v1978_v19 = vadd.f32 %v6173_v23, %v8753_v39  ;;  %v6208_v33 = vpop.f32.mrf.mxu0 }
 0x19e   : > { %v1933_v57 = vpop.f32.mrf.mxu1 }
 0x19f   : > { %v8849_v42 = vadd.f32 %v6207_v7, %v1978_v19  ;;  %v1976_v41 = vadd.f32 %v1933_v57, %v8756_v45  ;;  %v2662_v47 = vpop.f32.mrf.mxu0 }
 0x1a0   : > { %v6174_v52 = vpop.f32.mrf.mxu1 }
 0x1a1   : > { %v8852_v44 = vadd.f32 %v2659_v51, %v1976_v41  ;;  %v1979_v49 = vadd.f32 %v6174_v52, %v8759_v61  ;;  %v8855_v6 = vpop.f32.mrf.mxu0 }
 0x1a2   : > { %v1936_v14 = vpop.f32.mrf.mxu1 }
 0x1a3   : > { %v8857_v35 = vadd.f32 %v6208_v33, %v1979_v49  ;;  %v1977_v20 = vadd.f32 %v1936_v14, %v8762_v40  ;;  %v8860_v39 = vpop.f32.mrf.mxu0 }
 0x1a4   : > { %v8862_v36 = vpop.f32.mrf.mxu1 }
 0x1a5   : > { %v8864_v32 = vadd.f32 %v2662_v47, %v1977_v20  ;;  %v8866_v45 = vpop.f32.mrf.mxu0 }
 0x1a6   : > { %v8868_v5 = vpop.f32.mrf.mxu1 }
 0x1a7   : > { %v8870_v28 = vpop.f32.mrf.mxu0 }
 0x1a8   : > { %v8872_v61 = vpop.f32.mrf.mxu1 }
 0x1a9   : > { %v8874_v43 = vpop.f32.mrf.mxu0 }
 0x1aa   : > { %v8876_v37 = vpop.f32.mrf.mxu1 }
 0x1ab   : > { %v8878_v21 = vpop.f32.mrf.mxu0 }
 0x1ac   : > { %v8880_v40 = vpop.f32.mrf.mxu1 }
 0x1ad   : > { %v8882_v63 = vpop.f32.mrf.mxu0 }
 0x1ae   : > { %v8884_v54 = vpop.f32.mrf.mxu1 }
 0x1af   : > { %v8886_v10 = vpop.f32.mrf.mxu0 }
 0x1b0   : > { %v8888_v25 = vpop.f32.mrf.mxu1 }
 0x1b1   : > { %v8890_v46 = vpop.f32.mrf.mxu0 }
 0x1b2   : > { %9633 = vst [vmem:[#allocation9_spill] sm:$0xff] %v8890_v46  ;;  %v8892_v4 = vpop.f32.mrf.mxu1 }
 0x1b3   : > { %v8894_v50 = vpop.f32.mrf.mxu0 }
 0x1b4   : > { %9634 = vst [vmem:[#allocation18_spill] sm:$0xff] %v8894_v50  ;;  %v8896_v7 = vpop.f32.mrf.mxu1 }
 0x1b5   : > { %v8898_v1 = vpop.f32.mrf.mxu0 }
 0x1b6   : > { %9635 = vst [vmem:[#allocation21_spill] sm:$0xff] %v8898_v1  ;;  %v8900_v17 = vpop.f32.mrf.mxu1 }
 0x1b7   : > { %v8902_v51 = vpop.f32.mrf.mxu0 }
 0x1b8   : > { %9636 = vst [vmem:[#allocation23_spill] sm:$0xff] %v8902_v51  ;;  %v8904_v23 = vpop.f32.mrf.mxu1 }
 0x1b9   : > { %9637 = vst [vmem:[#allocation25_spill] sm:$0xff] %v8904_v23  ;;  %v8906_v19 = vpop.f32.mrf.mxu0 }
 0x1ba   : > { %9638 = vst [vmem:[#allocation4_spill] sm:$0xff] %v8906_v19  ;;  %v8908_v33 = vpop.f32.mrf.mxu1 }
 0x1bb   : > { %9639 = vst [vmem:[#allocation3_spill] sm:$0xff] %v8908_v33  ;;  %v3424_v57 = vpop.f32.mrf.mxu0 }
 0x1bc   : > { %v8910_v41 = vpop.f32.mrf.mxu1 }
 0x1bd   : > { %9640 = vst [vmem:[#allocation6_spill] sm:$0xff] %v8910_v41  ;;  %v6260_v47 = vpop.f32.mrf.mxu0 }
 0x1be   : > { %v3065_v52 = vpop.f32.mrf.mxu1 }
 0x1bf   : > { %v3156_v49 = vadd.f32 %v3065_v52, %v8804_v12  ;;  %v3427_v14 = vpop.f32.mrf.mxu0 }
 0x1c0   : > { %v6226_v20 = vpop.f32.mrf.mxu1 }
 0x1c1   : > { %v8913_v1 = vadd.f32 %v3424_v57, %v3156_v49  ;;  %v3159_v53 = vadd.f32 %v6226_v20, %v8807_v16  ;;  %v6263_v51 = vpop.f32.mrf.mxu0 }
 0x1c2   : > { %v3068_v50 = vpop.f32.mrf.mxu1 }
 0x1c3   : > { %v8916_v46 = vadd.f32 %v6260_v47, %v3159_v53  ;;  %v3157_v19 = vadd.f32 %v3068_v50, %v8810_v11  ;;  %v3440_v33 = vpop.f32.mrf.mxu0 }
 0x1c4   : > { %v6229_v8 = vpop.f32.mrf.mxu1 }
 0x1c5   : > { %v8919_v23 = vadd.f32 %v3427_v14, %v3157_v19  ;;  %v3162_v41 = vadd.f32 %v6229_v8, %v8813_v29  ;;  %v6264_v13 = vpop.f32.mrf.mxu0 }
 0x1c6   : > { %v3081_v12 = vpop.f32.mrf.mxu1 }
 0x1c7   : > { %v8922_v52 = vadd.f32 %v6263_v51, %v3162_v41  ;;  %v3160_v57 = vadd.f32 %v3081_v12, %v8816_v9  ;;  %v3443_v49 = vpop.f32.mrf.mxu0 }
 0x1c8   : > { %v6230_v16 = vpop.f32.mrf.mxu1 }
 0x1c9   : > { %v8925_v20 = vadd.f32 %v3440_v33, %v3160_v57  ;;  %v3163_v53 = vadd.f32 %v6230_v16, %v8819_v34  ;;  %v6267_v47 = vpop.f32.mrf.mxu0 }
 0x1ca   : > { %v3084_v11 = vpop.f32.mrf.mxu1 }
 0x1cb   : > { %v8928_v50 = vadd.f32 %v6264_v13, %v3163_v53  ;;  %v3161_v19 = vadd.f32 %v3084_v11, %v8822_v59  ;;  %v3456_v14 = vpop.f32.mrf.mxu0 }
 0x1cc   : > { %v6233_v8 = vpop.f32.mrf.mxu1 }
 0x1cd   : > { %v8931_v29 = vadd.f32 %v3443_v49, %v3161_v19  ;;  %v3166_v51 = vadd.f32 %v6233_v8, %v8825_v58  ;;  %v6268_v41 = vpop.f32.mrf.mxu0 }
 0x1ce   : > { %v3097_v9 = vpop.f32.mrf.mxu1 }
 0x1cf   : > { %v8934_v12 = vadd.f32 %v6267_v47, %v3166_v51  ;;  %v3164_v33 = vadd.f32 %v3097_v9, %v8828_v55  ;;  %v3459_v57 = vpop.f32.mrf.mxu0 }
 0x1d0   : > { %v6234_v34 = vpop.f32.mrf.mxu1 }
 0x1d1   : > { %v8937_v16 = vadd.f32 %v3456_v14, %v3164_v33  ;;  %v3167_v13 = vadd.f32 %v6234_v34, %v8831_v56  ;;  %v6271_v53 = vpop.f32.mrf.mxu0 }
 0x1d2   : > { %v3100_v59 = vpop.f32.mrf.mxu1 }
 0x1d3   : > { %v8940_v11 = vadd.f32 %v6268_v41, %v3167_v13  ;;  %v3165_v49 = vadd.f32 %v3100_v59, %v8834_v24  ;;  %v3472_v19 = vpop.f32.mrf.mxu0 }
 0x1d4   : > { %v6237_v58 = vpop.f32.mrf.mxu1 }
 0x1d5   : > { %v8943_v8 = vadd.f32 %v3459_v57, %v3165_v49  ;;  %v3170_v47 = vadd.f32 %v6237_v58, %v8837_v22  ;;  %v6272_v51 = vpop.f32.mrf.mxu0 }
 0x1d6   : > { %v3113_v55 = vpop.f32.mrf.mxu1 }
 0x1d7   : > { %v8946_v9 = vadd.f32 %v6271_v53, %v3170_v47  ;;  %v3168_v14 = vadd.f32 %v3113_v55, %v8840_v15  ;;  %v3475_v33 = vpop.f32.mrf.mxu0 }
 0x1d8   : > { %v6238_v56 = vpop.f32.mrf.mxu1 }
 0x1d9   : > { %v8949_v34 = vadd.f32 %v3472_v19, %v3168_v14  ;;  %v3171_v41 = vadd.f32 %v6238_v56, %v8843_v30  ;;  %v6275_v13 = vpop.f32.mrf.mxu0  ;;  %v3146_v19 = vadd.f32 %v8862_v36, %v8765_v62  ;;  %v3147_v62 = vadd.f32 %v8872_v61, %v8771_v26 }
 0x1da   : > { %v3116_v24 = vpop.f32.mrf.mxu1  ;;  %v3148_v26 = vadd.f32 %v8884_v54, %v8780_v31 }
 0x1db   : > { %v8952_v59 = vadd.f32 %v6272_v51, %v3171_v41  ;;  %v3169_v57 = vadd.f32 %v3116_v24, %v8846_v3  ;;  %v3488_v49 = vpop.f32.mrf.mxu0  ;;  %v3144_v3 = vadd.f32 %v8868_v5, %v8768_v0  ;;  %v3505_v24 = vadd.f32 %v8855_v6, %v3146_v19 }
 0x1dc   : > { %v6241_v22 = vpop.f32.mrf.mxu1  ;;  %v3145_v0 = vadd.f32 %v8876_v37, %v8774_v60  ;;  %v3150_v6 = vadd.f32 %v8880_v40, %v8777_v48  ;;  %v3149_v48 = vadd.f32 %v8892_v4, %v8786_v2 }
 0x1dd   : > { %v8955_v58 = vadd.f32 %v3475_v33, %v3169_v57  ;;  %v3174_v53 = vadd.f32 %v6241_v22, %v8849_v42  ;;  %v6276_v47 = vpop.f32.mrf.mxu0  ;;  %v3503_v22 = vadd.f32 %v8860_v39, %v3144_v3  ;;  %v3506_v39 = vadd.f32 %v8866_v45, %v3147_v62 }
 0x1de   : > { %v3129_v15 = vpop.f32.mrf.mxu1  ;;  %v3504_v31 = vadd.f32 %v8870_v28, %v3145_v0  ;;  %v3509_v45 = vadd.f32 %v8874_v43, %v3150_v6  ;;  %v9648_v6 = vld [vmem:[#allocation6_spill] sm:$0xff] }
 0x1df   : > { %v8960_v55 = vadd.f32 %v6275_v13, %v3174_v53  ;;  %v3172_v30 = vadd.f32 %v3129_v15, %v8852_v44  ;;  %v3491_v14 = vpop.f32.mrf.mxu0 }
 0x1e0   : > { %v6242_v51 = vpop.f32.mrf.mxu1 }
 0x1e1   : > { %v8965_v56 = vadd.f32 %v3488_v49, %v3172_v30  ;;  %v3175_v33 = vadd.f32 %v6242_v51, %v8857_v35  ;;  %v6315_v41 = vpop.f32.mrf.mxu0  ;;  %v3154_v51 = vadd.f32 %v8896_v7, %v8789_v27  ;;  %v9643_v7 = vld [vmem:[#allocation14_spill] sm:$0xff] }
 0x1e2   : > { %v3132_v42 = vpop.f32.mrf.mxu1 }
 0x1e3   : > { %v8971_v36 = vadd.f32 %v6276_v47, %v3175_v33  ;;  %v3173_v44 = vadd.f32 %v3132_v42, %v8864_v32  ;;  %v4572_v13 = vpop.f32.mrf.mxu0  ;;  %v8986_v32 = vld [vmem:[%s9438_s2] ss:$0 sm:$0xff]  ;;  %v3151_v47 = vadd.f32 %v8888_v25, %v8783_v38  ;;  %v3152_v38 = vadd.f32 %v8900_v17, %v8792_v18  ;;  %v9642_v42 = vld [vmem:[#allocation25_spill] sm:$0xff] }
 0x1e4   : > { %v6281_v57 = vpop.f32.mrf.mxu1 }
 0x1e5   : > { %v8977_v5 = vadd.f32 %v3491_v14, %v3173_v44  ;;  %v4231_v35 = vadd.f32 %v6281_v57, %v3505_v24  ;;  %v6316_v49 = vpop.f32.mrf.mxu0  ;;  %v3507_v14 = vadd.f32 %v8878_v21, %v3148_v26  ;;  %v3510_v43 = vadd.f32 %v8882_v63, %v3151_v47  ;;  %v9644_v24 = vld [vmem:[#allocation3_spill] sm:$0xff]  ;;  %v9645_v63 = vld [vmem:[#allocation9_spill] sm:$0xff] }
 0x1e6   : > { %v4102_v61 = vpop.f32.mrf.mxu1  ;;  %v3508_v21 = vadd.f32 %v8886_v10, %v3149_v48  ;;  %v3153_v18 = vadd.f32 %v9644_v24, %v9643_v7  ;;  %v3513_v0 = vadd.f32 %v9645_v63, %v3154_v51  ;;  %v9646_v10 = vld [vmem:[#allocation18_spill] sm:$0xff] }
 0x1e7   : > { %v4701_v53 = vadd.f32 %v6315_v41, %v4231_v35  ;;  %v4229_v60 = vadd.f32 %v4102_v61, %v3503_v22  ;;  %v4575_v37 = vpop.f32.mrf.mxu0  ;;  %v9641_v41 = vld [vmem:[#allocation2_spill] sm:$0xff]  ;;  %v3511_v35 = vadd.f32 %v9646_v10, %v3152_v38 }
 0x1e8   : > { %v6282_v40 = vpop.f32.mrf.mxu1  ;;  %v3155_v27 = vadd.f32 %v9642_v42, %v9641_v41  ;;  %v9651_v42 = vld [vmem:[#allocation4_spill] sm:$0xff] }
 0x1e9   : > { %v8995_v54 = vadd.f32 %v8986_v32, %v4701_v53  ;;  %v4699_v15 = vadd.f32 %v4572_v13, %v4229_v60  ;;  %v4232_v19 = vadd.f32 %v6282_v40, %v3506_v39  ;;  %v6319_v30 = vpop.f32.mrf.mxu0  ;;  %v9649_v40 = vld [vmem:[#allocation21_spill] sm:$0xff] }
 0x1ea   : > { %v4105_v2 = vpop.f32.mrf.mxu1 }
 0x1eb   : > { %v4772_v28 = vmul.f32 %v8995_v54, %v8995_v54  ;;  %v9006_v25 = vadd.f32 %v8986_v32, %v4699_v15  ;;  %v4702_v4 = vadd.f32 %v6316_v49, %v4232_v19  ;;  %v4230_v3 = vadd.f32 %v4105_v2, %v3504_v31  ;;  %v4588_v33 = vpop.f32.mrf.mxu0  ;;  %v9647_v49 = vld [vmem:[#allocation19_spill] sm:$0xff] }
 0x1ec   : > { %v6285_v17 = vpop.f32.mrf.mxu1  ;;  %v3158_v26 = vadd.f32 %v9648_v6, %v9647_v49  ;;  %v3514_v31 = vadd.f32 %v9649_v40, %v3155_v27  ;;  %v9650_v15 = vld [vmem:[#allocation23_spill] sm:$0xff] }
 0x1ed   : > { %v4804_v62 = vmul.f32 %v4772_v28, %v8995_v54  ;;  %v4770_v44 = vmul.f32 %v9006_v25, %v9006_v25  ;;  %v9018_v13 = vadd.f32 %v8986_v32, %v4702_v4  ;;  %v4700_v57 = vadd.f32 %v4575_v37, %v4230_v3  ;;  %v6320_v22 = vpop.f32.mrf.mxu0 }
 0x1ee   : > { %v4235_v61 = vadd.f32 %v6285_v17, %v3509_v45  ;;  %v4118_v39 = vpop.f32.mrf.mxu1  ;;  %v9032_v19 = vadd.f32 %v9650_v15, %v3153_v18  ;;  %v9039_v7 = vadd.f32 %v9651_v42, %v3158_v26 }
 0x1ef   : > { %v4836_v53 = vmul.f32 0.044715, %v4804_v62  ;;  %v4802_v60 = vmul.f32 %v4770_v44, %v9006_v25  ;;  %v4773_v47 = vmul.f32 %v9018_v13, %v9018_v13  ;;  %v9028_v48 = vadd.f32 %v8986_v32, %v4700_v57  ;;  %v4591_v37 = vpop.f32.mrf.mxu0 }
 0x1f0   : > { %v4705_v51 = vadd.f32 %v6319_v30, %v4235_v61  ;;  %v4233_v38 = vadd.f32 %v4118_v39, %v3507_v14  ;;  %v6286_v2 = vpop.f32.mrf.mxu1 }
 0x1f1   : > { %v4868_v45 = vadd.f32 %v4836_v53, %v8995_v54  ;;  %v4834_v28 = vmul.f32 0.044715, %v4802_v60  ;;  %v4805_v4 = vmul.f32 %v4773_v47, %v9018_v13  ;;  %v4771_v3 = vmul.f32 %v9028_v48, %v9028_v48  ;;  %v6323_v41 = vpop.f32.mrf.mxu0 }
 0x1f2   : > { %v9042_v27 = vadd.f32 %v8986_v32, %v4705_v51  ;;  %v4703_v24 = vadd.f32 %v4588_v33, %v4233_v38  ;;  %v4236_v18 = vadd.f32 %v6286_v2, %v3510_v43  ;;  %v4121_v30 = vpop.f32.mrf.mxu1 }
 0x1f3   : > { %v4900_v14 = vmul.f32 0.7978846, %v4868_v45  ;;  %v4866_v17 = vadd.f32 %v4834_v28, %v9006_v25  ;;  %v4837_v62 = vmul.f32 0.044715, %v4805_v4  ;;  %v4803_v44 = vmul.f32 %v4771_v3, %v9028_v48  ;;  %v4604_v57 = vpop.f32.mrf.mxu0 }
 0x1f4   : > { %v4776_v63 = vmul.f32 %v9042_v27, %v9042_v27  ;;  %v9049_v10 = vadd.f32 %v8986_v32, %v4703_v24  ;;  %v4706_v49 = vadd.f32 %v6320_v22, %v4236_v18  ;;  %v4234_v6 = vadd.f32 %v4121_v30, %v3508_v21  ;;  %v6289_v26 = vpop.f32.mrf.mxu1 }
 0x1f5   : > { %6414 = vtanh.f32 %v4900_v14  ;;  %v4898_v33 = vmul.f32 0.7978846, %v4866_v17  ;;  %v4869_v43 = vadd.f32 %v4837_v62, %v9018_v13  ;;  %v4835_v61 = vmul.f32 0.044715, %v4803_v44  ;;  %v6324_v39 = vpop.f32.mrf.mxu0 }
 0x1f6   : > { %v4808_v53 = vmul.f32 %v4776_v63, %v9042_v27  ;;  %v4774_v60 = vmul.f32 %v9049_v10, %v9049_v10  ;;  %v9056_v47 = vadd.f32 %v8986_v32, %v4706_v49  ;;  %v4704_v40 = vadd.f32 %v4591_v37, %v4234_v6  ;;  %v4134_v15 = vpop.f32.mrf.mxu1 }
 0x1f7   : > { %6416 = vtanh.f32 %v4898_v33  ;;  %v4901_v22 = vmul.f32 0.7978846, %v4869_v43  ;;  %v4867_v21 = vadd.f32 %v4835_v61, %v9028_v48  ;;  %v4239_v51 = vadd.f32 %v6289_v26, %v3513_v0  ;;  %v4607_v38 = vpop.f32.mrf.mxu0 }
 0x1f8   : > { %v4840_v2 = vmul.f32 0.044715, %v4808_v53  ;;  %v4806_v45 = vmul.f32 %v4774_v60, %v9049_v10  ;;  %v4777_v28 = vmul.f32 %v9056_v47, %v9056_v47  ;;  %v9063_v4 = vadd.f32 %v8986_v32, %v4704_v40  ;;  %v6290_v3 = vpop.f32.mrf.mxu1 }
 0x1f9   : > { %6418 = vtanh.f32 %v4901_v22  ;;  %v4899_v42 = vmul.f32 0.7978846, %v4867_v21  ;;  %v4709_v37 = vadd.f32 %v6323_v41, %v4239_v51  ;;  %v4237_v24 = vadd.f32 %v4134_v15, %v3511_v35  ;;  %v6327_v18 = vpop.f32.mrf.mxu0 }
 0x1fa   : > { %v4872_v30 = vadd.f32 %v4840_v2, %v9042_v27  ;;  %v4838_v14 = vmul.f32 0.044715, %v4806_v45  ;;  %v4809_v0 = vmul.f32 %v4777_v28, %v9056_v47  ;;  %v4775_v17 = vmul.f32 %v9063_v4, %v9063_v4  ;;  %v4137_v62 = vpop.f32.mrf.mxu1 }
 0x1fb   : > { %6420 = vtanh.f32 %v4899_v42  ;;  %v9070_v44 = vadd.f32 %v8986_v32, %v4709_v37  ;;  %v4707_v63 = vadd.f32 %v4604_v57, %v4237_v24  ;;  %v4240_v49 = vadd.f32 %v6290_v3, %v3514_v31  ;;  %v4620_v6 = vpop.f32.mrf.mxu0 }
 0x1fc   : > { %v4904_v26 = vmul.f32 0.7978846, %v4872_v30  ;;  %v4870_v35 = vadd.f32 %v4838_v14, %v9049_v10  ;;  %v4841_v41 = vmul.f32 0.044715, %v4809_v0  ;;  %v4807_v33 = vmul.f32 %v4775_v17, %v9063_v4  ;;  %v6293_v43 = vpop.f32.mrf.mxu1 }
 0x1fd   : > { %v4780_v61 = vmul.f32 %v9070_v44, %v9070_v44  ;;  %v9077_v53 = vadd.f32 %v8986_v32, %v4707_v63  ;;  %v4710_v60 = vadd.f32 %v6324_v39, %v4240_v49  ;;  %v4238_v40 = vadd.f32 %v4137_v62, %v9032_v19  ;;  %v9080_v15 = vpop.f32.mrf.mxu0 }
 0x1fe   : > { %6422 = vtanh.f32 %v4904_v26  ;;  %v4902_v31 = vmul.f32 0.7978846, %v4870_v35  ;;  %v4873_v57 = vadd.f32 %v4841_v41, %v9056_v47  ;;  %v4839_v22 = vmul.f32 0.044715, %v4807_v33  ;;  %v4150_v21 = vpop.f32.mrf.mxu1 }
 0x1ff   : > { %v4812_v51 = vmul.f32 %v4780_v61, %v9070_v44  ;;  %v4778_v2 = vmul.f32 %v9077_v53, %v9077_v53  ;;  %v9087_v45 = vadd.f32 %v8986_v32, %v4710_v60  ;;  %v4708_v28 = vadd.f32 %v4607_v38, %v4238_v40  ;;  %v9089_v39 = vpop.f32.mrf.mxu0 }
 0x200   : > { %6424 = vtanh.f32 %v4902_v31  ;;  %v4905_v19 = vmul.f32 0.7978846, %v4873_v57  ;;  %v4871_v3 = vadd.f32 %v4839_v22, %v9063_v4  ;;  %v4243_v42 = vadd.f32 %v6293_v43, %v9039_v7  ;;  %v9093_v37 = vpop.f32.mrf.mxu1 }
 0x201   : > { %v4844_v24 = vmul.f32 0.044715, %v4812_v51  ;;  %v4810_v30 = vmul.f32 %v4778_v2, %v9077_v53  ;;  %v4781_v14 = vmul.f32 %v9087_v45, %v9087_v45  ;;  %v9099_v0 = vadd.f32 %v8986_v32, %v4708_v28  ;;  %v9101_v38 = vpop.f32.mrf.mxu0 }
 0x202   : > { %v6415_v17 = vpop.eup %6414  ;;  %6426 = vtanh.f32 %v4905_v19  ;;  %v4903_v62 = vmul.f32 0.7978846, %v4871_v3  ;;  %v4713_v63 = vadd.f32 %v6327_v18, %v4243_v42  ;;  %v4241_v7 = vadd.f32 %v4150_v21, %v8913_v1  ;;  %v9104_v49 = vpop.f32.mrf.mxu1 }
 0x203   : > { %v4964_v26 = vadd.f32 1.0, %v6415_v17  ;;  %v4876_v35 = vadd.f32 %v4844_v24, %v9070_v44  ;;  %v4842_v41 = vmul.f32 0.044715, %v4810_v30  ;;  %v4813_v33 = vmul.f32 %v4781_v14, %v9087_v45  ;;  %v9115_v1 = vpop.f32.mrf.mxu0 }
 0x204   : > { %v6417_v43 = vpop.eup %6416  ;;  %6428 = vtanh.f32 %v4903_v62  ;;  %v4779_v61 = vmul.f32 %v9099_v0, %v9099_v0  ;;  %v9111_v60 = vadd.f32 %v8986_v32, %v4713_v63  ;;  %v4711_v40 = vadd.f32 %v4620_v6, %v4241_v7  ;;  %v9113_v18 = vpop.f32.mrf.mxu1 }
 0x205   : > { %v4996_v31 = vmul.f32 0.5, %v4964_v26  ;;  %v4962_v57 = vadd.f32 1.0, %v6417_v43  ;;  %v4908_v22 = vmul.f32 0.7978846, %v4876_v35  ;;  %v4874_v21 = vadd.f32 %v4842_v41, %v9077_v53  ;;  %v9137_v35 = vpop.f32.mrf.mxu0 }
 0x206   : > { %v6419_v51 = vpop.eup %6418  ;;  %v4845_v2 = vmul.f32 0.044715, %v4813_v33  ;;  %v4811_v28 = vmul.f32 %v4779_v61, %v9099_v0  ;;  %v4784_v19 = vmul.f32 %v9111_v60, %v9111_v60  ;;  %v9123_v3 = vadd.f32 %v8986_v32, %v4711_v40  ;;  %v9125_v6 = vpop.f32.mrf.mxu1 }
 0x207   : > { %v5028_v42 = vmul.f32 %v4996_v31, %v8995_v54  ;;  %v4994_v24 = vmul.f32 0.5, %v4962_v57  ;;  %v4965_v30 = vadd.f32 1.0, %v6419_v51  ;;  %6430 = vtanh.f32 %v4908_v22 }
 0x208   : > { %v6421_v14 = vpop.eup %6420  ;;  %v4906_v17 = vmul.f32 0.7978846, %v4874_v21  ;;  %v4877_v62 = vadd.f32 %v4845_v2, %v9087_v45  ;;  %v4843_v63 = vmul.f32 0.044715, %v4811_v28  ;;  %v4816_v7 = vmul.f32 %v4784_v19, %v9111_v60  ;;  %v9135_v26 = vpop.f32.mrf.mxu1 }
 0x209   : > { %v5856_v54 = vpack.c.bf16 %v5028_v42, %v5028_v42  ;;  %v5026_v41 = vmul.f32 %v4994_v24, %v9006_v25  ;;  %v4997_v33 = vmul.f32 0.5, %v4965_v30  ;;  %v4963_v43 = vadd.f32 1.0, %v6421_v14  ;;  %v9149_v24 = vpop.f32.mrf.mxu0 }
 0x20a   : > { %6432 = vtanh.f32 %v4906_v17  ;;  %v4909_v61 = vmul.f32 0.7978846, %v4877_v62  ;;  %v4875_v40 = vadd.f32 %v4843_v63, %v9099_v0  ;;  %v4848_v31 = vmul.f32 0.044715, %v4816_v7  ;;  %v9141_v57 = vpop.f32.mrf.mxu1 }
 0x20b   : > { %v6423_v22 = vpop.eup %6422  ;;  %5189 = vst.msk [vmem:[%s9131_s15 + $0x8] sm:$0xf] %vm5186_vm8, %v5856_v54  ;;  %v5854_v21 = vpack.c.bf16 %v5026_v41, %v5026_v41  ;;  %v5029_v51 = vmul.f32 %v4997_v33, %v9018_v13  ;;  %v4995_v2 = vmul.f32 0.5, %v4963_v43  ;;  %v4782_v25 = vmul.f32 %v9123_v3, %v9123_v3 }
 0x20c   : > { %v4968_v28 = vadd.f32 1.0, %v6423_v22  ;;  %6434 = vtanh.f32 %v4909_v61  ;;  %v4907_v19 = vmul.f32 0.7978846, %v4875_v40  ;;  %v4880_v42 = vadd.f32 %v4848_v31, %v9111_v60  ;;  %v9151_v30 = vpop.f32.mrf.mxu1 }
 0x20d   : > { %v6425_v14 = vpop.eup %6424  ;;  %5187 = vst.msk [vmem:[%s9131_s15] sm:$0xf] %vm5186_vm8, %v5854_v21  ;;  %v5857_v17 = vpack.c.bf16 %v5029_v51, %v5029_v51  ;;  %v5027_v13 = vmul.f32 %v4995_v2, %v9028_v48  ;;  %v4814_v62 = vmul.f32 %v4782_v25, %v9123_v3  ;;  %v4244_v63 = vadd.f32 %v9093_v37, %v8916_v46  ;;  %v9165_v46 = vpop.f32.mrf.mxu0 }
 0x20e   : > { %v5000_v7 = vmul.f32 0.5, %v4968_v28  ;;  %v4966_v54 = vadd.f32 1.0, %v6425_v14  ;;  %6436 = vtanh.f32 %v4907_v19  ;;  %v4912_v41 = vmul.f32 0.7978846, %v4880_v42  ;;  %v9167_v37 = vpop.f32.mrf.mxu1 }
 0x20f   : > { %v6427_v33 = vpop.eup %6426  ;;  %5190 = vst.msk [vmem:[%s9131_s15 + $0xc] sm:$0xf] %vm5186_vm8, %v5857_v17  ;;  %v5855_v43 = vpack.c.bf16 %v5027_v13, %v5027_v13  ;;  %v4846_v61 = vmul.f32 0.044715, %v4814_v62  ;;  %v4714_v40 = vadd.f32 %v9080_v15, %v4244_v63  ;;  %v4242_v48 = vadd.f32 %v9104_v49, %v8919_v23  ;;  %v9190_v63 = vpop.f32.mrf.mxu0 }
 0x210   : > { %v5032_v31 = vmul.f32 %v5000_v7, %v9042_v27  ;;  %v4998_v22 = vmul.f32 0.5, %v4966_v54  ;;  %v4969_v21 = vadd.f32 1.0, %v6427_v33  ;;  %6438 = vtanh.f32 %v4912_v41  ;;  %v9192_v7 = vpop.f32.mrf.mxu1 }
 0x211   : > { %v6429_v51 = vpop.eup %6428  ;;  %5188 = vst.msk [vmem:[%s9131_s15 + $0x4] sm:$0xf] %vm5186_vm8, %v5855_v43  ;;  %v4878_v2 = vadd.f32 %v4846_v61, %v9123_v3  ;;  %v9173_v15 = vadd.f32 %v8986_v32, %v4714_v40  ;;  %v4712_v23 = vadd.f32 %v9089_v39, %v4242_v48  ;;  %v4247_v27 = vadd.f32 %v9113_v18, %v8922_v52 }
 0x212   : > { %v5860_v49 = vpack.c.bf16 %v5032_v31, %v5032_v31  ;;  %v5030_v25 = vmul.f32 %v4998_v22, %v9049_v10  ;;  %v5001_v28 = vmul.f32 0.5, %v4969_v21  ;;  %v4967_v19 = vadd.f32 1.0, %v6429_v51 }
 0x213   : > { %v4910_v42 = vmul.f32 0.7978846, %v4878_v2  ;;  %v4785_v14 = vmul.f32 %v9173_v15, %v9173_v15  ;;  %v9182_v17 = vadd.f32 %v8986_v32, %v4712_v23  ;;  %v4717_v13 = vadd.f32 %v9101_v38, %v4247_v27  ;;  %v9216_v2 = vpop.f32.mrf.mxu1 }
 0x214   : > { %v6431_v62 = vpop.eup %6430  ;;  %5193 = vst.msk [vmem:[%s9131_s15 + $0x18] sm:$0xf] %vm5186_vm8, %v5860_v49  ;;  %v5858_v39 = vpack.c.bf16 %v5030_v25, %v5030_v25  ;;  %v5033_v52 = vmul.f32 %v5001_v28, %v9056_v47  ;;  %v4999_v18 = vmul.f32 0.5, %v4967_v19  ;;  %v4245_v10 = vadd.f32 %v9125_v6, %v8925_v20 }
 0x215   : > { %v4972_v54 = vadd.f32 1.0, %v6431_v62  ;;  %6440 = vtanh.f32 %v4910_v42  ;;  %v4817_v41 = vmul.f32 %v4785_v14, %v9173_v15  ;;  %v4783_v38 = vmul.f32 %v9182_v17, %v9182_v17 }
 0x216   : > { %5191 = vst.msk [vmem:[%s9131_s15 + $0x10] sm:$0xf] %vm5186_vm8, %v5858_v39  ;;  %v5861_v33 = vpack.c.bf16 %v5033_v52, %v5033_v52  ;;  %v5031_v47 = vmul.f32 %v4999_v18, %v9063_v4  ;;  %v9201_v43 = vadd.f32 %v8986_v32, %v4717_v13  ;;  %v4715_v20 = vadd.f32 %v9115_v1, %v4245_v10  ;;  %v9214_v1 = vpop.f32.mrf.mxu0 }
 0x217   : > { %v6433_v6 = vpop.eup %6432  ;;  %v5004_v61 = vmul.f32 0.5, %v4972_v54  ;;  %v4849_v40 = vmul.f32 0.044715, %v4817_v41  ;;  %v4815_v48 = vmul.f32 %v4783_v38, %v9182_v17  ;;  %v4248_v31 = vadd.f32 %v9135_v26, %v8928_v50  ;;  %v6305_v41 = vpop.f32.mrf.mxu1 }
 0x218   : > { %5194 = vst.msk [vmem:[%s9131_s15 + $0x1c] sm:$0xf] %vm5186_vm8, %v5861_v33  ;;  %v5859_v22 = vpack.c.bf16 %v5031_v47, %v5031_v47  ;;  %v4970_v21 = vadd.f32 1.0, %v6433_v6  ;;  %v4788_v4 = vmul.f32 %v9201_v43, %v9201_v43  ;;  %v9212_v51 = vadd.f32 %v8986_v32, %v4715_v20  ;;  %v4655_v54 = vpop.f32.mrf.mxu0 }
 0x219   : > { %v6435_v23 = vpop.eup %6434  ;;  %v5036_v27 = vmul.f32 %v5004_v61, %v9070_v44  ;;  %v4881_v49 = vadd.f32 %v4849_v40, %v9173_v15  ;;  %v4847_v50 = vmul.f32 0.044715, %v4815_v48  ;;  %v4718_v26 = vadd.f32 %v9137_v35, %v4248_v31 }
 0x21a   : > { %5192 = vst.msk [vmem:[%s9131_s15 + $0x14] sm:$0xf] %vm5186_vm8, %v5859_v22  ;;  %v5002_v25 = vmul.f32 0.5, %v4970_v21  ;;  %v4973_v28 = vadd.f32 1.0, %v6435_v23  ;;  %v4820_v19 = vmul.f32 %v4788_v4, %v9201_v43  ;;  %v4786_v42 = vmul.f32 %v9212_v51, %v9212_v51 }
 0x21b   : > { %v6437_v14 = vpop.eup %6436  ;;  %v5864_v13 = vpack.c.bf16 %v5036_v27, %v5036_v27  ;;  %v4913_v62 = vmul.f32 0.7978846, %v4881_v49  ;;  %v4879_v44 = vadd.f32 %v4847_v50, %v9182_v17  ;;  %v9228_v39 = vadd.f32 %v8986_v32, %v4718_v26  ;;  %v6339_v49 = vpop.f32.mrf.mxu0 }
 0x21c   : > { %v5034_v35 = vmul.f32 %v5002_v25, %v9077_v53  ;;  %v5005_v52 = vmul.f32 0.5, %v4973_v28  ;;  %v4971_v18 = vadd.f32 1.0, %v6437_v14  ;;  %v4852_v10 = vmul.f32 0.044715, %v4820_v19 }
 0x21d   : > { %v6439_v38 = vpop.eup %6438  ;;  %5197 = vst.msk [vmem:[%s9131_s15 + $0x28] sm:$0xf] %vm5186_vm8, %v5864_v13  ;;  %6442 = vtanh.f32 %v4913_v62  ;;  %v4911_v33 = vmul.f32 0.7978846, %v4879_v44  ;;  %v4818_v47 = vmul.f32 %v4786_v42, %v9212_v51  ;;  %v4789_v20 = vmul.f32 %v9228_v39, %v9228_v39 }
 0x21e   : > { %v5862_v6 = vpack.c.bf16 %v5034_v35, %v5034_v35  ;;  %v5037_v61 = vmul.f32 %v5005_v52, %v9087_v45  ;;  %v5003_v53 = vmul.f32 0.5, %v4971_v18  ;;  %v4976_v40 = vadd.f32 1.0, %v6439_v38  ;;  %v4198_v45 = vpop.f32.mrf.mxu1 }
 0x21f   : > { %6444 = vtanh.f32 %v4911_v33  ;;  %v4884_v48 = vadd.f32 %v4852_v10, %v9201_v43  ;;  %v4850_v31 = vmul.f32 0.044715, %v4818_v47  ;;  %v4821_v22 = vmul.f32 %v4789_v20, %v9228_v39 }
 0x220   : > { %5195 = vst.msk [vmem:[%s9131_s15 + $0x20] sm:$0xf] %vm5186_vm8, %v5862_v6  ;;  %v5865_v21 = vpack.c.bf16 %v5037_v61, %v5037_v61  ;;  %v5035_v4 = vmul.f32 %v5003_v53, %v9099_v0  ;;  %v5008_v23 = vmul.f32 0.5, %v4976_v40  ;;  %v4246_v27 = vadd.f32 %v9141_v57, %v8931_v29  ;;  %v9261_v35 = vpop.f32.mrf.mxu1 }
 0x221   : > { %v4916_v50 = vmul.f32 0.7978846, %v4884_v48  ;;  %v4882_v26 = vadd.f32 %v4850_v31, %v9212_v51  ;;  %v4853_v25 = vmul.f32 0.044715, %v4821_v22  ;;  %v4251_v28 = vadd.f32 %v9151_v30, %v8934_v12 }
 0x222   : > { %v6441_v19 = vpop.eup %6440  ;;  %5198 = vst.msk [vmem:[%s9131_s15 + $0x2c] sm:$0xf] %vm5186_vm8, %v5865_v21  ;;  %v5863_v42 = vpack.c.bf16 %v5035_v4, %v5035_v4  ;;  %v5040_v0 = vmul.f32 %v5008_v23, %v9111_v60  ;;  %v4716_v14 = vadd.f32 %v9149_v24, %v4246_v27  ;;  %v4249_v29 = vadd.f32 %v9167_v37, %v8937_v16  ;;  %v4668_v24 = vpop.f32.mrf.mxu0 }
 0x223   : > { %v4974_v57 = vadd.f32 1.0, %v6441_v19  ;;  %6446 = vtanh.f32 %v4916_v50  ;;  %v4914_v13 = vmul.f32 0.7978846, %v4882_v26  ;;  %v4885_v62 = vadd.f32 %v4853_v25, %v9228_v39 }
 0x224   : > { %5196 = vst.msk [vmem:[%s9131_s15 + $0x24] sm:$0xf] %vm5186_vm8, %v5863_v42  ;;  %v5868_v12 = vpack.c.bf16 %v5040_v0, %v5040_v0  ;;  %v9257_v30 = vadd.f32 %v8986_v32, %v4716_v14  ;;  %v4721_v44 = vadd.f32 %v9165_v46, %v4251_v28  ;;  %v4719_v60 = vadd.f32 %v9190_v63, %v4249_v29  ;;  %v9285_v61 = vpop.f32.mrf.mxu0 }
 0x225   : > { %v5006_v16 = vmul.f32 0.5, %v4974_v57  ;;  %6448 = vtanh.f32 %v4914_v13  ;;  %v4917_v37 = vmul.f32 0.7978846, %v4885_v62  ;;  %v4252_v52 = vadd.f32 %v9192_v7, %v8940_v11 }
 0x226   : > { %5201 = vst.msk [vmem:[%s9131_s15 + $0x38] sm:$0xf] %vm5186_vm8, %v5868_v12  ;;  %v4787_v18 = vmul.f32 %v9257_v30, %v9257_v30  ;;  %v9270_v10 = vadd.f32 %v8986_v32, %v4721_v44  ;;  %v9273_v46 = vadd.f32 %v8986_v32, %v4719_v60  ;;  %v4250_v63 = vadd.f32 %v9216_v2, %v8943_v8  ;;  %v9287_v8 = vpop.f32.mrf.mxu1  ;;  %v4671_v50 = vpop.f32.mrf.mxu0 }
 0x227   : > { %v5038_v38 = vmul.f32 %v5006_v16, %v9123_v3  ;;  %6450 = vtanh.f32 %v4917_v37  ;;  %v4722_v33 = vadd.f32 %v9214_v1, %v4252_v52  ;;  %v4255_v11 = vadd.f32 %v6305_v41, %v8946_v9 }
 0x228   : > { %v4819_v7 = vmul.f32 %v4787_v18, %v9257_v30  ;;  %v4792_v47 = vmul.f32 %v9270_v10, %v9270_v10  ;;  %v4790_v20 = vmul.f32 %v9273_v46, %v9273_v46  ;;  %v4720_v6 = vadd.f32 %v4655_v54, %v4250_v63  ;;  %v9308_v26 = vpop.f32.mrf.mxu1  ;;  %v6343_v52 = vpop.f32.mrf.mxu0 }
 0x229   : > { %v5866_v3 = vpack.c.bf16 %v5038_v38, %v5038_v38  ;;  %v9290_v2 = vadd.f32 %v8986_v32, %v4722_v33  ;;  %v4725_v1 = vadd.f32 %v6339_v49, %v4255_v11  ;;  %v4253_v9 = vadd.f32 %v4198_v45, %v8949_v34 }
 0x22a   : > { %v6443_v41 = vpop.eup %6442  ;;  %v4851_v53 = vmul.f32 0.044715, %v4819_v7  ;;  %v4824_v40 = vmul.f32 %v4792_v47, %v9270_v10  ;;  %v4822_v48 = vmul.f32 %v4790_v20, %v9273_v46  ;;  %v9296_v31 = vadd.f32 %v8986_v32, %v4720_v6  ;;  %v4214_v18 = vpop.f32.mrf.mxu1 }
 0x22b   : > { %5199 = vst.msk [vmem:[%s9131_s15 + $0x30] sm:$0xf] %vm5186_vm8, %v5866_v3  ;;  %v4977_v54 = vadd.f32 1.0, %v6443_v41  ;;  %v4793_v22 = vmul.f32 %v9290_v2, %v9290_v2  ;;  %v9303_v21 = vadd.f32 %v8986_v32, %v4725_v1  ;;  %v4723_v4 = vadd.f32 %v4668_v24, %v4253_v9 }
 0x22c   : > { %v6445_v34 = vpop.eup %6444  ;;  %v4883_v23 = vadd.f32 %v4851_v53, %v9257_v30  ;;  %v4856_v27 = vmul.f32 0.044715, %v4824_v40  ;;  %v4854_v49 = vmul.f32 0.044715, %v4822_v48  ;;  %v4791_v45 = vmul.f32 %v9296_v31, %v9296_v31  ;;  %v4684_v48 = vpop.f32.mrf.mxu0 }
 0x22d   : > { %v5009_v25 = vmul.f32 0.5, %v4977_v54  ;;  %v4975_v28 = vadd.f32 1.0, %v6445_v34  ;;  %v4825_v19 = vmul.f32 %v4793_v22, %v9290_v2  ;;  %v4796_v42 = vmul.f32 %v9303_v21, %v9303_v21  ;;  %v6310_v54 = vpop.f32.mrf.mxu1 }
 0x22e   : > { %v4915_v0 = vmul.f32 0.7978846, %v4883_v23  ;;  %v4888_v14 = vadd.f32 %v4856_v27, %v9270_v10  ;;  %v4886_v29 = vadd.f32 %v4854_v49, %v9273_v46  ;;  %v4823_v57 = vmul.f32 %v4791_v45, %v9296_v31 }
 0x22f   : > { %v5041_v13 = vmul.f32 %v5009_v25, %v9173_v15  ;;  %v5007_v62 = vmul.f32 0.5, %v4975_v28  ;;  %v4857_v12 = vmul.f32 0.044715, %v4825_v19  ;;  %v4828_v44 = vmul.f32 %v4796_v42, %v9303_v21 }
 0x230   : > { %v6447_v60 = vpop.eup %6446  ;;  %6452 = vtanh.f32 %v4915_v0  ;;  %v4920_v24 = vmul.f32 0.7978846, %v4888_v14  ;;  %v4918_v16 = vmul.f32 0.7978846, %v4886_v29  ;;  %v4855_v37 = vmul.f32 0.044715, %v4823_v57  ;;  %v6344_v14 = vpop.f32.mrf.mxu0 }
 0x231   : > { %v5869_v63 = vpack.c.bf16 %v5041_v13, %v5041_v13  ;;  %v5039_v38 = vmul.f32 %v5007_v62, %v9182_v17  ;;  %v4980_v33 = vadd.f32 1.0, %v6447_v60  ;;  %v4889_v11 = vadd.f32 %v4857_v12, %v9290_v2 }
 0x232   : > { %v6449_v7 = vpop.eup %6448  ;;  %6454 = vtanh.f32 %v4920_v24  ;;  %v4887_v15 = vadd.f32 %v4855_v37, %v9296_v31  ;;  %v4860_v47 = vmul.f32 0.044715, %v4828_v44  ;;  %v9322_v20 = vadd.f32 %v8986_v32, %v4723_v4  ;;  %v4687_v60 = vpop.f32.mrf.mxu0 }
 0x233   : > { %5202 = vst.msk [vmem:[%s9131_s15 + $0x3c] sm:$0xf] %vm5186_vm8, %v5869_v63  ;;  %v5867_v6 = vpack.c.bf16 %v5039_v38, %v5039_v38  ;;  %v5012_v3 = vmul.f32 0.5, %v4980_v33  ;;  %v4978_v1 = vadd.f32 1.0, %v6449_v7  ;;  %6456 = vtanh.f32 %v4918_v16 }
 0x234   : > { %v6451_v9 = vpop.eup %6450  ;;  %v4921_v17 = vmul.f32 0.7978846, %v4889_v11  ;;  %v4919_v41 = vmul.f32 0.7978846, %v4887_v15  ;;  %v4892_v53 = vadd.f32 %v4860_v47, %v9303_v21  ;;  %v4794_v40 = vmul.f32 %v9322_v20, %v9322_v20 }
 0x235   : > { %5200 = vst.msk [vmem:[%s9131_s15 + $0x34] sm:$0xf] %vm5186_vm8, %v5867_v6  ;;  %v5044_v22 = vmul.f32 %v5012_v3, %v9201_v43  ;;  %v5010_v4 = vmul.f32 0.5, %v4978_v1  ;;  %v4981_v34 = vadd.f32 1.0, %v6451_v9  ;;  %v4256_v23 = vadd.f32 %v9261_v35, %v8952_v59  ;;  %v4217_v59 = vpop.f32.mrf.mxu1 }
 0x236   : > { %6458 = vtanh.f32 %v4921_v17  ;;  %v4924_v27 = vmul.f32 0.7978846, %v4892_v53  ;;  %v4826_v49 = vmul.f32 %v4794_v40, %v9322_v20  ;;  %v4254_v45 = vadd.f32 %v9287_v8, %v8955_v58 }
 0x237   : > { %v5872_v25 = vpack.c.bf16 %v5044_v22, %v5044_v22  ;;  %v5042_v28 = vmul.f32 %v5010_v4, %v9212_v51  ;;  %v5013_v19 = vmul.f32 0.5, %v4981_v34  ;;  %6460 = vtanh.f32 %v4919_v41 }
 0x238   : > { %6462 = vtanh.f32 %v4924_v27  ;;  %v4858_v43 = vmul.f32 0.044715, %v4826_v49  ;;  %v4726_v42 = vadd.f32 %v9285_v61, %v4256_v23  ;;  %v4724_v0 = vadd.f32 %v4671_v50, %v4254_v45 }
 0x239   : > { %5205 = vst.msk [vmem:[%s9131_s15 + $0x48] sm:$0xf] %vm5186_vm8, %v5872_v25  ;;  %v5870_v35 = vpack.c.bf16 %v5042_v28, %v5042_v28  ;;  %v5045_v29 = vmul.f32 %v5013_v19, %v9228_v39  ;;  %v4259_v58 = vadd.f32 %v9308_v26, %v8960_v55  ;;  %v4257_v51 = vadd.f32 %v4214_v18, %v8965_v56 }
 0x23a   : > { %v4890_v8 = vadd.f32 %v4858_v43, %v9322_v20  ;;  %v9347_v57 = vadd.f32 %v8986_v32, %v4726_v42  ;;  %v9350_v61 = vadd.f32 %v8986_v32, %v4724_v0  ;;  %v4260_v50 = vadd.f32 %v6310_v54, %v8971_v36 }
 0x23b   : > { %5203 = vst.msk [vmem:[%s9131_s15 + $0x40] sm:$0xf] %vm5186_vm8, %v5870_v35  ;;  %v5873_v13 = vpack.c.bf16 %v5045_v29, %v5045_v29  ;;  %v4729_v39 = vadd.f32 %v6343_v52, %v4259_v58  ;;  %v4727_v62 = vadd.f32 %v4684_v48, %v4257_v51  ;;  %v4258_v55 = vadd.f32 %v4217_v59, %v8977_v5 }
 0x23c   : > { %v4922_v26 = vmul.f32 0.7978846, %v4890_v8  ;;  %v4797_v56 = vmul.f32 %v9347_v57, %v9347_v57  ;;  %v4795_v12 = vmul.f32 %v9350_v61, %v9350_v61  ;;  %v4730_v44 = vadd.f32 %v6344_v14, %v4260_v50 }
 0x23d   : > { %v6453_v24 = vpop.eup %6452  ;;  %5206 = vst.msk [vmem:[%s9131_s15 + $0x4c] sm:$0xf] %vm5186_vm8, %v5873_v13  ;;  %v9363_v36 = vadd.f32 %v8986_v32, %v4729_v39  ;;  %v9366_v16 = vadd.f32 %v8986_v32, %v4727_v62  ;;  %v4728_v37 = vadd.f32 %v4687_v60, %v4258_v55 }
 0x23e   : > { %v4979_v5 = vadd.f32 1.0, %v6453_v24  ;;  %6464 = vtanh.f32 %v4922_v26  ;;  %v4829_v52 = vmul.f32 %v4797_v56, %v9347_v57  ;;  %v4827_v18 = vmul.f32 %v4795_v12, %v9350_v61 }
 0x23f   : > { %v6455_v63 = vpop.eup %6454  ;;  %v4800_v38 = vmul.f32 %v9363_v36, %v9363_v36  ;;  %v4798_v33 = vmul.f32 %v9366_v16, %v9366_v16  ;;  %v9375_v11 = vadd.f32 %v8986_v32, %v4730_v44  ;;  %v9378_v7 = vadd.f32 %v8986_v32, %v4728_v37 }
 0x240   : > { %v6457_v15 = vpop.eup %6456  ;;  %v5011_v47 = vmul.f32 0.5, %v4979_v5  ;;  %v4984_v6 = vadd.f32 1.0, %v6455_v63  ;;  %v4861_v3 = vmul.f32 0.044715, %v4829_v52  ;;  %v4859_v1 = vmul.f32 0.044715, %v4827_v18 }
 0x241   : > { %v4982_v9 = vadd.f32 1.0, %v6457_v15  ;;  %v4832_v17 = vmul.f32 %v4800_v38, %v9363_v36  ;;  %v4830_v41 = vmul.f32 %v4798_v33, %v9366_v16  ;;  %v4801_v53 = vmul.f32 %v9375_v11, %v9375_v11 }
 0x242   : > { %v5043_v40 = vmul.f32 %v5011_v47, %v9257_v30  ;;  %v5016_v48 = vmul.f32 0.5, %v4984_v6  ;;  %v4893_v54 = vadd.f32 %v4861_v3, %v9347_v57  ;;  %v4891_v32 = vadd.f32 %v4859_v1, %v9350_v61 }
 0x243   : > { %v6459_v22 = vpop.eup %6458  ;;  %v5014_v4 = vmul.f32 0.5, %v4982_v9  ;;  %v4864_v34 = vmul.f32 0.044715, %v4832_v17  ;;  %v4862_v23 = vmul.f32 0.044715, %v4830_v41  ;;  %v4833_v27 = vmul.f32 %v4801_v53, %v9375_v11 }
 0x244   : > { %v6461_v49 = vpop.eup %6460  ;;  %v5871_v45 = vpack.c.bf16 %v5043_v40, %v5043_v40  ;;  %v5048_v25 = vmul.f32 %v5016_v48, %v9270_v10  ;;  %v4985_v28 = vadd.f32 1.0, %v6459_v22  ;;  %v4925_v19 = vmul.f32 0.7978846, %v4893_v54 }
 0x245   : > { %v6463_v30 = vpop.eup %6462  ;;  %v5046_v43 = vmul.f32 %v5014_v4, %v9273_v46  ;;  %v4983_v42 = vadd.f32 1.0, %v6461_v49  ;;  %v4923_v0 = vmul.f32 0.7978846, %v4891_v32  ;;  %v4896_v14 = vadd.f32 %v4864_v34, %v9363_v36 }
 0x246   : > { %5204 = vst.msk [vmem:[%s9131_s15 + $0x44] sm:$0xf] %vm5186_vm8, %v5871_v45  ;;  %v5876_v59 = vpack.c.bf16 %v5048_v25, %v5048_v25  ;;  %v5017_v35 = vmul.f32 0.5, %v4985_v28  ;;  %v4988_v29 = vadd.f32 1.0, %v6463_v30  ;;  %6466 = vtanh.f32 %v4925_v19 }
 0x247   : > { %v5874_v58 = vpack.c.bf16 %v5046_v43, %v5046_v43  ;;  %v5015_v51 = vmul.f32 0.5, %v4983_v42  ;;  %6468 = vtanh.f32 %v4923_v0  ;;  %v4928_v10 = vmul.f32 0.7978846, %v4896_v14 }
 0x248   : > { %5209 = vst.msk [vmem:[%s9131_s15 + $0x58] sm:$0xf] %vm5186_vm8, %v5876_v59  ;;  %v5049_v46 = vmul.f32 %v5017_v35, %v9290_v2  ;;  %v5020_v8 = vmul.f32 0.5, %v4988_v29  ;;  %v4894_v50 = vadd.f32 %v4862_v23, %v9366_v16  ;;  %v4865_v13 = vmul.f32 0.044715, %v4833_v27 }
 0x249   : > { %5207 = vst.msk [vmem:[%s9131_s15 + $0x50] sm:$0xf] %vm5186_vm8, %v5874_v58  ;;  %v5047_v39 = vmul.f32 %v5015_v51, %v9296_v31  ;;  %6470 = vtanh.f32 %v4928_v10  ;;  %v4799_v62 = vmul.f32 %v9378_v7, %v9378_v7 }
 0x24a   : > { %v5877_v55 = vpack.c.bf16 %v5049_v46, %v5049_v46  ;;  %v5052_v26 = vmul.f32 %v5020_v8, %v9303_v21  ;;  %v4926_v56 = vmul.f32 0.7978846, %v4894_v50  ;;  %v4897_v2 = vadd.f32 %v4865_v13, %v9375_v11 }
 0x24b   : > { %v6465_v12 = vpop.eup %6464  ;;  %v5875_v44 = vpack.c.bf16 %v5047_v39, %v5047_v39  ;;  %v4831_v60 = vmul.f32 %v4799_v62, %v9378_v7 }
 0x24c   : > { %5210 = vst.msk [vmem:[%s9131_s15 + $0x5c] sm:$0xf] %vm5186_vm8, %v5877_v55  ;;  %v5880_v24 = vpack.c.bf16 %v5052_v26, %v5052_v26  ;;  %v4986_v31 = vadd.f32 1.0, %v6465_v12  ;;  %6472 = vtanh.f32 %v4926_v56  ;;  %v4929_v37 = vmul.f32 0.7978846, %v4897_v2 }
 0x24d   : > { %5208 = vst.msk [vmem:[%s9131_s15 + $0x54] sm:$0xf] %vm5186_vm8, %v5875_v44  ;;  %v4863_v5 = vmul.f32 0.044715, %v4831_v60 }
 0x24e   : > { %5213 = vst.msk [vmem:[%s9131_s15 + $0x68] sm:$0xf] %vm5186_vm8, %v5880_v24  ;;  %v5018_v21 = vmul.f32 0.5, %v4986_v31  ;;  %6474 = vtanh.f32 %v4929_v37 }
 0x24f   : > { %v4895_v52 = vadd.f32 %v4863_v5, %v9378_v7 }
 0x250   : > { %v5050_v18 = vmul.f32 %v5018_v21, %v9322_v20 }
 0x251   : > { %v4927_v63 = vmul.f32 0.7978846, %v4895_v52 }
 0x252   : > { %v5878_v38 = vpack.c.bf16 %v5050_v18, %v5050_v18 }
 0x253   : > { %v6467_v33 = vpop.eup %6466  ;;  %6476 = vtanh.f32 %v4927_v63 }
 0x254   : > { %v6469_v15 = vpop.eup %6468  ;;  %5211 = vst.msk [vmem:[%s9131_s15 + $0x60] sm:$0xf] %vm5186_vm8, %v5878_v38  ;;  %v4989_v47 = vadd.f32 1.0, %v6467_v33 }
 0x255   : > { %v4987_v6 = vadd.f32 1.0, %v6469_v15 }
 0x256   : > { %v6471_v3 = vpop.eup %6470  ;;  %v5021_v1 = vmul.f32 0.5, %v4989_v47 }
 0x257   : > { %v5019_v9 = vmul.f32 0.5, %v4987_v6  ;;  %v4992_v17 = vadd.f32 1.0, %v6471_v3 }
 0x258   : > { %v5053_v41 = vmul.f32 %v5021_v1, %v9347_v57 }
 0x259   : > { %v6473_v53 = vpop.eup %6472  ;;  %v5051_v20 = vmul.f32 %v5019_v9, %v9350_v61  ;;  %v5024_v40 = vmul.f32 0.5, %v4992_v17 }
 0x25a   : > { %v5881_v48 = vpack.c.bf16 %v5053_v41, %v5053_v41  ;;  %v4990_v54 = vadd.f32 1.0, %v6473_v53 }
 0x25b   : > { %v6475_v32 = vpop.eup %6474  ;;  %v5879_v22 = vpack.c.bf16 %v5051_v20, %v5051_v20  ;;  %v5056_v4 = vmul.f32 %v5024_v40, %v9363_v36 }
 0x25c   : > { %5214 = vst.msk [vmem:[%s9131_s15 + $0x6c] sm:$0xf] %vm5186_vm8, %v5881_v48  ;;  %v5022_v34 = vmul.f32 0.5, %v4990_v54  ;;  %v4993_v23 = vadd.f32 1.0, %v6475_v32 }
 0x25d   : > { %5212 = vst.msk [vmem:[%s9131_s15 + $0x64] sm:$0xf] %vm5186_vm8, %v5879_v22  ;;  %v5884_v57 = vpack.c.bf16 %v5056_v4, %v5056_v4 }
 0x25e   : > { %v5054_v27 = vmul.f32 %v5022_v34, %v9366_v16  ;;  %v5025_v61 = vmul.f32 0.5, %v4993_v23 }
 0x25f   : > { %5217 = vst.msk [vmem:[%s9131_s15 + $0x78] sm:$0xf] %vm5186_vm8, %v5884_v57 }
 0x260   : > { %v6477_v49 = vpop.eup %6476  ;;  %v5882_v45 = vpack.c.bf16 %v5054_v27, %v5054_v27  ;;  %v5057_v25 = vmul.f32 %v5025_v61, %v9375_v11 }
 0x261   : > { %v4991_v28 = vadd.f32 1.0, %v6477_v49 }
 0x262   : > { %5215 = vst.msk [vmem:[%s9131_s15 + $0x70] sm:$0xf] %vm5186_vm8, %v5882_v45  ;;  %v5885_v36 = vpack.c.bf16 %v5057_v25, %v5057_v25 }
 0x263   : > { %v5023_v19 = vmul.f32 0.5, %v4991_v28 }
 0x264   : > { %5218 = vst.msk [vmem:[%s9131_s15 + $0x7c] sm:$0xf] %vm5186_vm8, %v5885_v36 }
 0x265   : > { %v5055_v30 = vmul.f32 %v5023_v19, %v9378_v7 }
 0x267   : > { %v5883_v43 = vpack.c.bf16 %v5055_v30, %v5055_v30 }
 0x269   : > { %5216 = vst.msk [vmem:[%s9131_s15 + $0x74] sm:$0xf] %vm5186_vm8, %v5883_v43 }
 0x26a PF: > { %s13_s12 = sadd.s32 1, %s6486_s12  }
 0x26b   : > { %p10_p4 = scmp.ge.s32.totalorder %s13_s12, 4  }
 0x26d   :  { %12 = sbr.rel (!%p10_p4) target bundleno = 1 (0x1), region = 72 }

</bundles_post_ra>
